<compile_context>
chip_gen: v5e
topology: v5e:2x2
jax: 0.10.0
libtpu: 0.0.40
codegen_flags: <defaults>
</compile_context>

<pallas_src>
import functools
import numpy as np
import jax
import jax.numpy as jnp
from jax.experimental import pallas as pl
from jax.experimental.pallas import tpu as pltpu

EPS = 1e-5  # torch.nn.LayerNorm default


def _layernorm(h, gamma, beta):
    # single pass over h: mean and mean-of-squares (one fewer XLU sweep per LN)
    mu = jnp.mean(h, axis=-1, keepdims=True)
    ms = jnp.mean(h * h, axis=-1, keepdims=True)
    var = jnp.maximum(ms - mu * mu, 0.0)
    return (h - mu) * jax.lax.rsqrt(var + EPS) * gamma + beta


def bronet_kernel(x_ref, w_in_ref, b_in_ref, g_in_ref, be_in_ref,
                  w1_ref, b1_ref, g1_ref, be1_ref,
                  w2_ref, b2_ref, g2_ref, be2_ref,
                  w_out_ref, b_out_ref, o_ref):
    n = w1_ref.shape[0]  # static -> unrolled at trace time (fine for small n)
    # TODO(synk): when 2*n*latent^2 bf16 weights no longer fit v7x's 64 MiB VMEM
    # (~latent=1024, n~10), add a second ("arbitrary") grid axis over layers,
    # block w1/w2/b/g/be on the layer index and carry h in a persistent VMEM
    # scratch instead of unrolling, so next-layer weights stream behind compute.

    # input block: Linear -> LayerNorm -> ReLU   (bf16 matmul, f32 accumulate)
    h = jnp.dot(x_ref[...].astype(jnp.bfloat16), w_in_ref[...],
                preferred_element_type=jnp.float32) + b_in_ref[...]
    h = _layernorm(h, g_in_ref[...], be_in_ref[...])
    h = jnp.maximum(h, 0.0)

    # n BroNetLayer residual blocks: out = LN(Linear(ReLU(LN(Linear(x))))) + x
    for i in range(n):
        res = h  # TODO(synk): keep the residual in bf16 if bundle dumps at TB>=256 show vld/vst spill pressure
        t = jnp.dot(h.astype(jnp.bfloat16), w1_ref[i],
                    preferred_element_type=jnp.float32) + b1_ref[i]
        t = _layernorm(t, g1_ref[i], be1_ref[i])
        t = jnp.maximum(t, 0.0)
        t = jnp.dot(t.astype(jnp.bfloat16), w2_ref[i],
                    preferred_element_type=jnp.float32) + b2_ref[i]
        t = _layernorm(t, g2_ref[i], be2_ref[i])
        h = t + res

    # output head (wrapper pads N to a multiple of 128 -> lane-dense store)
    # TODO(synk): for huge B with a tiny head, consider bf16 writeback (or masked
    # stores at out_pad == out_size) to cut the padded f32 write bytes.
    o_ref[...] = jnp.dot(h.astype(jnp.bfloat16), w_out_ref[...],
                         preferred_element_type=jnp.float32) + b_out_ref[...]


def _round_up(x, m):
    return ((x + m - 1) // m) * m


@functools.lru_cache(maxsize=1)
def _vmem_capacity_bytes():
    try:
        return int(pltpu.get_tpu_info().vmem_capacity_bytes)
    except Exception:
        return 64 * 2 ** 20  # conservative (v7x-sized) fallback


def bronet_forward(x, params, *, tile_b=256):
    B, in_size = x.shape
    out_size = params["w_out"].shape[1]

    # lane-dense output head: pad N to a multiple of 128 (sliced off below)
    out_pad = _round_up(out_size, 128)
    w_out = jnp.pad(params["w_out"], ((0, 0), (0, out_pad - out_size)))
    b_out = jnp.pad(params["b_out"], ((0, 0), (0, out_pad - out_size)))

    # batch tiling: TB rows per grid step; keep at least 2 grid steps so both
    # v7x TensorCores get work under dimension_semantics=("parallel",).
    TB = _round_up(max(8, min(tile_b, B)), 8)
    if _round_up(B, TB) // TB < 2 and B >= 16:
        TB = _round_up((B + 1) // 2, 8)
    Bp = _round_up(B, TB)
    xp = jnp.pad(x, ((0, Bp - B), (0, 0))) if Bp != B else x
    nb = Bp // TB

    args = (xp,
            params["w_in"], params["b_in"], params["g_in"], params["be_in"],
            params["w1"], params["b1"], params["g1"], params["be1"],
            params["w2"], params["b2"], params["g2"], params["be2"],
            w_out, b_out)

    def resident(a, single_buffer):
        # full-array block + constant index_map -> fetched once, stays in VMEM
        nd = a.ndim
        if single_buffer:
            # params never change across grid steps: one VMEM buffer is enough
            # (halves resident VMEM vs the default double-buffering)
            return pl.BlockSpec(a.shape, lambda i, _nd=nd: (0,) * _nd,
                                pipeline_mode=pl.Buffered(1))
        return pl.BlockSpec(a.shape, lambda i, _nd=nd: (0,) * _nd)

    out_spec = pl.BlockSpec((TB, out_pad), lambda i: (i, 0))

    # VMEM budget: generation-aware — cap at ~80% of physical VMEM (leaves
    # headroom for Mosaic internal scratch and activation temporaries), floor at
    # 32 MiB (raises the v5e/v6e scoped default).
    resident_bytes = sum(int(a.size) * a.dtype.itemsize for a in args[1:])
    tile_bytes = 2 * (TB * in_size + TB * out_pad) * 4
    need = 2 * resident_bytes + tile_bytes + (8 << 20)
    cap = int(0.8 * _vmem_capacity_bytes())
    vmem_limit = int(min(cap, max(need, 32 << 20)))

    def run(single_buffer):
        in_specs = [pl.BlockSpec((TB, in_size), lambda i: (i, 0))]
        in_specs += [resident(a, single_buffer) for a in args[1:]]
        return pl.pallas_call(
            bronet_kernel,
            out_shape=jax.ShapeDtypeStruct((Bp, out_pad), jnp.float32),
            grid=(nb,),
            in_specs=in_specs,
            out_specs=out_spec,
            compiler_params=pltpu.CompilerParams(
                dimension_semantics=("parallel",),
                vmem_limit_bytes=vmem_limit,
            ),
        )(*args)

    try:
        out_full = run(single_buffer=True)
    except Exception:
        # pl.Buffered(1) unsupported on this jax/Mosaic version: fall back to the
        # default double-buffered resident params (correct, just more VMEM).
        out_full = run(single_buffer=False)

    return out_full[:B, :out_size]


# ----- deterministic parameter construction (mirrors layer_init: orthogonal * sqrt(2)) -----
def orthogonal(rng, out_dim, in_dim, gain):
    rows, cols = max(out_dim, in_dim), min(out_dim, in_dim)
    a = rng.standard_normal((rows, cols))
    q, r = np.linalg.qr(a)
    q = q * np.sign(np.diag(r))          # deterministic / uniform
    if out_dim < in_dim:
        q = q.T
    return (gain * q[:out_dim, :in_dim]).astype(np.float32)


def make_params(n, in_size, out_size, latent, seed=0):
    # Biases and LN gamma/beta are made non-trivial so those code paths are
    # actually validated (torch's layer_init would zero the biases).
    rng = np.random.default_rng(seed)
    g = np.sqrt(2.0)
    bf16, f32 = jnp.bfloat16, np.float32

    def vec(shape):
        return jnp.asarray(0.1 * rng.standard_normal(shape), f32)

    p = {}
    # input block (weights pre-transposed to (in, out))
    p["w_in"] = jnp.asarray(orthogonal(rng, latent, in_size, g).T, bf16)
    p["b_in"] = vec((1, latent))
    p["g_in"] = 1.0 + vec((1, latent))
    p["be_in"] = vec((1, latent))
    # stacked BroNetLayer params
    p["w1"] = jnp.asarray(np.stack([orthogonal(rng, latent, latent, g).T
                                    for _ in range(n)]), bf16)
    p["b1"] = vec((n, 1, latent))
    p["g1"] = 1.0 + vec((n, 1, latent))
    p["be1"] = vec((n, 1, latent))
    p["w2"] = jnp.asarray(np.stack([orthogonal(rng, latent, latent, g).T
                                    for _ in range(n)]), bf16)
    p["b2"] = vec((n, 1, latent))
    p["g2"] = 1.0 + vec((n, 1, latent))
    p["be2"] = vec((n, 1, latent))
    # output head
    p["w_out"] = jnp.asarray(orthogonal(rng, out_size, latent, g).T, bf16)
    p["b_out"] = vec((1, out_size))
    return p


def bronet_reference(x, p):
    def ln(h, g, b):
        # torch-style two-pass LayerNorm statistics
        mu = jnp.mean(h, -1, keepdims=True)
        var = jnp.mean((h - mu) ** 2, -1, keepdims=True)
        return (h - mu) * jax.lax.rsqrt(var + EPS) * g + b

    def mm(a, w):
        return jnp.dot(a.astype(jnp.bfloat16), w, preferred_element_type=jnp.float32)

    h = jax.nn.relu(ln(mm(x, p["w_in"]) + p["b_in"], p["g_in"], p["be_in"]))
    for i in range(p["w1"].shape[0]):
        res = h
        t = jax.nn.relu(ln(mm(h, p["w1"][i]) + p["b1"][i], p["g1"][i], p["be1"][i]))
        t = ln(mm(t, p["w2"][i]) + p["b2"][i], p["g2"][i], p["be2"][i])
        h = t + res
    return mm(h, p["w_out"]) + p["b_out"]


if __name__ == "__main__":
    n, in_size, out_size, latent, batch = 2, 16, 8, 128, 256
    params = make_params(n, in_size, out_size, latent, seed=0)
    x = jax.random.normal(jax.random.PRNGKey(0), (batch, in_size), jnp.float32)

    out = jax.block_until_ready(bronet_forward(x, params, tile_b=256))

    ref = jax.block_until_ready(bronet_reference(x, params))
    np.testing.assert_allclose(np.asarray(out), np.asarray(ref), rtol=1e-2, atol=1e-2)
    print("KERNEL_OK")
</pallas_src>

<mosaic_0001>
module attributes {stable_mosaic.version = 11 : i64} {
  func.func @bronet_kernel(%arg0: i32, %arg1: memref<128x16xf32, #tpu.memory_space<vmem>>, %arg2: memref<16x128xbf16, #tpu.memory_space<vmem>>, %arg3: memref<1x128xf32, #tpu.memory_space<vmem>>, %arg4: memref<1x128xf32, #tpu.memory_space<vmem>>, %arg5: memref<1x128xf32, #tpu.memory_space<vmem>>, %arg6: memref<2x128x128xbf16, #tpu.memory_space<vmem>>, %arg7: memref<2x1x128xf32, #tpu.memory_space<vmem>>, %arg8: memref<2x1x128xf32, #tpu.memory_space<vmem>>, %arg9: memref<2x1x128xf32, #tpu.memory_space<vmem>>, %arg10: memref<2x128x128xbf16, #tpu.memory_space<vmem>>, %arg11: memref<2x1x128xf32, #tpu.memory_space<vmem>>, %arg12: memref<2x1x128xf32, #tpu.memory_space<vmem>>, %arg13: memref<2x1x128xf32, #tpu.memory_space<vmem>>, %arg14: memref<128x128xbf16, #tpu.memory_space<vmem>>, %arg15: memref<1x128xf32, #tpu.memory_space<vmem>>, %arg16: memref<128x128xf32, #tpu.memory_space<vmem>>) attributes {dimension_semantics = [#tpu.dimension_semantics<parallel>], iteration_bounds = array<i64: 2>, scalar_prefetch = 0 : i64, scratch_operands = 0 : i64, tpu.core_type = #tpu.core_type<tc>, window_params = [{transform_indices = @transform_0, window_bounds = array<i64: 128, 16>}, {pipeline_mode = #tpu.pipeline_mode<synchronous>, transform_indices = @transform_1, window_bounds = array<i64: 16, 128>}, {pipeline_mode = #tpu.pipeline_mode<synchronous>, transform_indices = @transform_2, window_bounds = array<i64: 1, 128>}, {pipeline_mode = #tpu.pipeline_mode<synchronous>, transform_indices = @transform_3, window_bounds = array<i64: 1, 128>}, {pipeline_mode = #tpu.pipeline_mode<synchronous>, transform_indices = @transform_4, window_bounds = array<i64: 1, 128>}, {pipeline_mode = #tpu.pipeline_mode<synchronous>, transform_indices = @transform_5, window_bounds = array<i64: 2, 128, 128>}, {pipeline_mode = #tpu.pipeline_mode<synchronous>, transform_indices = @transform_6, window_bounds = array<i64: 2, 1, 128>}, {pipeline_mode = #tpu.pipeline_mode<synchronous>, transform_indices = @transform_7, window_bounds = array<i64: 2, 1, 128>}, {pipeline_mode = #tpu.pipeline_mode<synchronous>, transform_indices = @transform_8, window_bounds = array<i64: 2, 1, 128>}, {pipeline_mode = #tpu.pipeline_mode<synchronous>, transform_indices = @transform_9, window_bounds = array<i64: 2, 128, 128>}, {pipeline_mode = #tpu.pipeline_mode<synchronous>, transform_indices = @transform_10, window_bounds = array<i64: 2, 1, 128>}, {pipeline_mode = #tpu.pipeline_mode<synchronous>, transform_indices = @transform_11, window_bounds = array<i64: 2, 1, 128>}, {pipeline_mode = #tpu.pipeline_mode<synchronous>, transform_indices = @transform_12, window_bounds = array<i64: 2, 1, 128>}, {pipeline_mode = #tpu.pipeline_mode<synchronous>, transform_indices = @transform_13, window_bounds = array<i64: 128, 128>}, {pipeline_mode = #tpu.pipeline_mode<synchronous>, transform_indices = @transform_14, window_bounds = array<i64: 1, 128>}, {transform_indices = @transform_15, window_bounds = array<i64: 128, 128>}]} {
    %c0 = arith.constant 0 : index
    %c0_0 = arith.constant 0 : index
    %0 = vector.load %arg1[%c0, %c0_0] : memref<128x16xf32, #tpu.memory_space<vmem>>, vector<128x16xf32>
    %1 = arith.truncf %0 : vector<128x16xf32> to vector<128x16xbf16>
    %c0_1 = arith.constant 0 : index
    %c0_2 = arith.constant 0 : index
    %2 = vector.load %arg2[%c0_1, %c0_2] : memref<16x128xbf16, #tpu.memory_space<vmem>>, vector<16x128xbf16>
    %cst = arith.constant dense<0.000000e+00> : vector<128x128xf32>
    %3 = tpu.matmul %1, %2, %cst {dimension_numbers = #tpu.dot_dimension_numbers<[1], [0], [0], [1], [0, 0, 1, 1], [], []>} : vector<128x16xbf16>, vector<16x128xbf16>, vector<128x128xf32> -> vector<128x128xf32>
    %c0_3 = arith.constant 0 : index
    %c0_4 = arith.constant 0 : index
    %4 = vector.load %arg3[%c0_3, %c0_4] : memref<1x128xf32, #tpu.memory_space<vmem>>, vector<1x128xf32>
    %5 = vector.broadcast %4 : vector<1x128xf32> to vector<128x128xf32>
    %6 = arith.addf %3, %5 : vector<128x128xf32>
    %c0_5 = arith.constant 0 : index
    %c0_6 = arith.constant 0 : index
    %7 = vector.load %arg4[%c0_5, %c0_6] : memref<1x128xf32, #tpu.memory_space<vmem>>, vector<1x128xf32>
    %c0_7 = arith.constant 0 : index
    %c0_8 = arith.constant 0 : index
    %8 = vector.load %arg5[%c0_7, %c0_8] : memref<1x128xf32, #tpu.memory_space<vmem>>, vector<1x128xf32>
    %cst_9 = arith.constant dense<0.000000e+00> : vector<128xf32>
    %9 = vector.multi_reduction <add>, %6, %cst_9 [1] : vector<128x128xf32> to vector<128xf32>
    %10 = vector.shape_cast %9 : vector<128xf32> to vector<128x1xf32>
    %cst_10 = arith.constant 1.280000e+02 : f32
    %11 = vector.broadcast %cst_10 : f32 to vector<128x1xf32>
    %12 = arith.divf %10, %11 : vector<128x1xf32>
    %13 = arith.mulf %6, %6 : vector<128x128xf32>
    %cst_11 = arith.constant dense<0.000000e+00> : vector<128xf32>
    %14 = vector.multi_reduction <add>, %13, %cst_11 [1] : vector<128x128xf32> to vector<128xf32>
    %15 = vector.shape_cast %14 : vector<128xf32> to vector<128x1xf32>
    %cst_12 = arith.constant 1.280000e+02 : f32
    %16 = vector.broadcast %cst_12 : f32 to vector<128x1xf32>
    %17 = arith.divf %15, %16 : vector<128x1xf32>
    %18 = arith.mulf %12, %12 : vector<128x1xf32>
    %19 = arith.subf %17, %18 : vector<128x1xf32>
    %cst_13 = arith.constant 0.000000e+00 : f32
    %20 = vector.broadcast %cst_13 : f32 to vector<128x1xf32>
    %21 = arith.maximumf %19, %20 : vector<128x1xf32>
    %22 = vector.broadcast %12 : vector<128x1xf32> to vector<128x128xf32>
    %23 = arith.subf %6, %22 : vector<128x128xf32>
    %cst_14 = arith.constant 9.99999974E-6 : f32
    %24 = vector.broadcast %cst_14 : f32 to vector<128x1xf32>
    %25 = arith.addf %21, %24 : vector<128x1xf32>
    %26 = math.rsqrt %25 : vector<128x1xf32>
    %27 = vector.broadcast %26 : vector<128x1xf32> to vector<128x128xf32>
    %28 = arith.mulf %23, %27 : vector<128x128xf32>
    %29 = vector.broadcast %7 : vector<1x128xf32> to vector<128x128xf32>
    %30 = arith.mulf %28, %29 : vector<128x128xf32>
    %31 = vector.broadcast %8 : vector<1x128xf32> to vector<128x128xf32>
    %32 = arith.addf %30, %31 : vector<128x128xf32>
    %cst_15 = arith.constant 0.000000e+00 : f32
    %33 = vector.broadcast %cst_15 : f32 to vector<128x128xf32>
    %34 = arith.maximumf %32, %33 : vector<128x128xf32>
    %35 = arith.truncf %34 : vector<128x128xf32> to vector<128x128xbf16>
    %c0_16 = arith.constant 0 : index
    %c0_17 = arith.constant 0 : index
    %c0_18 = arith.constant 0 : index
    %36 = vector.load %arg6[%c0_16, %c0_17, %c0_18] : memref<2x128x128xbf16, #tpu.memory_space<vmem>>, vector<1x128x128xbf16>
    %37 = vector.shape_cast %36 : vector<1x128x128xbf16> to vector<128x128xbf16>
    %cst_19 = arith.constant dense<0.000000e+00> : vector<128x128xf32>
    %38 = tpu.matmul %35, %37, %cst_19 {dimension_numbers = #tpu.dot_dimension_numbers<[1], [0], [0], [1], [0, 0, 1, 1], [], []>} : vector<128x128xbf16>, vector<128x128xbf16>, vector<128x128xf32> -> vector<128x128xf32>
    %c0_20 = arith.constant 0 : index
    %c0_21 = arith.constant 0 : index
    %c0_22 = arith.constant 0 : index
    %39 = vector.load %arg7[%c0_20, %c0_21, %c0_22] : memref<2x1x128xf32, #tpu.memory_space<vmem>>, vector<1x1x128xf32>
    %40 = vector.shape_cast %39 : vector<1x1x128xf32> to vector<1x128xf32>
    %41 = vector.broadcast %40 : vector<1x128xf32> to vector<128x128xf32>
    %42 = arith.addf %38, %41 : vector<128x128xf32>
    %c0_23 = arith.constant 0 : index
    %c0_24 = arith.constant 0 : index
    %c0_25 = arith.constant 0 : index
    %43 = vector.load %arg8[%c0_23, %c0_24, %c0_25] : memref<2x1x128xf32, #tpu.memory_space<vmem>>, vector<1x1x128xf32>
    %44 = vector.shape_cast %43 : vector<1x1x128xf32> to vector<1x128xf32>
    %c0_26 = arith.constant 0 : index
    %c0_27 = arith.constant 0 : index
    %c0_28 = arith.constant 0 : index
    %45 = vector.load %arg9[%c0_26, %c0_27, %c0_28] : memref<2x1x128xf32, #tpu.memory_space<vmem>>, vector<1x1x128xf32>
    %46 = vector.shape_cast %45 : vector<1x1x128xf32> to vector<1x128xf32>
    %cst_29 = arith.constant dense<0.000000e+00> : vector<128xf32>
    %47 = vector.multi_reduction <add>, %42, %cst_29 [1] : vector<128x128xf32> to vector<128xf32>
    %48 = vector.shape_cast %47 : vector<128xf32> to vector<128x1xf32>
    %cst_30 = arith.constant 1.280000e+02 : f32
    %49 = vector.broadcast %cst_30 : f32 to vector<128x1xf32>
    %50 = arith.divf %48, %49 : vector<128x1xf32>
    %51 = arith.mulf %42, %42 : vector<128x128xf32>
    %cst_31 = arith.constant dense<0.000000e+00> : vector<128xf32>
    %52 = vector.multi_reduction <add>, %51, %cst_31 [1] : vector<128x128xf32> to vector<128xf32>
    %53 = vector.shape_cast %52 : vector<128xf32> to vector<128x1xf32>
    %cst_32 = arith.constant 1.280000e+02 : f32
    %54 = vector.broadcast %cst_32 : f32 to vector<128x1xf32>
    %55 = arith.divf %53, %54 : vector<128x1xf32>
    %56 = arith.mulf %50, %50 : vector<128x1xf32>
    %57 = arith.subf %55, %56 : vector<128x1xf32>
    %cst_33 = arith.constant 0.000000e+00 : f32
    %58 = vector.broadcast %cst_33 : f32 to vector<128x1xf32>
    %59 = arith.maximumf %57, %58 : vector<128x1xf32>
    %60 = vector.broadcast %50 : vector<128x1xf32> to vector<128x128xf32>
    %61 = arith.subf %42, %60 : vector<128x128xf32>
    %cst_34 = arith.constant 9.99999974E-6 : f32
    %62 = vector.broadcast %cst_34 : f32 to vector<128x1xf32>
    %63 = arith.addf %59, %62 : vector<128x1xf32>
    %64 = math.rsqrt %63 : vector<128x1xf32>
    %65 = vector.broadcast %64 : vector<128x1xf32> to vector<128x128xf32>
    %66 = arith.mulf %61, %65 : vector<128x128xf32>
    %67 = vector.broadcast %44 : vector<1x128xf32> to vector<128x128xf32>
    %68 = arith.mulf %66, %67 : vector<128x128xf32>
    %69 = vector.broadcast %46 : vector<1x128xf32> to vector<128x128xf32>
    %70 = arith.addf %68, %69 : vector<128x128xf32>
    %cst_35 = arith.constant 0.000000e+00 : f32
    %71 = vector.broadcast %cst_35 : f32 to vector<128x128xf32>
    %72 = arith.maximumf %70, %71 : vector<128x128xf32>
    %73 = arith.truncf %72 : vector<128x128xf32> to vector<128x128xbf16>
    %c0_36 = arith.constant 0 : index
    %c0_37 = arith.constant 0 : index
    %c0_38 = arith.constant 0 : index
    %74 = vector.load %arg10[%c0_36, %c0_37, %c0_38] : memref<2x128x128xbf16, #tpu.memory_space<vmem>>, vector<1x128x128xbf16>
    %75 = vector.shape_cast %74 : vector<1x128x128xbf16> to vector<128x128xbf16>
    %cst_39 = arith.constant dense<0.000000e+00> : vector<128x128xf32>
    %76 = tpu.matmul %73, %75, %cst_39 {dimension_numbers = #tpu.dot_dimension_numbers<[1], [0], [0], [1], [0, 0, 1, 1], [], []>} : vector<128x128xbf16>, vector<128x128xbf16>, vector<128x128xf32> -> vector<128x128xf32>
    %c0_40 = arith.constant 0 : index
    %c0_41 = arith.constant 0 : index
    %c0_42 = arith.constant 0 : index
    %77 = vector.load %arg11[%c0_40, %c0_41, %c0_42] : memref<2x1x128xf32, #tpu.memory_space<vmem>>, vector<1x1x128xf32>
    %78 = vector.shape_cast %77 : vector<1x1x128xf32> to vector<1x128xf32>
    %79 = vector.broadcast %78 : vector<1x128xf32> to vector<128x128xf32>
    %80 = arith.addf %76, %79 : vector<128x128xf32>
    %c0_43 = arith.constant 0 : index
    %c0_44 = arith.constant 0 : index
    %c0_45 = arith.constant 0 : index
    %81 = vector.load %arg12[%c0_43, %c0_44, %c0_45] : memref<2x1x128xf32, #tpu.memory_space<vmem>>, vector<1x1x128xf32>
    %82 = vector.shape_cast %81 : vector<1x1x128xf32> to vector<1x128xf32>
    %c0_46 = arith.constant 0 : index
    %c0_47 = arith.constant 0 : index
    %c0_48 = arith.constant 0 : index
    %83 = vector.load %arg13[%c0_46, %c0_47, %c0_48] : memref<2x1x128xf32, #tpu.memory_space<vmem>>, vector<1x1x128xf32>
    %84 = vector.shape_cast %83 : vector<1x1x128xf32> to vector<1x128xf32>
    %cst_49 = arith.constant dense<0.000000e+00> : vector<128xf32>
    %85 = vector.multi_reduction <add>, %80, %cst_49 [1] : vector<128x128xf32> to vector<128xf32>
    %86 = vector.shape_cast %85 : vector<128xf32> to vector<128x1xf32>
    %cst_50 = arith.constant 1.280000e+02 : f32
    %87 = vector.broadcast %cst_50 : f32 to vector<128x1xf32>
    %88 = arith.divf %86, %87 : vector<128x1xf32>
    %89 = arith.mulf %80, %80 : vector<128x128xf32>
    %cst_51 = arith.constant dense<0.000000e+00> : vector<128xf32>
    %90 = vector.multi_reduction <add>, %89, %cst_51 [1] : vector<128x128xf32> to vector<128xf32>
    %91 = vector.shape_cast %90 : vector<128xf32> to vector<128x1xf32>
    %cst_52 = arith.constant 1.280000e+02 : f32
    %92 = vector.broadcast %cst_52 : f32 to vector<128x1xf32>
    %93 = arith.divf %91, %92 : vector<128x1xf32>
    %94 = arith.mulf %88, %88 : vector<128x1xf32>
    %95 = arith.subf %93, %94 : vector<128x1xf32>
    %cst_53 = arith.constant 0.000000e+00 : f32
    %96 = vector.broadcast %cst_53 : f32 to vector<128x1xf32>
    %97 = arith.maximumf %95, %96 : vector<128x1xf32>
    %98 = vector.broadcast %88 : vector<128x1xf32> to vector<128x128xf32>
    %99 = arith.subf %80, %98 : vector<128x128xf32>
    %cst_54 = arith.constant 9.99999974E-6 : f32
    %100 = vector.broadcast %cst_54 : f32 to vector<128x1xf32>
    %101 = arith.addf %97, %100 : vector<128x1xf32>
    %102 = math.rsqrt %101 : vector<128x1xf32>
    %103 = vector.broadcast %102 : vector<128x1xf32> to vector<128x128xf32>
    %104 = arith.mulf %99, %103 : vector<128x128xf32>
    %105 = vector.broadcast %82 : vector<1x128xf32> to vector<128x128xf32>
    %106 = arith.mulf %104, %105 : vector<128x128xf32>
    %107 = vector.broadcast %84 : vector<1x128xf32> to vector<128x128xf32>
    %108 = arith.addf %106, %107 : vector<128x128xf32>
    %109 = arith.addf %108, %34 : vector<128x128xf32>
    %110 = arith.truncf %109 : vector<128x128xf32> to vector<128x128xbf16>
    %c1 = arith.constant 1 : index
    %c0_55 = arith.constant 0 : index
    %c0_56 = arith.constant 0 : index
    %111 = vector.load %arg6[%c1, %c0_55, %c0_56] : memref<2x128x128xbf16, #tpu.memory_space<vmem>>, vector<1x128x128xbf16>
    %112 = vector.shape_cast %111 : vector<1x128x128xbf16> to vector<128x128xbf16>
    %cst_57 = arith.constant dense<0.000000e+00> : vector<128x128xf32>
    %113 = tpu.matmul %110, %112, %cst_57 {dimension_numbers = #tpu.dot_dimension_numbers<[1], [0], [0], [1], [0, 0, 1, 1], [], []>} : vector<128x128xbf16>, vector<128x128xbf16>, vector<128x128xf32> -> vector<128x128xf32>
    %c1_58 = arith.constant 1 : index
    %c0_59 = arith.constant 0 : index
    %c0_60 = arith.constant 0 : index
    %114 = vector.load %arg7[%c1_58, %c0_59, %c0_60] : memref<2x1x128xf32, #tpu.memory_space<vmem>>, vector<1x1x128xf32>
    %115 = vector.shape_cast %114 : vector<1x1x128xf32> to vector<1x128xf32>
    %116 = vector.broadcast %115 : vector<1x128xf32> to vector<128x128xf32>
    %117 = arith.addf %113, %116 : vector<128x128xf32>
    %c1_61 = arith.constant 1 : index
    %c0_62 = arith.constant 0 : index
    %c0_63 = arith.constant 0 : index
    %118 = vector.load %arg8[%c1_61, %c0_62, %c0_63] : memref<2x1x128xf32, #tpu.memory_space<vmem>>, vector<1x1x128xf32>
    %119 = vector.shape_cast %118 : vector<1x1x128xf32> to vector<1x128xf32>
    %c1_64 = arith.constant 1 : index
    %c0_65 = arith.constant 0 : index
    %c0_66 = arith.constant 0 : index
    %120 = vector.load %arg9[%c1_64, %c0_65, %c0_66] : memref<2x1x128xf32, #tpu.memory_space<vmem>>, vector<1x1x128xf32>
    %121 = vector.shape_cast %120 : vector<1x1x128xf32> to vector<1x128xf32>
    %cst_67 = arith.constant dense<0.000000e+00> : vector<128xf32>
    %122 = vector.multi_reduction <add>, %117, %cst_67 [1] : vector<128x128xf32> to vector<128xf32>
    %123 = vector.shape_cast %122 : vector<128xf32> to vector<128x1xf32>
    %cst_68 = arith.constant 1.280000e+02 : f32
    %124 = vector.broadcast %cst_68 : f32 to vector<128x1xf32>
    %125 = arith.divf %123, %124 : vector<128x1xf32>
    %126 = arith.mulf %117, %117 : vector<128x128xf32>
    %cst_69 = arith.constant dense<0.000000e+00> : vector<128xf32>
    %127 = vector.multi_reduction <add>, %126, %cst_69 [1] : vector<128x128xf32> to vector<128xf32>
    %128 = vector.shape_cast %127 : vector<128xf32> to vector<128x1xf32>
    %cst_70 = arith.constant 1.280000e+02 : f32
    %129 = vector.broadcast %cst_70 : f32 to vector<128x1xf32>
    %130 = arith.divf %128, %129 : vector<128x1xf32>
    %131 = arith.mulf %125, %125 : vector<128x1xf32>
    %132 = arith.subf %130, %131 : vector<128x1xf32>
    %cst_71 = arith.constant 0.000000e+00 : f32
    %133 = vector.broadcast %cst_71 : f32 to vector<128x1xf32>
    %134 = arith.maximumf %132, %133 : vector<128x1xf32>
    %135 = vector.broadcast %125 : vector<128x1xf32> to vector<128x128xf32>
    %136 = arith.subf %117, %135 : vector<128x128xf32>
    %cst_72 = arith.constant 9.99999974E-6 : f32
    %137 = vector.broadcast %cst_72 : f32 to vector<128x1xf32>
    %138 = arith.addf %134, %137 : vector<128x1xf32>
    %139 = math.rsqrt %138 : vector<128x1xf32>
    %140 = vector.broadcast %139 : vector<128x1xf32> to vector<128x128xf32>
    %141 = arith.mulf %136, %140 : vector<128x128xf32>
    %142 = vector.broadcast %119 : vector<1x128xf32> to vector<128x128xf32>
    %143 = arith.mulf %141, %142 : vector<128x128xf32>
    %144 = vector.broadcast %121 : vector<1x128xf32> to vector<128x128xf32>
    %145 = arith.addf %143, %144 : vector<128x128xf32>
    %cst_73 = arith.constant 0.000000e+00 : f32
    %146 = vector.broadcast %cst_73 : f32 to vector<128x128xf32>
    %147 = arith.maximumf %145, %146 : vector<128x128xf32>
    %148 = arith.truncf %147 : vector<128x128xf32> to vector<128x128xbf16>
    %c1_74 = arith.constant 1 : index
    %c0_75 = arith.constant 0 : index
    %c0_76 = arith.constant 0 : index
    %149 = vector.load %arg10[%c1_74, %c0_75, %c0_76] : memref<2x128x128xbf16, #tpu.memory_space<vmem>>, vector<1x128x128xbf16>
    %150 = vector.shape_cast %149 : vector<1x128x128xbf16> to vector<128x128xbf16>
    %cst_77 = arith.constant dense<0.000000e+00> : vector<128x128xf32>
    %151 = tpu.matmul %148, %150, %cst_77 {dimension_numbers = #tpu.dot_dimension_numbers<[1], [0], [0], [1], [0, 0, 1, 1], [], []>} : vector<128x128xbf16>, vector<128x128xbf16>, vector<128x128xf32> -> vector<128x128xf32>
    %c1_78 = arith.constant 1 : index
    %c0_79 = arith.constant 0 : index
    %c0_80 = arith.constant 0 : index
    %152 = vector.load %arg11[%c1_78, %c0_79, %c0_80] : memref<2x1x128xf32, #tpu.memory_space<vmem>>, vector<1x1x128xf32>
    %153 = vector.shape_cast %152 : vector<1x1x128xf32> to vector<1x128xf32>
    %154 = vector.broadcast %153 : vector<1x128xf32> to vector<128x128xf32>
    %155 = arith.addf %151, %154 : vector<128x128xf32>
    %c1_81 = arith.constant 1 : index
    %c0_82 = arith.constant 0 : index
    %c0_83 = arith.constant 0 : index
    %156 = vector.load %arg12[%c1_81, %c0_82, %c0_83] : memref<2x1x128xf32, #tpu.memory_space<vmem>>, vector<1x1x128xf32>
    %157 = vector.shape_cast %156 : vector<1x1x128xf32> to vector<1x128xf32>
    %c1_84 = arith.constant 1 : index
    %c0_85 = arith.constant 0 : index
    %c0_86 = arith.constant 0 : index
    %158 = vector.load %arg13[%c1_84, %c0_85, %c0_86] : memref<2x1x128xf32, #tpu.memory_space<vmem>>, vector<1x1x128xf32>
    %159 = vector.shape_cast %158 : vector<1x1x128xf32> to vector<1x128xf32>
    %cst_87 = arith.constant dense<0.000000e+00> : vector<128xf32>
    %160 = vector.multi_reduction <add>, %155, %cst_87 [1] : vector<128x128xf32> to vector<128xf32>
    %161 = vector.shape_cast %160 : vector<128xf32> to vector<128x1xf32>
    %cst_88 = arith.constant 1.280000e+02 : f32
    %162 = vector.broadcast %cst_88 : f32 to vector<128x1xf32>
    %163 = arith.divf %161, %162 : vector<128x1xf32>
    %164 = arith.mulf %155, %155 : vector<128x128xf32>
    %cst_89 = arith.constant dense<0.000000e+00> : vector<128xf32>
    %165 = vector.multi_reduction <add>, %164, %cst_89 [1] : vector<128x128xf32> to vector<128xf32>
    %166 = vector.shape_cast %165 : vector<128xf32> to vector<128x1xf32>
    %cst_90 = arith.constant 1.280000e+02 : f32
    %167 = vector.broadcast %cst_90 : f32 to vector<128x1xf32>
    %168 = arith.divf %166, %167 : vector<128x1xf32>
    %169 = arith.mulf %163, %163 : vector<128x1xf32>
    %170 = arith.subf %168, %169 : vector<128x1xf32>
    %cst_91 = arith.constant 0.000000e+00 : f32
    %171 = vector.broadcast %cst_91 : f32 to vector<128x1xf32>
    %172 = arith.maximumf %170, %171 : vector<128x1xf32>
    %173 = vector.broadcast %163 : vector<128x1xf32> to vector<128x128xf32>
    %174 = arith.subf %155, %173 : vector<128x128xf32>
    %cst_92 = arith.constant 9.99999974E-6 : f32
    %175 = vector.broadcast %cst_92 : f32 to vector<128x1xf32>
    %176 = arith.addf %172, %175 : vector<128x1xf32>
    %177 = math.rsqrt %176 : vector<128x1xf32>
    %178 = vector.broadcast %177 : vector<128x1xf32> to vector<128x128xf32>
    %179 = arith.mulf %174, %178 : vector<128x128xf32>
    %180 = vector.broadcast %157 : vector<1x128xf32> to vector<128x128xf32>
    %181 = arith.mulf %179, %180 : vector<128x128xf32>
    %182 = vector.broadcast %159 : vector<1x128xf32> to vector<128x128xf32>
    %183 = arith.addf %181, %182 : vector<128x128xf32>
    %184 = arith.addf %183, %109 : vector<128x128xf32>
    %185 = arith.truncf %184 : vector<128x128xf32> to vector<128x128xbf16>
    %c0_93 = arith.constant 0 : index
    %c0_94 = arith.constant 0 : index
    %186 = vector.load %arg14[%c0_93, %c0_94] : memref<128x128xbf16, #tpu.memory_space<vmem>>, vector<128x128xbf16>
    %cst_95 = arith.constant dense<0.000000e+00> : vector<128x128xf32>
    %187 = tpu.matmul %185, %186, %cst_95 {dimension_numbers = #tpu.dot_dimension_numbers<[1], [0], [0], [1], [0, 0, 1, 1], [], []>} : vector<128x128xbf16>, vector<128x128xbf16>, vector<128x128xf32> -> vector<128x128xf32>
    %c0_96 = arith.constant 0 : index
    %c0_97 = arith.constant 0 : index
    %188 = vector.load %arg15[%c0_96, %c0_97] : memref<1x128xf32, #tpu.memory_space<vmem>>, vector<1x128xf32>
    %189 = vector.broadcast %188 : vector<1x128xf32> to vector<128x128xf32>
    %190 = arith.addf %187, %189 : vector<128x128xf32>
    %c0_98 = arith.constant 0 : index
    %c0_99 = arith.constant 0 : index
    %191 = vector.load %arg16[%c0_98, %c0_99] : memref<128x128xf32, #tpu.memory_space<vmem>>, vector<128x128xf32>
    tpu.vector_store %arg16[%c0_98, %c0_99], %190 {strides = array<i32>} : memref<128x128xf32, #tpu.memory_space<vmem>>, vector<128x128xf32>,
    return
  }
  func.func @transform_0(%arg0: i32) -> (i32, i32) {
    %c0_i32 = arith.constant 0 : i32
    %c0_i32_0 = arith.constant 0 : i32
    return %arg0, %c0_i32 : i32, i32
  }
  func.func @transform_1(%arg0: i32) -> (i32, i32) {
    %c0_i32 = arith.constant 0 : i32
    %c0_i32_0 = arith.constant 0 : i32
    %c0_i32_1 = arith.constant 0 : i32
    return %c0_i32, %c0_i32_0 : i32, i32
  }
  func.func @transform_2(%arg0: i32) -> (i32, i32) {
    %c0_i32 = arith.constant 0 : i32
    %c0_i32_0 = arith.constant 0 : i32
    %c0_i32_1 = arith.constant 0 : i32
    return %c0_i32, %c0_i32_0 : i32, i32
  }
  func.func @transform_3(%arg0: i32) -> (i32, i32) {
    %c0_i32 = arith.constant 0 : i32
    %c0_i32_0 = arith.constant 0 : i32
    %c0_i32_1 = arith.constant 0 : i32
    return %c0_i32, %c0_i32_0 : i32, i32
  }
  func.func @transform_4(%arg0: i32) -> (i32, i32) {
    %c0_i32 = arith.constant 0 : i32
    %c0_i32_0 = arith.constant 0 : i32
    %c0_i32_1 = arith.constant 0 : i32
    return %c0_i32, %c0_i32_0 : i32, i32
  }
  func.func @transform_5(%arg0: i32) -> (i32, i32, i32) {
    %c0_i32 = arith.constant 0 : i32
    %c0_i32_0 = arith.constant 0 : i32
    %c0_i32_1 = arith.constant 0 : i32
    %c0_i32_2 = arith.constant 0 : i32
    return %c0_i32, %c0_i32_0, %c0_i32_1 : i32, i32, i32
  }
  func.func @transform_6(%arg0: i32) -> (i32, i32, i32) {
    %c0_i32 = arith.constant 0 : i32
    %c0_i32_0 = arith.constant 0 : i32
    %c0_i32_1 = arith.constant 0 : i32
    %c0_i32_2 = arith.constant 0 : i32
    return %c0_i32, %c0_i32_0, %c0_i32_1 : i32, i32, i32
  }
  func.func @transform_7(%arg0: i32) -> (i32, i32, i32) {
    %c0_i32 = arith.constant 0 : i32
    %c0_i32_0 = arith.constant 0 : i32
    %c0_i32_1 = arith.constant 0 : i32
    %c0_i32_2 = arith.constant 0 : i32
    return %c0_i32, %c0_i32_0, %c0_i32_1 : i32, i32, i32
  }
  func.func @transform_8(%arg0: i32) -> (i32, i32, i32) {
    %c0_i32 = arith.constant 0 : i32
    %c0_i32_0 = arith.constant 0 : i32
    %c0_i32_1 = arith.constant 0 : i32
    %c0_i32_2 = arith.constant 0 : i32
    return %c0_i32, %c0_i32_0, %c0_i32_1 : i32, i32, i32
  }
  func.func @transform_9(%arg0: i32) -> (i32, i32, i32) {
    %c0_i32 = arith.constant 0 : i32
    %c0_i32_0 = arith.constant 0 : i32
    %c0_i32_1 = arith.constant 0 : i32
    %c0_i32_2 = arith.constant 0 : i32
    return %c0_i32, %c0_i32_0, %c0_i32_1 : i32, i32, i32
  }
  func.func @transform_10(%arg0: i32) -> (i32, i32, i32) {
    %c0_i32 = arith.constant 0 : i32
    %c0_i32_0 = arith.constant 0 : i32
    %c0_i32_1 = arith.constant 0 : i32
    %c0_i32_2 = arith.constant 0 : i32
    return %c0_i32, %c0_i32_0, %c0_i32_1 : i32, i32, i32
  }
  func.func @transform_11(%arg0: i32) -> (i32, i32, i32) {
    %c0_i32 = arith.constant 0 : i32
    %c0_i32_0 = arith.constant 0 : i32
    %c0_i32_1 = arith.constant 0 : i32
    %c0_i32_2 = arith.constant 0 : i32
    return %c0_i32, %c0_i32_0, %c0_i32_1 : i32, i32, i32
  }
  func.func @transform_12(%arg0: i32) -> (i32, i32, i32) {
    %c0_i32 = arith.constant 0 : i32
    %c0_i32_0 = arith.constant 0 : i32
    %c0_i32_1 = arith.constant 0 : i32
    %c0_i32_2 = arith.constant 0 : i32
    return %c0_i32, %c0_i32_0, %c0_i32_1 : i32, i32, i32
  }
  func.func @transform_13(%arg0: i32) -> (i32, i32) {
    %c0_i32 = arith.constant 0 : i32
    %c0_i32_0 = arith.constant 0 : i32
    %c0_i32_1 = arith.constant 0 : i32
    return %c0_i32, %c0_i32_0 : i32, i32
  }
  func.func @transform_14(%arg0: i32) -> (i32, i32) {
    %c0_i32 = arith.constant 0 : i32
    %c0_i32_0 = arith.constant 0 : i32
    %c0_i32_1 = arith.constant 0 : i32
    return %c0_i32, %c0_i32_0 : i32, i32
  }
  func.func @transform_15(%arg0: i32) -> (i32, i32) {
    %c0_i32 = arith.constant 0 : i32
    %c0_i32_0 = arith.constant 0 : i32
    return %arg0, %c0_i32 : i32, i32
  }
}

module attributes {stable_mosaic.version = 11 : i64} {
  func.func @bronet_kernel(%arg0: i32, %arg1: memref<128x16xf32, #tpu.memory_space<vmem>>, %arg2: memref<16x128xbf16, #tpu.memory_space<vmem>>, %arg3: memref<1x128xf32, #tpu.memory_space<vmem>>, %arg4: memref<1x128xf32, #tpu.memory_space<vmem>>, %arg5: memref<1x128xf32, #tpu.memory_space<vmem>>, %arg6: memref<2x128x128xbf16, #tpu.memory_space<vmem>>, %arg7: memref<2x1x128xf32, #tpu.memory_space<vmem>>, %arg8: memref<2x1x128xf32, #tpu.memory_space<vmem>>, %arg9: memref<2x1x128xf32, #tpu.memory_space<vmem>>, %arg10: memref<2x128x128xbf16, #tpu.memory_space<vmem>>, %arg11: memref<2x1x128xf32, #tpu.memory_space<vmem>>, %arg12: memref<2x1x128xf32, #tpu.memory_space<vmem>>, %arg13: memref<2x1x128xf32, #tpu.memory_space<vmem>>, %arg14: memref<128x128xbf16, #tpu.memory_space<vmem>>, %arg15: memref<1x128xf32, #tpu.memory_space<vmem>>, %arg16: memref<128x128xf32, #tpu.memory_space<vmem>>) attributes {dimension_semantics = [#tpu.dimension_semantics<parallel>], iteration_bounds = array<i64: 2>, scalar_prefetch = 0 : i64, scratch_operands = 0 : i64, tpu.core_type = #tpu.core_type<tc>, window_params = [{transform_indices = @transform_0, window_bounds = array<i64: 128, 16>}, {pipeline_mode = #tpu.pipeline_mode<synchronous>, transform_indices = @transform_1, window_bounds = array<i64: 16, 128>}, {pipeline_mode = #tpu.pipeline_mode<synchronous>, transform_indices = @transform_2, window_bounds = array<i64: 1, 128>}, {pipeline_mode = #tpu.pipeline_mode<synchronous>, transform_indices = @transform_3, window_bounds = array<i64: 1, 128>}, {pipeline_mode = #tpu.pipeline_mode<synchronous>, transform_indices = @transform_4, window_bounds = array<i64: 1, 128>}, {pipeline_mode = #tpu.pipeline_mode<synchronous>, transform_indices = @transform_5, window_bounds = array<i64: 2, 128, 128>}, {pipeline_mode = #tpu.pipeline_mode<synchronous>, transform_indices = @transform_6, window_bounds = array<i64: 2, 1, 128>}, {pipeline_mode = #tpu.pipeline_mode<synchronous>, transform_indices = @transform_7, window_bounds = array<i64: 2, 1, 128>}, {pipeline_mode = #tpu.pipeline_mode<synchronous>, transform_indices = @transform_8, window_bounds = array<i64: 2, 1, 128>}, {pipeline_mode = #tpu.pipeline_mode<synchronous>, transform_indices = @transform_9, window_bounds = array<i64: 2, 128, 128>}, {pipeline_mode = #tpu.pipeline_mode<synchronous>, transform_indices = @transform_10, window_bounds = array<i64: 2, 1, 128>}, {pipeline_mode = #tpu.pipeline_mode<synchronous>, transform_indices = @transform_11, window_bounds = array<i64: 2, 1, 128>}, {pipeline_mode = #tpu.pipeline_mode<synchronous>, transform_indices = @transform_12, window_bounds = array<i64: 2, 1, 128>}, {pipeline_mode = #tpu.pipeline_mode<synchronous>, transform_indices = @transform_13, window_bounds = array<i64: 128, 128>}, {pipeline_mode = #tpu.pipeline_mode<synchronous>, transform_indices = @transform_14, window_bounds = array<i64: 1, 128>}, {transform_indices = @transform_15, window_bounds = array<i64: 128, 128>}]} {
    %c0 = arith.constant 0 : index
    %c0_0 = arith.constant 0 : index
    %0 = vector.load %arg1[%c0, %c0_0] : memref<128x16xf32, #tpu.memory_space<vmem>>, vector<128x16xf32>
    %1 = arith.truncf %0 : vector<128x16xf32> to vector<128x16xbf16>
    %c0_1 = arith.constant 0 : index
    %c0_2 = arith.constant 0 : index
    %2 = vector.load %arg2[%c0_1, %c0_2] : memref<16x128xbf16, #tpu.memory_space<vmem>>, vector<16x128xbf16>
    %cst = arith.constant dense<0.000000e+00> : vector<128x128xf32>
    %3 = tpu.matmul %1, %2, %cst {dimension_numbers = #tpu.dot_dimension_numbers<[1], [0], [0], [1], [0, 0, 1, 1], [], []>} : vector<128x16xbf16>, vector<16x128xbf16>, vector<128x128xf32> -> vector<128x128xf32>
    %c0_3 = arith.constant 0 : index
    %c0_4 = arith.constant 0 : index
    %4 = vector.load %arg3[%c0_3, %c0_4] : memref<1x128xf32, #tpu.memory_space<vmem>>, vector<1x128xf32>
    %5 = vector.broadcast %4 : vector<1x128xf32> to vector<128x128xf32>
    %6 = arith.addf %3, %5 : vector<128x128xf32>
    %c0_5 = arith.constant 0 : index
    %c0_6 = arith.constant 0 : index
    %7 = vector.load %arg4[%c0_5, %c0_6] : memref<1x128xf32, #tpu.memory_space<vmem>>, vector<1x128xf32>
    %c0_7 = arith.constant 0 : index
    %c0_8 = arith.constant 0 : index
    %8 = vector.load %arg5[%c0_7, %c0_8] : memref<1x128xf32, #tpu.memory_space<vmem>>, vector<1x128xf32>
    %cst_9 = arith.constant dense<0.000000e+00> : vector<128xf32>
    %9 = vector.multi_reduction <add>, %6, %cst_9 [1] : vector<128x128xf32> to vector<128xf32>
    %10 = vector.shape_cast %9 : vector<128xf32> to vector<128x1xf32>
    %cst_10 = arith.constant 1.280000e+02 : f32
    %11 = vector.broadcast %cst_10 : f32 to vector<128x1xf32>
    %12 = arith.divf %10, %11 : vector<128x1xf32>
    %13 = arith.mulf %6, %6 : vector<128x128xf32>
    %cst_11 = arith.constant dense<0.000000e+00> : vector<128xf32>
    %14 = vector.multi_reduction <add>, %13, %cst_11 [1] : vector<128x128xf32> to vector<128xf32>
    %15 = vector.shape_cast %14 : vector<128xf32> to vector<128x1xf32>
    %cst_12 = arith.constant 1.280000e+02 : f32
    %16 = vector.broadcast %cst_12 : f32 to vector<128x1xf32>
    %17 = arith.divf %15, %16 : vector<128x1xf32>
    %18 = arith.mulf %12, %12 : vector<128x1xf32>
    %19 = arith.subf %17, %18 : vector<128x1xf32>
    %cst_13 = arith.constant 0.000000e+00 : f32
    %20 = vector.broadcast %cst_13 : f32 to vector<128x1xf32>
    %21 = arith.maximumf %19, %20 : vector<128x1xf32>
    %22 = vector.broadcast %12 : vector<128x1xf32> to vector<128x128xf32>
    %23 = arith.subf %6, %22 : vector<128x128xf32>
    %cst_14 = arith.constant 9.99999974E-6 : f32
    %24 = vector.broadcast %cst_14 : f32 to vector<128x1xf32>
    %25 = arith.addf %21, %24 : vector<128x1xf32>
    %26 = math.rsqrt %25 : vector<128x1xf32>
    %27 = vector.broadcast %26 : vector<128x1xf32> to vector<128x128xf32>
    %28 = arith.mulf %23, %27 : vector<128x128xf32>
    %29 = vector.broadcast %7 : vector<1x128xf32> to vector<128x128xf32>
    %30 = arith.mulf %28, %29 : vector<128x128xf32>
    %31 = vector.broadcast %8 : vector<1x128xf32> to vector<128x128xf32>
    %32 = arith.addf %30, %31 : vector<128x128xf32>
    %cst_15 = arith.constant 0.000000e+00 : f32
    %33 = vector.broadcast %cst_15 : f32 to vector<128x128xf32>
    %34 = arith.maximumf %32, %33 : vector<128x128xf32>
    %35 = arith.truncf %34 : vector<128x128xf32> to vector<128x128xbf16>
    %c0_16 = arith.constant 0 : index
    %c0_17 = arith.constant 0 : index
    %c0_18 = arith.constant 0 : index
    %36 = vector.load %arg6[%c0_16, %c0_17, %c0_18] : memref<2x128x128xbf16, #tpu.memory_space<vmem>>, vector<1x128x128xbf16>
    %37 = vector.shape_cast %36 : vector<1x128x128xbf16> to vector<128x128xbf16>
    %cst_19 = arith.constant dense<0.000000e+00> : vector<128x128xf32>
    %38 = tpu.matmul %35, %37, %cst_19 {dimension_numbers = #tpu.dot_dimension_numbers<[1], [0], [0], [1], [0, 0, 1, 1], [], []>} : vector<128x128xbf16>, vector<128x128xbf16>, vector<128x128xf32> -> vector<128x128xf32>
    %c0_20 = arith.constant 0 : index
    %c0_21 = arith.constant 0 : index
    %c0_22 = arith.constant 0 : index
    %39 = vector.load %arg7[%c0_20, %c0_21, %c0_22] : memref<2x1x128xf32, #tpu.memory_space<vmem>>, vector<1x1x128xf32>
    %40 = vector.shape_cast %39 : vector<1x1x128xf32> to vector<1x128xf32>
    %41 = vector.broadcast %40 : vector<1x128xf32> to vector<128x128xf32>
    %42 = arith.addf %38, %41 : vector<128x128xf32>
    %c0_23 = arith.constant 0 : index
    %c0_24 = arith.constant 0 : index
    %c0_25 = arith.constant 0 : index
    %43 = vector.load %arg8[%c0_23, %c0_24, %c0_25] : memref<2x1x128xf32, #tpu.memory_space<vmem>>, vector<1x1x128xf32>
    %44 = vector.shape_cast %43 : vector<1x1x128xf32> to vector<1x128xf32>
    %c0_26 = arith.constant 0 : index
    %c0_27 = arith.constant 0 : index
    %c0_28 = arith.constant 0 : index
    %45 = vector.load %arg9[%c0_26, %c0_27, %c0_28] : memref<2x1x128xf32, #tpu.memory_space<vmem>>, vector<1x1x128xf32>
    %46 = vector.shape_cast %45 : vector<1x1x128xf32> to vector<1x128xf32>
    %cst_29 = arith.constant dense<0.000000e+00> : vector<128xf32>
    %47 = vector.multi_reduction <add>, %42, %cst_29 [1] : vector<128x128xf32> to vector<128xf32>
    %48 = vector.shape_cast %47 : vector<128xf32> to vector<128x1xf32>
    %cst_30 = arith.constant 1.280000e+02 : f32
    %49 = vector.broadcast %cst_30 : f32 to vector<128x1xf32>
    %50 = arith.divf %48, %49 : vector<128x1xf32>
    %51 = arith.mulf %42, %42 : vector<128x128xf32>
    %cst_31 = arith.constant dense<0.000000e+00> : vector<128xf32>
    %52 = vector.multi_reduction <add>, %51, %cst_31 [1] : vector<128x128xf32> to vector<128xf32>
    %53 = vector.shape_cast %52 : vector<128xf32> to vector<128x1xf32>
    %cst_32 = arith.constant 1.280000e+02 : f32
    %54 = vector.broadcast %cst_32 : f32 to vector<128x1xf32>
    %55 = arith.divf %53, %54 : vector<128x1xf32>
    %56 = arith.mulf %50, %50 : vector<128x1xf32>
    %57 = arith.subf %55, %56 : vector<128x1xf32>
    %cst_33 = arith.constant 0.000000e+00 : f32
    %58 = vector.broadcast %cst_33 : f32 to vector<128x1xf32>
    %59 = arith.maximumf %57, %58 : vector<128x1xf32>
    %60 = vector.broadcast %50 : vector<128x1xf32> to vector<128x128xf32>
    %61 = arith.subf %42, %60 : vector<128x128xf32>
    %cst_34 = arith.constant 9.99999974E-6 : f32
    %62 = vector.broadcast %cst_34 : f32 to vector<128x1xf32>
    %63 = arith.addf %59, %62 : vector<128x1xf32>
    %64 = math.rsqrt %63 : vector<128x1xf32>
    %65 = vector.broadcast %64 : vector<128x1xf32> to vector<128x128xf32>
    %66 = arith.mulf %61, %65 : vector<128x128xf32>
    %67 = vector.broadcast %44 : vector<1x128xf32> to vector<128x128xf32>
    %68 = arith.mulf %66, %67 : vector<128x128xf32>
    %69 = vector.broadcast %46 : vector<1x128xf32> to vector<128x128xf32>
    %70 = arith.addf %68, %69 : vector<128x128xf32>
    %cst_35 = arith.constant 0.000000e+00 : f32
    %71 = vector.broadcast %cst_35 : f32 to vector<128x128xf32>
    %72 = arith.maximumf %70, %71 : vector<128x128xf32>
    %73 = arith.truncf %72 : vector<128x128xf32> to vector<128x128xbf16>
    %c0_36 = arith.constant 0 : index
    %c0_37 = arith.constant 0 : index
    %c0_38 = arith.constant 0 : index
    %74 = vector.load %arg10[%c0_36, %c0_37, %c0_38] : memref<2x128x128xbf16, #tpu.memory_space<vmem>>, vector<1x128x128xbf16>
    %75 = vector.shape_cast %74 : vector<1x128x128xbf16> to vector<128x128xbf16>
    %cst_39 = arith.constant dense<0.000000e+00> : vector<128x128xf32>
    %76 = tpu.matmul %73, %75, %cst_39 {dimension_numbers = #tpu.dot_dimension_numbers<[1], [0], [0], [1], [0, 0, 1, 1], [], []>} : vector<128x128xbf16>, vector<128x128xbf16>, vector<128x128xf32> -> vector<128x128xf32>
    %c0_40 = arith.constant 0 : index
    %c0_41 = arith.constant 0 : index
    %c0_42 = arith.constant 0 : index
    %77 = vector.load %arg11[%c0_40, %c0_41, %c0_42] : memref<2x1x128xf32, #tpu.memory_space<vmem>>, vector<1x1x128xf32>
    %78 = vector.shape_cast %77 : vector<1x1x128xf32> to vector<1x128xf32>
    %79 = vector.broadcast %78 : vector<1x128xf32> to vector<128x128xf32>
    %80 = arith.addf %76, %79 : vector<128x128xf32>
    %c0_43 = arith.constant 0 : index
    %c0_44 = arith.constant 0 : index
    %c0_45 = arith.constant 0 : index
    %81 = vector.load %arg12[%c0_43, %c0_44, %c0_45] : memref<2x1x128xf32, #tpu.memory_space<vmem>>, vector<1x1x128xf32>
    %82 = vector.shape_cast %81 : vector<1x1x128xf32> to vector<1x128xf32>
    %c0_46 = arith.constant 0 : index
    %c0_47 = arith.constant 0 : index
    %c0_48 = arith.constant 0 : index
    %83 = vector.load %arg13[%c0_46, %c0_47, %c0_48] : memref<2x1x128xf32, #tpu.memory_space<vmem>>, vector<1x1x128xf32>
    %84 = vector.shape_cast %83 : vector<1x1x128xf32> to vector<1x128xf32>
    %cst_49 = arith.constant dense<0.000000e+00> : vector<128xf32>
    %85 = vector.multi_reduction <add>, %80, %cst_49 [1] : vector<128x128xf32> to vector<128xf32>
    %86 = vector.shape_cast %85 : vector<128xf32> to vector<128x1xf32>
    %cst_50 = arith.constant 1.280000e+02 : f32
    %87 = vector.broadcast %cst_50 : f32 to vector<128x1xf32>
    %88 = arith.divf %86, %87 : vector<128x1xf32>
    %89 = arith.mulf %80, %80 : vector<128x128xf32>
    %cst_51 = arith.constant dense<0.000000e+00> : vector<128xf32>
    %90 = vector.multi_reduction <add>, %89, %cst_51 [1] : vector<128x128xf32> to vector<128xf32>
    %91 = vector.shape_cast %90 : vector<128xf32> to vector<128x1xf32>
    %cst_52 = arith.constant 1.280000e+02 : f32
    %92 = vector.broadcast %cst_52 : f32 to vector<128x1xf32>
    %93 = arith.divf %91, %92 : vector<128x1xf32>
    %94 = arith.mulf %88, %88 : vector<128x1xf32>
    %95 = arith.subf %93, %94 : vector<128x1xf32>
    %cst_53 = arith.constant 0.000000e+00 : f32
    %96 = vector.broadcast %cst_53 : f32 to vector<128x1xf32>
    %97 = arith.maximumf %95, %96 : vector<128x1xf32>
    %98 = vector.broadcast %88 : vector<128x1xf32> to vector<128x128xf32>
    %99 = arith.subf %80, %98 : vector<128x128xf32>
    %cst_54 = arith.constant 9.99999974E-6 : f32
    %100 = vector.broadcast %cst_54 : f32 to vector<128x1xf32>
    %101 = arith.addf %97, %100 : vector<128x1xf32>
    %102 = math.rsqrt %101 : vector<128x1xf32>
    %103 = vector.broadcast %102 : vector<128x1xf32> to vector<128x128xf32>
    %104 = arith.mulf %99, %103 : vector<128x128xf32>
    %105 = vector.broadcast %82 : vector<1x128xf32> to vector<128x128xf32>
    %106 = arith.mulf %104, %105 : vector<128x128xf32>
    %107 = vector.broadcast %84 : vector<1x128xf32> to vector<128x128xf32>
    %108 = arith.addf %106, %107 : vector<128x128xf32>
    %109 = arith.addf %108, %34 : vector<128x128xf32>
    %110 = arith.truncf %109 : vector<128x128xf32> to vector<128x128xbf16>
    %c1 = arith.constant 1 : index
    %c0_55 = arith.constant 0 : index
    %c0_56 = arith.constant 0 : index
    %111 = vector.load %arg6[%c1, %c0_55, %c0_56] : memref<2x128x128xbf16, #tpu.memory_space<vmem>>, vector<1x128x128xbf16>
    %112 = vector.shape_cast %111 : vector<1x128x128xbf16> to vector<128x128xbf16>
    %cst_57 = arith.constant dense<0.000000e+00> : vector<128x128xf32>
    %113 = tpu.matmul %110, %112, %cst_57 {dimension_numbers = #tpu.dot_dimension_numbers<[1], [0], [0], [1], [0, 0, 1, 1], [], []>} : vector<128x128xbf16>, vector<128x128xbf16>, vector<128x128xf32> -> vector<128x128xf32>
    %c1_58 = arith.constant 1 : index
    %c0_59 = arith.constant 0 : index
    %c0_60 = arith.constant 0 : index
    %114 = vector.load %arg7[%c1_58, %c0_59, %c0_60] : memref<2x1x128xf32, #tpu.memory_space<vmem>>, vector<1x1x128xf32>
    %115 = vector.shape_cast %114 : vector<1x1x128xf32> to vector<1x128xf32>
    %116 = vector.broadcast %115 : vector<1x128xf32> to vector<128x128xf32>
    %117 = arith.addf %113, %116 : vector<128x128xf32>
    %c1_61 = arith.constant 1 : index
    %c0_62 = arith.constant 0 : index
    %c0_63 = arith.constant 0 : index
    %118 = vector.load %arg8[%c1_61, %c0_62, %c0_63] : memref<2x1x128xf32, #tpu.memory_space<vmem>>, vector<1x1x128xf32>
    %119 = vector.shape_cast %118 : vector<1x1x128xf32> to vector<1x128xf32>
    %c1_64 = arith.constant 1 : index
    %c0_65 = arith.constant 0 : index
    %c0_66 = arith.constant 0 : index
    %120 = vector.load %arg9[%c1_64, %c0_65, %c0_66] : memref<2x1x128xf32, #tpu.memory_space<vmem>>, vector<1x1x128xf32>
    %121 = vector.shape_cast %120 : vector<1x1x128xf32> to vector<1x128xf32>
    %cst_67 = arith.constant dense<0.000000e+00> : vector<128xf32>
    %122 = vector.multi_reduction <add>, %117, %cst_67 [1] : vector<128x128xf32> to vector<128xf32>
    %123 = vector.shape_cast %122 : vector<128xf32> to vector<128x1xf32>
    %cst_68 = arith.constant 1.280000e+02 : f32
    %124 = vector.broadcast %cst_68 : f32 to vector<128x1xf32>
    %125 = arith.divf %123, %124 : vector<128x1xf32>
    %126 = arith.mulf %117, %117 : vector<128x128xf32>
    %cst_69 = arith.constant dense<0.000000e+00> : vector<128xf32>
    %127 = vector.multi_reduction <add>, %126, %cst_69 [1] : vector<128x128xf32> to vector<128xf32>
    %128 = vector.shape_cast %127 : vector<128xf32> to vector<128x1xf32>
    %cst_70 = arith.constant 1.280000e+02 : f32
    %129 = vector.broadcast %cst_70 : f32 to vector<128x1xf32>
    %130 = arith.divf %128, %129 : vector<128x1xf32>
    %131 = arith.mulf %125, %125 : vector<128x1xf32>
    %132 = arith.subf %130, %131 : vector<128x1xf32>
    %cst_71 = arith.constant 0.000000e+00 : f32
    %133 = vector.broadcast %cst_71 : f32 to vector<128x1xf32>
    %134 = arith.maximumf %132, %133 : vector<128x1xf32>
    %135 = vector.broadcast %125 : vector<128x1xf32> to vector<128x128xf32>
    %136 = arith.subf %117, %135 : vector<128x128xf32>
    %cst_72 = arith.constant 9.99999974E-6 : f32
    %137 = vector.broadcast %cst_72 : f32 to vector<128x1xf32>
    %138 = arith.addf %134, %137 : vector<128x1xf32>
    %139 = math.rsqrt %138 : vector<128x1xf32>
    %140 = vector.broadcast %139 : vector<128x1xf32> to vector<128x128xf32>
    %141 = arith.mulf %136, %140 : vector<128x128xf32>
    %142 = vector.broadcast %119 : vector<1x128xf32> to vector<128x128xf32>
    %143 = arith.mulf %141, %142 : vector<128x128xf32>
    %144 = vector.broadcast %121 : vector<1x128xf32> to vector<128x128xf32>
    %145 = arith.addf %143, %144 : vector<128x128xf32>
    %cst_73 = arith.constant 0.000000e+00 : f32
    %146 = vector.broadcast %cst_73 : f32 to vector<128x128xf32>
    %147 = arith.maximumf %145, %146 : vector<128x128xf32>
    %148 = arith.truncf %147 : vector<128x128xf32> to vector<128x128xbf16>
    %c1_74 = arith.constant 1 : index
    %c0_75 = arith.constant 0 : index
    %c0_76 = arith.constant 0 : index
    %149 = vector.load %arg10[%c1_74, %c0_75, %c0_76] : memref<2x128x128xbf16, #tpu.memory_space<vmem>>, vector<1x128x128xbf16>
    %150 = vector.shape_cast %149 : vector<1x128x128xbf16> to vector<128x128xbf16>
    %cst_77 = arith.constant dense<0.000000e+00> : vector<128x128xf32>
    %151 = tpu.matmul %148, %150, %cst_77 {dimension_numbers = #tpu.dot_dimension_numbers<[1], [0], [0], [1], [0, 0, 1, 1], [], []>} : vector<128x128xbf16>, vector<128x128xbf16>, vector<128x128xf32> -> vector<128x128xf32>
    %c1_78 = arith.constant 1 : index
    %c0_79 = arith.constant 0 : index
    %c0_80 = arith.constant 0 : index
    %152 = vector.load %arg11[%c1_78, %c0_79, %c0_80] : memref<2x1x128xf32, #tpu.memory_space<vmem>>, vector<1x1x128xf32>
    %153 = vector.shape_cast %152 : vector<1x1x128xf32> to vector<1x128xf32>
    %154 = vector.broadcast %153 : vector<1x128xf32> to vector<128x128xf32>
    %155 = arith.addf %151, %154 : vector<128x128xf32>
    %c1_81 = arith.constant 1 : index
    %c0_82 = arith.constant 0 : index
    %c0_83 = arith.constant 0 : index
    %156 = vector.load %arg12[%c1_81, %c0_82, %c0_83] : memref<2x1x128xf32, #tpu.memory_space<vmem>>, vector<1x1x128xf32>
    %157 = vector.shape_cast %156 : vector<1x1x128xf32> to vector<1x128xf32>
    %c1_84 = arith.constant 1 : index
    %c0_85 = arith.constant 0 : index
    %c0_86 = arith.constant 0 : index
    %158 = vector.load %arg13[%c1_84, %c0_85, %c0_86] : memref<2x1x128xf32, #tpu.memory_space<vmem>>, vector<1x1x128xf32>
    %159 = vector.shape_cast %158 : vector<1x1x128xf32> to vector<1x128xf32>
    %cst_87 = arith.constant dense<0.000000e+00> : vector<128xf32>
    %160 = vector.multi_reduction <add>, %155, %cst_87 [1] : vector<128x128xf32> to vector<128xf32>
    %161 = vector.shape_cast %160 : vector<128xf32> to vector<128x1xf32>
    %cst_88 = arith.constant 1.280000e+02 : f32
    %162 = vector.broadcast %cst_88 : f32 to vector<128x1xf32>
    %163 = arith.divf %161, %162 : vector<128x1xf32>
    %164 = arith.mulf %155, %155 : vector<128x128xf32>
    %cst_89 = arith.constant dense<0.000000e+00> : vector<128xf32>
    %165 = vector.multi_reduction <add>, %164, %cst_89 [1] : vector<128x128xf32> to vector<128xf32>
    %166 = vector.shape_cast %165 : vector<128xf32> to vector<128x1xf32>
    %cst_90 = arith.constant 1.280000e+02 : f32
    %167 = vector.broadcast %cst_90 : f32 to vector<128x1xf32>
    %168 = arith.divf %166, %167 : vector<128x1xf32>
    %169 = arith.mulf %163, %163 : vector<128x1xf32>
    %170 = arith.subf %168, %169 : vector<128x1xf32>
    %cst_91 = arith.constant 0.000000e+00 : f32
    %171 = vector.broadcast %cst_91 : f32 to vector<128x1xf32>
    %172 = arith.maximumf %170, %171 : vector<128x1xf32>
    %173 = vector.broadcast %163 : vector<128x1xf32> to vector<128x128xf32>
    %174 = arith.subf %155, %173 : vector<128x128xf32>
    %cst_92 = arith.constant 9.99999974E-6 : f32
    %175 = vector.broadcast %cst_92 : f32 to vector<128x1xf32>
    %176 = arith.addf %172, %175 : vector<128x1xf32>
    %177 = math.rsqrt %176 : vector<128x1xf32>
    %178 = vector.broadcast %177 : vector<128x1xf32> to vector<128x128xf32>
    %179 = arith.mulf %174, %178 : vector<128x128xf32>
    %180 = vector.broadcast %157 : vector<1x128xf32> to vector<128x128xf32>
    %181 = arith.mulf %179, %180 : vector<128x128xf32>
    %182 = vector.broadcast %159 : vector<1x128xf32> to vector<128x128xf32>
    %183 = arith.addf %181, %182 : vector<128x128xf32>
    %184 = arith.addf %183, %109 : vector<128x128xf32>
    %185 = arith.truncf %184 : vector<128x128xf32> to vector<128x128xbf16>
    %c0_93 = arith.constant 0 : index
    %c0_94 = arith.constant 0 : index
    %186 = vector.load %arg14[%c0_93, %c0_94] : memref<128x128xbf16, #tpu.memory_space<vmem>>, vector<128x128xbf16>
    %cst_95 = arith.constant dense<0.000000e+00> : vector<128x128xf32>
    %187 = tpu.matmul %185, %186, %cst_95 {dimension_numbers = #tpu.dot_dimension_numbers<[1], [0], [0], [1], [0, 0, 1, 1], [], []>} : vector<128x128xbf16>, vector<128x128xbf16>, vector<128x128xf32> -> vector<128x128xf32>
    %c0_96 = arith.constant 0 : index
    %c0_97 = arith.constant 0 : index
    %188 = vector.load %arg15[%c0_96, %c0_97] : memref<1x128xf32, #tpu.memory_space<vmem>>, vector<1x128xf32>
    %189 = vector.broadcast %188 : vector<1x128xf32> to vector<128x128xf32>
    %190 = arith.addf %187, %189 : vector<128x128xf32>
    %c0_98 = arith.constant 0 : index
    %c0_99 = arith.constant 0 : index
    %191 = vector.load %arg16[%c0_98, %c0_99] : memref<128x128xf32, #tpu.memory_space<vmem>>, vector<128x128xf32>
    tpu.vector_store %arg16[%c0_98, %c0_99], %190 {strides = array<i32>} : memref<128x128xf32, #tpu.memory_space<vmem>>, vector<128x128xf32>,
    return
  }
  func.func @transform_0(%arg0: i32) -> (i32, i32) {
    %c0_i32 = arith.constant 0 : i32
    %c0_i32_0 = arith.constant 0 : i32
    return %arg0, %c0_i32 : i32, i32
  }
  func.func @transform_1(%arg0: i32) -> (i32, i32) {
    %c0_i32 = arith.constant 0 : i32
    %c0_i32_0 = arith.constant 0 : i32
    %c0_i32_1 = arith.constant 0 : i32
    return %c0_i32, %c0_i32_0 : i32, i32
  }
  func.func @transform_2(%arg0: i32) -> (i32, i32) {
    %c0_i32 = arith.constant 0 : i32
    %c0_i32_0 = arith.constant 0 : i32
    %c0_i32_1 = arith.constant 0 : i32
    return %c0_i32, %c0_i32_0 : i32, i32
  }
  func.func @transform_3(%arg0: i32) -> (i32, i32) {
    %c0_i32 = arith.constant 0 : i32
    %c0_i32_0 = arith.constant 0 : i32
    %c0_i32_1 = arith.constant 0 : i32
    return %c0_i32, %c0_i32_0 : i32, i32
  }
  func.func @transform_4(%arg0: i32) -> (i32, i32) {
    %c0_i32 = arith.constant 0 : i32
    %c0_i32_0 = arith.constant 0 : i32
    %c0_i32_1 = arith.constant 0 : i32
    return %c0_i32, %c0_i32_0 : i32, i32
  }
  func.func @transform_5(%arg0: i32) -> (i32, i32, i32) {
    %c0_i32 = arith.constant 0 : i32
    %c0_i32_0 = arith.constant 0 : i32
    %c0_i32_1 = arith.constant 0 : i32
    %c0_i32_2 = arith.constant 0 : i32
    return %c0_i32, %c0_i32_0, %c0_i32_1 : i32, i32, i32
  }
  func.func @transform_6(%arg0: i32) -> (i32, i32, i32) {
    %c0_i32 = arith.constant 0 : i32
    %c0_i32_0 = arith.constant 0 : i32
    %c0_i32_1 = arith.constant 0 : i32
    %c0_i32_2 = arith.constant 0 : i32
    return %c0_i32, %c0_i32_0, %c0_i32_1 : i32, i32, i32
  }
  func.func @transform_7(%arg0: i32) -> (i32, i32, i32) {
    %c0_i32 = arith.constant 0 : i32
    %c0_i32_0 = arith.constant 0 : i32
    %c0_i32_1 = arith.constant 0 : i32
    %c0_i32_2 = arith.constant 0 : i32
    return %c0_i32, %c0_i32_0, %c0_i32_1 : i32, i32, i32
  }
  func.func @transform_8(%arg0: i32) -> (i32, i32, i32) {
    %c0_i32 = arith.constant 0 : i32
    %c0_i32_0 = arith.constant 0 : i32
    %c0_i32_1 = arith.constant 0 : i32
    %c0_i32_2 = arith.constant 0 : i32
    return %c0_i32, %c0_i32_0, %c0_i32_1 : i32, i32, i32
  }
  func.func @transform_9(%arg0: i32) -> (i32, i32, i32) {
    %c0_i32 = arith.constant 0 : i32
    %c0_i32_0 = arith.constant 0 : i32
    %c0_i32_1 = arith.constant 0 : i32
    %c0_i32_2 = arith.constant 0 : i32
    return %c0_i32, %c0_i32_0, %c0_i32_1 : i32, i32, i32
  }
  func.func @transform_10(%arg0: i32) -> (i32, i32, i32) {
    %c0_i32 = arith.constant 0 : i32
    %c0_i32_0 = arith.constant 0 : i32
    %c0_i32_1 = arith.constant 0 : i32
    %c0_i32_2 = arith.constant 0 : i32
    return %c0_i32, %c0_i32_0, %c0_i32_1 : i32, i32, i32
  }
  func.func @transform_11(%arg0: i32) -> (i32, i32, i32) {
    %c0_i32 = arith.constant 0 : i32
    %c0_i32_0 = arith.constant 0 : i32
    %c0_i32_1 = arith.constant 0 : i32
    %c0_i32_2 = arith.constant 0 : i32
    return %c0_i32, %c0_i32_0, %c0_i32_1 : i32, i32, i32
  }
  func.func @transform_12(%arg0: i32) -> (i32, i32, i32) {
    %c0_i32 = arith.constant 0 : i32
    %c0_i32_0 = arith.constant 0 : i32
    %c0_i32_1 = arith.constant 0 : i32
    %c0_i32_2 = arith.constant 0 : i32
    return %c0_i32, %c0_i32_0, %c0_i32_1 : i32, i32, i32
  }
  func.func @transform_13(%arg0: i32) -> (i32, i32) {
    %c0_i32 = arith.constant 0 : i32
    %c0_i32_0 = arith.constant 0 : i32
    %c0_i32_1 = arith.constant 0 : i32
    return %c0_i32, %c0_i32_0 : i32, i32
  }
  func.func @transform_14(%arg0: i32) -> (i32, i32) {
    %c0_i32 = arith.constant 0 : i32
    %c0_i32_0 = arith.constant 0 : i32
    %c0_i32_1 = arith.constant 0 : i32
    return %c0_i32, %c0_i32_0 : i32, i32
  }
  func.func @transform_15(%arg0: i32) -> (i32, i32) {
    %c0_i32 = arith.constant 0 : i32
    %c0_i32_0 = arith.constant 0 : i32
    return %arg0, %c0_i32 : i32, i32
  }
}

</mosaic_0001>

<bundles_post_ra>
// kernel: tpu_custom_call.1
= control target key start
LH: loop header
LB: loop body
LE: loop exit
PB: predicated region body
PF: predicated region fallthrough
CT: control target
= control target key end

     0   :  { %s6066_s0 = inlined_call_operand.vmem [shape: f32[256,16], index: 0, kind: input, shape index: {}]   ;;  %s6067_s1 = inlined_call_operand.vmem [shape: bf16[16,128], index: 1, kind: input, shape index: {}]   ;;  %s6068_s2 = inlined_call_operand.vmem [shape: f32[1,128], index: 2, kind: input, shape index: {}]   ;;  %s6069_s3 = inlined_call_operand.vmem [shape: f32[1,128], index: 3, kind: input, shape index: {}]   ;;  %s6070_s4 = inlined_call_operand.vmem [shape: f32[1,128], index: 4, kind: input, shape index: {}]   ;;  %s6071_s5 = inlined_call_operand.vmem [shape: bf16[2,128,128], index: 5, kind: input, shape index: {}]   ;;  %s6072_s6 = inlined_call_operand.vmem [shape: f32[2,1,128], index: 6, kind: input, shape index: {}]   ;;  %s6073_s7 = inlined_call_operand.vmem [shape: f32[2,1,128], index: 7, kind: input, shape index: {}]   ;;  %s6074_s8 = inlined_call_operand.vmem [shape: f32[2,1,128], index: 8, kind: input, shape index: {}]   ;;  %s6075_s9 = inlined_call_operand.vmem [shape: bf16[2,128,128], index: 9, kind: input, shape index: {}]   ;;  %s6076_s10 = inlined_call_operand.vmem [shape: f32[2,1,128], index: 10, kind: input, shape index: {}]   ;;  %s6077_s11 = inlined_call_operand.vmem [shape: f32[2,1,128], index: 11, kind: input, shape index: {}]   ;;  %s6078_s12 = inlined_call_operand.vmem [shape: f32[2,1,128], index: 12, kind: input, shape index: {}]   ;;  %s6079_s13 = inlined_call_operand.hbm [shape: bf16[128,128], index: 13, kind: input, shape index: {}]   ;;  %s6080_s14 = inlined_call_operand.vmem [shape: f32[1,128], index: 14, kind: input, shape index: {}]   ;;  %s6081_s15 = inlined_call_operand.hbm [shape: f32[256,128], index: 15, kind: output, shape index: {}]  }
   0x1   :  { %6098 = sst [smem:[#allocation12_spill]] %s6066_s0 }
   0x2   :  { %6099 = sst [smem:[#allocation13_spill]] %s6079_s13 }
   0x3   :  { %20 = vsyncpa [#allocation3], 0 }
   0x4   :  { %21 = vsyncpa [#allocation4], 0 }
   0x5   :  { %23 = vsyncpa [#allocation4 + $0x1], 0  ;;  %s4190_s18 = smov 0   ;;  %s4192_s19 = smov 0  }
   0x6   :  { %s4194_s20 = smov 0   ;;  %s4196_s21 = smov 0  }
   0x7 LB: > { %6100 = sst [smem:[#allocation8_spill]] %s4098_s20  ;;  %s4211_s22 = sadd.s32 4294967295, %s4102_s21   ;;  %s4102_s21 = sphi %s4196_s21, %s6131_s21   ;;  %s4098_s20 = sphi %s4194_s20, %s6133_s20   ;;  %s4094_s19 = sphi %s4192_s19, %s6135_s19   ;;  %s4090_s18 = sphi %s4190_s18, %s6134_s18  }
   0x8   : > { %s3490_s23 = sadd.s32 4294967294, %s4102_s21   ;;  %s4215_s24 = sadd.s32 1, %s4102_s21  }
   0x9   : > { %6101 = sst [smem:[#allocation9_spill]] %s4215_s24  ;;  %s356_s25 = sadd.s32 1, %s4098_s20 }
   0xa   : > { %s353_s26 = ssub.s32 %s4102_s21, %s4215_s24  ;;  %p366_p0 = scmp.ne.s32.totalorder %s4098_s20, %s4094_s19 }
   0xb   : > { %p354_p1 = scmp.eq.s32.totalorder %s353_s26, 0  ;;  %p367_p2 = scmp.eq.s32.totalorder %s4211_s22, 1 }
   0xc   : > { %p372_p3 = scmp.ne.s32.totalorder %s4094_s19, %s4090_s18  ;;  %p373_p4 = scmp.eq.s32.totalorder %s3490_s23, 1 }
   0xd   : > { %s4226_s27 = scalar_select %p354_p1, %s4098_s20, %s356_s25  }
   0xe   : > { %p4228_p5 = por %p367_p2, %p366_p0  ;;  %p4232_p6 = por %p373_p4, %p372_p3 }
   0xf   : > { %6102 = sst [smem:[#allocation10_spill]] %s4226_s27  ;;  %p3491_p7 = scmp.ge.s32.totalorder %s4102_s21, 1 }
  0x10   : > { %s6104_s29 = scalar_select %p4232_p6, 1, 0 }
  0x11   : > { %p380_p8 = scmp.lt.s32.totalorder %s4102_s21, 3  ;;  %p3787_p9 = scmp.eq.s32.totalorder %s4211_s22, 0 }
  0x12   : > { %6105 = sst [smem:[#allocation11_spill]] %s6104_s29  ;;  %s4104_s23 = smov [#allocation2]  }
  0x13   : > { %p381_p10 = pnand %p3491_p7, %p380_p8  ;;  %s6106_s13 = sld [smem:[#allocation13_spill]] }
  0x14   : > { %s429_s25 = sshll.u32 %s4104_s23, 4  ;;  %s4105_s26 = smov 64   ;;  %s430_s25 = int_to_ptr.vmem [resolvable:$true] %s429_s25 }
  0x15   : > { %p3779_p11 = pneg %p381_p10  ;;  %s4106_s27 = smov 4  }
  0x16   : > { %457 = sbr.rel (%p381_p10) target bundleno = 1759 (0x6df), region = 80 }
  0x17   : > { %p3780_p12 = pnand %p3787_p9, %p3779_p11 }
  0x19   : > { %s427_s17 = sshll.u32 %s6106_s13, 4  ;;  %s428_s17 = int_to_ptr.hbm [resolvable:$true] %s427_s17 }
  0x1a   : > { %3782 = dma.hbm_to_vmem [thread:$0]  (!%p3780_p12), %s428_s17, 1024, %s430_s25, [#allocation3], %s4105_s26, %s4105_s26, %s4106_s27  }
  0x1b   : > { %4081 = dma.done.wait (%p3787_p9), [#allocation3], 1024  }
  0x1c   : > { %4083 = vsyncadd (%p3787_p9), [#allocation3], 4294966272  ;;  %s3497_s30 = sshll.u32 %s4211_s22, 4  ;;  %s6107_s0 = sld [smem:[#allocation12_spill]]  ;;  %v3714_v0 = vld [vmem:[%s6067_s1] sm:$0xff]  ;;  %vm550_vm0 = vcmask 130048  }
  0x1d   : > { %p507_p13 = scmp.lt.s32.totalorder %s3497_s30, 31  ;;  %582 = vmatpush.bf16.msra.mxu0 %v3714_v0  ;;  %3756 = vmatpush.bf16.msra.mxu3 %v3714_v0  ;;  %v4284_v25 = vld [vmem:[%s6068_s2] ss:$0 sm:$0xff]  ;;  %s503_s25 = sand.u32 1, %s4094_s19  }
  0x1e   : > { %s3496_s26 = sshll.u32 %s503_s25, 7  ;;  %s3755_s13 = sshll.u32 %s4211_s22, 7 }
  0x1f   : > { %s6137_s30 = smov (!%p507_p13, %s3497_s30), 31  ;;  %s6014_s23 = scalar_lea.vmem [#allocation5], %s3496_s26 }
  0x20   : > { %s3498_s16 = sshll.u32 %s6137_s30, 3  ;;  %s3412_s27 = scalar_lea.hbm %s6081_s15, %s3755_s13 }
  0x21   : > { %s3413_s29 = sshll.u32 %s6014_s23, 4  ;;  %s3415_s17 = sshll.u32 %s3412_s27, 4  ;;  %s3414_s29 = int_to_ptr.vmem [resolvable:$true] %s3413_s29  ;;  %s3416_s17 = int_to_ptr.hbm [resolvable:$true] %s3415_s17 }
  0x22   : > { %s4252_s20 = scalar_lea.vmem %s6107_s0, %s3498_s16  ;;  %s3401_s26 = scalar_lea.sflag [#allocation4], %s503_s25 }
  0x23   : > { %v514_v1 = vld [vmem:[%s4252_s20] sm:$0xff]  ;;  %v515_v2 = vld [vmem:[%s4252_s20 + $0x8] sm:$0xff]  ;;  %v516_v4 = vld [vmem:[%s4252_s20 + $0x10] sm:$0xff]  ;;  %s4050_s30 = sshra.s32 %s3416_s17, 4  ;;  %s4056_s13 = scalar_lea.hbm %s6081_s15, 256  ;;  %s4051_s30 = int_to_ptr.hbm [resolvable:$true] %s4050_s30 }
  0x24   : > { %v530_v3 = vpack.c.bf16 %v515_v2, %v514_v1  ;;  %v517_v5 = vld [vmem:[%s4252_s20 + $0x18] sm:$0xff]  ;;  %v524_v7 = vld [vmem:[%s4252_s20 + $0x50] sm:$0xff]  ;;  %v518_v10 = vld [vmem:[%s4252_s20 + $0x20] sm:$0xff]  ;;  %s4052_s22 = scalar_lea.hbm %s4051_s30, 128  ;;  %p4057_p3 = scmp.lt.s32.totalorder %s4051_s30, %s6081_s15 }
  0x25   : > { %v531_v6 = vpack.c.bf16 %v517_v5, %v516_v4  ;;  %v525_v8 = vld [vmem:[%s4252_s20 + $0x58] sm:$0xff]  ;;  %v519_v11 = vld [vmem:[%s4252_s20 + $0x28] sm:$0xff]  ;;  %v526_v13 = vld [vmem:[%s4252_s20 + $0x60] sm:$0xff]  ;;  %v4107_v4 = vmov 128.0   ;;  %p4053_p0 = scmp.ne.s32.totalorder %s4051_s30, %s4052_s22  ;;  %p4058_p4 = scmp.lt.s32.totalorder %s4056_s13, %s4052_s22 }
  0x26   : > { %3503 = vmatmul.msk.bf16.vlgmr.msra.gmra.mxu0 %vm550_vm0, %v530_v3  ;;  %v535_v9 = vpack.c.bf16 %v525_v8, %v524_v7  ;;  %v532_v12 = vpack.c.bf16 %v519_v11, %v518_v10  ;;  %v527_v14 = vld [vmem:[%s4252_s20 + $0x68] sm:$0xff]  ;;  %v520_v16 = vld [vmem:[%s4252_s20 + $0x30] sm:$0xff]  ;;  %v521_v17 = vld [vmem:[%s4252_s20 + $0x38] sm:$0xff]  ;;  %3844 = vrcp.f32 %v4107_v4 }
  0x27   : > { %v536_v15 = vpack.c.bf16 %v527_v14, %v526_v13  ;;  %v533_v18 = vpack.c.bf16 %v521_v17, %v520_v16  ;;  %v528_v19 = vld [vmem:[%s4252_s20 + $0x70] sm:$0xff]  ;;  %v529_v20 = vld [vmem:[%s4252_s20 + $0x78] sm:$0xff]  ;;  %v522_v22 = vld [vmem:[%s4252_s20 + $0x40] sm:$0xff]  ;;  %p4054_p1 = pnand %p4053_p0, %p4228_p5  ;;  %p4059_p7 = por %p4058_p4, %p4057_p3 }
  0x28   : > { %3508 = vmatmul.msk.bf16.vlgmr.msra.gmra.mxu3 %vm550_vm0, %v535_v9  ;;  %v537_v21 = vpack.c.bf16 %v529_v20, %v528_v19  ;;  %v523_v23 = vld [vmem:[%s4252_s20 + $0x48] sm:$0xff]  ;;  %v3719_v19 = vld [vmem:[%s6071_s5 + $0x20] sm:$0xff] }
  0x29   : > { %v534_v24 = vpack.c.bf16 %v523_v23, %v522_v22  ;;  %v3720_v17 = vld [vmem:[%s6071_s5 + $0x28] sm:$0xff]  ;;  %p4055_p2 = pneg %p4054_p1 }
  0x2b   : > { %p4060_p8 = pnand %p4059_p7, %p4055_p2 }
  0x2c   : > { %v3845_v7 = vpop.eup %3844 }
  0x2d   : > { %v659_v10 = vmul.f32 128.0, %v3845_v7  ;;  %vm663_vm1 = vweird.f32 %v3845_v7 }
  0x2f   : > { %v660_v13 = vsub.f32 1.0, %v659_v10 }
  0x31   : > { %v661_v16 = vmul.f32 %v3845_v7, %v660_v13 }
  0x36   : > { %3504 = vmatmul.msk.bf16.gmra.mxu0 %vm550_vm0, %v531_v6 }
  0x38   : > { %3509 = vmatmul.msk.bf16.gmra.mxu3 %vm550_vm0, %v536_v15  ;;  %v3721_v15 = vld [vmem:[%s6071_s5 + $0x30] sm:$0xff] }
  0x46   : > { %3505 = vmatmul.msk.bf16.gmra.mxu0 %vm550_vm0, %v532_v12  ;;  %v3722_v12 = vld [vmem:[%s6071_s5 + $0x38] sm:$0xff] }
  0x47   : > { %1131 = vmatpush.bf16.msra.mxu1 %v3722_v12  ;;  %3757 = vmatpush.bf16.msra.mxu2 %v3722_v12 }
  0x48   : > { %3510 = vmatmul.msk.bf16.gmra.mxu3 %vm550_vm0, %v537_v21  ;;  %v3718_v21 = vld [vmem:[%s6071_s5 + $0x18] sm:$0xff] }
  0x49   : > { %3758 = vmatpush.bf16.msrb.mxu3 %v3722_v12 }
  0x4b   : > { %1132 = vmatpush.bf16.msra.mxu1 %v3721_v15  ;;  %3759 = vmatpush.bf16.msra.mxu2 %v3721_v15 }
  0x4d   : > { %3760 = vmatpush.bf16.msrb.mxu3 %v3721_v15 }
  0x4f   : > { %1133 = vmatpush.bf16.msra.mxu1 %v3720_v17  ;;  %3761 = vmatpush.bf16.msra.mxu2 %v3720_v17 }
  0x51   : > { %3762 = vmatpush.bf16.msrb.mxu3 %v3720_v17 }
  0x53   : > { %1134 = vmatpush.bf16.msra.mxu1 %v3719_v19  ;;  %3763 = vmatpush.bf16.msra.mxu2 %v3719_v19 }
  0x55   : > { %3764 = vmatpush.bf16.msrb.mxu3 %v3719_v19 }
  0x56   : > { %3506 = vmatmul.msk.bf16.gmra.mxu0 %vm550_vm0, %v533_v18  ;;  %v662_v18 = vadd.f32 %v3845_v7, %v661_v16 }
  0x57   : > { %1135 = vmatpush.bf16.msra.mxu1 %v3718_v21  ;;  %3765 = vmatpush.bf16.msra.mxu2 %v3718_v21 }
  0x58   : > { %v4394_v20 = vsel %vm663_vm1, %v3845_v7, %v662_v18 }
  0x59   : > { %3766 = vmatpush.bf16.msrb.mxu3 %v3718_v21 }
  0x66   : > { %3507 = vmatmul.msk.bf16.gmra.mxu0 %vm550_vm0, %v534_v24 }
  0xa3   : > { %v584_v26 = vpop.f32.mrf.mxu0 }
  0xa4   : > { %v4287_v27 = vadd.f32 %v4284_v25, %v584_v26 }
  0xa6   : > { %626 = vadd.xlane.f32.xlu0 %v4287_v27  ;;  %v681_v28 = vmul.f32 %v4287_v27, %v4287_v27 }
  0xa8   : > { %697 = vadd.xlane.f32.xlu1 %v681_v28  ;;  %v3717_v28 = vld [vmem:[%s6071_s5 + $0x10] sm:$0xff] }
  0xa9   : > { %1136 = vmatpush.bf16.msra.mxu1 %v3717_v28  ;;  %3767 = vmatpush.bf16.msra.mxu2 %v3717_v28 }
  0xaa   : > { %3768 = vmatpush.bf16.msrb.mxu3 %v3717_v28 }
  0xab   : > { %v586_v29 = vpop.f32.mrf.mxu0  ;;  %v609_v45 = vpop.f32.mrf.mxu3 }
  0xac   : > { %v4293_v30 = vadd.f32 %v4284_v25, %v586_v29  ;;  %v4350_v60 = vadd.f32 %v4284_v25, %v609_v45 }
  0xae   : > { %628 = vadd.xlane.f32.xlu0 %v4293_v30  ;;  %v682_v31 = vmul.f32 %v4293_v30, %v4293_v30  ;;  %v691_v63 = vmul.f32 %v4350_v60, %v4350_v60 }
  0xb0   : > { %699 = vadd.xlane.f32.xlu1 %v682_v31 }
  0xb3   : > { %v589_v32 = vpop.f32.mrf.mxu0  ;;  %v611_v50 = vpop.f32.mrf.mxu3 }
  0xb4   : > { %v4299_v33 = vadd.f32 %v4284_v25, %v589_v32  ;;  %v4344_v58 = vadd.f32 %v4284_v25, %v611_v50  ;;  %v3716_v32 = vld [vmem:[%s6071_s5 + $0x8] sm:$0xff] }
  0xb5   : > { %1137 = vmatpush.bf16.msra.mxu1 %v3716_v32  ;;  %3769 = vmatpush.bf16.msra.mxu2 %v3716_v32 }
  0xb6   : > { %630 = vadd.xlane.f32.xlu2 %v4299_v33  ;;  %v683_v34 = vmul.f32 %v4299_v33, %v4299_v33  ;;  %v692_v2 = vmul.f32 %v4344_v58, %v4344_v58  ;;  %3770 = vmatpush.bf16.msrb.mxu3 %v3716_v32 }
  0xb8   : > { %701 = vadd.xlane.f32.xlu0 %v683_v34 }
  0xbb   : > { %v591_v35 = vpop.f32.mrf.mxu0  ;;  %v614_v55 = vpop.f32.mrf.mxu3 }
  0xbc   : > { %v4305_v36 = vadd.f32 %v4284_v25, %v591_v35  ;;  %v4354_v62 = vadd.f32 %v4284_v25, %v614_v55 }
  0xbe   : > { %632 = vadd.xlane.f32.xlu2 %v4305_v36  ;;  %v684_v37 = vmul.f32 %v4305_v36, %v4305_v36  ;;  %v693_v6 = vmul.f32 %v4354_v62, %v4354_v62 }
  0xc0   : > { %703 = vadd.xlane.f32.xlu1 %v684_v37 }
  0xc3   : > { %v594_v38 = vpop.f32.mrf.mxu0  ;;  %v616_v61 = vpop.f32.mrf.mxu3 }
  0xc4   : > { %v4311_v39 = vadd.f32 %v4284_v25, %v594_v38  ;;  %v4361_v0 = vadd.f32 %v4284_v25, %v616_v61 }
  0xc6   : > { %634 = vadd.xlane.f32.xlu2 %v4311_v39  ;;  %v685_v40 = vmul.f32 %v4311_v39, %v4311_v39  ;;  %v694_v3 = vmul.f32 %v4361_v0, %v4361_v0 }
  0xc8   : > { %705 = vadd.xlane.f32.xlu1 %v685_v40 }
  0xcb   : > { %v596_v41 = vpop.f32.mrf.mxu0  ;;  %v619_v1 = vpop.f32.mrf.mxu3 }
  0xcc   : > { %v4317_v42 = vadd.f32 %v4284_v25, %v596_v41  ;;  %v4369_v5 = vadd.f32 %v4284_v25, %v619_v1  ;;  %v3715_v41 = vld [vmem:[%s6071_s5] sm:$0xff] }
  0xcd   : > { %1138 = vmatpush.bf16.msra.mxu1 %v3715_v41  ;;  %3771 = vmatpush.bf16.msra.mxu2 %v3715_v41 }
  0xce   : > { %636 = vadd.xlane.f32.xlu0 %v4317_v42  ;;  %v686_v43 = vmul.f32 %v4317_v42, %v4317_v42  ;;  %v695_v8 = vmul.f32 %v4369_v5, %v4369_v5  ;;  %3772 = vmatpush.bf16.msrb.mxu3 %v3715_v41  ;;  %v4451_v41 = vld [vmem:[%s6070_s4] ss:$0 sm:$0xff] }
  0xd0   : > { %707 = vadd.xlane.f32.xlu2 %v686_v43 }
  0xd3   : > { %v599_v44 = vpop.f32.mrf.mxu0  ;;  %v621_v9 = vpop.f32.mrf.mxu3 }
  0xd4   : > { %v4323_v46 = vadd.f32 %v4284_v25, %v599_v44  ;;  %v4377_v11 = vadd.f32 %v4284_v25, %v621_v9 }
  0xd6   : > { %638 = vadd.xlane.f32.xlu0 %v4323_v46  ;;  %v687_v47 = vmul.f32 %v4323_v46, %v4323_v46  ;;  %v696_v14 = vmul.f32 %v4377_v11, %v4377_v11 }
  0xd8   : > { %709 = vadd.xlane.f32.xlu2 %v687_v47 }
  0xdb   : > { %v601_v48 = vpop.f32.mrf.mxu0 }
  0xdc   : > { %v4329_v49 = vadd.f32 %v4284_v25, %v601_v48 }
  0xde   : > { %640 = vadd.xlane.f32.xlu1 %v4329_v49  ;;  %v688_v51 = vmul.f32 %v4329_v49, %v4329_v49 }
  0xe0   : > { %711 = vadd.xlane.f32.xlu0 %v688_v51 }
  0xe3   : > { %v604_v52 = vpop.f32.mrf.mxu0 }
  0xe4   : > { %v4335_v53 = vadd.f32 %v4284_v25, %v604_v52 }
  0xe6   : > { %642 = vadd.xlane.f32.xlu1 %v4335_v53  ;;  %v689_v54 = vmul.f32 %v4335_v53, %v4335_v53 }
  0xe8   : > { %713 = vadd.xlane.f32.xlu0 %v689_v54 }
  0xeb   : > { %v606_v56 = vpop.f32.mrf.mxu0 }
  0xec   : > { %v4341_v57 = vadd.f32 %v4284_v25, %v606_v56 }
  0xee   : > { %644 = vadd.xlane.f32.xlu2 %v4341_v57  ;;  %v690_v59 = vmul.f32 %v4341_v57, %v4341_v57 }
  0xf0   : > { %648 = vadd.xlane.f32.xlu0 %v4344_v58  ;;  %715 = vadd.xlane.f32.xlu1 %v690_v59 }
  0xf6   : > { %646 = vadd.xlane.f32.xlu2 %v4350_v60 }
  0xf8   : > { %650 = vadd.xlane.f32.xlu0 %v4354_v62  ;;  %717 = vadd.xlane.f32.xlu1 %v691_v63 }
  0xfe   : > { %719 = vadd.xlane.f32.xlu2 %v692_v2 }
 0x100   : > { %652 = vadd.xlane.f32.xlu1 %v4361_v0  ;;  %723 = vadd.xlane.f32.xlu0 %v694_v3 }
 0x106   : > { %721 = vadd.xlane.f32.xlu2 %v693_v6 }
 0x108   : > { %654 = vadd.xlane.f32.xlu1 %v4369_v5  ;;  %725 = vadd.xlane.f32.xlu0 %v695_v8 }
 0x10e   : > { %656 = vadd.xlane.f32.xlu2 %v4377_v11 }
 0x110   : > { %727 = vadd.xlane.f32.xlu1 %v696_v14 }
 0x119   : > { %v627_v22 = vpop.xlane.xlu0 %626 }
 0x11a   : > { %v4400_v23 = vmul.f32 %v4394_v20, %v627_v22 }
 0x11b   : > { %v698_v24 = vpop.xlane.xlu1 %697 }
 0x11c   : > { %v745_v25 = vmul.f32 %v4400_v23, %v4400_v23  ;;  %v729_v26 = vmul.f32 %v698_v24, %v4394_v20  ;;  %v793_v16 = vsub.f32 %v4287_v27, %v4400_v23  ;;  %v4437_v24 = vld [vmem:[%s6069_s3] ss:$0 sm:$0xff] }
 0x11e   : > { %v761_v29 = vsub.f32 %v729_v26, %v745_v25 }
 0x120   : > { %v777_v31 = vmax.f32 %v761_v29, 0.0 }
 0x121   : > { %v629_v34 = vpop.xlane.xlu0 %628 }
 0x122   : > { %v809_v35 = vadd.f32 1e-05, %v777_v31  ;;  %v4412_v37 = vmul.f32 %v4394_v20, %v629_v34 }
 0x123   : > { %v700_v38 = vpop.xlane.xlu1 %699 }
 0x124   : > { %3846 = vrsqrt.f32 %v809_v35  ;;  %v746_v40 = vmul.f32 %v4412_v37, %v4412_v37  ;;  %v730_v43 = vmul.f32 %v700_v38, %v4394_v20  ;;  %vm831_vm3 = vweird.f32 %v809_v35 }
 0x126   : > { %v762_v44 = vsub.f32 %v730_v43, %v746_v40 }
 0x128   : > { %v778_v45 = vmax.f32 %v762_v44, 0.0 }
 0x129   : > { %v631_v47 = vpop.xlane.xlu2 %630 }
 0x12a   : > { %v3847_v48 = vpop.eup %3846  ;;  %v4421_v50 = vmul.f32 %v4394_v20, %v631_v47  ;;  %v810_v52 = vadd.f32 1e-05, %v778_v45 }
 0x12b   : > { %v826_v51 = vmul.f32 %v3847_v48, %v809_v35  ;;  %v702_v54 = vpop.xlane.xlu0 %701  ;;  %vm832_vm2 = vweird.f32 %v3847_v48  ;;  %v794_v35 = vsub.f32 %v4293_v30, %v4412_v37 }
 0x12c   : > { %v747_v55 = vmul.f32 %v4421_v50, %v4421_v50  ;;  %v731_v56 = vmul.f32 %v702_v54, %v4394_v20  ;;  %3848 = vrsqrt.f32 %v810_v52  ;;  %vm833_vm4 = vmor %vm831_vm3, %vm832_vm2  ;;  %vm841_vm6 = vweird.f32 %v810_v52 }
 0x12d   : > { %v827_v59 = vmul.f32 %v3847_v48, %v826_v51 }
 0x12e   : > { %v763_v61 = vsub.f32 %v731_v56, %v747_v55 }
 0x12f   : > { %v828_v63 = vmul.f32 0.5, %v827_v59 }
 0x130   : > { %v779_v1 = vmax.f32 %v763_v61, 0.0 }
 0x131   : > { %v829_v2 = vsub.f32 1.5, %v828_v63  ;;  %v633_v3 = vpop.xlane.xlu2 %632 }
 0x132   : > { %v811_v4 = vadd.f32 1e-05, %v779_v1  ;;  %v4427_v6 = vmul.f32 %v4394_v20, %v633_v3  ;;  %v3849_v7 = vpop.eup %3848 }
 0x133   : > { %v704_v8 = vpop.xlane.xlu1 %703  ;;  %v830_v9 = vmul.f32 %v3847_v48, %v829_v2  ;;  %v836_v10 = vmul.f32 %v3849_v7, %v810_v52  ;;  %vm842_vm5 = vweird.f32 %v3849_v7 }
 0x134   : > { %3850 = vrsqrt.f32 %v811_v4  ;;  %v748_v12 = vmul.f32 %v4427_v6, %v4427_v6  ;;  %v732_v13 = vmul.f32 %v704_v8, %v4394_v20  ;;  %vm843_vm7 = vmor %vm841_vm6, %vm842_vm5  ;;  %vm851_vm9 = vweird.f32 %v811_v4 }
 0x135   : > { %v837_v14 = vmul.f32 %v3849_v7, %v836_v10  ;;  %v834_v15 = vsel %vm833_vm4, %v3847_v48, %v830_v9 }
 0x136   : > { %v764_v17 = vsub.f32 %v732_v13, %v748_v12  ;;  %v985_v22 = vmul.f32 %v834_v15, %v793_v16  ;;  %v795_v12 = vsub.f32 %v4299_v33, %v4421_v50 }
 0x137   : > { %v838_v18 = vmul.f32 0.5, %v837_v14 }
 0x138   : > { %v780_v19 = vmax.f32 %v764_v17, 0.0  ;;  %v1004_v40 = vmul.f32 %v4437_v24, %v985_v22 }
 0x139   : > { %v635_v21 = vpop.xlane.xlu2 %634  ;;  %v839_v26 = vsub.f32 1.5, %v838_v18 }
 0x13a   : > { %v3851_v25 = vpop.eup %3850  ;;  %v4440_v28 = vmul.f32 %v4394_v20, %v635_v21  ;;  %v812_v31 = vadd.f32 1e-05, %v780_v19  ;;  %v4455_v30 = vadd.f32 %v4451_v41, %v1004_v40 }
 0x13b   : > { %v846_v29 = vmul.f32 %v3851_v25, %v811_v4  ;;  %v706_v32 = vpop.xlane.xlu1 %705  ;;  %v840_v34 = vmul.f32 %v3849_v7, %v839_v26  ;;  %vm852_vm8 = vweird.f32 %v3851_v25 }
 0x13c   : > { %v749_v27 = vmul.f32 %v4440_v28, %v4440_v28  ;;  %v733_v23 = vmul.f32 %v706_v32, %v4394_v20  ;;  %3852 = vrsqrt.f32 %v812_v31  ;;  %vm853_vm10 = vmor %vm851_vm9, %vm852_vm8  ;;  %vm861_vm12 = vweird.f32 %v812_v31 }
 0x13d   : > { %v847_v38 = vmul.f32 %v3851_v25, %v846_v29  ;;  %v844_v44 = vsel %vm843_vm7, %v3849_v7, %v840_v34  ;;  %v1039_v7 = vmax.f32 %v4455_v30, 0.0  ;;  %v796_v32 = vsub.f32 %v4305_v36, %v4427_v6 }
 0x13e   : > { %v765_v43 = vsub.f32 %v733_v23, %v749_v27  ;;  %v986_v47 = vmul.f32 %v844_v44, %v794_v35 }
 0x13f   : > { %v848_v45 = vmul.f32 0.5, %v847_v38 }
 0x140   : > { %v781_v48 = vmax.f32 %v765_v43, 0.0  ;;  %v1005_v54 = vmul.f32 %v4437_v24, %v986_v47 }
 0x141   : > { %v849_v51 = vsub.f32 1.5, %v848_v45  ;;  %v637_v52 = vpop.xlane.xlu0 %636 }
 0x142   : > { %v4457_v37 = vadd.f32 1e-05, %v781_v48  ;;  %v4460_v55 = vmul.f32 %v4394_v20, %v637_v52  ;;  %v3853_v56 = vpop.eup %3852  ;;  %v4463_v61 = vadd.f32 %v4451_v41, %v1005_v54 }
 0x143   : > { %v708_v59 = vpop.xlane.xlu2 %707  ;;  %v850_v63 = vmul.f32 %v3851_v25, %v849_v51  ;;  %v856_v1 = vmul.f32 %v3853_v56, %v812_v31  ;;  %vm862_vm11 = vweird.f32 %v3853_v56 }
 0x144   : > { %3854 = vrsqrt.f32 %v4457_v37  ;;  %v750_v2 = vmul.f32 %v4460_v55, %v4460_v55  ;;  %v734_v3 = vmul.f32 %v708_v59, %v4394_v20  ;;  %v1040_v8 = vmax.f32 %v4463_v61, 0.0  ;;  %vm863_vm13 = vmor %vm861_vm12, %vm862_vm11 }
 0x145   : > { %v857_v9 = vmul.f32 %v3853_v56, %v856_v1  ;;  %v854_v10 = vsel %vm853_vm10, %v3851_v25, %v850_v63  ;;  %vm871_vm15 = vweird.f32 %v4457_v37 }
 0x146   : > { %v766_v13 = vsub.f32 %v734_v3, %v750_v2  ;;  %v1055_v4 = vpack.c.bf16 %v1040_v8, %v1039_v7  ;;  %v987_v17 = vmul.f32 %v854_v10, %v795_v12  ;;  %v797_v12 = vsub.f32 %v4311_v39, %v4440_v28 }
 0x147   : > { %v858_v14 = vmul.f32 0.5, %v857_v9 }
 0x148   : > { %v782_v15 = vmax.f32 %v766_v13, 0.0  ;;  %1139 = vmatmul.bf16.vlgmr.msra.gmra.mxu1 %v1055_v4  ;;  %v1006_v23 = vmul.f32 %v4437_v24, %v987_v17 }
 0x149   : > { %v639_v16 = vpop.xlane.xlu0 %638  ;;  %v859_v19 = vsub.f32 1.5, %v858_v14 }
 0x14a   : > { %v3855_v18 = vpop.eup %3854  ;;  %v4478_v21 = vmul.f32 %v4394_v20, %v639_v16  ;;  %v814_v33 = vadd.f32 1e-05, %v782_v15  ;;  %v4489_v47 = vadd.f32 %v4451_v41, %v1006_v23 }
 0x14b   : > { %v866_v22 = vmul.f32 %v3855_v18, %v4457_v37  ;;  %v710_v50 = vpop.xlane.xlu2 %709  ;;  %v860_v29 = vmul.f32 %v3853_v56, %v859_v19  ;;  %vm872_vm14 = vweird.f32 %v3855_v18 }
 0x14c   : > { %v751_v25 = vmul.f32 %v4478_v21, %v4478_v21  ;;  %v735_v26 = vmul.f32 %v710_v50, %v4394_v20  ;;  %3856 = vrsqrt.f32 %v814_v33  ;;  %v1041_v1 = vmax.f32 %v4489_v47, 0.0  ;;  %vm873_vm0 = vmor %vm871_vm15, %vm872_vm14 }
 0x14d   : > { %v867_v27 = vmul.f32 %v3855_v18, %v866_v22  ;;  %v864_v35 = vsel %vm863_vm13, %v3853_v56, %v860_v29  ;;  %vm881_vm2 = vweird.f32 %v814_v33 }
 0x14e   : > { %v767_v34 = vsub.f32 %v735_v26, %v751_v25  ;;  %v988_v40 = vmul.f32 %v864_v35, %v796_v32  ;;  %v798_v26 = vsub.f32 %v4317_v42, %v4460_v55 }
 0x14f   : > { %v868_v38 = vmul.f32 0.5, %v867_v27 }
 0x150   : > { %v783_v43 = vmax.f32 %v767_v34, 0.0  ;;  %v1007_v45 = vmul.f32 %v4437_v24, %v988_v40 }
 0x151   : > { %v869_v31 = vsub.f32 1.5, %v868_v38  ;;  %v641_v44 = vpop.xlane.xlu1 %640 }
 0x152   : > { %v815_v48 = vadd.f32 1e-05, %v783_v43  ;;  %v4492_v36 = vmul.f32 %v4394_v20, %v641_v44  ;;  %v3857_v6 = vpop.eup %3856  ;;  %v4495_v52 = vadd.f32 %v4451_v41, %v1007_v45 }
 0x153   : > { %v712_v51 = vpop.xlane.xlu0 %711  ;;  %v870_v54 = vmul.f32 %v3855_v18, %v869_v31  ;;  %v876_v56 = vmul.f32 %v3857_v6, %v814_v33  ;;  %vm882_vm1 = vweird.f32 %v3857_v6 }
 0x154   : > { %3858 = vrsqrt.f32 %v815_v48  ;;  %v752_v59 = vmul.f32 %v4492_v36, %v4492_v36  ;;  %v736_v63 = vmul.f32 %v712_v51, %v4394_v20  ;;  %v1042_v2 = vmax.f32 %v4495_v52, 0.0  ;;  %vm883_vm3 = vmor %vm881_vm2, %vm882_vm1 }
 0x155   : > { %v877_v3 = vmul.f32 %v3857_v6, %v876_v56  ;;  %v874_v37 = vsel %vm873_vm0, %v3855_v18, %v870_v54  ;;  %vm891_vm5 = vweird.f32 %v815_v48 }
 0x156   : > { %v768_v9 = vsub.f32 %v736_v63, %v752_v59  ;;  %v1056_v10 = vpack.c.bf16 %v1042_v2, %v1041_v1  ;;  %v989_v19 = vmul.f32 %v874_v37, %v797_v12  ;;  %v799_v59 = vsub.f32 %v4323_v46, %v4478_v21 }
 0x157   : > { %v878_v13 = vmul.f32 0.5, %v877_v3 }
 0x158   : > { %v784_v4 = vmax.f32 %v768_v9, 0.0  ;;  %1144 = vmatmul.bf16.gmra.mxu1 %v1056_v10  ;;  %v1008_v23 = vmul.f32 %v4437_v24, %v989_v19 }
 0x159   : > { %v643_v14 = vpop.xlane.xlu1 %642  ;;  %v879_v16 = vsub.f32 1.5, %v878_v13 }
 0x15a   : > { %v3859_v15 = vpop.eup %3858  ;;  %v4510_v17 = vmul.f32 %v4394_v20, %v643_v14  ;;  %v816_v50 = vadd.f32 1e-05, %v784_v4  ;;  %v4525_v42 = vadd.f32 %v4451_v41, %v1008_v23 }
 0x15b   : > { %v886_v22 = vmul.f32 %v3859_v15, %v815_v48  ;;  %v714_v25 = vpop.xlane.xlu0 %713  ;;  %v880_v28 = vmul.f32 %v3857_v6, %v879_v16  ;;  %vm892_vm4 = vweird.f32 %v3859_v15 }
 0x15c   : > { %v753_v18 = vmul.f32 %v4510_v17, %v4510_v17  ;;  %v737_v39 = vmul.f32 %v714_v25, %v4394_v20  ;;  %3860 = vrsqrt.f32 %v816_v50  ;;  %vm893_vm6 = vmor %vm891_vm5, %vm892_vm4  ;;  %v6097_v10 = vmax.f32 %v4525_v42, 0.0 }
 0x15d   : > { %v887_v29 = vmul.f32 %v3859_v15, %v886_v22  ;;  %v884_v27 = vsel %vm883_vm3, %v3857_v6, %v880_v28  ;;  %vm901_vm8 = vweird.f32 %v816_v50 }
 0x15e   : > { %v769_v32 = vsub.f32 %v737_v39, %v753_v18  ;;  %v990_v35 = vmul.f32 %v884_v27, %v798_v26 }
 0x15f   : > { %v888_v34 = vmul.f32 0.5, %v887_v29 }
 0x160   : > { %v785_v38 = vmax.f32 %v769_v32, 0.0  ;;  %v1009_v43 = vmul.f32 %v4437_v24, %v990_v35  ;;  %v800_v32 = vsub.f32 %v4329_v49, %v4492_v36 }
 0x161   : > { %v889_v33 = vsub.f32 1.5, %v888_v34  ;;  %v645_v40 = vpop.xlane.xlu2 %644 }
 0x162   : > { %v4519_v31 = vadd.f32 1e-05, %v785_v38  ;;  %v4522_v44 = vmul.f32 %v4394_v20, %v645_v40  ;;  %v3861_v55 = vpop.eup %3860  ;;  %v4528_v54 = vadd.f32 %v4451_v41, %v1009_v43 }
 0x163   : > { %v890_v45 = vmul.f32 %v3859_v15, %v889_v33  ;;  %v649_v6 = vpop.xlane.xlu0 %648  ;;  %v716_v51 = vpop.xlane.xlu1 %715  ;;  %v896_v56 = vmul.f32 %v3861_v55, %v816_v50  ;;  %vm902_vm7 = vweird.f32 %v3861_v55 }
 0x164   : > { %3862 = vrsqrt.f32 %v4519_v31  ;;  %v754_v63 = vmul.f32 %v4522_v44, %v4522_v44  ;;  %v738_v3 = vmul.f32 %v716_v51, %v4394_v20  ;;  %v6096_v37 = vmax.f32 %v4528_v54, 0.0  ;;  %vm903_vm9 = vmor %vm901_vm8, %vm902_vm7 }
 0x165   : > { %v897_v9 = vmul.f32 %v3861_v55, %v896_v56  ;;  %v894_v12 = vsel %vm893_vm6, %v3859_v15, %v890_v45  ;;  %v4560_v50 = vmul.f32 %v4394_v20, %v649_v6  ;;  %vm911_vm11 = vweird.f32 %v4519_v31 }
 0x166   : > { %v770_v13 = vsub.f32 %v738_v3, %v754_v63  ;;  %v1057_v4 = vpack.c.bf16 %v6096_v37, %v6097_v10  ;;  %v991_v46 = vmul.f32 %v894_v12, %v799_v59 }
 0x167   : > { %v898_v48 = vmul.f32 0.5, %v897_v9  ;;  %v756_v51 = vmul.f32 %v4560_v50, %v4560_v50 }
 0x168   : > { %v786_v21 = vmax.f32 %v770_v13, 0.0  ;;  %1149 = vmatmul.bf16.vlgmr.msra.gmra.mxu2 %v1057_v4  ;;  %v1010_v29 = vmul.f32 %v4437_v24, %v991_v46 }
 0x169   : > { %v647_v14 = vpop.xlane.xlu2 %646  ;;  %v899_v19 = vsub.f32 1.5, %v898_v48 }
 0x16a   : > { %v4542_v16 = vpop.eup %3862  ;;  %v4545_v22 = vmul.f32 %v4394_v20, %v647_v14  ;;  %v4549_v25 = vadd.f32 1e-05, %v786_v21  ;;  %v4563_v40 = vadd.f32 %v4451_v41, %v1010_v29 }
 0x16b   : > { %v906_v15 = vmul.f32 %v4542_v16, %v4519_v31  ;;  %v651_v18 = vpop.xlane.xlu0 %650  ;;  %v718_v39 = vpop.xlane.xlu1 %717  ;;  %v900_v28 = vmul.f32 %v3861_v55, %v899_v19  ;;  %vm912_vm10 = vweird.f32 %v4542_v16  ;;  %v801_v31 = vsub.f32 %v4335_v53, %v4510_v17 }
 0x16c   : > { %v755_v26 = vmul.f32 %v4545_v22, %v4545_v22  ;;  %3864 = vrsqrt.f32 %v4549_v25  ;;  %v739_v23 = vmul.f32 %v718_v39, %v4394_v20  ;;  %v6095_v48 = vmax.f32 %v4563_v40, 0.0  ;;  %vm4596_vm12 = vmor %vm911_vm11, %vm912_vm10 }
 0x16d   : > { %v907_v27 = vmul.f32 %v4542_v16, %v906_v15  ;;  %v904_v34 = vsel %vm903_vm9, %v3861_v55, %v900_v28  ;;  %v4588_v39 = vmul.f32 %v4394_v20, %v651_v18  ;;  %vm921_vm14 = vweird.f32 %v4549_v25 }
 0x16e   : > { %v771_v38 = vsub.f32 %v739_v23, %v755_v26  ;;  %v992_v33 = vmul.f32 %v904_v34, %v800_v32 }
 0x16f   : > { %v908_v35 = vmul.f32 0.5, %v907_v27  ;;  %v757_v18 = vmul.f32 %v4588_v39, %v4588_v39 }
 0x170   : > { %v787_v45 = vmax.f32 %v771_v38, 0.0  ;;  %v1011_v36 = vmul.f32 %v4437_v24, %v992_v33 }
 0x171   : > { %v909_v43 = vsub.f32 1.5, %v908_v35  ;;  %v720_v49 = vpop.xlane.xlu2 %719 }
 0x172   : > { %v740_v56 = vmul.f32 %v720_v49, %v4394_v20  ;;  %v3865_v55 = vpop.eup %3864  ;;  %v4570_v59 = vadd.f32 1e-05, %v787_v45  ;;  %v4573_v3 = vadd.f32 %v4451_v41, %v1011_v36 }
 0x173   : > { %v653_v6 = vpop.xlane.xlu1 %652  ;;  %v724_v63 = vpop.xlane.xlu0 %723  ;;  %v916_v9 = vmul.f32 %v3865_v55, %v4549_v25  ;;  %v910_v4 = vmul.f32 %v4542_v16, %v909_v43  ;;  %vm922_vm13 = vweird.f32 %v3865_v55 }
 0x174   : > { %v772_v12 = vsub.f32 %v740_v56, %v756_v51  ;;  %v4577_v13 = vmul.f32 %v4394_v20, %v653_v6  ;;  %3866 = vrsqrt.f32 %v4570_v59  ;;  %v742_v46 = vmul.f32 %v724_v63, %v4394_v20  ;;  %vm923_vm15 = vmor %vm921_vm14, %vm922_vm13 }
 0x175   : > { %v6094_v21 = vmax.f32 %v4573_v3, 0.0  ;;  %v917_v14 = vmul.f32 %v3865_v55, %v916_v9  ;;  %v914_v34 = vsel %vm4596_vm12, %v4542_v16, %v910_v4  ;;  %v802_v51 = vsub.f32 %v4341_v57, %v4522_v44 }
 0x176   : > { %v788_v19 = vmax.f32 %v772_v12, 0.0  ;;  %v758_v15 = vmul.f32 %v4577_v13, %v4577_v13  ;;  %v993_v16 = vmul.f32 %v914_v34, %v801_v31  ;;  %vm931_vm1 = vweird.f32 %v4570_v59 }
 0x177   : > { %v1058_v28 = vpack.c.bf16 %v6094_v21, %v6095_v48  ;;  %v918_v29 = vmul.f32 0.5, %v917_v14 }
 0x178   : > { %v4600_v32 = vadd.f32 1e-05, %v788_v19  ;;  %v774_v27 = vsub.f32 %v742_v46, %v758_v15  ;;  %v1012_v57 = vmul.f32 %v4437_v24, %v993_v16 }
 0x179   : > { %v722_v23 = vpop.xlane.xlu2 %721  ;;  %v919_v35 = vsub.f32 1.5, %v918_v29  ;;  %1154 = vmatmul.bf16.gmra.mxu2 %v1058_v28 }
 0x17a   : > { %3868 = vrsqrt.f32 %v4600_v32  ;;  %v790_v38 = vmax.f32 %v774_v27, 0.0  ;;  %v4610_v33 = vpop.eup %3866  ;;  %v741_v53 = vmul.f32 %v722_v23, %v4394_v20  ;;  %vm941_vm4 = vweird.f32 %v4600_v32 }
 0x17b   : > { %v655_v17 = vpop.xlane.xlu1 %654  ;;  %v726_v43 = vpop.xlane.xlu0 %725  ;;  %v920_v45 = vmul.f32 %v3865_v55, %v919_v35  ;;  %v926_v49 = vmul.f32 %v4610_v33, %v4570_v59  ;;  %vm932_vm0 = vweird.f32 %v4610_v33 }
 0x17c   : > { %v4616_v36 = vadd.f32 1e-05, %v790_v38  ;;  %v773_v56 = vsub.f32 %v741_v53, %v757_v18  ;;  %v4621_v6 = vmul.f32 %v4394_v20, %v655_v17  ;;  %v743_v25 = vmul.f32 %v726_v43, %v4394_v20  ;;  %vm4657_vm3 = vmor %vm931_vm1, %vm932_vm0 }
 0x17d   : > { %v927_v63 = vmul.f32 %v4610_v33, %v926_v49  ;;  %v924_v9 = vsel %vm923_vm15, %v3865_v55, %v920_v45  ;;  %v4642_v53 = vadd.f32 %v4451_v41, %v1012_v57 }
 0x17e   : > { %3870 = vrsqrt.f32 %v4616_v36  ;;  %v789_v12 = vmax.f32 %v773_v56, 0.0  ;;  %v759_v4 = vmul.f32 %v4621_v6, %v4621_v6  ;;  %v994_v46 = vmul.f32 %v924_v9, %v802_v51 }
 0x17f   : > { %v928_v19 = vmul.f32 0.5, %v927_v63  ;;  %v804_v63 = vsub.f32 %v4344_v58, %v4560_v50  ;;  %v6093_v59 = vmax.f32 %v4642_v53, 0.0  ;;  %v803_v50 = vsub.f32 %v4350_v60, %v4545_v22 }
 0x180   : > { %v3869_v14 = vpop.eup %3868  ;;  %v4630_v15 = vadd.f32 1e-05, %v789_v12  ;;  %v775_v28 = vsub.f32 %v743_v25, %v759_v4  ;;  %v1013_v55 = vmul.f32 %v4437_v24, %v994_v46  ;;  %vm961_vm6 = vweird.f32 %v4616_v36 }
 0x181   : > { %v936_v44 = vmul.f32 %v3869_v14, %v4600_v32  ;;  %v657_v26 = vpop.xlane.xlu2 %656  ;;  %v929_v29 = vsub.f32 1.5, %v928_v19  ;;  %vm942_vm2 = vweird.f32 %v3869_v14 }
 0x182   : > { %v4633_v27 = vmul.f32 %v4394_v20, %v657_v26  ;;  %3872 = vrsqrt.f32 %v4630_v15  ;;  %v791_v18 = vmax.f32 %v775_v28, 0.0  ;;  %v4650_v51 = vadd.f32 %v4451_v41, %v1013_v55  ;;  %vm943_vm5 = vmor %vm941_vm4, %vm942_vm2 }
 0x183   : > { %v937_v31 = vmul.f32 %v3869_v14, %v936_v44  ;;  %v728_v23 = vpop.xlane.xlu1 %727  ;;  %v930_v17 = vmul.f32 %v4610_v33, %v929_v29  ;;  %vm951_vm10 = vweird.f32 %v4630_v15 }
 0x184   : > { %v3871_v34 = vpop.eup %3870  ;;  %v760_v35 = vmul.f32 %v4633_v27, %v4633_v27  ;;  %v744_v38 = vmul.f32 %v728_v23, %v4394_v20  ;;  %v4646_v49 = vadd.f32 1e-05, %v791_v18  ;;  %v6092_v4 = vmax.f32 %v4650_v51, 0.0 }
 0x185   : > { %v938_v43 = vmul.f32 0.5, %v937_v31  ;;  %v956_v45 = vmul.f32 %v3871_v34, %v4616_v36  ;;  %v934_v58 = vsel %vm4657_vm3, %v4610_v33, %v930_v17  ;;  %vm962_vm7 = vweird.f32 %v3871_v34 }
 0x186   : > { %v776_v16 = vsub.f32 %v744_v38, %v760_v35  ;;  %3874 = vrsqrt.f32 %v4646_v49  ;;  %v1059_v26 = vpack.c.bf16 %v6092_v4, %v6093_v59  ;;  %v995_v33 = vmul.f32 %v934_v58, %v803_v50  ;;  %vm963_vm8 = vmor %vm961_vm6, %vm962_vm7 }
 0x187   : > { %v939_v56 = vsub.f32 1.5, %v938_v43  ;;  %v957_v25 = vmul.f32 %v3871_v34, %v956_v45  ;;  %v806_v18 = vsub.f32 %v4361_v0, %v4577_v13  ;;  %v805_v13 = vsub.f32 %v4354_v62, %v4588_v39 }
 0x188   : > { %v792_v12 = vmax.f32 %v776_v16, 0.0  ;;  %v3873_v46 = vpop.eup %3872  ;;  %v1014_v43 = vmul.f32 %v4437_v24, %v995_v33  ;;  %vm971_vm12 = vweird.f32 %v4646_v49 }
 0x189   : > { %v940_v19 = vmul.f32 %v3869_v14, %v939_v56  ;;  %v958_v57 = vmul.f32 0.5, %v957_v25  ;;  %v946_v44 = vmul.f32 %v3873_v46, %v4630_v15  ;;  %1159 = vmatmul.bf16.gmra.mxu2 %v1059_v26  ;;  %vm952_vm9 = vweird.f32 %v3873_v46 }
 0x18a   : > { %v824_v28 = vadd.f32 1e-05, %v792_v12  ;;  %vm953_vm11 = vmor %vm951_vm10, %vm952_vm9 }
 0x18b   : > { %v959_v29 = vsub.f32 1.5, %v958_v57  ;;  %v944_v32 = vsel %vm943_vm5, %v3869_v14, %v940_v19  ;;  %v947_v55 = vmul.f32 %v3873_v46, %v946_v44  ;;  %v4688_v19 = vadd.f32 %v4451_v41, %v1014_v43 }
 0x18c   : > { %3876 = vrsqrt.f32 %v824_v28  ;;  %v996_v31 = vmul.f32 %v944_v32, %v804_v63  ;;  %v3875_v60 = vpop.eup %3874  ;;  %vm981_vm15 = vweird.f32 %v824_v28 }
 0x18d   : > { %v960_v22 = vmul.f32 %v3871_v34, %v959_v29  ;;  %v948_v23 = vmul.f32 0.5, %v947_v55  ;;  %v966_v35 = vmul.f32 %v3875_v60, %v4646_v49  ;;  %vm972_vm13 = vweird.f32 %v3875_v60 }
 0x18e   : > { %v1015_v38 = vmul.f32 %v4437_v24, %v996_v31  ;;  %vm4697_vm14 = vmor %vm971_vm12, %vm972_vm13 }
 0x18f   : > { %v964_v17 = vsel %vm963_vm8, %v3871_v34, %v960_v22  ;;  %v949_v36 = vsub.f32 1.5, %v948_v23  ;;  %v967_v14 = vmul.f32 %v3875_v60, %v966_v35  ;;  %v808_v22 = vsub.f32 %v4377_v11, %v4633_v27 }
 0x190   : > { %v998_v45 = vmul.f32 %v964_v17, %v806_v18  ;;  %v4682_v0 = vadd.f32 %v4451_v41, %v1015_v38  ;;  %v807_v18 = vsub.f32 %v4369_v5, %v4621_v6 }
 0x191   : > { %v950_v56 = vmul.f32 %v3873_v46, %v949_v36  ;;  %v968_v25 = vmul.f32 0.5, %v967_v14 }
 0x192   : > { %v3877_v16 = vpop.eup %3876  ;;  %v1017_v34 = vmul.f32 %v4437_v24, %v998_v45  ;;  %v6090_v15 = vmax.f32 %v4682_v0, 0.0 }
 0x193   : > { %v976_v63 = vmul.f32 %v3877_v16, %v824_v28  ;;  %v954_v9 = vsel %vm953_vm11, %v3873_v46, %v950_v56  ;;  %v969_v12 = vsub.f32 1.5, %v968_v25  ;;  %v6091_v46 = vmax.f32 %v4688_v19, 0.0 }
 0x194   : > { %v997_v58 = vmul.f32 %v954_v9, %v805_v13  ;;  %v4694_v62 = vadd.f32 %v4451_v41, %v1017_v34  ;;  %vm982_vm0 = vweird.f32 %v3877_v16 }
 0x195   : > { %v977_v57 = vmul.f32 %v3877_v16, %v976_v63  ;;  %v970_v39 = vmul.f32 %v3875_v60, %v969_v12  ;;  %v1060_v32 = vpack.c.bf16 %v6090_v15, %v6091_v46  ;;  %vm983_vm1 = vmor %vm981_vm15, %vm982_vm0 }
 0x196   : > { %v1016_v44 = vmul.f32 %v4437_v24, %v997_v58  ;;  %v6088_v31 = vmax.f32 %v4694_v62, 0.0 }
 0x197   : > { %v978_v50 = vmul.f32 0.5, %v977_v57  ;;  %v974_v28 = vsel %vm4697_vm14, %v3875_v60, %v970_v39 }
 0x198   : > { %v4702_v49 = vadd.f32 %v4451_v41, %v1016_v44  ;;  %v999_v17 = vmul.f32 %v974_v28, %v807_v18 }
 0x199   : > { %v979_v29 = vsub.f32 1.5, %v978_v50  ;;  %1164 = vmatmul.bf16.gmra.mxu2 %v1060_v32 }
 0x19a   : > { %v6089_v33 = vmax.f32 %v4702_v49, 0.0  ;;  %v1018_v11 = vmul.f32 %v4437_v24, %v999_v17 }
 0x19b   : > { %v980_v55 = vmul.f32 %v3877_v16, %v979_v29 }
 0x19c   : > { %v1061_v23 = vpack.c.bf16 %v6088_v31, %v6089_v33  ;;  %v4726_v60 = vadd.f32 %v4451_v41, %v1018_v11 }
 0x19d   : > { %v984_v35 = vsel %vm983_vm1, %v3877_v16, %v980_v55 }
 0x19e   : > { %v1000_v38 = vmul.f32 %v984_v35, %v808_v22  ;;  %1169 = vmatmul.bf16.vlgmr.msrb.gmra.mxu3 %v1061_v23  ;;  %v6087_v6 = vmax.f32 %v4726_v60, 0.0 }
 0x1a0   : > { %v1019_v36 = vmul.f32 %v4437_v24, %v1000_v38  ;;  %v4737_v24 = vld [vmem:[%s6072_s6] ss:$0 sm:$0xff] }
 0x1a2   : > { %v4723_v27 = vadd.f32 %v4451_v41, %v1019_v36  ;;  %v3730_v36 = vld [vmem:[%s6075_s9 + $0x38] sm:$0xff] }
 0x1a3   : > { %1680 = vmatpush.bf16.msrb.mxu2 %v3730_v36 }
 0x1a4   : > { %v6086_v5 = vmax.f32 %v4723_v27, 0.0 }
 0x1a6   : > { %v1062_v14 = vpack.c.bf16 %v6086_v5, %v6087_v6 }
 0x1ae   : > { %1174 = vmatmul.bf16.gmra.mxu3 %v1062_v14 }
 0x1c5   : > { %v1140_v43 = vpop.f32.mrf.mxu1 }
 0x1c6   : > { %v4740_v45 = vadd.f32 %v4737_v24, %v1140_v43 }
 0x1c8   : > { %1182 = vadd.xlane.f32.xlu2 %v4740_v45  ;;  %v1230_v41 = vmul.f32 %v4740_v45, %v4740_v45 }
 0x1ca   : > { %1246 = vadd.xlane.f32.xlu1 %v1230_v41  ;;  %v3729_v41 = vld [vmem:[%s6075_s9 + $0x30] sm:$0xff] }
 0x1cb   : > { %1681 = vmatpush.bf16.msrb.mxu2 %v3729_v41 }
 0x1cd   : > { %v1142_v16 = vpop.f32.mrf.mxu1 }
 0x1ce   : > { %v4746_v56 = vadd.f32 %v4737_v24, %v1142_v16 }
 0x1d0   : > { %1184 = vadd.xlane.f32.xlu0 %v4746_v56  ;;  %v1231_v25 = vmul.f32 %v4746_v56, %v4746_v56 }
 0x1d2   : > { %1248 = vadd.xlane.f32.xlu2 %v1231_v25 }
 0x1d5   : > { %v1145_v13 = vpop.f32.mrf.mxu1 }
 0x1d6   : > { %v4752_v63 = vadd.f32 %v4737_v24, %v1145_v13 }
 0x1d8   : > { %1186 = vadd.xlane.f32.xlu0 %v4752_v63  ;;  %v1232_v34 = vmul.f32 %v4752_v63, %v4752_v63 }
 0x1da   : > { %1250 = vadd.xlane.f32.xlu2 %v1232_v34 }
 0x1dd   : > { %v1147_v9 = vpop.f32.mrf.mxu1 }
 0x1de   : > { %v4758_v12 = vadd.f32 %v4737_v24, %v1147_v9 }
 0x1e0   : > { %1188 = vadd.xlane.f32.xlu1 %v4758_v12  ;;  %v1233_v57 = vmul.f32 %v4758_v12, %v4758_v12 }
 0x1e2   : > { %1252 = vadd.xlane.f32.xlu0 %v1233_v57 }
 0x1eb   : > { %v1150_v58 = vpop.f32.mrf.mxu2 }
 0x1ec   : > { %v4764_v50 = vadd.f32 %v4737_v24, %v1150_v58 }
 0x1ee   : > { %1190 = vadd.xlane.f32.xlu1 %v4764_v50  ;;  %v1234_v44 = vmul.f32 %v4764_v50, %v4764_v50 }
 0x1f0   : > { %1254 = vadd.xlane.f32.xlu0 %v1234_v44 }
 0x1f3   : > { %v1152_v39 = vpop.f32.mrf.mxu2 }
 0x1f4   : > { %v4770_v26 = vadd.f32 %v4737_v24, %v1152_v39 }
 0x1f6   : > { %1192 = vadd.xlane.f32.xlu2 %v4770_v26  ;;  %v1235_v29 = vmul.f32 %v4770_v26, %v4770_v26 }
 0x1f8   : > { %1256 = vadd.xlane.f32.xlu1 %v1235_v29 }
 0x1fc   : > { %v1155_v32 = vpop.f32.mrf.mxu2 }
 0x1fd   : > { %v4776_v55 = vadd.f32 %v4737_v24, %v1155_v32 }
 0x1ff   : > { %1194 = vadd.xlane.f32.xlu2 %v4776_v55  ;;  %v1236_v22 = vmul.f32 %v4776_v55, %v4776_v55 }
 0x201   : > { %1258 = vadd.xlane.f32.xlu1 %v1236_v22 }
 0x204   : > { %v1157_v28 = vpop.f32.mrf.mxu2 }
 0x205   : > { %v4782_v18 = vadd.f32 %v4737_v24, %v1157_v28 }
 0x207   : > { %1196 = vadd.xlane.f32.xlu0 %v4782_v18  ;;  %v1237_v23 = vmul.f32 %v4782_v18, %v4782_v18 }
 0x209   : > { %1260 = vadd.xlane.f32.xlu2 %v1237_v23  ;;  %v3728_v23 = vld [vmem:[%s6075_s9 + $0x28] sm:$0xff] }
 0x20a   : > { %1682 = vmatpush.bf16.msrb.mxu2 %v3728_v23 }
 0x20c   : > { %v1160_v35 = vpop.f32.mrf.mxu2 }
 0x20d   : > { %v4788_v38 = vadd.f32 %v4737_v24, %v1160_v35 }
 0x20f   : > { %1198 = vadd.xlane.f32.xlu0 %v4788_v38  ;;  %v1238_v17 = vmul.f32 %v4788_v38, %v4788_v38 }
 0x211   : > { %1262 = vadd.xlane.f32.xlu2 %v1238_v17  ;;  %v3727_v17 = vld [vmem:[%s6075_s9 + $0x20] sm:$0xff] }
 0x212   : > { %1683 = vmatpush.bf16.msrb.mxu2 %v3727_v17 }
 0x214   : > { %v1162_v11 = vpop.f32.mrf.mxu2 }
 0x215   : > { %v4797_v14 = vadd.f32 %v4737_v24, %v1162_v11 }
 0x217   : > { %1200 = vadd.xlane.f32.xlu1 %v4797_v14  ;;  %v1239_v43 = vmul.f32 %v4797_v14, %v4797_v14 }
 0x219   : > { %1264 = vadd.xlane.f32.xlu0 %v1239_v43 }
 0x21c   : > { %v1165_v16 = vpop.f32.mrf.mxu2 }
 0x21d   : > { %v4806_v25 = vadd.f32 %v4737_v24, %v1165_v16 }
 0x21f   : > { %1202 = vadd.xlane.f32.xlu1 %v4806_v25  ;;  %v1240_v13 = vmul.f32 %v4806_v25, %v4806_v25 }
 0x221   : > { %v1170_v34 = vpop.f32.mrf.mxu3  ;;  %1266 = vadd.xlane.f32.xlu0 %v1240_v13  ;;  %v3726_v13 = vld [vmem:[%s6075_s9 + $0x18] sm:$0xff] }
 0x222   : > { %v4822_v29 = vadd.f32 %v4737_v24, %v1170_v34  ;;  %1684 = vmatpush.bf16.msrb.mxu2 %v3726_v13 }
 0x224   : > { %v1167_v9 = vpop.f32.mrf.mxu2  ;;  %v1242_v32 = vmul.f32 %v4822_v29, %v4822_v29 }
 0x225   : > { %v4812_v57 = vadd.f32 %v4737_v24, %v1167_v9 }
 0x227   : > { %1204 = vadd.xlane.f32.xlu2 %v4812_v57  ;;  %v1241_v58 = vmul.f32 %v4812_v57, %v4812_v57 }
 0x229   : > { %v1172_v44 = vpop.f32.mrf.mxu3  ;;  %1268 = vadd.xlane.f32.xlu1 %v1241_v58 }
 0x22a   : > { %v4818_v39 = vadd.f32 %v4737_v24, %v1172_v44 }
 0x22c   : > { %1208 = vadd.xlane.f32.xlu0 %v4818_v39  ;;  %v1243_v35 = vmul.f32 %v4818_v39, %v4818_v39 }
 0x22f   : > { %1206 = vadd.xlane.f32.xlu2 %v4822_v29 }
 0x231   : > { %v1175_v22 = vpop.f32.mrf.mxu3  ;;  %1270 = vadd.xlane.f32.xlu1 %v1242_v32  ;;  %v3725_v32 = vld [vmem:[%s6075_s9 + $0x10] sm:$0xff] }
 0x232   : > { %v4828_v28 = vadd.f32 %v4737_v24, %v1175_v22  ;;  %1685 = vmatpush.bf16.msrb.mxu2 %v3725_v32 }
 0x234   : > { %1210 = vadd.xlane.f32.xlu0 %v4828_v28  ;;  %v1244_v58 = vmul.f32 %v4828_v28, %v4828_v28 }
 0x237   : > { %1272 = vadd.xlane.f32.xlu2 %v1243_v35 }
 0x239   : > { %v1177_v36 = vpop.f32.mrf.mxu3 }
 0x23a   : > { %v4840_v11 = vadd.f32 %v4737_v24, %v1177_v36  ;;  %v3724_v36 = vld [vmem:[%s6075_s9 + $0x8] sm:$0xff] }
 0x23b   : > { %v1183_v43 = vpop.xlane.xlu2 %1182  ;;  %1686 = vmatpush.bf16.msrb.mxu2 %v3724_v36 }
 0x23c   : > { %v4843_v41 = vmul.f32 %v1183_v43, %v4394_v20  ;;  %1212 = vadd.xlane.f32.xlu1 %v4840_v11  ;;  %v1245_v16 = vmul.f32 %v4840_v11, %v4840_v11 }
 0x23d   : > { %v1247_v34 = vpop.xlane.xlu1 %1246 }
 0x23e   : > { %v1294_v9 = vmul.f32 %v4843_v41, %v4843_v41  ;;  %v1278_v24 = vmul.f32 %v1247_v34, %v4394_v20  ;;  %1276 = vadd.xlane.f32.xlu0 %v1245_v16  ;;  %v3723_v34 = vld [vmem:[%s6075_s9] sm:$0xff] }
 0x23f   : > { %1274 = vadd.xlane.f32.xlu2 %v1244_v58  ;;  %1687 = vmatpush.bf16.msrb.mxu2 %v3723_v34 }
 0x240   : > { %v1310_v44 = vsub.f32 %v1278_v24, %v1294_v9 }
 0x242   : > { %v1326_v22 = vmax.f32 %v1310_v44, 0.0 }
 0x243   : > { %v1185_v23 = vpop.xlane.xlu0 %1184 }
 0x244   : > { %v1358_v35 = vadd.f32 1e-05, %v1326_v22  ;;  %v1215_v17 = vmul.f32 %v1185_v23, %v4394_v20 }
 0x245   : > { %v1249_v43 = vpop.xlane.xlu2 %1248 }
 0x246   : > { %3878 = vrsqrt.f32 %v1358_v35  ;;  %v1295_v16 = vmul.f32 %v1215_v17, %v1215_v17  ;;  %v1279_v13 = vmul.f32 %v1249_v43, %v4394_v20  ;;  %vm1380_vm3 = vweird.f32 %v1358_v35 }
 0x248   : > { %v1311_v9 = vsub.f32 %v1279_v13, %v1295_v16 }
 0x24a   : > { %v1327_v24 = vmax.f32 %v1311_v9, 0.0 }
 0x24b   : > { %v1187_v58 = vpop.xlane.xlu0 %1186 }
 0x24c   : > { %v3879_v44 = vpop.eup %3878  ;;  %v4868_v32 = vmul.f32 %v1187_v58, %v4394_v20  ;;  %v1359_v23 = vadd.f32 1e-05, %v1327_v24 }
 0x24d   : > { %v1375_v22 = vmul.f32 %v3879_v44, %v1358_v35  ;;  %v1251_v5 = vpop.xlane.xlu2 %1250  ;;  %vm1381_vm2 = vweird.f32 %v3879_v44  ;;  %v4884_v35 = vld [vmem:[%s6073_s7] ss:$0 sm:$0xff] }
 0x24e   : > { %v1296_v36 = vmul.f32 %v4868_v32, %v4868_v32  ;;  %v1280_v43 = vmul.f32 %v1251_v5, %v4394_v20  ;;  %3880 = vrsqrt.f32 %v1359_v23  ;;  %vm1382_vm4 = vmor %vm1380_vm3, %vm1381_vm2  ;;  %vm1390_vm6 = vweird.f32 %v1359_v23 }
 0x24f   : > { %v1376_v6 = vmul.f32 %v3879_v44, %v1375_v22 }
 0x250   : > { %v1312_v31 = vsub.f32 %v1280_v43, %v1296_v36  ;;  %v1342_v36 = vsub.f32 %v4740_v45, %v4843_v41 }
 0x251   : > { %v1377_v33 = vmul.f32 0.5, %v1376_v6 }
 0x252   : > { %v1328_v16 = vmax.f32 %v1312_v31, 0.0 }
 0x253   : > { %v1378_v13 = vsub.f32 1.5, %v1377_v33  ;;  %v1189_v34 = vpop.xlane.xlu1 %1188 }
 0x254   : > { %v1360_v9 = vadd.f32 1e-05, %v1328_v16  ;;  %v4874_v15 = vmul.f32 %v1189_v34, %v4394_v20  ;;  %v3881_v58 = vpop.eup %3880 }
 0x255   : > { %v1379_v46 = vmul.f32 %v3879_v44, %v1378_v13  ;;  %v1253_v24 = vpop.xlane.xlu0 %1252  ;;  %v1385_v4 = vmul.f32 %v3881_v58, %v1359_v23  ;;  %vm1391_vm5 = vweird.f32 %v3881_v58 }
 0x256   : > { %3882 = vrsqrt.f32 %v1360_v9  ;;  %v1297_v5 = vmul.f32 %v4874_v15, %v4874_v15  ;;  %v1281_v22 = vmul.f32 %v1253_v24, %v4394_v20  ;;  %vm1392_vm7 = vmor %vm1390_vm6, %vm1391_vm5  ;;  %vm1400_vm9 = vweird.f32 %v1360_v9 }
 0x257   : > { %v1386_v31 = vmul.f32 %v3881_v58, %v1385_v4  ;;  %v1383_v33 = vsel %vm1382_vm4, %v3879_v44, %v1379_v46  ;;  %v1343_v4 = vsub.f32 %v4746_v56, %v1215_v17  ;;  %v4891_v44 = vld [vmem:[%s6074_s8] ss:$0 sm:$0xff] }
 0x258   : > { %v1313_v6 = vsub.f32 %v1281_v22, %v1297_v5  ;;  %v1534_v59 = vmul.f32 %v1383_v33, %v1342_v36 }
 0x259   : > { %v1387_v43 = vmul.f32 0.5, %v1386_v31 }
 0x25a   : > { %v1329_v16 = vmax.f32 %v1313_v6, 0.0  ;;  %v1553_v41 = vmul.f32 %v4884_v35, %v1534_v59 }
 0x25b   : > { %v1388_v34 = vsub.f32 1.5, %v1387_v43 }
 0x25c   : > { %v3883_v13 = vpop.eup %3882  ;;  %v1361_v24 = vadd.f32 1e-05, %v1329_v16 }
 0x25d   : > { %v1395_v21 = vmul.f32 %v3883_v13, %v1360_v9  ;;  %v1389_v48 = vmul.f32 %v3881_v58, %v1388_v34  ;;  %vm1401_vm8 = vweird.f32 %v3883_v13 }
 0x25e   : > { %3884 = vrsqrt.f32 %v1361_v24  ;;  %vm1402_vm10 = vmor %vm1400_vm9, %vm1401_vm8  ;;  %vm1410_vm12 = vweird.f32 %v1361_v24 }
 0x25f   : > { %v1396_v46 = vmul.f32 %v3883_v13, %v1395_v21  ;;  %v1393_v45 = vsel %vm1392_vm7, %v3881_v58, %v1389_v48  ;;  %v1572_v48 = vadd.f32 %v4891_v44, %v1553_v41  ;;  %v1344_v41 = vsub.f32 %v4752_v63, %v4868_v32 }
 0x260   : > { %v1535_v22 = vmul.f32 %v1393_v45, %v1343_v4  ;;  %v1345_v32 = vsub.f32 %v4758_v12, %v4874_v15 }
 0x261   : > { %v1397_v5 = vmul.f32 0.5, %v1396_v46  ;;  %v1191_v31 = vpop.xlane.xlu1 %1190  ;;  %v1588_v4 = vmax.f32 %v1572_v48, 0.0 }
 0x262   : > { %v4894_v6 = vmul.f32 %v1191_v31, %v4394_v20  ;;  %v1554_v56 = vmul.f32 %v4884_v35, %v1535_v22 }
 0x263   : > { %v1398_v33 = vsub.f32 1.5, %v1397_v5  ;;  %v1255_v21 = vpop.xlane.xlu0 %1254 }
 0x264   : > { %v3885_v17 = vpop.eup %3884  ;;  %v1298_v23 = vmul.f32 %v4894_v6, %v4894_v6  ;;  %v1282_v58 = vmul.f32 %v1255_v21, %v4394_v20  ;;  %v1573_v43 = vadd.f32 %v4891_v44, %v1554_v56 }
 0x265   : > { %v1399_v59 = vmul.f32 %v3883_v13, %v1398_v33  ;;  %v1405_v36 = vmul.f32 %v3885_v17, %v1361_v24  ;;  %vm1411_vm11 = vweird.f32 %v3885_v17 }
 0x266   : > { %v1314_v16 = vsub.f32 %v1282_v58, %v1298_v23  ;;  %v1589_v46 = vmax.f32 %v1573_v43, 0.0  ;;  %vm1412_vm13 = vmor %vm1410_vm12, %vm1411_vm11 }
 0x267   : > { %v1406_v34 = vmul.f32 %v3885_v17, %v1405_v36  ;;  %v1403_v45 = vsel %vm1402_vm10, %v3883_v13, %v1399_v59 }
 0x268   : > { %v1330_v5 = vmax.f32 %v1314_v16, 0.0  ;;  %v1604_v33 = vpack.c.bf16 %v1589_v46, %v1588_v4  ;;  %v1536_v9 = vmul.f32 %v1403_v45, %v1344_v41 }
 0x269   : > { %v1407_v22 = vmul.f32 0.5, %v1406_v34  ;;  %v1193_v31 = vpop.xlane.xlu2 %1192 }
 0x26a   : > { %v1362_v37 = vadd.f32 1e-05, %v1330_v5  ;;  %v4905_v21 = vmul.f32 %v1193_v31, %v4394_v20  ;;  %1688 = vmatmul.bf16.vlgmr.msrb.gmra.mxu2 %v1604_v33  ;;  %v1555_v59 = vmul.f32 %v4884_v35, %v1536_v9 }
 0x26b   : > { %v1408_v10 = vsub.f32 1.5, %v1407_v22  ;;  %v1257_v56 = vpop.xlane.xlu1 %1256 }
 0x26c   : > { %3886 = vrsqrt.f32 %v1362_v37  ;;  %v1299_v13 = vmul.f32 %v4905_v21, %v4905_v21  ;;  %v1283_v63 = vmul.f32 %v1257_v56, %v4394_v20  ;;  %v1574_v24 = vadd.f32 %v4891_v44, %v1555_v59 }
 0x26d   : > { %v1409_v48 = vmul.f32 %v3885_v17, %v1408_v10  ;;  %vm1420_vm15 = vweird.f32 %v1362_v37 }
 0x26e   : > { %v1315_v23 = vsub.f32 %v1283_v63, %v1299_v13  ;;  %v1590_v31 = vmax.f32 %v1574_v24, 0.0 }
 0x26f   : > { %v1413_v58 = vsel %vm1412_vm13, %v3885_v17, %v1409_v48 }
 0x270   : > { %v1537_v36 = vmul.f32 %v1413_v58, %v1345_v32  ;;  %v1331_v43 = vmax.f32 %v1315_v23, 0.0 }
 0x272   : > { %v1195_v16 = vpop.xlane.xlu2 %1194  ;;  %v3887_v34 = vpop.eup %3886  ;;  %v1556_v10 = vmul.f32 %v4884_v35, %v1537_v36  ;;  %v1363_v45 = vadd.f32 1e-05, %v1331_v43 }
 0x273   : > { %v4914_v4 = vmul.f32 %v1195_v16, %v4394_v20  ;;  %v1415_v46 = vmul.f32 %v3887_v34, %v1362_v37  ;;  %vm1421_vm14 = vweird.f32 %v3887_v34 }
 0x274   : > { %v1259_v41 = vpop.xlane.xlu1 %1258  ;;  %v1575_v17 = vadd.f32 %v4891_v44, %v1556_v10  ;;  %3888 = vrsqrt.f32 %v1363_v45  ;;  %vm1422_vm0 = vmor %vm1420_vm15, %vm1421_vm14  ;;  %vm1430_vm2 = vweird.f32 %v1363_v45 }
 0x275   : > { %v1300_v15 = vmul.f32 %v4914_v4, %v4914_v4  ;;  %v1284_v12 = vmul.f32 %v1259_v41, %v4394_v20  ;;  %v1416_v5 = vmul.f32 %v3887_v34, %v1415_v46  ;;  %v1346_v41 = vsub.f32 %v4764_v50, %v4894_v6 }
 0x276   : > { %v1591_v33 = vmax.f32 %v1575_v17, 0.0 }
 0x277   : > { %v1316_v22 = vsub.f32 %v1284_v12, %v1300_v15  ;;  %v1417_v9 = vmul.f32 0.5, %v1416_v5 }
 0x278   : > { %v1605_v13 = vpack.c.bf16 %v1591_v33, %v1590_v31 }
 0x279   : > { %v1332_v56 = vmax.f32 %v1316_v22, 0.0  ;;  %v1418_v48 = vsub.f32 1.5, %v1417_v9 }
 0x27a   : > { %v1197_v63 = vpop.xlane.xlu0 %1196  ;;  %v3889_v23 = vpop.eup %3888  ;;  %1693 = vmatmul.bf16.gmra.mxu2 %v1605_v13 }
 0x27b   : > { %v1364_v32 = vadd.f32 1e-05, %v1332_v56  ;;  %v4923_v59 = vmul.f32 %v1197_v63, %v4394_v20  ;;  %v1419_v58 = vmul.f32 %v3887_v34, %v1418_v48  ;;  %v1425_v43 = vmul.f32 %v3889_v23, %v1363_v45 }
 0x27c   : > { %v1261_v36 = vpop.xlane.xlu2 %1260  ;;  %vm1431_vm1 = vweird.f32 %v3889_v23 }
 0x27d   : > { %3890 = vrsqrt.f32 %v1364_v32  ;;  %v1301_v16 = vmul.f32 %v4923_v59, %v4923_v59  ;;  %v1285_v10 = vmul.f32 %v1261_v36, %v4394_v20  ;;  %v1426_v24 = vmul.f32 %v3889_v23, %v1425_v43  ;;  %vm1432_vm3 = vmor %vm1430_vm2, %vm1431_vm1 }
 0x27e   : > { %v1423_v46 = vsel %vm1422_vm0, %v3887_v34, %v1419_v58  ;;  %v1347_v34 = vsub.f32 %v4770_v26, %v4905_v21  ;;  %vm1440_vm5 = vweird.f32 %v1364_v32 }
 0x27f   : > { %v1317_v15 = vsub.f32 %v1285_v10, %v1301_v16  ;;  %v1427_v12 = vmul.f32 0.5, %v1426_v24  ;;  %v1538_v5 = vmul.f32 %v1423_v46, %v1346_v41 }
 0x281   : > { %v1333_v17 = vmax.f32 %v1317_v15, 0.0  ;;  %v1428_v31 = vsub.f32 1.5, %v1427_v12  ;;  %v1557_v48 = vmul.f32 %v4884_v35, %v1538_v5 }
 0x282   : > { %v1199_v9 = vpop.xlane.xlu0 %1198 }
 0x283   : > { %v3891_v22 = vpop.eup %3890  ;;  %v1365_v33 = vadd.f32 1e-05, %v1333_v17  ;;  %v1429_v56 = vmul.f32 %v3889_v23, %v1428_v31  ;;  %v4931_v13 = vmul.f32 %v1199_v9, %v4394_v20  ;;  %v1576_v26 = vadd.f32 %v4891_v44, %v1557_v48 }
 0x284   : > { %v1435_v37 = vmul.f32 %v3891_v22, %v1364_v32  ;;  %v1263_v6 = vpop.xlane.xlu2 %1262  ;;  %vm1441_vm4 = vweird.f32 %v3891_v22 }
 0x285   : > { %3892 = vrsqrt.f32 %v1365_v33  ;;  %v1302_v63 = vmul.f32 %v4931_v13, %v4931_v13  ;;  %v1286_v58 = vmul.f32 %v1263_v6, %v4394_v20  ;;  %v1433_v36 = vsel %vm1432_vm3, %v3889_v23, %v1429_v56  ;;  %vm1442_vm6 = vmor %vm1440_vm5, %vm1441_vm4 }
 0x286   : > { %v1436_v50 = vmul.f32 %v3891_v22, %v1435_v37  ;;  %v1539_v45 = vmul.f32 %v1433_v36, %v1347_v34  ;;  %v1592_v37 = vmax.f32 %v1576_v26, 0.0  ;;  %vm1450_vm8 = vweird.f32 %v1365_v33 }
 0x287   : > { %v1318_v16 = vsub.f32 %v1286_v58, %v1302_v63  ;;  %v1348_v63 = vsub.f32 %v4776_v55, %v4914_v4 }
 0x288   : > { %v1437_v43 = vmul.f32 0.5, %v1436_v50  ;;  %v1558_v24 = vmul.f32 %v4884_v35, %v1539_v45 }
 0x289   : > { %v1334_v21 = vmax.f32 %v1318_v16, 0.0 }
 0x28a   : > { %v1438_v10 = vsub.f32 1.5, %v1437_v43  ;;  %v1201_v15 = vpop.xlane.xlu1 %1200  ;;  %v1577_v12 = vadd.f32 %v4891_v44, %v1558_v24 }
 0x28b   : > { %v3893_v46 = vpop.eup %3892  ;;  %v1366_v5 = vadd.f32 1e-05, %v1334_v21  ;;  %v4943_v31 = vmul.f32 %v1201_v15, %v4394_v20 }
 0x28c   : > { %v1439_v41 = vmul.f32 %v3891_v22, %v1438_v10  ;;  %v1445_v17 = vmul.f32 %v3893_v46, %v1365_v33  ;;  %v1265_v23 = vpop.xlane.xlu0 %1264  ;;  %v1593_v9 = vmax.f32 %v1577_v12, 0.0  ;;  %vm1451_vm7 = vweird.f32 %v3893_v46 }
 0x28d   : > { %3894 = vrsqrt.f32 %v1366_v5  ;;  %v1303_v34 = vmul.f32 %v4943_v31, %v4943_v31  ;;  %v1287_v50 = vmul.f32 %v1265_v23, %v4394_v20  ;;  %vm1452_vm9 = vmor %vm1450_vm8, %vm1451_vm7  ;;  %vm1460_vm11 = vweird.f32 %v1366_v5 }
 0x28e   : > { %v1446_v56 = vmul.f32 %v3893_v46, %v1445_v17  ;;  %v1606_v6 = vpack.c.bf16 %v1593_v9, %v1592_v37  ;;  %v1443_v48 = vsel %vm1442_vm6, %v3891_v22, %v1439_v41  ;;  %v1349_v22 = vsub.f32 %v4782_v18, %v4923_v59 }
 0x28f   : > { %v1319_v36 = vsub.f32 %v1287_v50, %v1303_v34  ;;  %v1540_v43 = vmul.f32 %v1443_v48, %v1348_v63 }
 0x290   : > { %v1447_v58 = vmul.f32 0.5, %v1446_v56  ;;  %1698 = vmatmul.bf16.gmra.mxu2 %v1606_v6 }
 0x291   : > { %v1335_v45 = vmax.f32 %v1319_v36, 0.0  ;;  %v1559_v17 = vmul.f32 %v4884_v35, %v1540_v43 }
 0x292   : > { %v1448_v32 = vsub.f32 1.5, %v1447_v58  ;;  %v1203_v16 = vpop.xlane.xlu1 %1202 }
 0x293   : > { %v3895_v10 = vpop.eup %3894  ;;  %v4951_v26 = vmul.f32 %v1203_v16, %v4394_v20  ;;  %v1367_v55 = vadd.f32 1e-05, %v1335_v45  ;;  %v1578_v59 = vadd.f32 %v4891_v44, %v1559_v17 }
 0x294   : > { %v1449_v24 = vmul.f32 %v3893_v46, %v1448_v32  ;;  %v1455_v21 = vmul.f32 %v3895_v10, %v1366_v5  ;;  %v1267_v4 = vpop.xlane.xlu0 %1266  ;;  %vm1461_vm10 = vweird.f32 %v3895_v10 }
 0x295   : > { %v1304_v41 = vmul.f32 %v4951_v26, %v4951_v26  ;;  %v1288_v15 = vmul.f32 %v1267_v4, %v4394_v20  ;;  %3896 = vrsqrt.f32 %v1367_v55  ;;  %v1594_v16 = vmax.f32 %v1578_v59, 0.0  ;;  %vm1462_vm12 = vmor %vm1460_vm11, %vm1461_vm10 }
 0x296   : > { %v1453_v12 = vsel %vm1452_vm9, %v3893_v46, %v1449_v24  ;;  %v1456_v23 = vmul.f32 %v3895_v10, %v1455_v21  ;;  %vm1470_vm14 = vweird.f32 %v1367_v55 }
 0x297   : > { %v1541_v33 = vmul.f32 %v1453_v12, %v1349_v22  ;;  %v1320_v37 = vsub.f32 %v1288_v15, %v1304_v41  ;;  %v1350_v15 = vsub.f32 %v4788_v38, %v4931_v13 }
 0x298   : > { %v1457_v9 = vmul.f32 0.5, %v1456_v23 }
 0x299   : > { %v1560_v56 = vmul.f32 %v4884_v35, %v1541_v33  ;;  %v1336_v18 = vmax.f32 %v1320_v37, 0.0 }
 0x29a   : > { %v1458_v34 = vsub.f32 1.5, %v1457_v9  ;;  %v1205_v50 = vpop.xlane.xlu2 %1204 }
 0x29b   : > { %v1579_v6 = vadd.f32 %v4891_v44, %v1560_v56  ;;  %v4962_v48 = vadd.f32 1e-05, %v1336_v18  ;;  %v4965_v46 = vmul.f32 %v1205_v50, %v4394_v20  ;;  %v3897_v63 = vpop.eup %3896  ;;  %v1351_v50 = vsub.f32 %v4797_v14, %v4943_v31 }
 0x29c   : > { %v1459_v58 = vmul.f32 %v3895_v10, %v1458_v34  ;;  %v1269_v36 = vpop.xlane.xlu1 %1268  ;;  %v1465_v43 = vmul.f32 %v3897_v63, %v1367_v55  ;;  %vm1471_vm13 = vweird.f32 %v3897_v63 }
 0x29d   : > { %v1595_v32 = vmax.f32 %v1579_v6, 0.0  ;;  %3898 = vrsqrt.f32 %v4962_v48  ;;  %v1305_v24 = vmul.f32 %v4965_v46, %v4965_v46  ;;  %v1289_v22 = vmul.f32 %v1269_v36, %v4394_v20  ;;  %vm1472_vm15 = vmor %vm1470_vm14, %vm1471_vm13 }
 0x29e   : > { %v1466_v21 = vmul.f32 %v3897_v63, %v1465_v43  ;;  %v1463_v41 = vsel %vm1462_vm12, %v3895_v10, %v1459_v58  ;;  %vm1480_vm1 = vweird.f32 %v4962_v48 }
 0x29f   : > { %v1209_v45 = vpop.xlane.xlu0 %1208  ;;  %v1607_v4 = vpack.c.bf16 %v1595_v32, %v1594_v16  ;;  %v1321_v12 = vsub.f32 %v1289_v22, %v1305_v24  ;;  %v1542_v33 = vmul.f32 %v1463_v41, %v1350_v15 }
 0x2a0   : > { %v1467_v17 = vmul.f32 0.5, %v1466_v21  ;;  %v4987_v55 = vmul.f32 %v1209_v45, %v4394_v20 }
 0x2a1   : > { %1703 = vmatmul.bf16.gmra.mxu2 %v1607_v4  ;;  %v1337_v5 = vmax.f32 %v1321_v12, 0.0  ;;  %v1561_v58 = vmul.f32 %v4884_v35, %v1542_v33 }
 0x2a2   : > { %v1207_v23 = vpop.xlane.xlu2 %1206  ;;  %v1468_v9 = vsub.f32 1.5, %v1467_v17 }
 0x2a3   : > { %v3899_v37 = vpop.eup %3898  ;;  %v4974_v56 = vmul.f32 %v1207_v23, %v4394_v20  ;;  %v4977_v59 = vadd.f32 1e-05, %v1337_v5  ;;  %v1580_v14 = vadd.f32 %v4891_v44, %v1561_v58 }
 0x2a4   : > { %v1475_v18 = vmul.f32 %v3899_v37, %v4962_v48  ;;  %v1271_v10 = vpop.xlane.xlu1 %1270  ;;  %v1469_v34 = vmul.f32 %v3897_v63, %v1468_v9  ;;  %vm1481_vm0 = vweird.f32 %v3899_v37 }
 0x2a5   : > { %v1306_v38 = vmul.f32 %v4974_v56, %v4974_v56  ;;  %v1290_v13 = vmul.f32 %v1271_v10, %v4394_v20  ;;  %3900 = vrsqrt.f32 %v4977_v59  ;;  %vm5003_vm2 = vmor %vm1480_vm1, %vm1481_vm0  ;;  %vm1490_vm4 = vweird.f32 %v4977_v59 }
 0x2a6   : > { %v1476_v6 = vmul.f32 %v3899_v37, %v1475_v18  ;;  %v1473_v43 = vsel %vm1472_vm15, %v3897_v63, %v1469_v34  ;;  %v1307_v63 = vmul.f32 %v4987_v55, %v4987_v55  ;;  %v1596_v34 = vmax.f32 %v1580_v14, 0.0 }
 0x2a7   : > { %v1322_v36 = vsub.f32 %v1290_v13, %v1306_v38  ;;  %v1211_v32 = vpop.xlane.xlu0 %1210  ;;  %v1543_v24 = vmul.f32 %v1473_v43, %v1351_v50 }
 0x2a8   : > { %v1477_v16 = vmul.f32 0.5, %v1476_v6  ;;  %v5001_v23 = vmul.f32 %v1211_v32, %v4394_v20  ;;  %v1352_v6 = vsub.f32 %v4806_v25, %v4951_v26 }
 0x2a9   : > { %v1338_v22 = vmax.f32 %v1322_v36, 0.0  ;;  %v1562_v41 = vmul.f32 %v4884_v35, %v1543_v24 }
 0x2aa   : > { %v1478_v21 = vsub.f32 1.5, %v1477_v16  ;;  %v1273_v4 = vpop.xlane.xlu2 %1272  ;;  %v1308_v24 = vmul.f32 %v5001_v23, %v5001_v23 }
 0x2ab   : > { %v4991_v31 = vadd.f32 1e-05, %v1338_v22  ;;  %v1291_v15 = vmul.f32 %v1273_v4, %v4394_v20  ;;  %v3901_v12 = vpop.eup %3900  ;;  %v1581_v45 = vadd.f32 %v4891_v44, %v1562_v41 }
 0x2ac   : > { %v1479_v17 = vmul.f32 %v3899_v37, %v1478_v21  ;;  %v1485_v5 = vmul.f32 %v3901_v12, %v4977_v59  ;;  %vm1491_vm3 = vweird.f32 %v3901_v12 }
 0x2ad   : > { %3902 = vrsqrt.f32 %v4991_v31  ;;  %v1323_v18 = vsub.f32 %v1291_v15, %v1307_v63  ;;  %v1597_v38 = vmax.f32 %v1581_v45, 0.0  ;;  %v1353_v45 = vsub.f32 %v4812_v57, %v4965_v46  ;;  %vm1492_vm5 = vmor %vm1490_vm4, %vm1491_vm3 }
 0x2ae   : > { %v1486_v13 = vmul.f32 %v3901_v12, %v1485_v5  ;;  %v1483_v50 = vsel %vm5003_vm2, %v3899_v37, %v1479_v17  ;;  %vm1500_vm7 = vweird.f32 %v4991_v31 }
 0x2af   : > { %v1213_v33 = vpop.xlane.xlu1 %1212  ;;  %v1339_v58 = vmax.f32 %v1323_v18, 0.0  ;;  %v1608_v32 = vpack.c.bf16 %v1597_v38, %v1596_v34  ;;  %v1544_v4 = vmul.f32 %v1483_v50, %v1352_v6 }
 0x2b0   : > { %v5008_v10 = vmul.f32 %v1213_v33, %v4394_v20  ;;  %v1487_v43 = vmul.f32 0.5, %v1486_v13 }
 0x2b1   : > { %v1277_v48 = vpop.xlane.xlu0 %1276  ;;  %v1371_v22 = vadd.f32 1e-05, %v1339_v58  ;;  %1708 = vmatmul.bf16.gmra.mxu2 %v1608_v32  ;;  %v1563_v33 = vmul.f32 %v4884_v35, %v1544_v4  ;;  %v1354_v4 = vsub.f32 %v4822_v29, %v4974_v56 }
 0x2b2   : > { %v1309_v36 = vmul.f32 %v5008_v10, %v5008_v10  ;;  %v1293_v16 = vmul.f32 %v1277_v48, %v4394_v20  ;;  %v1275_v21 = vpop.xlane.xlu2 %1274  ;;  %v1488_v37 = vsub.f32 1.5, %v1487_v43 }
 0x2b3   : > { %v3903_v41 = vpop.eup %3902  ;;  %v1292_v25 = vmul.f32 %v1275_v21, %v4394_v20  ;;  %3904 = vrsqrt.f32 %v1371_v22  ;;  %v1582_v58 = vadd.f32 %v4891_v44, %v1563_v33  ;;  %vm1510_vm10 = vweird.f32 %v1371_v22 }
 0x2b4   : > { %v1325_v14 = vsub.f32 %v1293_v16, %v1309_v36  ;;  %v1495_v26 = vmul.f32 %v3903_v41, %v4991_v31  ;;  %v1489_v15 = vmul.f32 %v3901_v12, %v1488_v37  ;;  %vm1501_vm6 = vweird.f32 %v3903_v41 }
 0x2b5   : > { %v1324_v63 = vsub.f32 %v1292_v25, %v1308_v24  ;;  %vm1502_vm8 = vmor %vm1500_vm7, %vm1501_vm6 }
 0x2b6   : > { %v1341_v17 = vmax.f32 %v1325_v14, 0.0  ;;  %v1496_v5 = vmul.f32 %v3903_v41, %v1495_v26  ;;  %v1493_v34 = vsel %vm1492_vm5, %v3901_v12, %v1489_v15  ;;  %v1598_v12 = vmax.f32 %v1582_v58, 0.0 }
 0x2b7   : > { %v1340_v18 = vmax.f32 %v1324_v63, 0.0  ;;  %v1545_v13 = vmul.f32 %v1493_v34, %v1353_v45  ;;  %v1355_v45 = vsub.f32 %v4818_v39, %v4987_v55 }
 0x2b8   : > { %v1373_v9 = vadd.f32 1e-05, %v1341_v17  ;;  %v1497_v38 = vmul.f32 0.5, %v1496_v5 }
 0x2b9   : > { %v1372_v48 = vadd.f32 1e-05, %v1340_v18  ;;  %v3905_v50 = vpop.eup %3904  ;;  %v1564_v59 = vmul.f32 %v4884_v35, %v1545_v13 }
 0x2ba   : > { %3906 = vrsqrt.f32 %v1373_v9  ;;  %v1498_v6 = vsub.f32 1.5, %v1497_v38  ;;  %v1505_v36 = vmul.f32 %v3905_v50, %v1371_v22  ;;  %vm1511_vm9 = vweird.f32 %v3905_v50 }
 0x2bb   : > { %3908 = vrsqrt.f32 %v1372_v48  ;;  %v1583_v46 = vadd.f32 %v4891_v44, %v1564_v59  ;;  %vm1512_vm11 = vmor %vm1510_vm10, %vm1511_vm9  ;;  %vm1530_vm14 = vweird.f32 %v1373_v9  ;;  %vm1520_vm0 = vweird.f32 %v1372_v48 }
 0x2bc   : > { %v1499_v57 = vmul.f32 %v3903_v41, %v1498_v6  ;;  %v1506_v32 = vmul.f32 %v3905_v50, %v1505_v36  ;;  %v1356_v36 = vsub.f32 %v4828_v28, %v5001_v23  ;;  %v5048_v28 = vld [vmem:[%s6076_s10] ss:$0 sm:$0xff] }
 0x2bd   : > { %v1599_v43 = vmax.f32 %v1583_v46, 0.0 }
 0x2be   : > { %v1507_v24 = vmul.f32 0.5, %v1506_v32  ;;  %v1503_v21 = vsel %vm1502_vm8, %v3903_v41, %v1499_v57  ;;  %v1357_v57 = vsub.f32 %v4840_v11, %v5008_v10 }
 0x2bf   : > { %v1609_v14 = vpack.c.bf16 %v1599_v43, %v1598_v12  ;;  %v1546_v63 = vmul.f32 %v1503_v21, %v1354_v4 }
 0x2c0   : > { %v3907_v16 = vpop.eup %3906  ;;  %v1508_v26 = vsub.f32 1.5, %v1507_v24 }
 0x2c1   : > { %v1525_v37 = vmul.f32 %v3907_v16, %v1373_v9  ;;  %v3909_v25 = vpop.eup %3908  ;;  %1713 = vmatmul.bf16.gmra.mxu2 %v1609_v14  ;;  %v1565_v34 = vmul.f32 %v4884_v35, %v1546_v63  ;;  %vm1531_vm12 = vweird.f32 %v3907_v16 }
 0x2c2   : > { %v1515_v17 = vmul.f32 %v3909_v25, %v1372_v48  ;;  %v1509_v31 = vmul.f32 %v3905_v50, %v1508_v26  ;;  %vm1521_vm13 = vweird.f32 %v3909_v25  ;;  %vm1532_vm15 = vmor %vm1530_vm14, %vm1531_vm12 }
 0x2c3   : > { %v1526_v15 = vmul.f32 %v3907_v16, %v1525_v37  ;;  %v1584_v59 = vadd.f32 %v4891_v44, %v1565_v34  ;;  %vm1522_vm1 = vmor %vm1520_vm0, %vm1521_vm13 }
 0x2c4   : > { %v1516_v41 = vmul.f32 %v3909_v25, %v1515_v17  ;;  %v1513_v33 = vsel %vm1512_vm11, %v3905_v50, %v1509_v31 }
 0x2c5   : > { %v1527_v5 = vmul.f32 0.5, %v1526_v15  ;;  %v1547_v56 = vmul.f32 %v1513_v33, %v1355_v45  ;;  %v1600_v46 = vmax.f32 %v1584_v59, 0.0 }
 0x2c6   : > { %v1517_v29 = vmul.f32 0.5, %v1516_v41 }
 0x2c7   : > { %v1528_v18 = vsub.f32 1.5, %v1527_v5  ;;  %v1566_v13 = vmul.f32 %v4884_v35, %v1547_v56 }
 0x2c8   : > { %v1518_v38 = vsub.f32 1.5, %v1517_v29 }
 0x2c9   : > { %v1529_v6 = vmul.f32 %v3907_v16, %v1528_v18  ;;  %v1585_v39 = vadd.f32 %v4891_v44, %v1566_v13 }
 0x2ca   : > { %v1519_v22 = vmul.f32 %v3909_v25, %v1518_v38 }
 0x2cb   : > { %v1601_v55 = vmax.f32 %v1585_v39, 0.0  ;;  %v1533_v58 = vsel %vm1532_vm15, %v3907_v16, %v1529_v6 }
 0x2cc   : > { %v1523_v50 = vsel %vm1522_vm1, %v3909_v25, %v1519_v22  ;;  %v1549_v12 = vmul.f32 %v1533_v58, %v1357_v57 }
 0x2cd   : > { %v1610_v32 = vpack.c.bf16 %v1601_v55, %v1600_v46  ;;  %v1548_v9 = vmul.f32 %v1523_v50, %v1356_v36 }
 0x2ce   : > { %v1568_v24 = vmul.f32 %v4884_v35, %v1549_v12 }
 0x2cf   : > { %v1567_v43 = vmul.f32 %v4884_v35, %v1548_v9 }
 0x2d0   : > { %v1587_v21 = vadd.f32 %v4891_v44, %v1568_v24  ;;  %v3738_v24 = vld [vmem:[%s6071_s5 + $0x78] sm:$0xff] }
 0x2d1   : > { %1718 = vmatmul.bf16.gmra.mxu2 %v1610_v32  ;;  %v1586_v48 = vadd.f32 %v4891_v44, %v1567_v43  ;;  %2231 = vmatpush.bf16.msra.mxu3 %v3738_v24 }
 0x2d2   : > { %v1603_v4 = vmax.f32 %v1587_v21, 0.0 }
 0x2d3   : > { %v1602_v16 = vmax.f32 %v1586_v48, 0.0 }
 0x2d5   : > { %v1611_v37 = vpack.c.bf16 %v1603_v4, %v1602_v16  ;;  %v3737_v4 = vld [vmem:[%s6071_s5 + $0x70] sm:$0xff] }
 0x2d6   : > { %2232 = vmatpush.bf16.msra.mxu3 %v3737_v4 }
 0x2e1   : > { %1723 = vmatmul.bf16.gmra.mxu2 %v1611_v37  ;;  %v3736_v37 = vld [vmem:[%s6071_s5 + $0x68] sm:$0xff] }
 0x2e2   : > { %2233 = vmatpush.bf16.msra.mxu3 %v3736_v37 }
 0x2ed   : > { %v1689_v11 = vpop.f32.mrf.mxu2 }
 0x2ee   : > { %v5051_v23 = vadd.f32 %v5048_v28, %v1689_v11 }
 0x2f0   : > { %1731 = vadd.xlane.f32.xlu1 %v5051_v23  ;;  %v1779_v35 = vmul.f32 %v5051_v23, %v5051_v23 }
 0x2f2   : > { %1795 = vadd.xlane.f32.xlu0 %v1779_v35 }
 0x2f5   : > { %v1691_v44 = vpop.f32.mrf.mxu2 }
 0x2f6   : > { %v5057_v10 = vadd.f32 %v5048_v28, %v1691_v44 }
 0x2f8   : > { %1733 = vadd.xlane.f32.xlu2 %v5057_v10  ;;  %v1780_v14 = vmul.f32 %v5057_v10, %v5057_v10 }
 0x2fa   : > { %1797 = vadd.xlane.f32.xlu1 %v1780_v14  ;;  %v3735_v14 = vld [vmem:[%s6071_s5 + $0x60] sm:$0xff] }
 0x2fb   : > { %2234 = vmatpush.bf16.msra.mxu3 %v3735_v14 }
 0x2fd   : > { %v1694_v25 = vpop.f32.mrf.mxu2 }
 0x2fe   : > { %v5063_v26 = vadd.f32 %v5048_v28, %v1694_v25 }
 0x300   : > { %1735 = vadd.xlane.f32.xlu2 %v5063_v26  ;;  %v1781_v15 = vmul.f32 %v5063_v26, %v5063_v26 }
 0x302   : > { %1799 = vadd.xlane.f32.xlu1 %v1781_v15 }
 0x305   : > { %v1696_v17 = vpop.f32.mrf.mxu2 }
 0x306   : > { %v5069_v63 = vadd.f32 %v5048_v28, %v1696_v17  ;;  %v3734_v17 = vld [vmem:[%s6071_s5 + $0x58] sm:$0xff] }
 0x307   : > { %2235 = vmatpush.bf16.msra.mxu3 %v3734_v17 }
 0x308   : > { %1737 = vadd.xlane.f32.xlu0 %v5069_v63  ;;  %v1782_v31 = vmul.f32 %v5069_v63, %v5069_v63 }
 0x30a   : > { %1801 = vadd.xlane.f32.xlu2 %v1782_v31 }
 0x313   : > { %v1699_v45 = vpop.f32.mrf.mxu2 }
 0x314   : > { %v5075_v5 = vadd.f32 %v5048_v28, %v1699_v45 }
 0x316   : > { %1739 = vadd.xlane.f32.xlu0 %v5075_v5  ;;  %v1783_v41 = vmul.f32 %v5075_v5, %v5075_v5 }
 0x318   : > { %1803 = vadd.xlane.f32.xlu2 %v1783_v41 }
 0x31b   : > { %v1701_v33 = vpop.f32.mrf.mxu2 }
 0x31c   : > { %v5081_v18 = vadd.f32 %v5048_v28, %v1701_v33 }
 0x31e   : > { %1741 = vadd.xlane.f32.xlu1 %v5081_v18  ;;  %v1784_v29 = vmul.f32 %v5081_v18, %v5081_v18 }
 0x320   : > { %1805 = vadd.xlane.f32.xlu0 %v1784_v29 }
 0x324   : > { %v1704_v56 = vpop.f32.mrf.mxu2 }
 0x325   : > { %v5087_v34 = vadd.f32 %v5048_v28, %v1704_v56 }
 0x327   : > { %1743 = vadd.xlane.f32.xlu1 %v5087_v34  ;;  %v1785_v38 = vmul.f32 %v5087_v34, %v5087_v34 }
 0x329   : > { %1807 = vadd.xlane.f32.xlu0 %v1785_v38 }
 0x32c   : > { %v1706_v13 = vpop.f32.mrf.mxu2 }
 0x32d   : > { %v5093_v6 = vadd.f32 %v5048_v28, %v1706_v13  ;;  %v3733_v13 = vld [vmem:[%s6071_s5 + $0x50] sm:$0xff] }
 0x32e   : > { %2236 = vmatpush.bf16.msra.mxu3 %v3733_v13 }
 0x32f   : > { %1745 = vadd.xlane.f32.xlu2 %v5093_v6  ;;  %v1786_v22 = vmul.f32 %v5093_v6, %v5093_v6 }
 0x331   : > { %1809 = vadd.xlane.f32.xlu1 %v1786_v22 }
 0x334   : > { %v1709_v59 = vpop.f32.mrf.mxu2 }
 0x335   : > { %v5099_v39 = vadd.f32 %v5048_v28, %v1709_v59 }
 0x337   : > { %1747 = vadd.xlane.f32.xlu2 %v5099_v39  ;;  %v1787_v55 = vmul.f32 %v5099_v39, %v5099_v39 }
 0x339   : > { %1811 = vadd.xlane.f32.xlu1 %v1787_v55 }
 0x33c   : > { %v1711_v50 = vpop.f32.mrf.mxu2 }
 0x33d   : > { %v5105_v58 = vadd.f32 %v5048_v28, %v1711_v50 }
 0x33f   : > { %1749 = vadd.xlane.f32.xlu0 %v5105_v58  ;;  %v1788_v36 = vmul.f32 %v5105_v58, %v5105_v58 }
 0x341   : > { %1813 = vadd.xlane.f32.xlu2 %v1788_v36  ;;  %v3732_v36 = vld [vmem:[%s6071_s5 + $0x48] sm:$0xff] }
 0x342   : > { %2237 = vmatpush.bf16.msra.mxu3 %v3732_v36 }
 0x344   : > { %v1714_v57 = vpop.f32.mrf.mxu2 }
 0x345   : > { %v5111_v46 = vadd.f32 %v5048_v28, %v1714_v57 }
 0x347   : > { %1751 = vadd.xlane.f32.xlu0 %v5111_v46  ;;  %v1789_v32 = vmul.f32 %v5111_v46, %v5111_v46 }
 0x349   : > { %1815 = vadd.xlane.f32.xlu2 %v1789_v32 }
 0x34c   : > { %v1716_v9 = vpop.f32.mrf.mxu2 }
 0x34d   : > { %v5117_v12 = vadd.f32 %v5048_v28, %v1716_v9 }
 0x34f   : > { %1753 = vadd.xlane.f32.xlu1 %v5117_v12  ;;  %v1790_v43 = vmul.f32 %v5117_v12, %v5117_v12 }
 0x351   : > { %1817 = vadd.xlane.f32.xlu0 %v1790_v43 }
 0x354   : > { %v1719_v48 = vpop.f32.mrf.mxu2 }
 0x355   : > { %v5126_v21 = vadd.f32 %v5048_v28, %v1719_v48  ;;  %v3731_v48 = vld [vmem:[%s6071_s5 + $0x40] sm:$0xff] }
 0x356   : > { %2238 = vmatpush.bf16.msra.mxu3 %v3731_v48 }
 0x357   : > { %1755 = vadd.xlane.f32.xlu1 %v5126_v21  ;;  %v1791_v16 = vmul.f32 %v5126_v21, %v5126_v21 }
 0x359   : > { %1819 = vadd.xlane.f32.xlu0 %v1791_v16 }
 0x35c   : > { %v1721_v11 = vpop.f32.mrf.mxu2 }
 0x35d   : > { %v5138_v35 = vadd.f32 %v5048_v28, %v1721_v11 }
 0x35f   : > { %1757 = vadd.xlane.f32.xlu2 %v5138_v35  ;;  %v1792_v44 = vmul.f32 %v5138_v35, %v5138_v35 }
 0x361   : > { %1821 = vadd.xlane.f32.xlu1 %v1792_v44 }
 0x363   : > { %v1732_v25 = vpop.xlane.xlu1 %1731 }
 0x364   : > { %v5147_v15 = vmul.f32 %v1732_v25, %v4394_v20  ;;  %v1724_v31 = vpop.f32.mrf.mxu2 }
 0x365   : > { %v1796_v45 = vpop.xlane.xlu0 %1795  ;;  %v5153_v41 = vadd.f32 %v5048_v28, %v1724_v31 }
 0x366   : > { %v1843_v33 = vmul.f32 %v5147_v15, %v5147_v15  ;;  %v1827_v29 = vmul.f32 %v1796_v45, %v4394_v20 }
 0x367   : > { %1759 = vadd.xlane.f32.xlu2 %v5153_v41  ;;  %v1793_v38 = vmul.f32 %v5153_v41, %v5153_v41 }
 0x368   : > { %v1859_v56 = vsub.f32 %v1827_v29, %v1843_v33 }
 0x369   : > { %1823 = vadd.xlane.f32.xlu1 %v1793_v38 }
 0x36a   : > { %v1875_v22 = vmax.f32 %v1859_v56, 0.0 }
 0x36b   : > { %v1734_v59 = vpop.xlane.xlu2 %1733 }
 0x36c   : > { %v1907_v55 = vadd.f32 1e-05, %v1875_v22  ;;  %v5165_v50 = vmul.f32 %v1734_v59, %v4394_v20  ;;  %v1726_v57 = vpop.f32.mrf.mxu2 }
 0x36d   : > { %v1798_v32 = vpop.xlane.xlu1 %1797  ;;  %v5173_v43 = vadd.f32 %v5048_v28, %v1726_v57 }
 0x36e   : > { %3910 = vrsqrt.f32 %v1907_v55  ;;  %v1844_v9 = vmul.f32 %v5165_v50, %v5165_v50  ;;  %v1828_v24 = vmul.f32 %v1798_v32, %v4394_v20  ;;  %vm1929_vm3 = vweird.f32 %v1907_v55 }
 0x36f   : > { %1761 = vadd.xlane.f32.xlu0 %v5173_v43  ;;  %v1794_v4 = vmul.f32 %v5173_v43, %v5173_v43 }
 0x370   : > { %v1860_v16 = vsub.f32 %v1828_v24, %v1844_v9 }
 0x371   : > { %1825 = vadd.xlane.f32.xlu2 %v1794_v4 }
 0x372   : > { %v1876_v37 = vmax.f32 %v1860_v16, 0.0 }
 0x373   : > { %v1736_v11 = vpop.xlane.xlu2 %1735 }
 0x374   : > { %v3911_v44 = vpop.eup %3910  ;;  %v5183_v28 = vmul.f32 %v1736_v11, %v4394_v20  ;;  %v1908_v25 = vadd.f32 1e-05, %v1876_v37  ;;  %v1891_v11 = vsub.f32 %v5051_v23, %v5147_v15 }
 0x375   : > { %v1924_v14 = vmul.f32 %v3911_v44, %v1907_v55  ;;  %v1800_v17 = vpop.xlane.xlu1 %1799  ;;  %vm1930_vm2 = vweird.f32 %v3911_v44  ;;  %v5199_v55 = vld [vmem:[%s6077_s11] ss:$0 sm:$0xff] }
 0x376   : > { %v1845_v31 = vmul.f32 %v5183_v28, %v5183_v28  ;;  %v1829_v45 = vmul.f32 %v1800_v17, %v4394_v20  ;;  %3912 = vrsqrt.f32 %v1908_v25  ;;  %vm1931_vm4 = vmor %vm1929_vm3, %vm1930_vm2  ;;  %vm1939_vm6 = vweird.f32 %v1908_v25 }
 0x377   : > { %v1925_v33 = vmul.f32 %v3911_v44, %v1924_v14  ;;  %v1893_v30 = vsub.f32 %v5063_v26, %v5183_v28 }
 0x378   : > { %v1861_v29 = vsub.f32 %v1829_v45, %v1845_v31 }
 0x379   : > { %v1926_v56 = vmul.f32 0.5, %v1925_v33 }
 0x37a   : > { %v1877_v38 = vmax.f32 %v1861_v29, 0.0 }
 0x37b   : > { %v1927_v13 = vsub.f32 1.5, %v1926_v56  ;;  %v1738_v22 = vpop.xlane.xlu0 %1737 }
 0x37c   : > { %v1909_v59 = vadd.f32 1e-05, %v1877_v38  ;;  %v5189_v36 = vmul.f32 %v1738_v22, %v4394_v20  ;;  %v3913_v57 = vpop.eup %3912  ;;  %v5207_v22 = vld [vmem:[%s6078_s12] ss:$0 sm:$0xff] }
 0x37d   : > { %v1928_v32 = vmul.f32 %v3911_v44, %v1927_v13  ;;  %v1802_v9 = vpop.xlane.xlu2 %1801  ;;  %v1934_v24 = vmul.f32 %v3913_v57, %v1908_v25  ;;  %vm1940_vm5 = vweird.f32 %v3913_v57 }
 0x37e   : > { %3914 = vrsqrt.f32 %v1909_v59  ;;  %v1846_v48 = vmul.f32 %v5189_v36, %v5189_v36  ;;  %v1830_v16 = vmul.f32 %v1802_v9, %v4394_v20  ;;  %vm1941_vm7 = vmor %vm1939_vm6, %vm1940_vm5  ;;  %vm1949_vm9 = vweird.f32 %v1909_v59 }
 0x37f   : > { %v1932_v4 = vsel %vm1931_vm4, %v3911_v44, %v1928_v32  ;;  %v1935_v37 = vmul.f32 %v3913_v57, %v1934_v24  ;;  %v1892_v44 = vsub.f32 %v5057_v10, %v5165_v50  ;;  %v1894_v26 = vsub.f32 %v5069_v63, %v5189_v36 }
 0x380   : > { %v1862_v14 = vsub.f32 %v1830_v16, %v1846_v48  ;;  %v2083_v31 = vmul.f32 %v1932_v4, %v1891_v11 }
 0x381   : > { %v1936_v17 = vmul.f32 0.5, %v1935_v37 }
 0x382   : > { %v1878_v45 = vmax.f32 %v1862_v14, 0.0  ;;  %v2102_v15 = vmul.f32 %v5199_v55, %v2083_v31 }
 0x383   : > { %v1937_v29 = vsub.f32 1.5, %v1936_v17 }
 0x384   : > { %v3915_v33 = vpop.eup %3914  ;;  %v1910_v38 = vadd.f32 1e-05, %v1878_v45  ;;  %v2121_v50 = vadd.f32 %v5207_v22, %v2102_v15 }
 0x385   : > { %v1944_v56 = vmul.f32 %v3915_v33, %v1909_v59  ;;  %v1938_v13 = vmul.f32 %v3913_v57, %v1937_v29  ;;  %vm1950_vm8 = vweird.f32 %v3915_v33 }
 0x386   : > { %3916 = vrsqrt.f32 %v1910_v38  ;;  %v5220_v29 = vadd.f32 %v2121_v50, %v1039_v7  ;;  %vm5226_vm10 = vmor %vm1949_vm9, %vm1950_vm8  ;;  %vm1959_vm12 = vweird.f32 %v1910_v38 }
 0x387   : > { %v1945_v23 = vmul.f32 %v3915_v33, %v1944_v56  ;;  %v1942_v32 = vsel %vm1941_vm7, %v3913_v57, %v1938_v13 }
 0x388   : > { %v2084_v9 = vmul.f32 %v1942_v32, %v1892_v44 }
 0x389   : > { %v1946_v24 = vmul.f32 0.5, %v1945_v23  ;;  %v1740_v48 = vpop.xlane.xlu0 %1739 }
 0x38a   : > { %v5210_v16 = vmul.f32 %v1740_v48, %v4394_v20  ;;  %v2103_v10 = vmul.f32 %v5199_v55, %v2084_v9 }
 0x38b   : > { %v1947_v25 = vsub.f32 1.5, %v1946_v24  ;;  %v1804_v4 = vpop.xlane.xlu2 %1803 }
 0x38c   : > { %v1847_v37 = vmul.f32 %v5210_v16, %v5210_v16  ;;  %v1831_v11 = vmul.f32 %v1804_v4, %v4394_v20  ;;  %v3917_v14 = vpop.eup %3916  ;;  %v2122_v57 = vadd.f32 %v5207_v22, %v2103_v10 }
 0x38d   : > { %v1948_v17 = vmul.f32 %v3915_v33, %v1947_v25  ;;  %v1954_v31 = vmul.f32 %v3917_v14, %v1910_v38  ;;  %vm1960_vm11 = vweird.f32 %v3917_v14 }
 0x38e   : > { %v1863_v45 = vsub.f32 %v1831_v11, %v1847_v37  ;;  %v5224_v56 = vadd.f32 %v2122_v57, %v1040_v8  ;;  %vm1961_vm13 = vmor %vm1959_vm12, %vm1960_vm11 }
 0x38f   : > { %v1955_v44 = vmul.f32 %v3917_v14, %v1954_v31  ;;  %v1952_v59 = vsel %vm5226_vm10, %v3915_v33, %v1948_v17 }
 0x390   : > { %v1879_v23 = vmax.f32 %v1863_v45, 0.0  ;;  %v2153_v32 = vpack.c.bf16 %v5224_v56, %v5220_v29  ;;  %v2085_v25 = vmul.f32 %v1952_v59, %v1893_v30 }
 0x391   : > { %v1742_v15 = vpop.xlane.xlu1 %1741  ;;  %v1956_v7 = vmul.f32 0.5, %v1955_v44 }
 0x392   : > { %v1911_v61 = vadd.f32 1e-05, %v1879_v23  ;;  %v5237_v8 = vmul.f32 %v1742_v15, %v4394_v20  ;;  %2239 = vmatmul.bf16.vlgmr.msra.gmra.mxu3 %v2153_v32  ;;  %v2104_v50 = vmul.f32 %v5199_v55, %v2085_v25 }
 0x393   : > { %v1806_v9 = vpop.xlane.xlu0 %1805  ;;  %v1957_v24 = vsub.f32 1.5, %v1956_v7 }
 0x394   : > { %3918 = vrsqrt.f32 %v1911_v61  ;;  %v1848_v48 = vmul.f32 %v5237_v8, %v5237_v8  ;;  %v1832_v4 = vmul.f32 %v1806_v9, %v4394_v20  ;;  %v2123_v23 = vadd.f32 %v5207_v22, %v2104_v50 }
 0x395   : > { %v1958_v33 = vmul.f32 %v3917_v14, %v1957_v24  ;;  %vm1969_vm15 = vweird.f32 %v1911_v61 }
 0x396   : > { %v1864_v28 = vsub.f32 %v1832_v4, %v1848_v48  ;;  %v5256_v30 = vadd.f32 %v2123_v23, %v1041_v1 }
 0x397   : > { %v1962_v10 = vsel %vm1961_vm13, %v3917_v14, %v1958_v33 }
 0x398   : > { %v1880_v37 = vmax.f32 %v1864_v28, 0.0  ;;  %v2086_v11 = vmul.f32 %v1962_v10, %v1894_v26 }
 0x39a   : > { %v3919_v17 = vpop.eup %3918  ;;  %v1744_v57 = vpop.xlane.xlu1 %1743  ;;  %v1912_v45 = vadd.f32 1e-05, %v1880_v37  ;;  %v2105_v38 = vmul.f32 %v5199_v55, %v2086_v11  ;;  %v1895_v37 = vsub.f32 %v5075_v5, %v5210_v16 }
 0x39b   : > { %v1964_v31 = vmul.f32 %v3919_v17, %v1911_v61  ;;  %v5246_v13 = vmul.f32 %v1744_v57, %v4394_v20  ;;  %vm1970_vm14 = vweird.f32 %v3919_v17 }
 0x39c   : > { %v1808_v44 = vpop.xlane.xlu0 %1807  ;;  %3920 = vrsqrt.f32 %v1912_v45  ;;  %v2124_v15 = vadd.f32 %v5207_v22, %v2105_v38  ;;  %vm1971_vm0 = vmor %vm1969_vm15, %vm1970_vm14  ;;  %vm1979_vm2 = vweird.f32 %v1912_v45 }
 0x39d   : > { %v1965_v63 = vmul.f32 %v3919_v17, %v1964_v31  ;;  %v1849_v36 = vmul.f32 %v5246_v13, %v5246_v13  ;;  %v1833_v14 = vmul.f32 %v1808_v44, %v4394_v20 }
 0x39e   : > { %v5260_v7 = vadd.f32 %v2124_v15, %v1042_v2 }
 0x39f   : > { %v1966_v32 = vmul.f32 0.5, %v1965_v63  ;;  %v1865_v59 = vsub.f32 %v1833_v14, %v1849_v36 }
 0x3a0   : > { %v2154_v25 = vpack.c.bf16 %v5260_v7, %v5256_v30 }
 0x3a1   : > { %v1967_v9 = vsub.f32 1.5, %v1966_v32  ;;  %v1881_v24 = vmax.f32 %v1865_v59, 0.0 }
 0x3a2   : > { %v1746_v48 = vpop.xlane.xlu2 %1745  ;;  %v3921_v4 = vpop.eup %3920  ;;  %2244 = vmatmul.bf16.gmra.mxu3 %v2154_v25 }
 0x3a3   : > { %v1968_v33 = vmul.f32 %v3919_v17, %v1967_v9  ;;  %v5265_v26 = vmul.f32 %v1746_v48, %v4394_v20  ;;  %v1974_v47 = vmul.f32 %v3921_v4, %v1912_v45  ;;  %v1913_v1 = vadd.f32 1e-05, %v1881_v24 }
 0x3a4   : > { %v1810_v28 = vpop.xlane.xlu1 %1809  ;;  %vm1980_vm1 = vweird.f32 %v3921_v4 }
 0x3a5   : > { %v1850_v52 = vmul.f32 %v5265_v26, %v5265_v26  ;;  %v1834_v2 = vmul.f32 %v1810_v28, %v4394_v20  ;;  %v1975_v10 = vmul.f32 %v3921_v4, %v1974_v47  ;;  %3922 = vrsqrt.f32 %v1913_v1  ;;  %vm1981_vm3 = vmor %vm1979_vm2, %vm1980_vm1 }
 0x3a6   : > { %v1972_v50 = vsel %vm1971_vm0, %v3919_v17, %v1968_v33  ;;  %v1896_v17 = vsub.f32 %v5081_v18, %v5237_v8  ;;  %vm1989_vm5 = vweird.f32 %v1913_v1 }
 0x3a7   : > { %v1866_v11 = vsub.f32 %v1834_v2, %v1850_v52  ;;  %v1976_v57 = vmul.f32 0.5, %v1975_v10  ;;  %v2087_v61 = vmul.f32 %v1972_v50, %v1895_v37 }
 0x3a9   : > { %v1882_v31 = vmax.f32 %v1866_v11, 0.0  ;;  %v1977_v44 = vsub.f32 1.5, %v1976_v57  ;;  %v2106_v16 = vmul.f32 %v5199_v55, %v2087_v61  ;;  %v6118_v57 = vmax.f32 %v4525_v42, 0.0 }
 0x3aa   : > { %v1748_v23 = vpop.xlane.xlu2 %1747  ;;  %v6119_v61 = vmax.f32 %v4528_v54, 0.0 }
 0x3ab   : > { %v1914_v38 = vadd.f32 1e-05, %v1882_v31  ;;  %v3923_v63 = vpop.eup %3922  ;;  %v1978_v36 = vmul.f32 %v3921_v4, %v1977_v44  ;;  %v5273_v14 = vmul.f32 %v1748_v23, %v4394_v20  ;;  %v2125_v18 = vadd.f32 %v5207_v22, %v2106_v16 }
 0x3ac   : > { %v1984_v15 = vmul.f32 %v3923_v63, %v1913_v1  ;;  %v1812_v5 = vpop.xlane.xlu1 %1811  ;;  %vm1990_vm4 = vweird.f32 %v3923_v63 }
 0x3ad   : > { %3924 = vrsqrt.f32 %v1914_v38  ;;  %v1851_v32 = vmul.f32 %v5273_v14, %v5273_v14  ;;  %v1835_v59 = vmul.f32 %v1812_v5, %v4394_v20  ;;  %v1982_v9 = vsel %vm1981_vm3, %v3921_v4, %v1978_v36  ;;  %vm1991_vm6 = vmor %vm1989_vm5, %vm1990_vm4 }
 0x3ae   : > { %v1985_v24 = vmul.f32 %v3923_v63, %v1984_v15  ;;  %v2088_v45 = vmul.f32 %v1982_v9, %v1896_v17  ;;  %v5289_v31 = vadd.f32 %v2125_v18, %v6118_v57  ;;  %v1897_v17 = vsub.f32 %v5087_v34, %v5246_v13 }
 0x3af   : > { %v1867_v48 = vsub.f32 %v1835_v59, %v1851_v32  ;;  %vm1999_vm8 = vweird.f32 %v1914_v38  ;;  %v1898_v34 = vsub.f32 %v5093_v6, %v5265_v26 }
 0x3b0   : > { %v1986_v25 = vmul.f32 0.5, %v1985_v24  ;;  %v2107_v33 = vmul.f32 %v5199_v55, %v2088_v45 }
 0x3b1   : > { %v1883_v8 = vmax.f32 %v1867_v48, 0.0 }
 0x3b2   : > { %v1987_v28 = vsub.f32 1.5, %v1986_v25  ;;  %v1750_v52 = vpop.xlane.xlu0 %1749  ;;  %v2126_v2 = vadd.f32 %v5207_v22, %v2107_v33 }
 0x3b3   : > { %v3925_v47 = vpop.eup %3924  ;;  %v1915_v50 = vadd.f32 1e-05, %v1883_v8  ;;  %v5285_v37 = vmul.f32 %v1750_v52, %v4394_v20 }
 0x3b4   : > { %v1994_v10 = vmul.f32 %v3925_v47, %v1914_v38  ;;  %v1988_v4 = vmul.f32 %v3923_v63, %v1987_v28  ;;  %v1814_v11 = vpop.xlane.xlu2 %1813  ;;  %v5293_v44 = vadd.f32 %v2126_v2, %v6119_v61  ;;  %vm2000_vm7 = vweird.f32 %v3925_v47 }
 0x3b5   : > { %3926 = vrsqrt.f32 %v1915_v50  ;;  %v1852_v36 = vmul.f32 %v5285_v37, %v5285_v37  ;;  %v1836_v1 = vmul.f32 %v1814_v11, %v4394_v20  ;;  %vm2001_vm9 = vmor %vm1999_vm8, %vm2000_vm7  ;;  %vm2009_vm11 = vweird.f32 %v1915_v50 }
 0x3b6   : > { %v1995_v23 = vmul.f32 %v3925_v47, %v1994_v10  ;;  %v2155_v42 = vpack.c.bf16 %v5293_v44, %v5289_v31  ;;  %v1992_v15 = vsel %vm1991_vm6, %v3923_v63, %v1988_v4 }
 0x3b7   : > { %v1868_v16 = vsub.f32 %v1836_v1, %v1852_v36  ;;  %v2089_v54 = vmul.f32 %v1992_v15, %v1897_v17 }
 0x3b8   : > { %v1996_v5 = vmul.f32 0.5, %v1995_v23  ;;  %2249 = vmatmul.bf16.gmra.mxu3 %v2155_v42  ;;  %v6120_v42 = vmax.f32 %v4563_v40, 0.0 }
 0x3b9   : > { %v1884_v59 = vmax.f32 %v1868_v16, 0.0  ;;  %v2108_v33 = vmul.f32 %v5199_v55, %v2089_v54 }
 0x3ba   : > { %v1997_v32 = vsub.f32 1.5, %v1996_v5  ;;  %v1752_v9 = vpop.xlane.xlu0 %1751  ;;  %v6121_v5 = vmax.f32 %v4573_v3, 0.0 }
 0x3bb   : > { %v3927_v24 = vpop.eup %3926  ;;  %v5303_v48 = vmul.f32 %v1752_v9, %v4394_v20  ;;  %v1916_v63 = vadd.f32 1e-05, %v1884_v59  ;;  %v2127_v6 = vadd.f32 %v5207_v22, %v2108_v33 }
 0x3bc   : > { %v1998_v45 = vmul.f32 %v3925_v47, %v1997_v32  ;;  %v2004_v13 = vmul.f32 %v3927_v24, %v1915_v50  ;;  %v1816_v25 = vpop.xlane.xlu2 %1815  ;;  %vm2010_vm10 = vweird.f32 %v3927_v24 }
 0x3bd   : > { %v1853_v18 = vmul.f32 %v5303_v48, %v5303_v48  ;;  %v1837_v8 = vmul.f32 %v1816_v25, %v4394_v20  ;;  %3928 = vrsqrt.f32 %v1916_v63  ;;  %v5319_v15 = vadd.f32 %v2127_v6, %v6120_v42  ;;  %vm2011_vm12 = vmor %vm2009_vm11, %vm2010_vm10 }
 0x3be   : > { %v2002_v28 = vsel %vm2001_vm9, %v3925_v47, %v1998_v45  ;;  %v2005_v52 = vmul.f32 %v3927_v24, %v2004_v13  ;;  %vm2019_vm14 = vweird.f32 %v1916_v63 }
 0x3bf   : > { %v2090_v38 = vmul.f32 %v2002_v28, %v1898_v34  ;;  %v1869_v2 = vsub.f32 %v1837_v8, %v1853_v18  ;;  %v1899_v34 = vsub.f32 %v5099_v39, %v5273_v14 }
 0x3c0   : > { %v2006_v10 = vmul.f32 0.5, %v2005_v52 }
 0x3c1   : > { %v2109_v4 = vmul.f32 %v5199_v55, %v2090_v38  ;;  %v1885_v26 = vmax.f32 %v1869_v2, 0.0 }
 0x3c2   : > { %v2007_v11 = vsub.f32 1.5, %v2006_v10  ;;  %v1754_v57 = vpop.xlane.xlu1 %1753 }
 0x3c3   : > { %v2128_v61 = vadd.f32 %v5207_v22, %v2109_v4  ;;  %v1917_v23 = vadd.f32 1e-05, %v1885_v26  ;;  %v5315_v36 = vmul.f32 %v1754_v57, %v4394_v20  ;;  %v3929_v47 = vpop.eup %3928 }
 0x3c4   : > { %v2008_v17 = vmul.f32 %v3927_v24, %v2007_v11  ;;  %v1818_v1 = vpop.xlane.xlu0 %1817  ;;  %v2014_v54 = vmul.f32 %v3929_v47, %v1916_v63  ;;  %vm2020_vm13 = vweird.f32 %v3929_v47 }
 0x3c5   : > { %v5323_v16 = vadd.f32 %v2128_v61, %v6121_v5  ;;  %3930 = vrsqrt.f32 %v1917_v23  ;;  %v1854_v32 = vmul.f32 %v5315_v36, %v5315_v36  ;;  %v1838_v59 = vmul.f32 %v1818_v1, %v4394_v20  ;;  %vm2021_vm15 = vmor %vm2019_vm14, %vm2020_vm13 }
 0x3c6   : > { %v2015_v45 = vmul.f32 %v3929_v47, %v2014_v54  ;;  %v2012_v40 = vsel %vm2011_vm12, %v3927_v24, %v2008_v17  ;;  %v1900_v24 = vsub.f32 %v5105_v58, %v5285_v37  ;;  %vm2029_vm1 = vweird.f32 %v1917_v23 }
 0x3c7   : > { %v2156_v9 = vpack.c.bf16 %v5323_v16, %v5319_v15  ;;  %v1870_v3 = vsub.f32 %v1838_v59, %v1854_v32  ;;  %v2091_v33 = vmul.f32 %v2012_v40, %v1899_v34  ;;  %v6122_v34 = vmax.f32 %v4642_v53, 0.0 }
 0x3c8   : > { %v2016_v13 = vmul.f32 0.5, %v2015_v45 }
 0x3c9   : > { %2254 = vmatmul.bf16.gmra.mxu3 %v2156_v9  ;;  %v1886_v50 = vmax.f32 %v1870_v3, 0.0  ;;  %v2110_v6 = vmul.f32 %v5199_v55, %v2091_v33 }
 0x3ca   : > { %v1756_v25 = vpop.xlane.xlu1 %1755  ;;  %v2017_v8 = vsub.f32 1.5, %v2016_v13  ;;  %v6123_v13 = vmax.f32 %v4650_v51, 0.0 }
 0x3cb   : > { %v3931_v18 = vpop.eup %3930  ;;  %v5333_v28 = vmul.f32 %v1756_v25, %v4394_v20  ;;  %v1918_v38 = vadd.f32 1e-05, %v1886_v50  ;;  %v2129_v5 = vadd.f32 %v5207_v22, %v2110_v6 }
 0x3cc   : > { %v2024_v52 = vmul.f32 %v3931_v18, %v1917_v23  ;;  %v1820_v2 = vpop.xlane.xlu0 %1819  ;;  %v2018_v10 = vmul.f32 %v3929_v47, %v2017_v8  ;;  %vm2030_vm0 = vweird.f32 %v3931_v18  ;;  %v1901_v23 = vsub.f32 %v5111_v46, %v5303_v48 }
 0x3cd   : > { %v1855_v39 = vmul.f32 %v5333_v28, %v5333_v28  ;;  %v1839_v14 = vmul.f32 %v1820_v2, %v4394_v20  ;;  %3932 = vrsqrt.f32 %v1918_v38  ;;  %vm2031_vm2 = vmor %vm2029_vm1, %vm2030_vm0  ;;  %v5352_v3 = vadd.f32 %v2129_v5, %v6122_v34 }
 0x3ce   : > { %v2025_v4 = vmul.f32 %v3931_v18, %v2024_v52  ;;  %v2022_v11 = vsel %vm2021_vm15, %v3929_v47, %v2018_v10  ;;  %vm2039_vm4 = vweird.f32 %v1918_v38 }
 0x3cf   : > { %v1871_v26 = vsub.f32 %v1839_v14, %v1855_v39  ;;  %v2092_v61 = vmul.f32 %v2022_v11, %v1900_v24  ;;  %v1902_v11 = vsub.f32 %v5117_v12, %v5315_v36 }
 0x3d0   : > { %v2026_v57 = vmul.f32 0.5, %v2025_v4 }
 0x3d1   : > { %v1887_v17 = vmax.f32 %v1871_v26, 0.0  ;;  %v2111_v42 = vmul.f32 %v5199_v55, %v2092_v61 }
 0x3d2   : > { %v2027_v1 = vsub.f32 1.5, %v2026_v57  ;;  %v1758_v63 = vpop.xlane.xlu2 %1757 }
 0x3d3   : > { %v1919_v54 = vadd.f32 1e-05, %v1887_v17  ;;  %v5344_v58 = vmul.f32 %v1758_v63, %v4394_v20  ;;  %v3933_v37 = vpop.eup %3932  ;;  %v2130_v9 = vadd.f32 %v5207_v22, %v2111_v42 }
 0x3d4   : > { %v2028_v32 = vmul.f32 %v3931_v18, %v2027_v1  ;;  %v1822_v59 = vpop.xlane.xlu1 %1821  ;;  %v2034_v47 = vmul.f32 %v3933_v37, %v1918_v38  ;;  %vm2040_vm3 = vweird.f32 %v3933_v37 }
 0x3d5   : > { %3934 = vrsqrt.f32 %v1919_v54  ;;  %v1856_v45 = vmul.f32 %v5344_v58, %v5344_v58  ;;  %v1840_v40 = vmul.f32 %v1822_v59, %v4394_v20  ;;  %v5356_v50 = vadd.f32 %v2130_v9, %v6123_v13  ;;  %vm2041_vm5 = vmor %vm2039_vm4, %vm2040_vm3 }
 0x3d6   : > { %v2035_v25 = vmul.f32 %v3933_v37, %v2034_v47  ;;  %v2032_v33 = vsel %vm2031_vm2, %v3931_v18, %v2028_v32  ;;  %vm2049_vm7 = vweird.f32 %v1919_v54 }
 0x3d7   : > { %v1872_v8 = vsub.f32 %v1840_v40, %v1856_v45  ;;  %v2157_v52 = vpack.c.bf16 %v5356_v50, %v5352_v3  ;;  %v2093_v53 = vmul.f32 %v2032_v33, %v1901_v23  ;;  %v6124_v33 = vmax.f32 %v4688_v19, 0.0 }
 0x3d8   : > { %v2036_v2 = vmul.f32 0.5, %v2035_v25 }
 0x3d9   : > { %v1888_v10 = vmax.f32 %v1872_v8, 0.0  ;;  %2259 = vmatmul.bf16.gmra.mxu3 %v2157_v52  ;;  %v2112_v61 = vmul.f32 %v5199_v55, %v2093_v53  ;;  %v6125_v8 = vmax.f32 %v4682_v0, 0.0 }
 0x3da   : > { %v1760_v39 = vpop.xlane.xlu2 %1759  ;;  %v2037_v24 = vsub.f32 1.5, %v2036_v2 }
 0x3db   : > { %v3935_v14 = vpop.eup %3934  ;;  %v5363_v51 = vmul.f32 %v1760_v39, %v4394_v20  ;;  %v1920_v18 = vadd.f32 1e-05, %v1888_v10  ;;  %v2131_v59 = vadd.f32 %v5207_v22, %v2112_v61 }
 0x3dc   : > { %v2044_v4 = vmul.f32 %v3935_v14, %v1919_v54  ;;  %v1824_v6 = vpop.xlane.xlu1 %1823  ;;  %v2038_v26 = vmul.f32 %v3933_v37, %v2037_v24  ;;  %vm2050_vm6 = vweird.f32 %v3935_v14  ;;  %v1903_v54 = vsub.f32 %v5126_v21, %v5333_v28 }
 0x3dd   : > { %v1857_v46 = vmul.f32 %v5363_v51, %v5363_v51  ;;  %v1841_v48 = vmul.f32 %v1824_v6, %v4394_v20  ;;  %3936 = vrsqrt.f32 %v1920_v18  ;;  %vm2051_vm8 = vmor %vm2049_vm7, %vm2050_vm6  ;;  %v5382_v23 = vadd.f32 %v2131_v59, %v6124_v33 }
 0x3de   : > { %v2045_v57 = vmul.f32 %v3935_v14, %v2044_v4  ;;  %v2042_v1 = vsel %vm2041_vm5, %v3933_v37, %v2038_v26  ;;  %vm2059_vm10 = vweird.f32 %v1920_v18 }
 0x3df   : > { %v1873_v17 = vsub.f32 %v1841_v48, %v1857_v46  ;;  %v2094_v42 = vmul.f32 %v2042_v1, %v1902_v11 }
 0x3e0   : > { %v2046_v63 = vmul.f32 0.5, %v2045_v57 }
 0x3e1   : > { %v1889_v5 = vmax.f32 %v1873_v17, 0.0  ;;  %v2113_v38 = vmul.f32 %v5199_v55, %v2094_v42 }
 0x3e2   : > { %v2047_v32 = vsub.f32 1.5, %v2046_v63  ;;  %v1762_v47 = vpop.xlane.xlu0 %1761 }
 0x3e3   : > { %v1921_v9 = vadd.f32 1e-05, %v1889_v5  ;;  %v3937_v45 = vpop.eup %3936  ;;  %v5374_v36 = vmul.f32 %v1762_v47, %v4394_v20  ;;  %v2132_v40 = vadd.f32 %v5207_v22, %v2113_v38  ;;  %v6127_v38 = vmax.f32 %v4694_v62, 0.0 }
 0x3e4   : > { %v2048_v12 = vmul.f32 %v3935_v14, %v2047_v32  ;;  %v2054_v37 = vmul.f32 %v3937_v45, %v1920_v18  ;;  %v1826_v34 = vpop.xlane.xlu2 %1825  ;;  %vm2060_vm9 = vweird.f32 %v3937_v45 }
 0x3e5   : > { %3938 = vrsqrt.f32 %v1921_v9  ;;  %v1858_v13 = vmul.f32 %v5374_v36, %v5374_v36  ;;  %v1842_v25 = vmul.f32 %v1826_v34, %v4394_v20  ;;  %v5386_v52 = vadd.f32 %v2132_v40, %v6125_v8  ;;  %vm2061_vm11 = vmor %vm2059_vm10, %vm2060_vm9 }
 0x3e6   : > { %v2055_v2 = vmul.f32 %v3937_v45, %v2054_v37  ;;  %v2052_v10 = vsel %vm2051_vm8, %v3935_v14, %v2048_v12  ;;  %v1904_v14 = vsub.f32 %v5138_v35, %v5344_v58  ;;  %vm2069_vm13 = vweird.f32 %v1921_v9 }
 0x3e7   : > { %v1874_v39 = vsub.f32 %v1842_v25, %v1858_v13  ;;  %v2158_v53 = vpack.c.bf16 %v5386_v52, %v5382_v23  ;;  %v2095_v6 = vmul.f32 %v2052_v10, %v1903_v54  ;;  %v6126_v58 = vmax.f32 %v4702_v49, 0.0 }
 0x3e8   : > { %v2056_v24 = vmul.f32 0.5, %v2055_v2  ;;  %v1905_v12 = vsub.f32 %v5153_v41, %v5363_v51  ;;  %v1906_v62 = vsub.f32 %v5173_v43, %v5374_v36  ;;  %v6128_v2 = vmax.f32 %v4726_v60, 0.0 }
 0x3e9   : > { %v1890_v4 = vmax.f32 %v1874_v39, 0.0  ;;  %2264 = vmatmul.bf16.gmra.mxu3 %v2158_v53  ;;  %v2114_v28 = vmul.f32 %v5199_v55, %v2095_v6  ;;  %v6129_v54 = vmax.f32 %v4723_v27, 0.0 }
 0x3ea   : > { %v2057_v26 = vsub.f32 1.5, %v2056_v24 }
 0x3eb   : > { %v3939_v19 = vpop.eup %3938  ;;  %v1922_v0 = vadd.f32 1e-05, %v1890_v4  ;;  %v2133_v63 = vadd.f32 %v5207_v22, %v2114_v28 }
 0x3ec   : > { %v2064_v46 = vmul.f32 %v3939_v19, %v1921_v9  ;;  %v2058_v48 = vmul.f32 %v3937_v45, %v2057_v26  ;;  %vm2070_vm12 = vweird.f32 %v3939_v19 }
 0x3ed   : > { %3940 = vrsqrt.f32 %v1922_v0  ;;  %vm2071_vm14 = vmor %vm2069_vm13, %vm2070_vm12  ;;  %v5400_v32 = vadd.f32 %v2133_v63, %v6126_v58  ;;  %vm2079_vm0 = vweird.f32 %v1922_v0  ;;  %v3746_v63 = vld [vmem:[%s6075_s9 + $0x78] sm:$0xff] }
 0x3ee   : > { %v2065_v21 = vmul.f32 %v3939_v19, %v2064_v46  ;;  %v2062_v11 = vsel %vm2061_vm11, %v3937_v45, %v2058_v48  ;;  %2784 = vmatpush.bf16.msrb.mxu0 %v3746_v63 }
 0x3ef   : > { %v2096_v61 = vmul.f32 %v2062_v11, %v1904_v14 }
 0x3f0   : > { %v2066_v57 = vmul.f32 0.5, %v2065_v21 }
 0x3f1   : > { %v2115_v1 = vmul.f32 %v5199_v55, %v2096_v61 }
 0x3f2   : > { %v2067_v17 = vsub.f32 1.5, %v2066_v57 }
 0x3f3   : > { %v3941_v42 = vpop.eup %3940  ;;  %v2134_v18 = vadd.f32 %v5207_v22, %v2115_v1 }
 0x3f4   : > { %v2068_v5 = vmul.f32 %v3939_v19, %v2067_v17  ;;  %v2074_v35 = vmul.f32 %v3941_v42, %v1922_v0  ;;  %vm2080_vm15 = vweird.f32 %v3941_v42 }
 0x3f5   : > { %v5404_v59 = vadd.f32 %v2134_v18, %v6127_v38  ;;  %vm2081_vm1 = vmor %vm2079_vm0, %vm2080_vm15 }
 0x3f6   : > { %v2072_v47 = vsel %vm2071_vm14, %v3939_v19, %v2068_v5  ;;  %v2075_v45 = vmul.f32 %v3941_v42, %v2074_v35  ;;  %v3745_v35 = vld [vmem:[%s6075_s9 + $0x70] sm:$0xff] }
 0x3f7   : > { %v2159_v40 = vpack.c.bf16 %v5404_v59, %v5400_v32  ;;  %v2097_v9 = vmul.f32 %v2072_v47, %v1905_v12  ;;  %2785 = vmatpush.bf16.msrb.mxu0 %v3745_v35 }
 0x3f8   : > { %v2076_v37 = vmul.f32 0.5, %v2075_v45 }
 0x3f9   : > { %2269 = vmatmul.bf16.gmra.mxu3 %v2159_v40  ;;  %v2116_v13 = vmul.f32 %v5199_v55, %v2097_v9  ;;  %v3744_v40 = vld [vmem:[%s6075_s9 + $0x68] sm:$0xff] }
 0x3fa   : > { %v2077_v34 = vsub.f32 1.5, %v2076_v37 }
 0x3fb   : > { %v2135_v51 = vadd.f32 %v5207_v22, %v2116_v13  ;;  %2786 = vmatpush.bf16.msrb.mxu0 %v3744_v40 }
 0x3fc   : > { %v2078_v49 = vmul.f32 %v3941_v42, %v2077_v34 }
 0x3fd   : > { %v5418_v10 = vadd.f32 %v2135_v51, %v6128_v2 }
 0x3fe   : > { %v2082_v25 = vsel %vm2081_vm1, %v3941_v42, %v2078_v49 }
 0x3ff   : > { %v2098_v33 = vmul.f32 %v2082_v25, %v1906_v62 }
 0x401   : > { %v2117_v41 = vmul.f32 %v5199_v55, %v2098_v33  ;;  %v5429_v55 = vld [vmem:[%s6072_s6 + $0x1] ss:$0 sm:$0xff] }
 0x403   : > { %v2136_v8 = vadd.f32 %v5207_v22, %v2117_v41 }
 0x405   : > { %v5422_v39 = vadd.f32 %v2136_v8, %v6129_v54  ;;  %v3743_v54 = vld [vmem:[%s6075_s9 + $0x60] sm:$0xff] }
 0x406   : > { %2787 = vmatpush.bf16.msrb.mxu0 %v3743_v54 }
 0x407   : > { %v2160_v43 = vpack.c.bf16 %v5422_v39, %v5418_v10 }
 0x409   : > { %2274 = vmatmul.bf16.gmra.mxu3 %v2160_v43 }
 0x415   : > { %v2240_v36 = vpop.f32.mrf.mxu3 }
 0x416   : > { %v5432_v22 = vadd.f32 %v5429_v55, %v2240_v36 }
 0x418   : > { %2284 = vadd.xlane.f32.xlu0 %v5432_v22  ;;  %v2332_v27 = vmul.f32 %v5432_v22, %v5432_v22 }
 0x41a   : > { %2348 = vadd.xlane.f32.xlu2 %v2332_v27 }
 0x41d   : > { %v2242_v60 = vpop.f32.mrf.mxu3 }
 0x41e   : > { %v5438_v53 = vadd.f32 %v5429_v55, %v2242_v60  ;;  %v3742_v60 = vld [vmem:[%s6075_s9 + $0x58] sm:$0xff] }
 0x41f   : > { %2788 = vmatpush.bf16.msrb.mxu0 %v3742_v60 }
 0x420   : > { %2286 = vadd.xlane.f32.xlu1 %v5438_v53  ;;  %v2333_v24 = vmul.f32 %v5438_v53, %v5438_v53 }
 0x422   : > { %2350 = vadd.xlane.f32.xlu0 %v2333_v24 }
 0x425   : > { %v2245_v4 = vpop.f32.mrf.mxu3 }
 0x426   : > { %v5444_v6 = vadd.f32 %v5429_v55, %v2245_v4 }
 0x428   : > { %2288 = vadd.xlane.f32.xlu1 %v5444_v6  ;;  %v2334_v19 = vmul.f32 %v5444_v6, %v5444_v6 }
 0x42a   : > { %2352 = vadd.xlane.f32.xlu0 %v2334_v19 }
 0x42d   : > { %v2247_v26 = vpop.f32.mrf.mxu3 }
 0x42e   : > { %v5450_v46 = vadd.f32 %v5429_v55, %v2247_v26 }
 0x430   : > { %2290 = vadd.xlane.f32.xlu2 %v5450_v46  ;;  %v2335_v0 = vmul.f32 %v5450_v46, %v5450_v46 }
 0x432   : > { %2354 = vadd.xlane.f32.xlu1 %v2335_v0 }
 0x43b   : > { %v2250_v48 = vpop.f32.mrf.mxu3 }
 0x43c   : > { %v5456_v14 = vadd.f32 %v5429_v55, %v2250_v48 }
 0x43e   : > { %2292 = vadd.xlane.f32.xlu2 %v5456_v14  ;;  %v2336_v21 = vmul.f32 %v5456_v14, %v5456_v14 }
 0x440   : > { %2356 = vadd.xlane.f32.xlu1 %v2336_v21 }
 0x443   : > { %v2252_v28 = vpop.f32.mrf.mxu3 }
 0x444   : > { %v5462_v11 = vadd.f32 %v5429_v55, %v2252_v28  ;;  %v3741_v28 = vld [vmem:[%s6075_s9 + $0x50] sm:$0xff] }
 0x445   : > { %2789 = vmatpush.bf16.msrb.mxu0 %v3741_v28 }
 0x446   : > { %2294 = vadd.xlane.f32.xlu0 %v5462_v11  ;;  %v2337_v57 = vmul.f32 %v5462_v11, %v5462_v11 }
 0x448   : > { %2358 = vadd.xlane.f32.xlu2 %v2337_v57 }
 0x44c   : > { %v2255_v61 = vpop.f32.mrf.mxu3 }
 0x44d   : > { %v5468_v17 = vadd.f32 %v5429_v55, %v2255_v61 }
 0x44f   : > { %2296 = vadd.xlane.f32.xlu0 %v5468_v17  ;;  %v2338_v1 = vmul.f32 %v5468_v17, %v5468_v17 }
 0x451   : > { %2360 = vadd.xlane.f32.xlu2 %v2338_v1 }
 0x454   : > { %v2257_v42 = vpop.f32.mrf.mxu3 }
 0x455   : > { %v5477_v5 = vadd.f32 %v5429_v55, %v2257_v42  ;;  %v3740_v42 = vld [vmem:[%s6075_s9 + $0x48] sm:$0xff] }
 0x456   : > { %2790 = vmatpush.bf16.msrb.mxu0 %v3740_v42 }
 0x457   : > { %2298 = vadd.xlane.f32.xlu1 %v5477_v5  ;;  %v2339_v18 = vmul.f32 %v5477_v5, %v5477_v5 }
 0x459   : > { %2362 = vadd.xlane.f32.xlu0 %v2339_v18 }
 0x45c   : > { %v2260_v58 = vpop.f32.mrf.mxu3 }
 0x45d   : > { %v5486_v38 = vadd.f32 %v5429_v55, %v2260_v58 }
 0x45f   : > { %2300 = vadd.xlane.f32.xlu1 %v5486_v38  ;;  %v2340_v47 = vmul.f32 %v5486_v38, %v5486_v38 }
 0x461   : > { %2364 = vadd.xlane.f32.xlu0 %v2340_v47 }
 0x464   : > { %v2262_v45 = vpop.f32.mrf.mxu3 }
 0x465   : > { %v5492_v12 = vadd.f32 %v5429_v55, %v2262_v45 }
 0x467   : > { %2302 = vadd.xlane.f32.xlu2 %v5492_v12  ;;  %v2341_v37 = vmul.f32 %v5492_v12, %v5492_v12 }
 0x469   : > { %2366 = vadd.xlane.f32.xlu1 %v2341_v37  ;;  %v3739_v37 = vld [vmem:[%s6075_s9 + $0x40] sm:$0xff] }
 0x46a   : > { %2791 = vmatpush.bf16.msrb.mxu0 %v3739_v37 }
 0x46c   : > { %v2265_v9 = vpop.f32.mrf.mxu3 }
 0x46d   : > { %v5501_v34 = vadd.f32 %v5429_v55, %v2265_v9 }
 0x46f   : > { %2304 = vadd.xlane.f32.xlu2 %v5501_v34  ;;  %v2342_v49 = vmul.f32 %v5501_v34, %v5501_v34 }
 0x471   : > { %2368 = vadd.xlane.f32.xlu1 %v2342_v49 }
 0x474   : > { %v2267_v62 = vpop.f32.mrf.mxu3 }
 0x475   : > { %v5507_v13 = vadd.f32 %v5429_v55, %v2267_v62 }
 0x477   : > { %2306 = vadd.xlane.f32.xlu0 %v5507_v13  ;;  %v2343_v25 = vmul.f32 %v5507_v13, %v5507_v13 }
 0x479   : > { %2370 = vadd.xlane.f32.xlu2 %v2343_v25 }
 0x47c   : > { %v2270_v33 = vpop.f32.mrf.mxu3 }
 0x47d   : > { %v5513_v41 = vadd.f32 %v5429_v55, %v2270_v33 }
 0x47f   : > { %2308 = vadd.xlane.f32.xlu0 %v5513_v41  ;;  %v2344_v51 = vmul.f32 %v5513_v41, %v5513_v41 }
 0x481   : > { %2372 = vadd.xlane.f32.xlu2 %v2344_v51 }
 0x484   : > { %v2272_v8 = vpop.f32.mrf.mxu3 }
 0x485   : > { %v5519_v2 = vadd.f32 %v5429_v55, %v2272_v8 }
 0x487   : > { %2310 = vadd.xlane.f32.xlu1 %v5519_v2  ;;  %v2345_v43 = vmul.f32 %v5519_v2, %v5519_v2 }
 0x489   : > { %2374 = vadd.xlane.f32.xlu0 %v2345_v43 }
 0x48b   : > { %v2285_v36 = vpop.xlane.xlu0 %2284 }
 0x48c   : > { %v5528_v27 = vmul.f32 %v2285_v36, %v4394_v20  ;;  %v2275_v24 = vpop.f32.mrf.mxu3 }
 0x48d   : > { %v2349_v4 = vpop.xlane.xlu2 %2348  ;;  %v5536_v26 = vadd.f32 %v5429_v55, %v2275_v24 }
 0x48e   : > { %v2396_v19 = vmul.f32 %v5528_v27, %v5528_v27  ;;  %v2380_v0 = vmul.f32 %v2349_v4, %v4394_v20 }
 0x48f   : > { %2312 = vadd.xlane.f32.xlu1 %v5536_v26  ;;  %v2346_v21 = vmul.f32 %v5536_v26, %v5536_v26 }
 0x490   : > { %v2412_v48 = vsub.f32 %v2380_v0, %v2396_v19 }
 0x491   : > { %2376 = vadd.xlane.f32.xlu0 %v2346_v21 }
 0x492   : > { %v2428_v57 = vmax.f32 %v2412_v48, 0.0 }
 0x493   : > { %v2287_v61 = vpop.xlane.xlu1 %2286 }
 0x494   : > { %v2460_v1 = vadd.f32 1e-05, %v2428_v57  ;;  %v5546_v63 = vmul.f32 %v2287_v61, %v4394_v20  ;;  %v2277_v18 = vpop.f32.mrf.mxu3 }
 0x495   : > { %v2351_v35 = vpop.xlane.xlu0 %2350  ;;  %v5552_v58 = vadd.f32 %v5429_v55, %v2277_v18 }
 0x496   : > { %3942 = vrsqrt.f32 %v2460_v1  ;;  %v2397_v47 = vmul.f32 %v5546_v63, %v5546_v63  ;;  %v2381_v45 = vmul.f32 %v2351_v35, %v4394_v20  ;;  %vm2482_vm3 = vweird.f32 %v2460_v1 }
 0x497   : > { %2314 = vadd.xlane.f32.xlu2 %v5552_v58  ;;  %v2347_v40 = vmul.f32 %v5552_v58, %v5552_v58 }
 0x498   : > { %v2413_v9 = vsub.f32 %v2381_v45, %v2397_v47 }
 0x499   : > { %2378 = vadd.xlane.f32.xlu1 %v2347_v40  ;;  %v2444_v40 = vsub.f32 %v5432_v22, %v5528_v27 }
 0x49a   : > { %v2429_v55 = vmax.f32 %v2413_v9, 0.0 }
 0x49b   : > { %v2289_v62 = vpop.xlane.xlu1 %2288 }
 0x49c   : > { %v3943_v49 = vpop.eup %3942  ;;  %v2461_v33 = vadd.f32 1e-05, %v2429_v55  ;;  %v5564_v51 = vmul.f32 %v2289_v62, %v4394_v20 }
 0x49d   : > { %v2477_v25 = vmul.f32 %v3943_v49, %v2460_v1  ;;  %v2353_v8 = vpop.xlane.xlu0 %2352  ;;  %vm2483_vm2 = vweird.f32 %v3943_v49  ;;  %v5580_v1 = vld [vmem:[%s6073_s7 + $0x1] ss:$0 sm:$0xff] }
 0x49e   : > { %3944 = vrsqrt.f32 %v2461_v33  ;;  %v2398_v43 = vmul.f32 %v5564_v51, %v5564_v51  ;;  %v2382_v36 = vmul.f32 %v2353_v8, %v4394_v20  ;;  %vm2484_vm4 = vmor %vm2482_vm3, %vm2483_vm2  ;;  %vm2492_vm6 = vweird.f32 %v2461_v33 }
 0x49f   : > { %v2478_v54 = vmul.f32 %v3943_v49, %v2477_v25 }
 0x4a0   : > { %v2414_v24 = vsub.f32 %v2382_v36, %v2398_v43  ;;  %v5588_v36 = vld [vmem:[%s6074_s8 + $0x1] ss:$0 sm:$0xff] }
 0x4a1   : > { %v2479_v60 = vmul.f32 0.5, %v2478_v54 }
 0x4a2   : > { %v2430_v19 = vmax.f32 %v2414_v24, 0.0 }
 0x4a3   : > { %v2480_v4 = vsub.f32 1.5, %v2479_v60  ;;  %v2291_v0 = vpop.xlane.xlu2 %2290 }
 0x4a4   : > { %v3945_v48 = vpop.eup %3944  ;;  %v5570_v28 = vmul.f32 %v2291_v0, %v4394_v20  ;;  %v2462_v61 = vadd.f32 1e-05, %v2430_v19 }
 0x4a5   : > { %v2481_v21 = vmul.f32 %v3943_v49, %v2480_v4  ;;  %v2487_v57 = vmul.f32 %v3945_v48, %v2461_v33  ;;  %v2355_v42 = vpop.xlane.xlu1 %2354  ;;  %vm2493_vm5 = vweird.f32 %v3945_v48 }
 0x4a6   : > { %v2399_v18 = vmul.f32 %v5570_v28, %v5570_v28  ;;  %v2383_v35 = vmul.f32 %v2355_v42, %v4394_v20  ;;  %3946 = vrsqrt.f32 %v2462_v61  ;;  %vm2494_vm7 = vmor %vm2492_vm6, %vm2493_vm5  ;;  %vm2502_vm9 = vweird.f32 %v2462_v61 }
 0x4a7   : > { %v2485_v47 = vsel %vm2484_vm4, %v3943_v49, %v2481_v21  ;;  %v2488_v45 = vmul.f32 %v3945_v48, %v2487_v57  ;;  %v2445_v49 = vsub.f32 %v5438_v53, %v5546_v63 }
 0x4a8   : > { %v2415_v37 = vsub.f32 %v2383_v35, %v2399_v18  ;;  %v2636_v62 = vmul.f32 %v2485_v47, %v2444_v40 }
 0x4a9   : > { %v2489_v9 = vmul.f32 0.5, %v2488_v45 }
 0x4aa   : > { %v2431_v55 = vmax.f32 %v2415_v37, 0.0  ;;  %v2655_v27 = vmul.f32 %v5580_v1, %v2636_v62 }
 0x4ab   : > { %v2490_v25 = vsub.f32 1.5, %v2489_v9 }
 0x4ac   : > { %v2463_v8 = vadd.f32 1e-05, %v2431_v55  ;;  %v3947_v54 = vpop.eup %3946  ;;  %v2674_v63 = vadd.f32 %v5588_v36, %v2655_v27 }
 0x4ad   : > { %v2491_v43 = vmul.f32 %v3945_v48, %v2490_v25  ;;  %v2497_v22 = vmul.f32 %v3947_v54, %v2462_v61  ;;  %vm2503_vm8 = vweird.f32 %v3947_v54  ;;  %v2446_v25 = vsub.f32 %v5444_v6, %v5564_v51 }
 0x4ae   : > { %3948 = vrsqrt.f32 %v2463_v8  ;;  %v2690_v37 = vmax.f32 %v2674_v63, 0.0  ;;  %vm2504_vm10 = vmor %vm2502_vm9, %vm2503_vm8  ;;  %vm2512_vm12 = vweird.f32 %v2463_v8  ;;  %v2447_v51 = vsub.f32 %v5450_v46, %v5570_v28 }
 0x4af   : > { %v2495_v60 = vsel %vm2494_vm7, %v3945_v48, %v2491_v43  ;;  %v2498_v24 = vmul.f32 %v3947_v54, %v2497_v22 }
 0x4b0   : > { %v2637_v19 = vmul.f32 %v2495_v60, %v2445_v49 }
 0x4b1   : > { %v2293_v4 = vpop.xlane.xlu2 %2292  ;;  %v2499_v33 = vmul.f32 0.5, %v2498_v24 }
 0x4b2   : > { %v5591_v0 = vmul.f32 %v2293_v4, %v4394_v20  ;;  %v2656_v53 = vmul.f32 %v5580_v1, %v2637_v19 }
 0x4b3   : > { %v2357_v21 = vpop.xlane.xlu1 %2356  ;;  %v2500_v35 = vsub.f32 1.5, %v2499_v33 }
 0x4b4   : > { %v2400_v57 = vmul.f32 %v5591_v0, %v5591_v0  ;;  %v2384_v42 = vmul.f32 %v2357_v21, %v4394_v20  ;;  %v3949_v18 = vpop.eup %3948  ;;  %v2675_v48 = vadd.f32 %v5588_v36, %v2656_v53 }
 0x4b5   : > { %v2507_v47 = vmul.f32 %v3949_v18, %v2463_v8  ;;  %v2501_v40 = vmul.f32 %v3947_v54, %v2500_v35  ;;  %vm2513_vm11 = vweird.f32 %v3949_v18 }
 0x4b6   : > { %v2416_v45 = vsub.f32 %v2384_v42, %v2400_v57  ;;  %v2691_v9 = vmax.f32 %v2675_v48, 0.0  ;;  %vm2514_vm13 = vmor %vm2512_vm12, %vm2513_vm11 }
 0x4b7   : > { %v2508_v55 = vmul.f32 %v3949_v18, %v2507_v47  ;;  %v2505_v22 = vsel %vm2504_vm10, %v3947_v54, %v2501_v40 }
 0x4b8   : > { %v2432_v62 = vmax.f32 %v2416_v45, 0.0  ;;  %v2706_v49 = vpack.c.bf16 %v2691_v9, %v2690_v37  ;;  %v2638_v19 = vmul.f32 %v2505_v22, %v2446_v25 }
 0x4b9   : > { %v2295_v43 = vpop.xlane.xlu0 %2294  ;;  %v2509_v27 = vmul.f32 0.5, %v2508_v55 }
 0x4ba   : > { %v2464_v60 = vadd.f32 1e-05, %v2432_v62  ;;  %v5602_v24 = vmul.f32 %v2295_v43, %v4394_v20  ;;  %2792 = vmatmul.bf16.vlgmr.msrb.gmra.mxu0 %v2706_v49  ;;  %v2657_v53 = vmul.f32 %v5580_v1, %v2638_v19 }
 0x4bb   : > { %v2359_v4 = vpop.xlane.xlu2 %2358  ;;  %v2510_v61 = vsub.f32 1.5, %v2509_v27 }
 0x4bc   : > { %3950 = vrsqrt.f32 %v2464_v60  ;;  %v2401_v33 = vmul.f32 %v5602_v24, %v5602_v24  ;;  %v2385_v21 = vmul.f32 %v2359_v4, %v4394_v20  ;;  %v2676_v9 = vadd.f32 %v5588_v36, %v2657_v53 }
 0x4bd   : > { %v2511_v6 = vmul.f32 %v3949_v18, %v2510_v61  ;;  %vm2522_vm15 = vweird.f32 %v2464_v60 }
 0x4be   : > { %v2417_v54 = vsub.f32 %v2385_v21, %v2401_v33  ;;  %v2692_v43 = vmax.f32 %v2676_v9, 0.0 }
 0x4bf   : > { %v2515_v63 = vsel %vm2514_vm13, %v3949_v18, %v2511_v6 }
 0x4c0   : > { %v2433_v57 = vmax.f32 %v2417_v54, 0.0  ;;  %v2639_v35 = vmul.f32 %v2515_v63, %v2447_v51 }
 0x4c2   : > { %v2297_v42 = vpop.xlane.xlu0 %2296  ;;  %v3951_v48 = vpop.eup %3950  ;;  %v2465_v40 = vadd.f32 1e-05, %v2433_v57  ;;  %v2658_v8 = vmul.f32 %v5580_v1, %v2639_v35  ;;  %v2448_v35 = vsub.f32 %v5456_v14, %v5591_v0 }
 0x4c3   : > { %v5611_v47 = vmul.f32 %v2297_v42, %v4394_v20  ;;  %v2517_v45 = vmul.f32 %v3951_v48, %v2464_v60  ;;  %vm2523_vm14 = vweird.f32 %v3951_v48 }
 0x4c4   : > { %v2361_v37 = vpop.xlane.xlu2 %2360  ;;  %3952 = vrsqrt.f32 %v2465_v40  ;;  %v2677_v55 = vadd.f32 %v5588_v36, %v2658_v8  ;;  %vm2524_vm0 = vmor %vm2522_vm15, %vm2523_vm14  ;;  %vm2532_vm2 = vweird.f32 %v2465_v40 }
 0x4c5   : > { %v2402_v46 = vmul.f32 %v5611_v47, %v5611_v47  ;;  %v2386_v28 = vmul.f32 %v2361_v37, %v4394_v20  ;;  %v2518_v18 = vmul.f32 %v3951_v48, %v2517_v45 }
 0x4c6   : > { %v2693_v49 = vmax.f32 %v2677_v55, 0.0 }
 0x4c7   : > { %v2418_v62 = vsub.f32 %v2386_v28, %v2402_v46  ;;  %v2519_v25 = vmul.f32 0.5, %v2518_v18 }
 0x4c8   : > { %v2707_v19 = vpack.c.bf16 %v2693_v49, %v2692_v43 }
 0x4c9   : > { %v2434_v22 = vmax.f32 %v2418_v62, 0.0  ;;  %v2520_v27 = vsub.f32 1.5, %v2519_v25 }
 0x4ca   : > { %v2299_v4 = vpop.xlane.xlu1 %2298  ;;  %v3953_v21 = vpop.eup %3952  ;;  %2797 = vmatmul.bf16.gmra.mxu0 %v2707_v19 }
 0x4cb   : > { %v2466_v61 = vadd.f32 1e-05, %v2434_v22  ;;  %v5620_v33 = vmul.f32 %v2299_v4, %v4394_v20  ;;  %v2521_v6 = vmul.f32 %v3951_v48, %v2520_v27  ;;  %v2527_v54 = vmul.f32 %v3953_v21, %v2465_v40 }
 0x4cc   : > { %v2363_v51 = vpop.xlane.xlu0 %2362  ;;  %vm2533_vm1 = vweird.f32 %v3953_v21 }
 0x4cd   : > { %3954 = vrsqrt.f32 %v2466_v61  ;;  %v2403_v53 = vmul.f32 %v5620_v33, %v5620_v33  ;;  %v2387_v63 = vmul.f32 %v2363_v51, %v4394_v20  ;;  %v2528_v57 = vmul.f32 %v3953_v21, %v2527_v54  ;;  %vm2534_vm3 = vmor %vm2532_vm2, %vm2533_vm1 }
 0x4ce   : > { %v2525_v42 = vsel %vm2524_vm0, %v3951_v48, %v2521_v6  ;;  %v2449_v48 = vsub.f32 %v5462_v11, %v5602_v24  ;;  %vm2542_vm5 = vweird.f32 %v2466_v61 }
 0x4cf   : > { %v2419_v45 = vsub.f32 %v2387_v63, %v2403_v53  ;;  %v2529_v37 = vmul.f32 0.5, %v2528_v57  ;;  %v2640_v9 = vmul.f32 %v2525_v42, %v2448_v35 }
 0x4d1   : > { %v2435_v8 = vmax.f32 %v2419_v45, 0.0  ;;  %v2530_v28 = vsub.f32 1.5, %v2529_v37  ;;  %v2659_v43 = vmul.f32 %v5580_v1, %v2640_v9 }
 0x4d2   : > { %v2301_v55 = vpop.xlane.xlu1 %2300 }
 0x4d3   : > { %v3955_v46 = vpop.eup %3954  ;;  %v2467_v18 = vadd.f32 1e-05, %v2435_v8  ;;  %v2531_v62 = vmul.f32 %v3953_v21, %v2530_v28  ;;  %v5628_v25 = vmul.f32 %v2301_v55, %v4394_v20  ;;  %v2678_v11 = vadd.f32 %v5588_v36, %v2659_v43 }
 0x4d4   : > { %v2537_v60 = vmul.f32 %v3955_v46, %v2466_v61  ;;  %v2365_v0 = vpop.xlane.xlu0 %2364  ;;  %vm2543_vm4 = vweird.f32 %v3955_v46  ;;  %v2450_v55 = vsub.f32 %v5468_v17, %v5611_v47  ;;  %v2451_v17 = vsub.f32 %v5477_v5, %v5620_v33 }
 0x4d5   : > { %3956 = vrsqrt.f32 %v2467_v18  ;;  %v2404_v49 = vmul.f32 %v5628_v25, %v5628_v25  ;;  %v2388_v22 = vmul.f32 %v2365_v0, %v4394_v20  ;;  %v2535_v27 = vsel %vm2534_vm3, %v3953_v21, %v2531_v62  ;;  %vm2544_vm6 = vmor %vm2542_vm5, %vm2543_vm4 }
 0x4d6   : > { %v2538_v14 = vmul.f32 %v3955_v46, %v2537_v60  ;;  %v2641_v40 = vmul.f32 %v2535_v27, %v2449_v48  ;;  %v2694_v37 = vmax.f32 %v2678_v11, 0.0  ;;  %vm2552_vm8 = vweird.f32 %v2467_v18 }
 0x4d7   : > { %v2420_v19 = vsub.f32 %v2388_v22, %v2404_v49 }
 0x4d8   : > { %v2539_v4 = vmul.f32 0.5, %v2538_v14  ;;  %v2660_v51 = vmul.f32 %v5580_v1, %v2641_v40 }
 0x4d9   : > { %v2436_v24 = vmax.f32 %v2420_v19, 0.0 }
 0x4da   : > { %v2540_v6 = vsub.f32 1.5, %v2539_v4  ;;  %v2303_v63 = vpop.xlane.xlu2 %2302  ;;  %v2679_v57 = vadd.f32 %v5588_v36, %v2660_v51 }
 0x4db   : > { %v3957_v54 = vpop.eup %3956  ;;  %v2468_v35 = vadd.f32 1e-05, %v2436_v24  ;;  %v5640_v21 = vmul.f32 %v2303_v63, %v4394_v20 }
 0x4dc   : > { %v2541_v53 = vmul.f32 %v3955_v46, %v2540_v6  ;;  %v2547_v42 = vmul.f32 %v3957_v54, %v2467_v18  ;;  %v2367_v45 = vpop.xlane.xlu1 %2366  ;;  %v2695_v8 = vmax.f32 %v2679_v57, 0.0  ;;  %vm2553_vm7 = vweird.f32 %v3957_v54 }
 0x4dd   : > { %3958 = vrsqrt.f32 %v2468_v35  ;;  %v2405_v28 = vmul.f32 %v5640_v21, %v5640_v21  ;;  %v2389_v61 = vmul.f32 %v2367_v45, %v4394_v20  ;;  %vm2554_vm9 = vmor %vm2552_vm8, %vm2553_vm7  ;;  %vm2562_vm11 = vweird.f32 %v2468_v35 }
 0x4de   : > { %v2548_v9 = vmul.f32 %v3957_v54, %v2547_v42  ;;  %v2545_v60 = vsel %vm2544_vm6, %v3955_v46, %v2541_v53  ;;  %v2708_v62 = vpack.c.bf16 %v2695_v8, %v2694_v37 }
 0x4df   : > { %v2421_v14 = vsub.f32 %v2389_v61, %v2405_v28  ;;  %v2642_v0 = vmul.f32 %v2545_v60, %v2450_v55 }
 0x4e0   : > { %v2549_v48 = vmul.f32 0.5, %v2548_v9  ;;  %2802 = vmatmul.bf16.gmra.mxu0 %v2708_v62 }
 0x4e1   : > { %v2437_v49 = vmax.f32 %v2421_v14, 0.0  ;;  %v2661_v6 = vmul.f32 %v5580_v1, %v2642_v0 }
 0x4e2   : > { %v2550_v43 = vsub.f32 1.5, %v2549_v48  ;;  %v2305_v22 = vpop.xlane.xlu2 %2304 }
 0x4e3   : > { %v3959_v27 = vpop.eup %3958  ;;  %v5648_v40 = vmul.f32 %v2305_v22, %v4394_v20  ;;  %v2469_v46 = vadd.f32 1e-05, %v2437_v49  ;;  %v2680_v5 = vadd.f32 %v5588_v36, %v2661_v6 }
 0x4e4   : > { %v2551_v4 = vmul.f32 %v3957_v54, %v2550_v43  ;;  %v2557_v47 = vmul.f32 %v3959_v27, %v2468_v35  ;;  %v2369_v19 = vpop.xlane.xlu1 %2368  ;;  %vm2563_vm10 = vweird.f32 %v3959_v27 }
 0x4e5   : > { %v2406_v51 = vmul.f32 %v5648_v40, %v5648_v40  ;;  %v2390_v11 = vmul.f32 %v2369_v19, %v4394_v20  ;;  %3960 = vrsqrt.f32 %v2469_v46  ;;  %v2696_v61 = vmax.f32 %v2680_v5, 0.0  ;;  %vm2564_vm12 = vmor %vm2562_vm11, %vm2563_vm10 }
 0x4e6   : > { %v2555_v24 = vsel %vm2554_vm9, %v3957_v54, %v2551_v4  ;;  %v2558_v53 = vmul.f32 %v3959_v27, %v2557_v47  ;;  %v2452_v4 = vsub.f32 %v5486_v38, %v5628_v25  ;;  %vm2572_vm14 = vweird.f32 %v2469_v46 }
 0x4e7   : > { %v2643_v18 = vmul.f32 %v2555_v24, %v2451_v17  ;;  %v2422_v63 = vsub.f32 %v2390_v11, %v2406_v51 }
 0x4e8   : > { %v2559_v57 = vmul.f32 0.5, %v2558_v53 }
 0x4e9   : > { %v2662_v42 = vmul.f32 %v5580_v1, %v2643_v18  ;;  %v2438_v33 = vmax.f32 %v2422_v63, 0.0 }
 0x4ea   : > { %v2560_v45 = vsub.f32 1.5, %v2559_v57  ;;  %v2307_v37 = vpop.xlane.xlu0 %2306 }
 0x4eb   : > { %v2681_v8 = vadd.f32 %v5588_v36, %v2662_v42  ;;  %v2470_v9 = vadd.f32 1e-05, %v2438_v33  ;;  %v5660_v28 = vmul.f32 %v2307_v37, %v4394_v20  ;;  %v3961_v54 = vpop.eup %3960 }
 0x4ec   : > { %v2561_v60 = vmul.f32 %v3959_v27, %v2560_v45  ;;  %v2371_v55 = vpop.xlane.xlu2 %2370  ;;  %v2567_v48 = vmul.f32 %v3961_v54, %v2469_v46  ;;  %vm2573_vm13 = vweird.f32 %v3961_v54 }
 0x4ed   : > { %v2697_v62 = vmax.f32 %v2681_v8, 0.0  ;;  %3962 = vrsqrt.f32 %v2470_v9  ;;  %v2407_v14 = vmul.f32 %v5660_v28, %v5660_v28  ;;  %v2391_v0 = vmul.f32 %v2371_v55, %v4394_v20  ;;  %vm2574_vm15 = vmor %vm2572_vm14, %vm2573_vm13 }
 0x4ee   : > { %v2568_v49 = vmul.f32 %v3961_v54, %v2567_v48  ;;  %v2565_v22 = vsel %vm2564_vm12, %v3959_v27, %v2561_v60  ;;  %v2453_v27 = vsub.f32 %v5492_v12, %v5640_v21  ;;  %vm2582_vm1 = vweird.f32 %v2470_v9 }
 0x4ef   : > { %v2709_v43 = vpack.c.bf16 %v2697_v62, %v2696_v61  ;;  %v2423_v17 = vsub.f32 %v2391_v0, %v2407_v14  ;;  %v2644_v35 = vmul.f32 %v2565_v22, %v2452_v4 }
 0x4f0   : > { %v2569_v47 = vmul.f32 0.5, %v2568_v49 }
 0x4f1   : > { %2807 = vmatmul.bf16.gmra.mxu0 %v2709_v43  ;;  %v2439_v19 = vmax.f32 %v2423_v17, 0.0  ;;  %v2663_v5 = vmul.f32 %v5580_v1, %v2644_v35 }
 0x4f2   : > { %v2309_v6 = vpop.xlane.xlu0 %2308  ;;  %v2570_v11 = vsub.f32 1.5, %v2569_v47 }
 0x4f3   : > { %v3963_v51 = vpop.eup %3962  ;;  %v5668_v24 = vmul.f32 %v2309_v6, %v4394_v20  ;;  %v2471_v18 = vadd.f32 1e-05, %v2439_v19  ;;  %v2682_v62 = vadd.f32 %v5588_v36, %v2663_v5  ;;  %v2454_v6 = vsub.f32 %v5501_v34, %v5648_v40 }
 0x4f4   : > { %v2577_v53 = vmul.f32 %v3963_v51, %v2470_v9  ;;  %v2373_v63 = vpop.xlane.xlu2 %2372  ;;  %v2571_v57 = vmul.f32 %v3961_v54, %v2570_v11  ;;  %vm2583_vm0 = vweird.f32 %v3963_v51 }
 0x4f5   : > { %v2408_v38 = vmul.f32 %v5668_v24, %v5668_v24  ;;  %v2392_v25 = vmul.f32 %v2373_v63, %v4394_v20  ;;  %3964 = vrsqrt.f32 %v2471_v18  ;;  %vm2584_vm2 = vmor %vm2582_vm1, %vm2583_vm0  ;;  %v2698_v4 = vmax.f32 %v2682_v62, 0.0 }
 0x4f6   : > { %v2578_v42 = vmul.f32 %v3963_v51, %v2577_v53  ;;  %v2575_v45 = vsel %vm2574_vm15, %v3961_v54, %v2571_v57  ;;  %vm2592_vm4 = vweird.f32 %v2471_v18 }
 0x4f7   : > { %v2424_v33 = vsub.f32 %v2392_v25, %v2408_v38  ;;  %v2645_v8 = vmul.f32 %v2575_v45, %v2453_v27  ;;  %v2455_v45 = vsub.f32 %v5507_v13, %v5660_v28 }
 0x4f8   : > { %v2579_v37 = vmul.f32 0.5, %v2578_v42 }
 0x4f9   : > { %v2440_v60 = vmax.f32 %v2424_v33, 0.0  ;;  %v2664_v61 = vmul.f32 %v5580_v1, %v2645_v8 }
 0x4fa   : > { %v2580_v55 = vsub.f32 1.5, %v2579_v37  ;;  %v2311_v46 = vpop.xlane.xlu1 %2310 }
 0x4fb   : > { %v2472_v48 = vadd.f32 1e-05, %v2440_v60  ;;  %v5679_v12 = vmul.f32 %v2311_v46, %v4394_v20  ;;  %v3965_v21 = vpop.eup %3964  ;;  %v2683_v43 = vadd.f32 %v5588_v36, %v2664_v61 }
 0x4fc   : > { %v2581_v14 = vmul.f32 %v3963_v51, %v2580_v55  ;;  %v2375_v0 = vpop.xlane.xlu0 %2374  ;;  %v2587_v54 = vmul.f32 %v3965_v21, %v2471_v18  ;;  %vm2593_vm3 = vweird.f32 %v3965_v21 }
 0x4fd   : > { %3966 = vrsqrt.f32 %v2472_v48  ;;  %v2409_v49 = vmul.f32 %v5679_v12, %v5679_v12  ;;  %v2393_v22 = vmul.f32 %v2375_v0, %v4394_v20  ;;  %v2699_v17 = vmax.f32 %v2683_v43, 0.0  ;;  %vm2594_vm5 = vmor %vm2592_vm4, %vm2593_vm3 }
 0x4fe   : > { %v2588_v47 = vmul.f32 %v3965_v21, %v2587_v54  ;;  %v2585_v19 = vsel %vm2584_vm2, %v3963_v51, %v2581_v14  ;;  %vm2602_vm7 = vweird.f32 %v2472_v48 }
 0x4ff   : > { %v2425_v35 = vsub.f32 %v2393_v22, %v2409_v49  ;;  %v2710_v11 = vpack.c.bf16 %v2699_v17, %v2698_v4  ;;  %v2646_v57 = vmul.f32 %v2585_v19, %v2454_v6 }
 0x500   : > { %v2589_v53 = vmul.f32 0.5, %v2588_v47 }
 0x501   : > { %v2441_v63 = vmax.f32 %v2425_v35, 0.0  ;;  %2812 = vmatmul.bf16.gmra.mxu0 %v2710_v11  ;;  %v2665_v8 = vmul.f32 %v5580_v1, %v2646_v57 }
 0x502   : > { %v2313_v9 = vpop.xlane.xlu1 %2312  ;;  %v2590_v25 = vsub.f32 1.5, %v2589_v53  ;;  %v2456_v53 = vsub.f32 %v5513_v41, %v5668_v24 }
 0x503   : > { %v3967_v38 = vpop.eup %3966  ;;  %v5688_v27 = vmul.f32 %v2313_v9, %v4394_v20  ;;  %v2473_v5 = vadd.f32 1e-05, %v2441_v63  ;;  %v2684_v43 = vadd.f32 %v5588_v36, %v2665_v8 }
 0x504   : > { %v2597_v42 = vmul.f32 %v3967_v38, %v2472_v48  ;;  %v2377_v33 = vpop.xlane.xlu0 %2376  ;;  %v2591_v51 = vmul.f32 %v3965_v21, %v2590_v25  ;;  %vm2603_vm6 = vweird.f32 %v3967_v38 }
 0x505   : > { %v2410_v34 = vmul.f32 %v5688_v27, %v5688_v27  ;;  %v2394_v40 = vmul.f32 %v2377_v33, %v4394_v20  ;;  %3968 = vrsqrt.f32 %v2473_v5  ;;  %vm2604_vm8 = vmor %vm2602_vm7, %vm2603_vm6  ;;  %v2700_v19 = vmax.f32 %v2684_v43, 0.0 }
 0x506   : > { %v2598_v37 = vmul.f32 %v3967_v38, %v2597_v42  ;;  %v2595_v55 = vsel %vm2594_vm5, %v3965_v21, %v2591_v51  ;;  %vm2612_vm10 = vweird.f32 %v2473_v5  ;;  %v2458_v43 = vsub.f32 %v5536_v26, %v5688_v27 }
 0x507   : > { %v2426_v60 = vsub.f32 %v2394_v40, %v2410_v34  ;;  %v2647_v61 = vmul.f32 %v2595_v55, %v2455_v45  ;;  %v2457_v45 = vsub.f32 %v5519_v2, %v5679_v12 }
 0x508   : > { %v2599_v46 = vmul.f32 0.5, %v2598_v37 }
 0x509   : > { %v2442_v62 = vmax.f32 %v2426_v60, 0.0  ;;  %v2666_v0 = vmul.f32 %v5580_v1, %v2647_v61 }
 0x50a   : > { %v2600_v14 = vsub.f32 1.5, %v2599_v46  ;;  %v2315_v18 = vpop.xlane.xlu2 %2314 }
 0x50b   : > { %v2474_v54 = vadd.f32 1e-05, %v2442_v62  ;;  %v5699_v13 = vmul.f32 %v2315_v18, %v4394_v20  ;;  %v3969_v28 = vpop.eup %3968  ;;  %v2685_v4 = vadd.f32 %v5588_v36, %v2666_v0 }
 0x50c   : > { %v2601_v49 = vmul.f32 %v3967_v38, %v2600_v14  ;;  %v2379_v22 = vpop.xlane.xlu1 %2378  ;;  %v2607_v21 = vmul.f32 %v3969_v28, %v2473_v5  ;;  %vm2613_vm9 = vweird.f32 %v3969_v28 }
 0x50d   : > { %3970 = vrsqrt.f32 %v2474_v54  ;;  %v2411_v17 = vmul.f32 %v5699_v13, %v5699_v13  ;;  %v2395_v47 = vmul.f32 %v2379_v22, %v4394_v20  ;;  %v2701_v6 = vmax.f32 %v2685_v4, 0.0  ;;  %vm2614_vm11 = vmor %vm2612_vm10, %vm2613_vm9 }
 0x50e   : > { %v2608_v35 = vmul.f32 %v3969_v28, %v2607_v21  ;;  %v2605_v11 = vsel %vm2604_vm8, %v3967_v38, %v2601_v49  ;;  %vm2622_vm13 = vweird.f32 %v2474_v54 }
 0x50f   : > { %v2427_v63 = vsub.f32 %v2395_v47, %v2411_v17  ;;  %v2711_v9 = vpack.c.bf16 %v2701_v6, %v2700_v19  ;;  %v2648_v48 = vmul.f32 %v2605_v11, %v2456_v53 }
 0x510   : > { %v2609_v57 = vmul.f32 0.5, %v2608_v35 }
 0x511   : > { %v2443_v25 = vmax.f32 %v2427_v63, 0.0  ;;  %2817 = vmatmul.bf16.gmra.mxu0 %v2711_v9  ;;  %v2667_v41 = vmul.f32 %v5580_v1, %v2648_v48  ;;  %v5724_v63 = vld [vmem:[%s6076_s10 + $0x1] ss:$0 sm:$0xff] }
 0x512   : > { %v2610_v33 = vsub.f32 1.5, %v2609_v57 }
 0x513   : > { %v3971_v42 = vpop.eup %3970  ;;  %v2475_v34 = vadd.f32 1e-05, %v2443_v25  ;;  %v2686_v46 = vadd.f32 %v5588_v36, %v2667_v41 }
 0x514   : > { %v2617_v51 = vmul.f32 %v3971_v42, %v2474_v54  ;;  %v2611_v40 = vmul.f32 %v3969_v28, %v2610_v33  ;;  %vm2623_vm12 = vweird.f32 %v3971_v42  ;;  %v2459_v54 = vsub.f32 %v5552_v58, %v5699_v13 }
 0x515   : > { %3972 = vrsqrt.f32 %v2475_v34  ;;  %vm2624_vm14 = vmor %vm2622_vm13, %vm2623_vm12  ;;  %v2702_v12 = vmax.f32 %v2686_v46, 0.0  ;;  %vm2632_vm0 = vweird.f32 %v2475_v34 }
 0x516   : > { %v2618_v38 = vmul.f32 %v3971_v42, %v2617_v51  ;;  %v2615_v24 = vsel %vm2614_vm11, %v3969_v28, %v2611_v40 }
 0x517   : > { %v2649_v8 = vmul.f32 %v2615_v24, %v2457_v45 }
 0x518   : > { %v2619_v37 = vmul.f32 0.5, %v2618_v38 }
 0x519   : > { %v2668_v55 = vmul.f32 %v5580_v1, %v2649_v8 }
 0x51a   : > { %v2620_v60 = vsub.f32 1.5, %v2619_v37 }
 0x51b   : > { %v3973_v61 = vpop.eup %3972  ;;  %v2687_v5 = vadd.f32 %v5588_v36, %v2668_v55 }
 0x51c   : > { %v2621_v62 = vmul.f32 %v3971_v42, %v2620_v60  ;;  %v2627_v2 = vmul.f32 %v3973_v61, %v2475_v34  ;;  %vm2633_vm15 = vweird.f32 %v3973_v61 }
 0x51d   : > { %v2703_v14 = vmax.f32 %v2687_v5, 0.0  ;;  %vm2634_vm1 = vmor %vm2632_vm0, %vm2633_vm15 }
 0x51e   : > { %v2625_v18 = vsel %vm2624_vm14, %v3971_v42, %v2621_v62  ;;  %v2628_v0 = vmul.f32 %v3973_v61, %v2627_v2 }
 0x51f   : > { %v2712_v28 = vpack.c.bf16 %v2703_v14, %v2702_v12  ;;  %v2650_v22 = vmul.f32 %v2625_v18, %v2458_v43 }
 0x520   : > { %v2629_v49 = vmul.f32 0.5, %v2628_v0 }
 0x521   : > { %2822 = vmatmul.bf16.gmra.mxu0 %v2712_v28  ;;  %v2669_v17 = vmul.f32 %v5580_v1, %v2650_v22 }
 0x522   : > { %v2630_v4 = vsub.f32 1.5, %v2629_v49 }
 0x523   : > { %v2688_v26 = vadd.f32 %v5588_v36, %v2669_v17 }
 0x524   : > { %v2631_v21 = vmul.f32 %v3973_v61, %v2630_v4 }
 0x525   : > { %v2704_v35 = vmax.f32 %v2688_v26, 0.0  ;;  %v3752_v26 = vld [vmem:[#allocation2 + $0x28] sm:$0xff] }
 0x526   : > { %v2635_v47 = vsel %vm2634_vm1, %v3973_v61, %v2631_v21 }
 0x527   : > { %v2651_v19 = vmul.f32 %v2635_v47, %v2459_v54  ;;  %v3754_v54 = vld [vmem:[#allocation2 + $0x38] sm:$0xff] }
 0x528   : > { %3335 = vmatpush.bf16.msrb.mxu1 %v3754_v54 }
 0x529   : > { %v2670_v6 = vmul.f32 %v5580_v1, %v2651_v19 }
 0x52b   : > { %v2689_v27 = vadd.f32 %v5588_v36, %v2670_v6  ;;  %v3753_v6 = vld [vmem:[#allocation2 + $0x30] sm:$0xff] }
 0x52c   : > { %3336 = vmatpush.bf16.msrb.mxu1 %v3753_v6 }
 0x52d   : > { %v2705_v11 = vmax.f32 %v2689_v27, 0.0 }
 0x52f   : > { %v2713_v53 = vpack.c.bf16 %v2705_v11, %v2704_v35 }
 0x530   : > { %3337 = vmatpush.bf16.msrb.mxu1 %v3752_v26 }
 0x531   : > { %2827 = vmatmul.bf16.gmra.mxu0 %v2713_v53  ;;  %v3751_v53 = vld [vmem:[#allocation2 + $0x20] sm:$0xff] }
 0x534   : > { %3338 = vmatpush.bf16.msrb.mxu1 %v3751_v53 }
 0x537   : > { %v2793_v58 = vpop.f32.mrf.mxu0 }
 0x538   : > { %v5727_v13 = vadd.f32 %v5724_v63, %v2793_v58 }
 0x53a   : > { %2837 = vadd.xlane.f32.xlu2 %v5727_v13  ;;  %v2885_v1 = vmul.f32 %v5727_v13, %v5727_v13 }
 0x53c   : > { %2901 = vadd.xlane.f32.xlu1 %v2885_v1 }
 0x53f   : > { %v2795_v36 = vpop.f32.mrf.mxu0 }
 0x540   : > { %v5733_v9 = vadd.f32 %v5724_v63, %v2795_v36  ;;  %v3750_v36 = vld [vmem:[#allocation2 + $0x18] sm:$0xff] }
 0x541   : > { %3339 = vmatpush.bf16.msrb.mxu1 %v3750_v36 }
 0x542   : > { %2839 = vadd.xlane.f32.xlu0 %v5733_v9  ;;  %v2886_v57 = vmul.f32 %v5733_v9, %v5733_v9 }
 0x544   : > { %2903 = vadd.xlane.f32.xlu2 %v2886_v57 }
 0x547   : > { %v2798_v25 = vpop.f32.mrf.mxu0 }
 0x548   : > { %v5739_v48 = vadd.f32 %v5724_v63, %v2798_v25 }
 0x54a   : > { %2841 = vadd.xlane.f32.xlu0 %v5739_v48  ;;  %v2887_v42 = vmul.f32 %v5739_v48, %v5739_v48 }
 0x54c   : > { %2905 = vadd.xlane.f32.xlu2 %v2887_v42 }
 0x54f   : > { %v2800_v33 = vpop.f32.mrf.mxu0 }
 0x550   : > { %v5745_v51 = vadd.f32 %v5724_v63, %v2800_v33 }
 0x552   : > { %2843 = vadd.xlane.f32.xlu1 %v5745_v51  ;;  %v2888_v34 = vmul.f32 %v5745_v51, %v5745_v51 }
 0x554   : > { %2907 = vadd.xlane.f32.xlu0 %v2888_v34 }
 0x55d   : > { %v2803_v40 = vpop.f32.mrf.mxu0 }
 0x55e   : > { %v5751_v45 = vadd.f32 %v5724_v63, %v2803_v40 }
 0x560   : > { %2845 = vadd.xlane.f32.xlu1 %v5751_v45  ;;  %v2889_v38 = vmul.f32 %v5751_v45, %v5751_v45 }
 0x562   : > { %2909 = vadd.xlane.f32.xlu0 %v2889_v38 }
 0x565   : > { %v2805_v41 = vpop.f32.mrf.mxu0 }
 0x566   : > { %v5757_v24 = vadd.f32 %v5724_v63, %v2805_v41  ;;  %v3749_v41 = vld [vmem:[#allocation2 + $0x10] sm:$0xff] }
 0x567   : > { %3340 = vmatpush.bf16.msrb.mxu1 %v3749_v41 }
 0x568   : > { %2847 = vadd.xlane.f32.xlu2 %v5757_v24  ;;  %v2890_v37 = vmul.f32 %v5757_v24, %v5757_v24 }
 0x56a   : > { %2911 = vadd.xlane.f32.xlu1 %v2890_v37 }
 0x56e   : > { %v2808_v8 = vpop.f32.mrf.mxu0 }
 0x56f   : > { %v5763_v60 = vadd.f32 %v5724_v63, %v2808_v8 }
 0x571   : > { %2849 = vadd.xlane.f32.xlu2 %v5763_v60  ;;  %v2891_v55 = vmul.f32 %v5763_v60, %v5763_v60 }
 0x573   : > { %2913 = vadd.xlane.f32.xlu1 %v2891_v55 }
 0x576   : > { %v2810_v46 = vpop.f32.mrf.mxu0 }
 0x577   : > { %v5769_v61 = vadd.f32 %v5724_v63, %v2810_v46 }
 0x579   : > { %2851 = vadd.xlane.f32.xlu0 %v5769_v61  ;;  %v2892_v62 = vmul.f32 %v5769_v61, %v5769_v61 }
 0x57b   : > { %2915 = vadd.xlane.f32.xlu2 %v2892_v62  ;;  %v3748_v62 = vld [vmem:[#allocation2 + $0x8] sm:$0xff] }
 0x57c   : > { %3341 = vmatpush.bf16.msrb.mxu1 %v3748_v62 }
 0x57e   : > { %v2813_v5 = vpop.f32.mrf.mxu0 }
 0x57f   : > { %v5775_v2 = vadd.f32 %v5724_v63, %v2813_v5 }
 0x581   : > { %2853 = vadd.xlane.f32.xlu0 %v5775_v2  ;;  %v2893_v12 = vmul.f32 %v5775_v2, %v5775_v2 }
 0x583   : > { %2917 = vadd.xlane.f32.xlu2 %v2893_v12 }
 0x586   : > { %v2815_v14 = vpop.f32.mrf.mxu0 }
 0x587   : > { %v5781_v18 = vadd.f32 %v5724_v63, %v2815_v14 }
 0x589   : > { %2855 = vadd.xlane.f32.xlu1 %v5781_v18  ;;  %v2894_v0 = vmul.f32 %v5781_v18, %v5781_v18 }
 0x58b   : > { %2919 = vadd.xlane.f32.xlu0 %v2894_v0 }
 0x58e   : > { %v2818_v43 = vpop.f32.mrf.mxu0 }
 0x58f   : > { %v5787_v28 = vadd.f32 %v5724_v63, %v2818_v43 }
 0x591   : > { %2857 = vadd.xlane.f32.xlu1 %v5787_v28  ;;  %v2895_v49 = vmul.f32 %v5787_v28, %v5787_v28 }
 0x593   : > { %2921 = vadd.xlane.f32.xlu0 %v2895_v49  ;;  %v3747_v49 = vld [vmem:[#allocation2] sm:$0xff] }
 0x594   : > { %3342 = vmatpush.bf16.msrb.mxu1 %v3747_v49 }
 0x596   : > { %v2820_v22 = vpop.f32.mrf.mxu0 }
 0x597   : > { %v5793_v4 = vadd.f32 %v5724_v63, %v2820_v22 }
 0x599   : > { %2859 = vadd.xlane.f32.xlu2 %v5793_v4  ;;  %v2896_v21 = vmul.f32 %v5793_v4, %v5793_v4 }
 0x59b   : > { %2923 = vadd.xlane.f32.xlu1 %v2896_v21 }
 0x59e   : > { %v2823_v17 = vpop.f32.mrf.mxu0 }
 0x59f   : > { %v5799_v47 = vadd.f32 %v5724_v63, %v2823_v17 }
 0x5a1   : > { %2861 = vadd.xlane.f32.xlu2 %v5799_v47  ;;  %v2897_v19 = vmul.f32 %v5799_v47, %v5799_v47 }
 0x5a3   : > { %2925 = vadd.xlane.f32.xlu1 %v2897_v19 }
 0x5a6   : > { %v2825_v27 = vpop.f32.mrf.mxu0 }
 0x5a7   : > { %v5805_v35 = vadd.f32 %v5724_v63, %v2825_v27 }
 0x5a9   : > { %2863 = vadd.xlane.f32.xlu0 %v5805_v35  ;;  %v2898_v11 = vmul.f32 %v5805_v35, %v5805_v35 }
 0x5ab   : > { %2927 = vadd.xlane.f32.xlu2 %v2898_v11 }
 0x5ad   : > { %v2838_v58 = vpop.xlane.xlu2 %2837 }
 0x5ae   : > { %v5811_v1 = vmul.f32 %v2838_v58, %v4394_v20  ;;  %v2828_v57 = vpop.f32.mrf.mxu0 }
 0x5af   : > { %v2902_v25 = vpop.xlane.xlu1 %2901  ;;  %v5816_v33 = vadd.f32 %v5724_v63, %v2828_v57 }
 0x5b0   : > { %v2949_v42 = vmul.f32 %v5811_v1, %v5811_v1  ;;  %v2933_v34 = vmul.f32 %v2902_v25, %v4394_v20  ;;  %v2997_v49 = vsub.f32 %v5727_v13, %v5811_v1 }
 0x5b1   : > { %2865 = vadd.xlane.f32.xlu0 %v5816_v33  ;;  %v2899_v38 = vmul.f32 %v5816_v33, %v5816_v33 }
 0x5b2   : > { %v2965_v40 = vsub.f32 %v2933_v34, %v2949_v42 }
 0x5b3   : > { %2929 = vadd.xlane.f32.xlu2 %v2899_v38 }
 0x5b4   : > { %v2981_v37 = vmax.f32 %v2965_v40, 0.0 }
 0x5b5   : > { %v2840_v8 = vpop.xlane.xlu0 %2839 }
 0x5b6   : > { %v3013_v55 = vadd.f32 1e-05, %v2981_v37  ;;  %v5823_v46 = vmul.f32 %v2840_v8, %v4394_v20  ;;  %v2830_v5 = vpop.f32.mrf.mxu0 }
 0x5b7   : > { %v2904_v12 = vpop.xlane.xlu2 %2903  ;;  %v5828_v0 = vadd.f32 %v5724_v63, %v2830_v5 }
 0x5b8   : > { %3974 = vrsqrt.f32 %v3013_v55  ;;  %v2950_v14 = vmul.f32 %v5823_v46, %v5823_v46  ;;  %v2934_v43 = vmul.f32 %v2904_v12, %v4394_v20  ;;  %vm3035_vm3 = vweird.f32 %v3013_v55 }
 0x5b9   : > { %2867 = vadd.xlane.f32.xlu1 %v5828_v0  ;;  %v2900_v21 = vmul.f32 %v5828_v0, %v5828_v0 }
 0x5ba   : > { %v2966_v22 = vsub.f32 %v2934_v43, %v2950_v14 }
 0x5bb   : > { %2931 = vadd.xlane.f32.xlu0 %v2900_v21 }
 0x5bc   : > { %v2982_v54 = vmax.f32 %v2966_v22, 0.0 }
 0x5bd   : > { %v2842_v17 = vpop.xlane.xlu0 %2841 }
 0x5be   : > { %v3975_v19 = vpop.eup %3974  ;;  %v5835_v6 = vmul.f32 %v2842_v17, %v4394_v20  ;;  %v3014_v63 = vadd.f32 1e-05, %v2982_v54 }
 0x5bf   : > { %v3030_v26 = vmul.f32 %v3975_v19, %v3013_v55  ;;  %v2906_v27 = vpop.xlane.xlu2 %2905  ;;  %vm3036_vm2 = vweird.f32 %v3975_v19  ;;  %v5851_v55 = vld [vmem:[%s6077_s11 + $0x1] ss:$0 sm:$0xff] }
 0x5c0   : > { %v2951_v11 = vmul.f32 %v5835_v6, %v5835_v6  ;;  %v2935_v53 = vmul.f32 %v2906_v27, %v4394_v20  ;;  %3976 = vrsqrt.f32 %v3014_v63  ;;  %vm3037_vm4 = vmor %vm3035_vm3, %vm3036_vm2  ;;  %vm3045_vm6 = vweird.f32 %v3014_v63 }
 0x5c1   : > { %v3031_v58 = vmul.f32 %v3975_v19, %v3030_v26 }
 0x5c2   : > { %v2967_v36 = vsub.f32 %v2935_v53, %v2951_v11 }
 0x5c3   : > { %v3032_v57 = vmul.f32 0.5, %v3031_v58 }
 0x5c4   : > { %v2983_v25 = vmax.f32 %v2967_v36, 0.0  ;;  %v5859_v36 = vld [vmem:[%s6078_s12 + $0x1] ss:$0 sm:$0xff] }
 0x5c5   : > { %v3033_v42 = vsub.f32 1.5, %v3032_v57  ;;  %v2844_v34 = vpop.xlane.xlu1 %2843 }
 0x5c6   : > { %v3015_v40 = vadd.f32 1e-05, %v2983_v25  ;;  %v5841_v38 = vmul.f32 %v2844_v34, %v4394_v20  ;;  %v3977_v41 = vpop.eup %3976 }
 0x5c7   : > { %v3034_v37 = vmul.f32 %v3975_v19, %v3033_v42  ;;  %v2908_v8 = vpop.xlane.xlu0 %2907  ;;  %v3040_v62 = vmul.f32 %v3977_v41, %v3014_v63  ;;  %vm3046_vm5 = vweird.f32 %v3977_v41 }
 0x5c8   : > { %3978 = vrsqrt.f32 %v3015_v40  ;;  %v2952_v5 = vmul.f32 %v5841_v38, %v5841_v38  ;;  %v2936_v12 = vmul.f32 %v2908_v8, %v4394_v20  ;;  %vm3047_vm7 = vmor %vm3045_vm6, %vm3046_vm5  ;;  %vm3055_vm9 = vweird.f32 %v3015_v40 }
 0x5c9   : > { %v3038_v14 = vsel %vm3037_vm4, %v3975_v19, %v3034_v37  ;;  %v3041_v43 = vmul.f32 %v3977_v41, %v3040_v62  ;;  %v2998_v19 = vsub.f32 %v5733_v9, %v5823_v46 }
 0x5ca   : > { %v2968_v22 = vsub.f32 %v2936_v12, %v2952_v5  ;;  %v3189_v17 = vmul.f32 %v3038_v14, %v2997_v49 }
 0x5cb   : > { %v3042_v21 = vmul.f32 0.5, %v3041_v43 }
 0x5cc   : > { %v2984_v54 = vmax.f32 %v2968_v22, 0.0  ;;  %v3208_v1 = vmul.f32 %v5851_v55, %v3189_v17 }
 0x5cd   : > { %v3043_v27 = vsub.f32 1.5, %v3042_v21 }
 0x5ce   : > { %v3979_v26 = vpop.eup %3978  ;;  %v3016_v53 = vadd.f32 1e-05, %v2984_v54  ;;  %v3227_v46 = vadd.f32 %v5859_v36, %v3208_v1 }
 0x5cf   : > { %v3050_v11 = vmul.f32 %v3979_v26, %v3015_v40  ;;  %v3044_v58 = vmul.f32 %v3977_v41, %v3043_v27  ;;  %vm3056_vm8 = vweird.f32 %v3979_v26 }
 0x5d0   : > { %3980 = vrsqrt.f32 %v3016_v53  ;;  %vm3057_vm10 = vmor %vm3055_vm9, %vm3056_vm8  ;;  %v3243_v22 = vadd.f32 %v3227_v46, %v5220_v29  ;;  %vm3065_vm12 = vweird.f32 %v3016_v53 }
 0x5d1   : > { %v3051_v13 = vmul.f32 %v3979_v26, %v3050_v11  ;;  %v3048_v57 = vsel %vm3047_vm7, %v3977_v41, %v3044_v58  ;;  %v2999_v11 = vsub.f32 %v5739_v48, %v5835_v6  ;;  %v3000_v48 = vsub.f32 %v5745_v51, %v5841_v38 }
 0x5d2   : > { %v3190_v34 = vmul.f32 %v3048_v57, %v2998_v19 }
 0x5d3   : > { %v3052_v25 = vmul.f32 0.5, %v3051_v13  ;;  %v2846_v42 = vpop.xlane.xlu1 %2845 }
 0x5d4   : > { %v5862_v37 = vmul.f32 %v2846_v42, %v4394_v20  ;;  %v3209_v9 = vmul.f32 %v5851_v55, %v3190_v34 }
 0x5d5   : > { %v3053_v63 = vsub.f32 1.5, %v3052_v25  ;;  %v2910_v8 = vpop.xlane.xlu0 %2909 }
 0x5d6   : > { %v2953_v62 = vmul.f32 %v5862_v37, %v5862_v37  ;;  %v2937_v5 = vmul.f32 %v2910_v8, %v4394_v20  ;;  %v3981_v12 = vpop.eup %3980  ;;  %v3228_v14 = vadd.f32 %v5859_v36, %v3209_v9 }
 0x5d7   : > { %v3054_v41 = vmul.f32 %v3979_v26, %v3053_v63  ;;  %v3060_v43 = vmul.f32 %v3981_v12, %v3016_v53  ;;  %vm3066_vm11 = vweird.f32 %v3981_v12 }
 0x5d8   : > { %v2969_v49 = vsub.f32 %v2937_v5, %v2953_v62  ;;  %v3244_v21 = vadd.f32 %v3228_v14, %v5224_v56  ;;  %vm3067_vm13 = vmor %vm3065_vm12, %vm3066_vm11 }
 0x5d9   : > { %v3061_v54 = vmul.f32 %v3981_v12, %v3060_v43  ;;  %v3058_v27 = vsel %vm3057_vm10, %v3979_v26, %v3054_v41 }
 0x5da   : > { %v2985_v17 = vmax.f32 %v2969_v49, 0.0  ;;  %v3259_v19 = vpack.c.bf16 %v3244_v21, %v3243_v22  ;;  %v3191_v25 = vmul.f32 %v3058_v27, %v2999_v11 }
 0x5db   : > { %v2848_v58 = vpop.xlane.xlu2 %2847  ;;  %v3062_v13 = vmul.f32 0.5, %v3061_v54 }
 0x5dc   : > { %v3017_v1 = vadd.f32 1e-05, %v2985_v17  ;;  %v5875_v57 = vmul.f32 %v2848_v58, %v4394_v20  ;;  %3343 = vmatmul.bf16.vlgmr.msrb.gmra.mxu1 %v3259_v19  ;;  %v3210_v34 = vmul.f32 %v5851_v55, %v3191_v25 }
 0x5dd   : > { %v2912_v40 = vpop.xlane.xlu1 %2911  ;;  %v3063_v42 = vsub.f32 1.5, %v3062_v13 }
 0x5de   : > { %3982 = vrsqrt.f32 %v3017_v1  ;;  %v2954_v29 = vmul.f32 %v5875_v57, %v5875_v57  ;;  %v2938_v56 = vmul.f32 %v2912_v40, %v4394_v20  ;;  %v3229_v49 = vadd.f32 %v5859_v36, %v3210_v34 }
 0x5df   : > { %v3064_v26 = vmul.f32 %v3981_v12, %v3063_v42  ;;  %vm3075_vm15 = vweird.f32 %v3017_v1  ;;  %v3001_v34 = vsub.f32 %v5751_v45, %v5862_v37 }
 0x5e0   : > { %v2970_v6 = vsub.f32 %v2938_v56, %v2954_v29  ;;  %v3245_v17 = vadd.f32 %v3229_v49, %v5256_v30 }
 0x5e1   : > { %v3068_v63 = vsel %vm3067_vm13, %v3981_v12, %v3064_v26 }
 0x5e2   : > { %v2986_v8 = vmax.f32 %v2970_v6, 0.0  ;;  %v3192_v46 = vmul.f32 %v3068_v63, %v3000_v48 }
 0x5e4   : > { %v2850_v9 = vpop.xlane.xlu2 %2849  ;;  %v3983_v62 = vpop.eup %3982  ;;  %v3018_v14 = vadd.f32 1e-05, %v2986_v8  ;;  %v3211_v53 = vmul.f32 %v5851_v55, %v3192_v46 }
 0x5e5   : > { %v5884_v5 = vmul.f32 %v2850_v9, %v4394_v20  ;;  %v3070_v41 = vmul.f32 %v3983_v62, %v3017_v1  ;;  %vm3076_vm14 = vweird.f32 %v3983_v62 }
 0x5e6   : > { %v2914_v43 = vpop.xlane.xlu1 %2913  ;;  %3984 = vrsqrt.f32 %v3018_v14  ;;  %v3230_v22 = vadd.f32 %v5859_v36, %v3211_v53  ;;  %vm3077_vm0 = vmor %vm3075_vm15, %vm3076_vm14  ;;  %vm3085_vm2 = vweird.f32 %v3018_v14 }
 0x5e7   : > { %v2955_v51 = vmul.f32 %v5884_v5, %v5884_v5  ;;  %v2939_v38 = vmul.f32 %v2914_v43, %v4394_v20  ;;  %v3071_v12 = vmul.f32 %v3983_v62, %v3070_v41 }
 0x5e8   : > { %v3246_v27 = vadd.f32 %v3230_v22, %v5260_v7 }
 0x5e9   : > { %v2971_v21 = vsub.f32 %v2939_v38, %v2955_v51  ;;  %v3072_v54 = vmul.f32 0.5, %v3071_v12 }
 0x5ea   : > { %v3260_v13 = vpack.c.bf16 %v3246_v27, %v3245_v17 }
 0x5eb   : > { %v2987_v11 = vmax.f32 %v2971_v21, 0.0  ;;  %v3073_v58 = vsub.f32 1.5, %v3072_v54 }
 0x5ec   : > { %v2852_v19 = vpop.xlane.xlu0 %2851  ;;  %v3985_v42 = vpop.eup %3984  ;;  %3348 = vmatmul.bf16.gmra.mxu1 %v3260_v13 }
 0x5ed   : > { %v3019_v40 = vadd.f32 1e-05, %v2987_v11  ;;  %v5895_v25 = vmul.f32 %v2852_v19, %v4394_v20  ;;  %v3074_v29 = vmul.f32 %v3983_v62, %v3073_v58  ;;  %v3080_v26 = vmul.f32 %v3985_v42, %v3018_v14 }
 0x5ee   : > { %v2916_v56 = vpop.xlane.xlu2 %2915  ;;  %vm3086_vm1 = vweird.f32 %v3985_v42 }
 0x5ef   : > { %3986 = vrsqrt.f32 %v3019_v40  ;;  %v2956_v30 = vmul.f32 %v5895_v25, %v5895_v25  ;;  %v2940_v7 = vmul.f32 %v2916_v56, %v4394_v20  ;;  %v3081_v48 = vmul.f32 %v3985_v42, %v3080_v26  ;;  %vm3087_vm3 = vmor %vm3085_vm2, %vm3086_vm1 }
 0x5f0   : > { %v3078_v6 = vsel %vm3077_vm0, %v3983_v62, %v3074_v29  ;;  %v3002_v62 = vsub.f32 %v5757_v24, %v5875_v57  ;;  %vm3095_vm5 = vweird.f32 %v3019_v40 }
 0x5f1   : > { %v2972_v63 = vsub.f32 %v2940_v7, %v2956_v30  ;;  %v3082_v8 = vmul.f32 0.5, %v3081_v48  ;;  %v3193_v46 = vmul.f32 %v3078_v6, %v3001_v34 }
 0x5f3   : > { %v2988_v9 = vmax.f32 %v2972_v63, 0.0  ;;  %v3083_v43 = vsub.f32 1.5, %v3082_v8  ;;  %v3212_v12 = vmul.f32 %v5851_v55, %v3193_v46 }
 0x5f4   : > { %v2854_v49 = vpop.xlane.xlu0 %2853 }
 0x5f5   : > { %v3987_v41 = vpop.eup %3986  ;;  %v3020_v53 = vadd.f32 1e-05, %v2988_v9  ;;  %v3084_v51 = vmul.f32 %v3985_v42, %v3083_v43  ;;  %v5903_v38 = vmul.f32 %v2854_v49, %v4394_v20  ;;  %v3231_v24 = vadd.f32 %v5859_v36, %v3212_v12 }
 0x5f6   : > { %v3090_v1 = vmul.f32 %v3987_v41, %v3019_v40  ;;  %v2918_v37 = vpop.xlane.xlu2 %2917  ;;  %vm3096_vm4 = vweird.f32 %v3987_v41  ;;  %v3003_v40 = vsub.f32 %v5763_v60, %v5884_v5  ;;  %v3004_v60 = vsub.f32 %v5769_v61, %v5895_v25 }
 0x5f7   : > { %3988 = vrsqrt.f32 %v3020_v53  ;;  %v2957_v22 = vmul.f32 %v5903_v38, %v5903_v38  ;;  %v2941_v21 = vmul.f32 %v2918_v37, %v4394_v20  ;;  %v3088_v54 = vsel %vm3087_vm3, %v3985_v42, %v3084_v51  ;;  %vm3097_vm6 = vmor %vm3095_vm5, %vm3096_vm4 }
 0x5f8   : > { %v3091_v45 = vmul.f32 %v3987_v41, %v3090_v1  ;;  %v3194_v14 = vmul.f32 %v3088_v54, %v3002_v62  ;;  %v3247_v48 = vadd.f32 %v3231_v24, %v5289_v31  ;;  %vm3105_vm8 = vweird.f32 %v3020_v53 }
 0x5f9   : > { %v2973_v27 = vsub.f32 %v2941_v21, %v2957_v22 }
 0x5fa   : > { %v3092_v17 = vmul.f32 0.5, %v3091_v45  ;;  %v3213_v58 = vmul.f32 %v5851_v55, %v3194_v14 }
 0x5fb   : > { %v2989_v57 = vmax.f32 %v2973_v27, 0.0 }
 0x5fc   : > { %v3093_v11 = vsub.f32 1.5, %v3092_v17  ;;  %v2856_v29 = vpop.xlane.xlu1 %2855  ;;  %v3232_v56 = vadd.f32 %v5859_v36, %v3213_v58 }
 0x5fd   : > { %v3989_v19 = vpop.eup %3988  ;;  %v3021_v30 = vadd.f32 1e-05, %v2989_v57  ;;  %v5915_v42 = vmul.f32 %v2856_v29, %v4394_v20 }
 0x5fe   : > { %v3094_v13 = vmul.f32 %v3987_v41, %v3093_v11  ;;  %v3100_v26 = vmul.f32 %v3989_v19, %v3020_v53  ;;  %v2920_v7 = vpop.xlane.xlu0 %2919  ;;  %v3248_v6 = vadd.f32 %v3232_v56, %v5293_v44  ;;  %vm3106_vm7 = vweird.f32 %v3989_v19 }
 0x5ff   : > { %3990 = vrsqrt.f32 %v3021_v30  ;;  %v2958_v63 = vmul.f32 %v5915_v42, %v5915_v42  ;;  %v2942_v9 = vmul.f32 %v2920_v7, %v4394_v20  ;;  %vm3107_vm9 = vmor %vm3105_vm8, %vm3106_vm7  ;;  %vm3115_vm11 = vweird.f32 %v3021_v30 }
 0x600   : > { %v3101_v34 = vmul.f32 %v3989_v19, %v3100_v26  ;;  %v3098_v8 = vsel %vm3097_vm6, %v3987_v41, %v3094_v13  ;;  %v3261_v46 = vpack.c.bf16 %v3248_v6, %v3247_v48 }
 0x601   : > { %v2974_v1 = vsub.f32 %v2942_v9, %v2958_v63  ;;  %v3195_v49 = vmul.f32 %v3098_v8, %v3003_v40 }
 0x602   : > { %v3102_v43 = vmul.f32 0.5, %v3101_v34  ;;  %3353 = vmatmul.bf16.gmra.mxu1 %v3261_v46 }
 0x603   : > { %v2990_v31 = vmax.f32 %v2974_v1, 0.0  ;;  %v3214_v22 = vmul.f32 %v5851_v55, %v3195_v49 }
 0x604   : > { %v3103_v51 = vsub.f32 1.5, %v3102_v43  ;;  %v2858_v44 = vpop.xlane.xlu1 %2857  ;;  %v3005_v43 = vsub.f32 %v5775_v2, %v5903_v38 }
 0x605   : > { %v3991_v62 = vpop.eup %3990  ;;  %v5925_v37 = vmul.f32 %v2858_v44, %v4394_v20  ;;  %v3022_v41 = vadd.f32 1e-05, %v2990_v31  ;;  %v3233_v61 = vadd.f32 %v5859_v36, %v3214_v22 }
 0x606   : > { %v3104_v45 = vmul.f32 %v3989_v19, %v3103_v51  ;;  %v3110_v5 = vmul.f32 %v3991_v62, %v3021_v30  ;;  %v2922_v12 = vpop.xlane.xlu0 %2921  ;;  %vm3116_vm10 = vweird.f32 %v3991_v62 }
 0x607   : > { %v2959_v21 = vmul.f32 %v5925_v37, %v5925_v37  ;;  %v2943_v54 = vmul.f32 %v2922_v12, %v4394_v20  ;;  %3992 = vrsqrt.f32 %v3022_v41  ;;  %v3249_v48 = vadd.f32 %v3233_v61, %v5319_v15  ;;  %vm3117_vm12 = vmor %vm3115_vm11, %vm3116_vm10 }
 0x608   : > { %v3108_v17 = vsel %vm3107_vm9, %v3989_v19, %v3104_v45  ;;  %v3111_v14 = vmul.f32 %v3991_v62, %v3110_v5  ;;  %vm3125_vm14 = vweird.f32 %v3022_v41 }
 0x609   : > { %v3196_v53 = vmul.f32 %v3108_v17, %v3004_v60  ;;  %v2975_v27 = vsub.f32 %v2943_v54, %v2959_v21 }
 0x60a   : > { %v3112_v11 = vmul.f32 0.5, %v3111_v14 }
 0x60b   : > { %v3215_v58 = vmul.f32 %v5851_v55, %v3196_v53  ;;  %v2991_v25 = vmax.f32 %v2975_v27, 0.0 }
 0x60c   : > { %v3113_v24 = vsub.f32 1.5, %v3112_v11  ;;  %v2860_v57 = vpop.xlane.xlu2 %2859 }
 0x60d   : > { %v3234_v13 = vadd.f32 %v5859_v36, %v3215_v58  ;;  %v3023_v29 = vadd.f32 1e-05, %v2991_v25  ;;  %v5937_v56 = vmul.f32 %v2860_v57, %v4394_v20  ;;  %v3993_v19 = vpop.eup %3992 }
 0x60e   : > { %v3114_v26 = vmul.f32 %v3991_v62, %v3113_v24  ;;  %v2924_v7 = vpop.xlane.xlu1 %2923  ;;  %v3120_v34 = vmul.f32 %v3993_v19, %v3022_v41  ;;  %vm3126_vm13 = vweird.f32 %v3993_v19 }
 0x60f   : > { %v3250_v6 = vadd.f32 %v3234_v13, %v5323_v16  ;;  %3994 = vrsqrt.f32 %v3023_v29  ;;  %v2960_v63 = vmul.f32 %v5937_v56, %v5937_v56  ;;  %v2944_v8 = vmul.f32 %v2924_v7, %v4394_v20  ;;  %vm3127_vm15 = vmor %vm3125_vm14, %vm3126_vm13 }
 0x610   : > { %v3121_v9 = vmul.f32 %v3993_v19, %v3120_v34  ;;  %v3118_v46 = vsel %vm3117_vm12, %v3991_v62, %v3114_v26  ;;  %v3006_v62 = vsub.f32 %v5781_v18, %v5915_v42  ;;  %vm3135_vm1 = vweird.f32 %v3023_v29 }
 0x611   : > { %v3262_v40 = vpack.c.bf16 %v3250_v6, %v3249_v48  ;;  %v2976_v1 = vsub.f32 %v2944_v8, %v2960_v63  ;;  %v3197_v30 = vmul.f32 %v3118_v46, %v3005_v43  ;;  %v3007_v8 = vsub.f32 %v5787_v28, %v5925_v37 }
 0x612   : > { %v3122_v15 = vmul.f32 0.5, %v3121_v9 }
 0x613   : > { %3358 = vmatmul.bf16.gmra.mxu1 %v3262_v40  ;;  %v2992_v49 = vmax.f32 %v2976_v1, 0.0  ;;  %v3216_v21 = vmul.f32 %v5851_v55, %v3197_v30 }
 0x614   : > { %v2862_v16 = vpop.xlane.xlu2 %2861  ;;  %v3123_v31 = vsub.f32 1.5, %v3122_v15 }
 0x615   : > { %v3995_v51 = vpop.eup %3994  ;;  %v5947_v44 = vmul.f32 %v2862_v16, %v4394_v20  ;;  %v3024_v60 = vadd.f32 1e-05, %v2992_v49  ;;  %v3235_v61 = vadd.f32 %v5859_v36, %v3216_v21 }
 0x616   : > { %v3130_v45 = vmul.f32 %v3995_v51, %v3023_v29  ;;  %v2926_v5 = vpop.xlane.xlu1 %2925  ;;  %v3124_v12 = vmul.f32 %v3993_v19, %v3123_v31  ;;  %vm3136_vm0 = vweird.f32 %v3995_v51  ;;  %v3008_v31 = vsub.f32 %v5793_v4, %v5937_v56 }
 0x617   : > { %v2961_v2 = vmul.f32 %v5947_v44, %v5947_v44  ;;  %v2945_v38 = vmul.f32 %v2926_v5, %v4394_v20  ;;  %3996 = vrsqrt.f32 %v3024_v60  ;;  %vm3137_vm2 = vmor %vm3135_vm1, %vm3136_vm0  ;;  %v3251_v48 = vadd.f32 %v3235_v61, %v5352_v3 }
 0x618   : > { %v3131_v22 = vmul.f32 %v3995_v51, %v3130_v45  ;;  %v3128_v17 = vsel %vm3127_vm15, %v3993_v19, %v3124_v12  ;;  %vm3145_vm4 = vweird.f32 %v3024_v60 }
 0x619   : > { %v2977_v54 = vsub.f32 %v2945_v38, %v2961_v2  ;;  %v3198_v53 = vmul.f32 %v3128_v17, %v3006_v62 }
 0x61a   : > { %v3132_v14 = vmul.f32 0.5, %v3131_v22 }
 0x61b   : > { %v2993_v27 = vmax.f32 %v2977_v54, 0.0  ;;  %v3217_v58 = vmul.f32 %v5851_v55, %v3198_v53 }
 0x61c   : > { %v3133_v11 = vsub.f32 1.5, %v3132_v14  ;;  %v2864_v41 = vpop.xlane.xlu0 %2863 }
 0x61d   : > { %v3025_v25 = vadd.f32 1e-05, %v2993_v27  ;;  %v5958_v18 = vmul.f32 %v2864_v41, %v4394_v20  ;;  %v3997_v42 = vpop.eup %3996  ;;  %v3236_v13 = vadd.f32 %v5859_v36, %v3217_v58 }
 0x61e   : > { %v3134_v24 = vmul.f32 %v3995_v51, %v3133_v11  ;;  %v2928_v57 = vpop.xlane.xlu2 %2927  ;;  %v3140_v19 = vmul.f32 %v3997_v42, %v3024_v60  ;;  %vm3146_vm3 = vweird.f32 %v3997_v42 }
 0x61f   : > { %3998 = vrsqrt.f32 %v3025_v25  ;;  %v2962_v26 = vmul.f32 %v5958_v18, %v5958_v18  ;;  %v2946_v7 = vmul.f32 %v2928_v57, %v4394_v20  ;;  %v3252_v6 = vadd.f32 %v3236_v13, %v5356_v50  ;;  %vm3147_vm5 = vmor %vm3145_vm4, %vm3146_vm3 }
 0x620   : > { %v3141_v34 = vmul.f32 %v3997_v42, %v3140_v19  ;;  %v3138_v63 = vsel %vm3137_vm2, %v3995_v51, %v3134_v24  ;;  %vm3155_vm7 = vweird.f32 %v3025_v25  ;;  %v3009_v19 = vsub.f32 %v5799_v47, %v5947_v44 }
 0x621   : > { %v2978_v40 = vsub.f32 %v2946_v7, %v2962_v26  ;;  %v3263_v9 = vpack.c.bf16 %v3252_v6, %v3251_v48  ;;  %v3199_v1 = vmul.f32 %v3138_v63, %v3007_v8 }
 0x622   : > { %v3142_v29 = vmul.f32 0.5, %v3141_v34 }
 0x623   : > { %v2994_v46 = vmax.f32 %v2978_v40, 0.0  ;;  %3363 = vmatmul.bf16.gmra.mxu1 %v3263_v9  ;;  %v3218_v5 = vmul.f32 %v5851_v55, %v3199_v1 }
 0x624   : > { %v2866_v43 = vpop.xlane.xlu0 %2865  ;;  %v3143_v49 = vsub.f32 1.5, %v3142_v29 }
 0x625   : > { %v3999_v15 = vpop.eup %3998  ;;  %v5969_v16 = vmul.f32 %v2866_v43, %v4394_v20  ;;  %v3026_v50 = vadd.f32 1e-05, %v2994_v46  ;;  %v3237_v54 = vadd.f32 %v5859_v36, %v3218_v5 }
 0x626   : > { %v3150_v3 = vmul.f32 %v3999_v15, %v3025_v25  ;;  %v2930_v30 = vpop.xlane.xlu2 %2929  ;;  %v3144_v51 = vmul.f32 %v3997_v42, %v3143_v49  ;;  %vm3156_vm6 = vweird.f32 %v3999_v15 }
 0x627   : > { %v2963_v28 = vmul.f32 %v5969_v16, %v5969_v16  ;;  %v2947_v37 = vmul.f32 %v2930_v30, %v4394_v20  ;;  %4000 = vrsqrt.f32 %v3026_v50  ;;  %vm3157_vm8 = vmor %vm3155_vm7, %vm3156_vm6  ;;  %vm3165_vm10 = vweird.f32 %v3026_v50 }
 0x628   : > { %v3151_v45 = vmul.f32 %v3999_v15, %v3150_v3  ;;  %v3148_v2 = vsel %vm3147_vm5, %v3997_v42, %v3144_v51  ;;  %v3253_v42 = vadd.f32 %v3237_v54, %v5382_v23  ;;  %v3010_v23 = vsub.f32 %v5805_v35, %v5958_v18 }
 0x629   : > { %v2979_v12 = vsub.f32 %v2947_v37, %v2963_v28  ;;  %v3200_v62 = vmul.f32 %v3148_v2, %v3008_v31  ;;  %v3011_v28 = vsub.f32 %v5816_v33, %v5969_v16 }
 0x62a   : > { %v3152_v38 = vmul.f32 0.5, %v3151_v45 }
 0x62b   : > { %v2995_v22 = vmax.f32 %v2979_v12, 0.0  ;;  %v3219_v60 = vmul.f32 %v5851_v55, %v3200_v62 }
 0x62c   : > { %v3153_v21 = vsub.f32 1.5, %v3152_v38  ;;  %v2868_v14 = vpop.xlane.xlu1 %2867 }
 0x62d   : > { %v3027_v17 = vadd.f32 1e-05, %v2995_v22  ;;  %v4001_v53 = vpop.eup %4000  ;;  %v5980_v56 = vmul.f32 %v2868_v14, %v4394_v20  ;;  %v3238_v27 = vadd.f32 %v5859_v36, %v3219_v60 }
 0x62e   : > { %v3154_v4 = vmul.f32 %v3999_v15, %v3153_v21  ;;  %v3160_v11 = vmul.f32 %v4001_v53, %v3026_v50  ;;  %v2932_v41 = vpop.xlane.xlu0 %2931  ;;  %vm3166_vm9 = vweird.f32 %v4001_v53 }
 0x62f   : > { %4002 = vrsqrt.f32 %v3027_v17  ;;  %v2964_v58 = vmul.f32 %v5980_v56, %v5980_v56  ;;  %v2948_v61 = vmul.f32 %v2932_v41, %v4394_v20  ;;  %v3254_v24 = vadd.f32 %v3238_v27, %v5386_v52  ;;  %vm3167_vm11 = vmor %vm3165_vm10, %vm3166_vm9 }
 0x630   : > { %v3161_v57 = vmul.f32 %v4001_v53, %v3160_v11  ;;  %v3158_v13 = vsel %vm3157_vm8, %v3999_v15, %v3154_v4  ;;  %vm3175_vm13 = vweird.f32 %v3027_v17 }
 0x631   : > { %v2980_v26 = vsub.f32 %v2948_v61, %v2964_v58  ;;  %v3264_v25 = vpack.c.bf16 %v3254_v24, %v3253_v42  ;;  %v3201_v6 = vmul.f32 %v3158_v13, %v3009_v19 }
 0x632   : > { %v3162_v7 = vmul.f32 0.5, %v3161_v57 }
 0x633   : > { %v2996_v48 = vmax.f32 %v2980_v26, 0.0  ;;  %3368 = vmatmul.bf16.gmra.mxu1 %v3264_v25  ;;  %v3220_v47 = vmul.f32 %v5851_v55, %v3201_v6 }
 0x634   : > { %v3163_v63 = vsub.f32 1.5, %v3162_v7 }
 0x635   : > { %v4003_v34 = vpop.eup %4002  ;;  %v3028_v20 = vadd.f32 1e-05, %v2996_v48  ;;  %v3239_v1 = vadd.f32 %v5859_v36, %v3220_v47 }
 0x636   : > { %v3170_v8 = vmul.f32 %v4003_v34, %v3027_v17  ;;  %v3164_v40 = vmul.f32 %v4001_v53, %v3163_v63  ;;  %vm3176_vm12 = vweird.f32 %v4003_v34 }
 0x637   : > { %4004 = vrsqrt.f32 %v3028_v20  ;;  %vm3177_vm14 = vmor %vm3175_vm13, %vm3176_vm12  ;;  %v3255_v18 = vadd.f32 %v3239_v1, %v5400_v32  ;;  %vm3185_vm0 = vweird.f32 %v3028_v20  ;;  %v3012_v32 = vsub.f32 %v5828_v0, %v5980_v56  ;;  %v3843_v0 = vld [vmem:[%s6080_s14] ss:$0 sm:$0xff] }
 0x638   : > { %v3171_v52 = vmul.f32 %v4003_v34, %v3170_v8  ;;  %v3168_v44 = vsel %vm3167_vm11, %v4001_v53, %v3164_v40 }
 0x639   : > { %v3202_v29 = vmul.f32 %v3168_v44, %v3010_v23 }
 0x63a   : > { %v3172_v9 = vmul.f32 0.5, %v3171_v52 }
 0x63b   : > { %v3221_v43 = vmul.f32 %v5851_v55, %v3202_v29 }
 0x63c   : > { %v3173_v46 = vsub.f32 1.5, %v3172_v9 }
 0x63d   : > { %v4005_v15 = vpop.eup %4004  ;;  %v3240_v3 = vadd.f32 %v5859_v36, %v3221_v43 }
 0x63e   : > { %v3174_v49 = vmul.f32 %v4003_v34, %v3173_v46  ;;  %v3180_v35 = vmul.f32 %v4005_v15, %v3028_v20  ;;  %vm3186_vm15 = vweird.f32 %v4005_v15 }
 0x63f   : > { %v3256_v50 = vadd.f32 %v3240_v3, %v5404_v59  ;;  %vm3187_vm1 = vmor %vm3185_vm0, %vm3186_vm15 }
 0x640   : > { %v3181_v30 = vmul.f32 %v4005_v15, %v3180_v35  ;;  %v3178_v51 = vsel %vm3177_vm14, %v4003_v34, %v3174_v49 }
 0x641   : > { %v3265_v37 = vpack.c.bf16 %v3256_v50, %v3255_v18  ;;  %v3203_v45 = vmul.f32 %v3178_v51, %v3011_v28 }
 0x642   : > { %v3182_v31 = vmul.f32 0.5, %v3181_v30 }
 0x643   : > { %3373 = vmatmul.bf16.gmra.mxu1 %v3265_v37  ;;  %v3222_v59 = vmul.f32 %v5851_v55, %v3203_v45 }
 0x644   : > { %v3183_v5 = vsub.f32 1.5, %v3182_v31 }
 0x645   : > { %v3241_v16 = vadd.f32 %v5859_v36, %v3222_v59 }
 0x646   : > { %v3184_v12 = vmul.f32 %v4005_v15, %v3183_v5 }
 0x647   : > { %v3257_v22 = vadd.f32 %v3241_v16, %v5418_v10 }
 0x648   : > { %v3188_v2 = vsel %vm3187_vm1, %v4005_v15, %v3184_v12 }
 0x649   : > { %v3204_v38 = vmul.f32 %v3188_v2, %v3012_v32 }
 0x64b   : > { %v3223_v33 = vmul.f32 %v5851_v55, %v3204_v38 }
 0x64d   : > { %v3242_v62 = vadd.f32 %v5859_v36, %v3223_v33 }
 0x64f   : > { %v3258_v21 = vadd.f32 %v3242_v62, %v5422_v39 }
 0x651   : > { %v3266_v60 = vpack.c.bf16 %v3258_v21, %v3257_v22 }
 0x653   : > { %3378 = vmatmul.bf16.gmra.mxu1 %v3266_v60 }
 0x659   : > { %v3344_v54 = vpop.f32.mrf.mxu1 }
 0x65a   : > { %v3345_v17 = vadd.f32 %v3843_v0, %v3344_v54 }
 0x65c   : > { %3384 = vst [vmem:[%s6014_s23] sm:$0xff] %v3345_v17 }
 0x661   : > { %v3346_v10 = vpop.f32.mrf.mxu1 }
 0x662   : > { %v3347_v39 = vadd.f32 %v3843_v0, %v3346_v10 }
 0x664   : > { %3385 = vst [vmem:[%s6014_s23 + $0x8] sm:$0xff] %v3347_v39 }
 0x669   : > { %v3349_v55 = vpop.f32.mrf.mxu1 }
 0x66a   : > { %v3350_v36 = vadd.f32 %v3843_v0, %v3349_v55 }
 0x66c   : > { %3386 = vst [vmem:[%s6014_s23 + $0x10] sm:$0xff] %v3350_v36 }
 0x671   : > { %v3351_v14 = vpop.f32.mrf.mxu1 }
 0x672   : > { %v3352_v53 = vadd.f32 %v3843_v0, %v3351_v14 }
 0x674   : > { %3387 = vst [vmem:[%s6014_s23 + $0x18] sm:$0xff] %v3352_v53 }
 0x67f   : > { %v3354_v4 = vpop.f32.mrf.mxu1 }
 0x680   : > { %v3355_v56 = vadd.f32 %v3843_v0, %v3354_v4 }
 0x682   : > { %3388 = vst [vmem:[%s6014_s23 + $0x20] sm:$0xff] %v3355_v56 }
 0x687   : > { %v3356_v27 = vpop.f32.mrf.mxu1 }
 0x688   : > { %v3357_v11 = vadd.f32 %v3843_v0, %v3356_v27 }
 0x68a   : > { %3389 = vst [vmem:[%s6014_s23 + $0x28] sm:$0xff] %v3357_v11 }
 0x690   : > { %v3359_v41 = vpop.f32.mrf.mxu1 }
 0x691   : > { %v3360_v58 = vadd.f32 %v3843_v0, %v3359_v41 }
 0x693   : > { %3390 = vst [vmem:[%s6014_s23 + $0x30] sm:$0xff] %v3360_v58 }
 0x698   : > { %v3361_v61 = vpop.f32.mrf.mxu1 }
 0x699   : > { %v3362_v42 = vadd.f32 %v3843_v0, %v3361_v61 }
 0x69b   : > { %3391 = vst [vmem:[%s6014_s23 + $0x38] sm:$0xff] %v3362_v42 }
 0x6a0   : > { %v3364_v24 = vpop.f32.mrf.mxu1 }
 0x6a1   : > { %v3365_v57 = vadd.f32 %v3843_v0, %v3364_v24 }
 0x6a3   : > { %3392 = vst [vmem:[%s6014_s23 + $0x40] sm:$0xff] %v3365_v57 }
 0x6a8   : > { %v3366_v13 = vpop.f32.mrf.mxu1 }
 0x6a9   : > { %v3367_v19 = vadd.f32 %v3843_v0, %v3366_v13 }
 0x6ab   : > { %3393 = vst [vmem:[%s6014_s23 + $0x48] sm:$0xff] %v3367_v19 }
 0x6b0   : > { %v3369_v26 = vpop.f32.mrf.mxu1 }
 0x6b1   : > { %v3370_v25 = vadd.f32 %v3843_v0, %v3369_v26 }
 0x6b3   : > { %3394 = vst [vmem:[%s6014_s23 + $0x50] sm:$0xff] %v3370_v25 }
 0x6b8   : > { %v3371_v7 = vpop.f32.mrf.mxu1 }
 0x6b9   : > { %v3372_v48 = vadd.f32 %v3843_v0, %v3371_v7 }
 0x6bb   : > { %3395 = vst [vmem:[%s6014_s23 + $0x58] sm:$0xff] %v3372_v48 }
 0x6c0   : > { %v3374_v6 = vpop.f32.mrf.mxu1 }
 0x6c1   : > { %v3375_v34 = vadd.f32 %v3843_v0, %v3374_v6 }
 0x6c3   : > { %3396 = vst [vmem:[%s6014_s23 + $0x60] sm:$0xff] %v3375_v34 }
 0x6c8   : > { %v3376_v63 = vpop.f32.mrf.mxu1 }
 0x6c9   : > { %v3377_v8 = vadd.f32 %v3843_v0, %v3376_v63 }
 0x6cb   : > { %3397 = vst [vmem:[%s6014_s23 + $0x68] sm:$0xff] %v3377_v8 }
 0x6d0   : > { %v3379_v20 = vpop.f32.mrf.mxu1 }
 0x6d1   : > { %v3380_v40 = vadd.f32 %v3843_v0, %v3379_v20 }
 0x6d3   : > { %3398 = vst [vmem:[%s6014_s23 + $0x70] sm:$0xff] %v3380_v40 }
 0x6d8   : > { %v3381_v23 = vpop.f32.mrf.mxu1 }
 0x6d9   : > { %v3382_v52 = vadd.f32 %v3843_v0, %v3381_v23 }
 0x6db   : > { %3399 = vst [vmem:[%s6014_s23 + $0x78] sm:$0xff] %v3382_v52 }
 0x6dc   : > { %4063 = shalt.err (!%p4060_p8)
}
 0x6dd   : > { %s4108_s25 = smov 128   ;;  %s4109_s23 = smov 8  }
 0x6de   : > { %3777 = dma.vmem_to_hbm [thread:$0]  (%p4228_p5), %s3414_s29, 2048, %s3416_s17, %s3401_s26, %s4108_s25, %s4108_s25, %s4109_s23  }
 0x6df PF: > { %p3789_p9 = scmp.ge.s32.totalorder %s4102_s21, 2  ;;  %s3430_s16 = sand.u32 1, %s4090_s18  }
 0x6e0   : > { %s3431_s24 = scalar_lea.sflag [#allocation4], %s3430_s16 }
 0x6e1   : > { %p3784_p10 = pnand %p3789_p9, %p4232_p6 }
 0x6e3   : > { %p3785_p11 = pneg %p3784_p10 }
 0x6e5   : > { %4085 = dma.done.wait (%p3785_p11), %s3431_s24, 2048  }
 0x6e6   : > { %4087 = vsyncadd (%p3785_p11), %s3431_s24, 4294965248  ;;  %s6131_s21 = sld [smem:[#allocation9_spill]]  ;;  %s6134_s18 = smov %s4094_s19 }
 0x6e7   : > { %s6132_s30 = sld [smem:[#allocation8_spill]] }
 0x6e8   : > { %s6133_s20 = sld [smem:[#allocation10_spill]] }
 0x6ec   : > { %p26_p12 = scmp.ge.s32.totalorder %s6131_s21, 4  }
 0x6ed   : > { %s6135_s19 = smov %s6132_s30 }
 0x6ee   :  { %28 = sbr.rel (!%p26_p12) target bundleno = 7 (0x7), region = 128 }
 0x6f3   :  { %3437 = vsyncpa [#allocation3], 1 }
 0x6f4   :  { %3439 = vsyncpa [#allocation3 + $0x1], 1 }
 0x6f5   :  { %3440 = vsyncpa [#allocation4], 1 }
 0x6f6   :  { %3442 = vsyncpa [#allocation4 + $0x1], 1 }

// kernel: tpu_custom_call.1
= control target key start
LH: loop header
LB: loop body
LE: loop exit
PB: predicated region body
PF: predicated region fallthrough
CT: control target
= control target key end

     0   :  { %s6066_s0 = inlined_call_operand.vmem [shape: f32[256,16], index: 0, kind: input, shape index: {}]   ;;  %s6067_s1 = inlined_call_operand.vmem [shape: bf16[16,128], index: 1, kind: input, shape index: {}]   ;;  %s6068_s2 = inlined_call_operand.vmem [shape: f32[1,128], index: 2, kind: input, shape index: {}]   ;;  %s6069_s3 = inlined_call_operand.vmem [shape: f32[1,128], index: 3, kind: input, shape index: {}]   ;;  %s6070_s4 = inlined_call_operand.vmem [shape: f32[1,128], index: 4, kind: input, shape index: {}]   ;;  %s6071_s5 = inlined_call_operand.vmem [shape: bf16[2,128,128], index: 5, kind: input, shape index: {}]   ;;  %s6072_s6 = inlined_call_operand.vmem [shape: f32[2,1,128], index: 6, kind: input, shape index: {}]   ;;  %s6073_s7 = inlined_call_operand.vmem [shape: f32[2,1,128], index: 7, kind: input, shape index: {}]   ;;  %s6074_s8 = inlined_call_operand.vmem [shape: f32[2,1,128], index: 8, kind: input, shape index: {}]   ;;  %s6075_s9 = inlined_call_operand.vmem [shape: bf16[2,128,128], index: 9, kind: input, shape index: {}]   ;;  %s6076_s10 = inlined_call_operand.vmem [shape: f32[2,1,128], index: 10, kind: input, shape index: {}]   ;;  %s6077_s11 = inlined_call_operand.vmem [shape: f32[2,1,128], index: 11, kind: input, shape index: {}]   ;;  %s6078_s12 = inlined_call_operand.vmem [shape: f32[2,1,128], index: 12, kind: input, shape index: {}]   ;;  %s6079_s13 = inlined_call_operand.hbm [shape: bf16[128,128], index: 13, kind: input, shape index: {}]   ;;  %s6080_s14 = inlined_call_operand.vmem [shape: f32[1,128], index: 14, kind: input, shape index: {}]   ;;  %s6081_s15 = inlined_call_operand.hbm [shape: f32[256,128], index: 15, kind: output, shape index: {}]  }
   0x1   :  { %6098 = sst [smem:[#allocation12_spill]] %s6066_s0 }
   0x2   :  { %6099 = sst [smem:[#allocation13_spill]] %s6079_s13 }
   0x3   :  { %20 = vsyncpa [#allocation3], 0 }
   0x4   :  { %21 = vsyncpa [#allocation4], 0 }
   0x5   :  { %23 = vsyncpa [#allocation4 + $0x1], 0  ;;  %s4190_s18 = smov 0   ;;  %s4192_s19 = smov 0  }
   0x6   :  { %s4194_s20 = smov 0   ;;  %s4196_s21 = smov 0  }
   0x7 LB: > { %6100 = sst [smem:[#allocation8_spill]] %s4098_s20  ;;  %s4211_s22 = sadd.s32 4294967295, %s4102_s21   ;;  %s4102_s21 = sphi %s4196_s21, %s6131_s21   ;;  %s4098_s20 = sphi %s4194_s20, %s6133_s20   ;;  %s4094_s19 = sphi %s4192_s19, %s6135_s19   ;;  %s4090_s18 = sphi %s4190_s18, %s6134_s18  }
   0x8   : > { %s3490_s23 = sadd.s32 4294967294, %s4102_s21   ;;  %s4215_s24 = sadd.s32 1, %s4102_s21  }
   0x9   : > { %6101 = sst [smem:[#allocation9_spill]] %s4215_s24  ;;  %s356_s25 = sadd.s32 1, %s4098_s20 }
   0xa   : > { %s353_s26 = ssub.s32 %s4102_s21, %s4215_s24  ;;  %p366_p0 = scmp.ne.s32.totalorder %s4098_s20, %s4094_s19 }
   0xb   : > { %p354_p1 = scmp.eq.s32.totalorder %s353_s26, 0  ;;  %p367_p2 = scmp.eq.s32.totalorder %s4211_s22, 1 }
   0xc   : > { %p372_p3 = scmp.ne.s32.totalorder %s4094_s19, %s4090_s18  ;;  %p373_p4 = scmp.eq.s32.totalorder %s3490_s23, 1 }
   0xd   : > { %s4226_s27 = scalar_select %p354_p1, %s4098_s20, %s356_s25  }
   0xe   : > { %p4228_p5 = por %p367_p2, %p366_p0  ;;  %p4232_p6 = por %p373_p4, %p372_p3 }
   0xf   : > { %6102 = sst [smem:[#allocation10_spill]] %s4226_s27  ;;  %p3491_p7 = scmp.ge.s32.totalorder %s4102_s21, 1 }
  0x10   : > { %s6104_s29 = scalar_select %p4232_p6, 1, 0 }
  0x11   : > { %p380_p8 = scmp.lt.s32.totalorder %s4102_s21, 3  ;;  %p3787_p9 = scmp.eq.s32.totalorder %s4211_s22, 0 }
  0x12   : > { %6105 = sst [smem:[#allocation11_spill]] %s6104_s29  ;;  %s4104_s23 = smov [#allocation2]  }
  0x13   : > { %p381_p10 = pnand %p3491_p7, %p380_p8  ;;  %s6106_s13 = sld [smem:[#allocation13_spill]] }
  0x14   : > { %s429_s25 = sshll.u32 %s4104_s23, 4  ;;  %s4105_s26 = smov 64   ;;  %s430_s25 = int_to_ptr.vmem [resolvable:$true] %s429_s25 }
  0x15   : > { %p3779_p11 = pneg %p381_p10  ;;  %s4106_s27 = smov 4  }
  0x16   : > { %457 = sbr.rel (%p381_p10) target bundleno = 1759 (0x6df), region = 80 }
  0x17   : > { %p3780_p12 = pnand %p3787_p9, %p3779_p11 }
  0x19   : > { %s427_s17 = sshll.u32 %s6106_s13, 4  ;;  %s428_s17 = int_to_ptr.hbm [resolvable:$true] %s427_s17 }
  0x1a   : > { %3782 = dma.hbm_to_vmem [thread:$0]  (!%p3780_p12), %s428_s17, 1024, %s430_s25, [#allocation3], %s4105_s26, %s4105_s26, %s4106_s27  }
  0x1b   : > { %4081 = dma.done.wait (%p3787_p9), [#allocation3], 1024  }
  0x1c   : > { %4083 = vsyncadd (%p3787_p9), [#allocation3], 4294966272  ;;  %s3497_s30 = sshll.u32 %s4211_s22, 4  ;;  %s6107_s0 = sld [smem:[#allocation12_spill]]  ;;  %v3714_v0 = vld [vmem:[%s6067_s1] sm:$0xff]  ;;  %vm550_vm0 = vcmask 130048  }
  0x1d   : > { %p507_p13 = scmp.lt.s32.totalorder %s3497_s30, 31  ;;  %582 = vmatpush.bf16.msra.mxu0 %v3714_v0  ;;  %3756 = vmatpush.bf16.msra.mxu3 %v3714_v0  ;;  %v4284_v25 = vld [vmem:[%s6068_s2] ss:$0 sm:$0xff]  ;;  %s503_s25 = sand.u32 1, %s4094_s19  }
  0x1e   : > { %s3496_s26 = sshll.u32 %s503_s25, 7  ;;  %s3755_s13 = sshll.u32 %s4211_s22, 7 }
  0x1f   : > { %s6137_s30 = smov (!%p507_p13, %s3497_s30), 31  ;;  %s6014_s23 = scalar_lea.vmem [#allocation5], %s3496_s26 }
  0x20   : > { %s3498_s16 = sshll.u32 %s6137_s30, 3  ;;  %s3412_s27 = scalar_lea.hbm %s6081_s15, %s3755_s13 }
  0x21   : > { %s3413_s29 = sshll.u32 %s6014_s23, 4  ;;  %s3415_s17 = sshll.u32 %s3412_s27, 4  ;;  %s3414_s29 = int_to_ptr.vmem [resolvable:$true] %s3413_s29  ;;  %s3416_s17 = int_to_ptr.hbm [resolvable:$true] %s3415_s17 }
  0x22   : > { %s4252_s20 = scalar_lea.vmem %s6107_s0, %s3498_s16  ;;  %s3401_s26 = scalar_lea.sflag [#allocation4], %s503_s25 }
  0x23   : > { %v514_v1 = vld [vmem:[%s4252_s20] sm:$0xff]  ;;  %v515_v2 = vld [vmem:[%s4252_s20 + $0x8] sm:$0xff]  ;;  %v516_v4 = vld [vmem:[%s4252_s20 + $0x10] sm:$0xff]  ;;  %s4050_s30 = sshra.s32 %s3416_s17, 4  ;;  %s4056_s13 = scalar_lea.hbm %s6081_s15, 256  ;;  %s4051_s30 = int_to_ptr.hbm [resolvable:$true] %s4050_s30 }
  0x24   : > { %v530_v3 = vpack.c.bf16 %v515_v2, %v514_v1  ;;  %v517_v5 = vld [vmem:[%s4252_s20 + $0x18] sm:$0xff]  ;;  %v524_v7 = vld [vmem:[%s4252_s20 + $0x50] sm:$0xff]  ;;  %v518_v10 = vld [vmem:[%s4252_s20 + $0x20] sm:$0xff]  ;;  %s4052_s22 = scalar_lea.hbm %s4051_s30, 128  ;;  %p4057_p3 = scmp.lt.s32.totalorder %s4051_s30, %s6081_s15 }
  0x25   : > { %v531_v6 = vpack.c.bf16 %v517_v5, %v516_v4  ;;  %v525_v8 = vld [vmem:[%s4252_s20 + $0x58] sm:$0xff]  ;;  %v519_v11 = vld [vmem:[%s4252_s20 + $0x28] sm:$0xff]  ;;  %v526_v13 = vld [vmem:[%s4252_s20 + $0x60] sm:$0xff]  ;;  %v4107_v4 = vmov 128.0   ;;  %p4053_p0 = scmp.ne.s32.totalorder %s4051_s30, %s4052_s22  ;;  %p4058_p4 = scmp.lt.s32.totalorder %s4056_s13, %s4052_s22 }
  0x26   : > { %3503 = vmatmul.msk.bf16.vlgmr.msra.gmra.mxu0 %vm550_vm0, %v530_v3  ;;  %v535_v9 = vpack.c.bf16 %v525_v8, %v524_v7  ;;  %v532_v12 = vpack.c.bf16 %v519_v11, %v518_v10  ;;  %v527_v14 = vld [vmem:[%s4252_s20 + $0x68] sm:$0xff]  ;;  %v520_v16 = vld [vmem:[%s4252_s20 + $0x30] sm:$0xff]  ;;  %v521_v17 = vld [vmem:[%s4252_s20 + $0x38] sm:$0xff]  ;;  %3844 = vrcp.f32 %v4107_v4 }
  0x27   : > { %v536_v15 = vpack.c.bf16 %v527_v14, %v526_v13  ;;  %v533_v18 = vpack.c.bf16 %v521_v17, %v520_v16  ;;  %v528_v19 = vld [vmem:[%s4252_s20 + $0x70] sm:$0xff]  ;;  %v529_v20 = vld [vmem:[%s4252_s20 + $0x78] sm:$0xff]  ;;  %v522_v22 = vld [vmem:[%s4252_s20 + $0x40] sm:$0xff]  ;;  %p4054_p1 = pnand %p4053_p0, %p4228_p5  ;;  %p4059_p7 = por %p4058_p4, %p4057_p3 }
  0x28   : > { %3508 = vmatmul.msk.bf16.vlgmr.msra.gmra.mxu3 %vm550_vm0, %v535_v9  ;;  %v537_v21 = vpack.c.bf16 %v529_v20, %v528_v19  ;;  %v523_v23 = vld [vmem:[%s4252_s20 + $0x48] sm:$0xff]  ;;  %v3719_v19 = vld [vmem:[%s6071_s5 + $0x20] sm:$0xff] }
  0x29   : > { %v534_v24 = vpack.c.bf16 %v523_v23, %v522_v22  ;;  %v3720_v17 = vld [vmem:[%s6071_s5 + $0x28] sm:$0xff]  ;;  %p4055_p2 = pneg %p4054_p1 }
  0x2b   : > { %p4060_p8 = pnand %p4059_p7, %p4055_p2 }
  0x2c   : > { %v3845_v7 = vpop.eup %3844 }
  0x2d   : > { %v659_v10 = vmul.f32 128.0, %v3845_v7  ;;  %vm663_vm1 = vweird.f32 %v3845_v7 }
  0x2f   : > { %v660_v13 = vsub.f32 1.0, %v659_v10 }
  0x31   : > { %v661_v16 = vmul.f32 %v3845_v7, %v660_v13 }
  0x36   : > { %3504 = vmatmul.msk.bf16.gmra.mxu0 %vm550_vm0, %v531_v6 }
  0x38   : > { %3509 = vmatmul.msk.bf16.gmra.mxu3 %vm550_vm0, %v536_v15  ;;  %v3721_v15 = vld [vmem:[%s6071_s5 + $0x30] sm:$0xff] }
  0x46   : > { %3505 = vmatmul.msk.bf16.gmra.mxu0 %vm550_vm0, %v532_v12  ;;  %v3722_v12 = vld [vmem:[%s6071_s5 + $0x38] sm:$0xff] }
  0x47   : > { %1131 = vmatpush.bf16.msra.mxu1 %v3722_v12  ;;  %3757 = vmatpush.bf16.msra.mxu2 %v3722_v12 }
  0x48   : > { %3510 = vmatmul.msk.bf16.gmra.mxu3 %vm550_vm0, %v537_v21  ;;  %v3718_v21 = vld [vmem:[%s6071_s5 + $0x18] sm:$0xff] }
  0x49   : > { %3758 = vmatpush.bf16.msrb.mxu3 %v3722_v12 }
  0x4b   : > { %1132 = vmatpush.bf16.msra.mxu1 %v3721_v15  ;;  %3759 = vmatpush.bf16.msra.mxu2 %v3721_v15 }
  0x4d   : > { %3760 = vmatpush.bf16.msrb.mxu3 %v3721_v15 }
  0x4f   : > { %1133 = vmatpush.bf16.msra.mxu1 %v3720_v17  ;;  %3761 = vmatpush.bf16.msra.mxu2 %v3720_v17 }
  0x51   : > { %3762 = vmatpush.bf16.msrb.mxu3 %v3720_v17 }
  0x53   : > { %1134 = vmatpush.bf16.msra.mxu1 %v3719_v19  ;;  %3763 = vmatpush.bf16.msra.mxu2 %v3719_v19 }
  0x55   : > { %3764 = vmatpush.bf16.msrb.mxu3 %v3719_v19 }
  0x56   : > { %3506 = vmatmul.msk.bf16.gmra.mxu0 %vm550_vm0, %v533_v18  ;;  %v662_v18 = vadd.f32 %v3845_v7, %v661_v16 }
  0x57   : > { %1135 = vmatpush.bf16.msra.mxu1 %v3718_v21  ;;  %3765 = vmatpush.bf16.msra.mxu2 %v3718_v21 }
  0x58   : > { %v4394_v20 = vsel %vm663_vm1, %v3845_v7, %v662_v18 }
  0x59   : > { %3766 = vmatpush.bf16.msrb.mxu3 %v3718_v21 }
  0x66   : > { %3507 = vmatmul.msk.bf16.gmra.mxu0 %vm550_vm0, %v534_v24 }
  0xa3   : > { %v584_v26 = vpop.f32.mrf.mxu0 }
  0xa4   : > { %v4287_v27 = vadd.f32 %v4284_v25, %v584_v26 }
  0xa6   : > { %626 = vadd.xlane.f32.xlu0 %v4287_v27  ;;  %v681_v28 = vmul.f32 %v4287_v27, %v4287_v27 }
  0xa8   : > { %697 = vadd.xlane.f32.xlu1 %v681_v28  ;;  %v3717_v28 = vld [vmem:[%s6071_s5 + $0x10] sm:$0xff] }
  0xa9   : > { %1136 = vmatpush.bf16.msra.mxu1 %v3717_v28  ;;  %3767 = vmatpush.bf16.msra.mxu2 %v3717_v28 }
  0xaa   : > { %3768 = vmatpush.bf16.msrb.mxu3 %v3717_v28 }
  0xab   : > { %v586_v29 = vpop.f32.mrf.mxu0  ;;  %v609_v45 = vpop.f32.mrf.mxu3 }
  0xac   : > { %v4293_v30 = vadd.f32 %v4284_v25, %v586_v29  ;;  %v4350_v60 = vadd.f32 %v4284_v25, %v609_v45 }
  0xae   : > { %628 = vadd.xlane.f32.xlu0 %v4293_v30  ;;  %v682_v31 = vmul.f32 %v4293_v30, %v4293_v30  ;;  %v691_v63 = vmul.f32 %v4350_v60, %v4350_v60 }
  0xb0   : > { %699 = vadd.xlane.f32.xlu1 %v682_v31 }
  0xb3   : > { %v589_v32 = vpop.f32.mrf.mxu0  ;;  %v611_v50 = vpop.f32.mrf.mxu3 }
  0xb4   : > { %v4299_v33 = vadd.f32 %v4284_v25, %v589_v32  ;;  %v4344_v58 = vadd.f32 %v4284_v25, %v611_v50  ;;  %v3716_v32 = vld [vmem:[%s6071_s5 + $0x8] sm:$0xff] }
  0xb5   : > { %1137 = vmatpush.bf16.msra.mxu1 %v3716_v32  ;;  %3769 = vmatpush.bf16.msra.mxu2 %v3716_v32 }
  0xb6   : > { %630 = vadd.xlane.f32.xlu2 %v4299_v33  ;;  %v683_v34 = vmul.f32 %v4299_v33, %v4299_v33  ;;  %v692_v2 = vmul.f32 %v4344_v58, %v4344_v58  ;;  %3770 = vmatpush.bf16.msrb.mxu3 %v3716_v32 }
  0xb8   : > { %701 = vadd.xlane.f32.xlu0 %v683_v34 }
  0xbb   : > { %v591_v35 = vpop.f32.mrf.mxu0  ;;  %v614_v55 = vpop.f32.mrf.mxu3 }
  0xbc   : > { %v4305_v36 = vadd.f32 %v4284_v25, %v591_v35  ;;  %v4354_v62 = vadd.f32 %v4284_v25, %v614_v55 }
  0xbe   : > { %632 = vadd.xlane.f32.xlu2 %v4305_v36  ;;  %v684_v37 = vmul.f32 %v4305_v36, %v4305_v36  ;;  %v693_v6 = vmul.f32 %v4354_v62, %v4354_v62 }
  0xc0   : > { %703 = vadd.xlane.f32.xlu1 %v684_v37 }
  0xc3   : > { %v594_v38 = vpop.f32.mrf.mxu0  ;;  %v616_v61 = vpop.f32.mrf.mxu3 }
  0xc4   : > { %v4311_v39 = vadd.f32 %v4284_v25, %v594_v38  ;;  %v4361_v0 = vadd.f32 %v4284_v25, %v616_v61 }
  0xc6   : > { %634 = vadd.xlane.f32.xlu2 %v4311_v39  ;;  %v685_v40 = vmul.f32 %v4311_v39, %v4311_v39  ;;  %v694_v3 = vmul.f32 %v4361_v0, %v4361_v0 }
  0xc8   : > { %705 = vadd.xlane.f32.xlu1 %v685_v40 }
  0xcb   : > { %v596_v41 = vpop.f32.mrf.mxu0  ;;  %v619_v1 = vpop.f32.mrf.mxu3 }
  0xcc   : > { %v4317_v42 = vadd.f32 %v4284_v25, %v596_v41  ;;  %v4369_v5 = vadd.f32 %v4284_v25, %v619_v1  ;;  %v3715_v41 = vld [vmem:[%s6071_s5] sm:$0xff] }
  0xcd   : > { %1138 = vmatpush.bf16.msra.mxu1 %v3715_v41  ;;  %3771 = vmatpush.bf16.msra.mxu2 %v3715_v41 }
  0xce   : > { %636 = vadd.xlane.f32.xlu0 %v4317_v42  ;;  %v686_v43 = vmul.f32 %v4317_v42, %v4317_v42  ;;  %v695_v8 = vmul.f32 %v4369_v5, %v4369_v5  ;;  %3772 = vmatpush.bf16.msrb.mxu3 %v3715_v41  ;;  %v4451_v41 = vld [vmem:[%s6070_s4] ss:$0 sm:$0xff] }
  0xd0   : > { %707 = vadd.xlane.f32.xlu2 %v686_v43 }
  0xd3   : > { %v599_v44 = vpop.f32.mrf.mxu0  ;;  %v621_v9 = vpop.f32.mrf.mxu3 }
  0xd4   : > { %v4323_v46 = vadd.f32 %v4284_v25, %v599_v44  ;;  %v4377_v11 = vadd.f32 %v4284_v25, %v621_v9 }
  0xd6   : > { %638 = vadd.xlane.f32.xlu0 %v4323_v46  ;;  %v687_v47 = vmul.f32 %v4323_v46, %v4323_v46  ;;  %v696_v14 = vmul.f32 %v4377_v11, %v4377_v11 }
  0xd8   : > { %709 = vadd.xlane.f32.xlu2 %v687_v47 }
  0xdb   : > { %v601_v48 = vpop.f32.mrf.mxu0 }
  0xdc   : > { %v4329_v49 = vadd.f32 %v4284_v25, %v601_v48 }
  0xde   : > { %640 = vadd.xlane.f32.xlu1 %v4329_v49  ;;  %v688_v51 = vmul.f32 %v4329_v49, %v4329_v49 }
  0xe0   : > { %711 = vadd.xlane.f32.xlu0 %v688_v51 }
  0xe3   : > { %v604_v52 = vpop.f32.mrf.mxu0 }
  0xe4   : > { %v4335_v53 = vadd.f32 %v4284_v25, %v604_v52 }
  0xe6   : > { %642 = vadd.xlane.f32.xlu1 %v4335_v53  ;;  %v689_v54 = vmul.f32 %v4335_v53, %v4335_v53 }
  0xe8   : > { %713 = vadd.xlane.f32.xlu0 %v689_v54 }
  0xeb   : > { %v606_v56 = vpop.f32.mrf.mxu0 }
  0xec   : > { %v4341_v57 = vadd.f32 %v4284_v25, %v606_v56 }
  0xee   : > { %644 = vadd.xlane.f32.xlu2 %v4341_v57  ;;  %v690_v59 = vmul.f32 %v4341_v57, %v4341_v57 }
  0xf0   : > { %648 = vadd.xlane.f32.xlu0 %v4344_v58  ;;  %715 = vadd.xlane.f32.xlu1 %v690_v59 }
  0xf6   : > { %646 = vadd.xlane.f32.xlu2 %v4350_v60 }
  0xf8   : > { %650 = vadd.xlane.f32.xlu0 %v4354_v62  ;;  %717 = vadd.xlane.f32.xlu1 %v691_v63 }
  0xfe   : > { %719 = vadd.xlane.f32.xlu2 %v692_v2 }
 0x100   : > { %652 = vadd.xlane.f32.xlu1 %v4361_v0  ;;  %723 = vadd.xlane.f32.xlu0 %v694_v3 }
 0x106   : > { %721 = vadd.xlane.f32.xlu2 %v693_v6 }
 0x108   : > { %654 = vadd.xlane.f32.xlu1 %v4369_v5  ;;  %725 = vadd.xlane.f32.xlu0 %v695_v8 }
 0x10e   : > { %656 = vadd.xlane.f32.xlu2 %v4377_v11 }
 0x110   : > { %727 = vadd.xlane.f32.xlu1 %v696_v14 }
 0x119   : > { %v627_v22 = vpop.xlane.xlu0 %626 }
 0x11a   : > { %v4400_v23 = vmul.f32 %v4394_v20, %v627_v22 }
 0x11b   : > { %v698_v24 = vpop.xlane.xlu1 %697 }
 0x11c   : > { %v745_v25 = vmul.f32 %v4400_v23, %v4400_v23  ;;  %v729_v26 = vmul.f32 %v698_v24, %v4394_v20  ;;  %v793_v16 = vsub.f32 %v4287_v27, %v4400_v23  ;;  %v4437_v24 = vld [vmem:[%s6069_s3] ss:$0 sm:$0xff] }
 0x11e   : > { %v761_v29 = vsub.f32 %v729_v26, %v745_v25 }
 0x120   : > { %v777_v31 = vmax.f32 %v761_v29, 0.0 }
 0x121   : > { %v629_v34 = vpop.xlane.xlu0 %628 }
 0x122   : > { %v809_v35 = vadd.f32 1e-05, %v777_v31  ;;  %v4412_v37 = vmul.f32 %v4394_v20, %v629_v34 }
 0x123   : > { %v700_v38 = vpop.xlane.xlu1 %699 }
 0x124   : > { %3846 = vrsqrt.f32 %v809_v35  ;;  %v746_v40 = vmul.f32 %v4412_v37, %v4412_v37  ;;  %v730_v43 = vmul.f32 %v700_v38, %v4394_v20  ;;  %vm831_vm3 = vweird.f32 %v809_v35 }
 0x126   : > { %v762_v44 = vsub.f32 %v730_v43, %v746_v40 }
 0x128   : > { %v778_v45 = vmax.f32 %v762_v44, 0.0 }
 0x129   : > { %v631_v47 = vpop.xlane.xlu2 %630 }
 0x12a   : > { %v3847_v48 = vpop.eup %3846  ;;  %v4421_v50 = vmul.f32 %v4394_v20, %v631_v47  ;;  %v810_v52 = vadd.f32 1e-05, %v778_v45 }
 0x12b   : > { %v826_v51 = vmul.f32 %v3847_v48, %v809_v35  ;;  %v702_v54 = vpop.xlane.xlu0 %701  ;;  %vm832_vm2 = vweird.f32 %v3847_v48  ;;  %v794_v35 = vsub.f32 %v4293_v30, %v4412_v37 }
 0x12c   : > { %v747_v55 = vmul.f32 %v4421_v50, %v4421_v50  ;;  %v731_v56 = vmul.f32 %v702_v54, %v4394_v20  ;;  %3848 = vrsqrt.f32 %v810_v52  ;;  %vm833_vm4 = vmor %vm831_vm3, %vm832_vm2  ;;  %vm841_vm6 = vweird.f32 %v810_v52 }
 0x12d   : > { %v827_v59 = vmul.f32 %v3847_v48, %v826_v51 }
 0x12e   : > { %v763_v61 = vsub.f32 %v731_v56, %v747_v55 }
 0x12f   : > { %v828_v63 = vmul.f32 0.5, %v827_v59 }
 0x130   : > { %v779_v1 = vmax.f32 %v763_v61, 0.0 }
 0x131   : > { %v829_v2 = vsub.f32 1.5, %v828_v63  ;;  %v633_v3 = vpop.xlane.xlu2 %632 }
 0x132   : > { %v811_v4 = vadd.f32 1e-05, %v779_v1  ;;  %v4427_v6 = vmul.f32 %v4394_v20, %v633_v3  ;;  %v3849_v7 = vpop.eup %3848 }
 0x133   : > { %v704_v8 = vpop.xlane.xlu1 %703  ;;  %v830_v9 = vmul.f32 %v3847_v48, %v829_v2  ;;  %v836_v10 = vmul.f32 %v3849_v7, %v810_v52  ;;  %vm842_vm5 = vweird.f32 %v3849_v7 }
 0x134   : > { %3850 = vrsqrt.f32 %v811_v4  ;;  %v748_v12 = vmul.f32 %v4427_v6, %v4427_v6  ;;  %v732_v13 = vmul.f32 %v704_v8, %v4394_v20  ;;  %vm843_vm7 = vmor %vm841_vm6, %vm842_vm5  ;;  %vm851_vm9 = vweird.f32 %v811_v4 }
 0x135   : > { %v837_v14 = vmul.f32 %v3849_v7, %v836_v10  ;;  %v834_v15 = vsel %vm833_vm4, %v3847_v48, %v830_v9 }
 0x136   : > { %v764_v17 = vsub.f32 %v732_v13, %v748_v12  ;;  %v985_v22 = vmul.f32 %v834_v15, %v793_v16  ;;  %v795_v12 = vsub.f32 %v4299_v33, %v4421_v50 }
 0x137   : > { %v838_v18 = vmul.f32 0.5, %v837_v14 }
 0x138   : > { %v780_v19 = vmax.f32 %v764_v17, 0.0  ;;  %v1004_v40 = vmul.f32 %v4437_v24, %v985_v22 }
 0x139   : > { %v635_v21 = vpop.xlane.xlu2 %634  ;;  %v839_v26 = vsub.f32 1.5, %v838_v18 }
 0x13a   : > { %v3851_v25 = vpop.eup %3850  ;;  %v4440_v28 = vmul.f32 %v4394_v20, %v635_v21  ;;  %v812_v31 = vadd.f32 1e-05, %v780_v19  ;;  %v4455_v30 = vadd.f32 %v4451_v41, %v1004_v40 }
 0x13b   : > { %v846_v29 = vmul.f32 %v3851_v25, %v811_v4  ;;  %v706_v32 = vpop.xlane.xlu1 %705  ;;  %v840_v34 = vmul.f32 %v3849_v7, %v839_v26  ;;  %vm852_vm8 = vweird.f32 %v3851_v25 }
 0x13c   : > { %v749_v27 = vmul.f32 %v4440_v28, %v4440_v28  ;;  %v733_v23 = vmul.f32 %v706_v32, %v4394_v20  ;;  %3852 = vrsqrt.f32 %v812_v31  ;;  %vm853_vm10 = vmor %vm851_vm9, %vm852_vm8  ;;  %vm861_vm12 = vweird.f32 %v812_v31 }
 0x13d   : > { %v847_v38 = vmul.f32 %v3851_v25, %v846_v29  ;;  %v844_v44 = vsel %vm843_vm7, %v3849_v7, %v840_v34  ;;  %v1039_v7 = vmax.f32 %v4455_v30, 0.0  ;;  %v796_v32 = vsub.f32 %v4305_v36, %v4427_v6 }
 0x13e   : > { %v765_v43 = vsub.f32 %v733_v23, %v749_v27  ;;  %v986_v47 = vmul.f32 %v844_v44, %v794_v35 }
 0x13f   : > { %v848_v45 = vmul.f32 0.5, %v847_v38 }
 0x140   : > { %v781_v48 = vmax.f32 %v765_v43, 0.0  ;;  %v1005_v54 = vmul.f32 %v4437_v24, %v986_v47 }
 0x141   : > { %v849_v51 = vsub.f32 1.5, %v848_v45  ;;  %v637_v52 = vpop.xlane.xlu0 %636 }
 0x142   : > { %v4457_v37 = vadd.f32 1e-05, %v781_v48  ;;  %v4460_v55 = vmul.f32 %v4394_v20, %v637_v52  ;;  %v3853_v56 = vpop.eup %3852  ;;  %v4463_v61 = vadd.f32 %v4451_v41, %v1005_v54 }
 0x143   : > { %v708_v59 = vpop.xlane.xlu2 %707  ;;  %v850_v63 = vmul.f32 %v3851_v25, %v849_v51  ;;  %v856_v1 = vmul.f32 %v3853_v56, %v812_v31  ;;  %vm862_vm11 = vweird.f32 %v3853_v56 }
 0x144   : > { %3854 = vrsqrt.f32 %v4457_v37  ;;  %v750_v2 = vmul.f32 %v4460_v55, %v4460_v55  ;;  %v734_v3 = vmul.f32 %v708_v59, %v4394_v20  ;;  %v1040_v8 = vmax.f32 %v4463_v61, 0.0  ;;  %vm863_vm13 = vmor %vm861_vm12, %vm862_vm11 }
 0x145   : > { %v857_v9 = vmul.f32 %v3853_v56, %v856_v1  ;;  %v854_v10 = vsel %vm853_vm10, %v3851_v25, %v850_v63  ;;  %vm871_vm15 = vweird.f32 %v4457_v37 }
 0x146   : > { %v766_v13 = vsub.f32 %v734_v3, %v750_v2  ;;  %v1055_v4 = vpack.c.bf16 %v1040_v8, %v1039_v7  ;;  %v987_v17 = vmul.f32 %v854_v10, %v795_v12  ;;  %v797_v12 = vsub.f32 %v4311_v39, %v4440_v28 }
 0x147   : > { %v858_v14 = vmul.f32 0.5, %v857_v9 }
 0x148   : > { %v782_v15 = vmax.f32 %v766_v13, 0.0  ;;  %1139 = vmatmul.bf16.vlgmr.msra.gmra.mxu1 %v1055_v4  ;;  %v1006_v23 = vmul.f32 %v4437_v24, %v987_v17 }
 0x149   : > { %v639_v16 = vpop.xlane.xlu0 %638  ;;  %v859_v19 = vsub.f32 1.5, %v858_v14 }
 0x14a   : > { %v3855_v18 = vpop.eup %3854  ;;  %v4478_v21 = vmul.f32 %v4394_v20, %v639_v16  ;;  %v814_v33 = vadd.f32 1e-05, %v782_v15  ;;  %v4489_v47 = vadd.f32 %v4451_v41, %v1006_v23 }
 0x14b   : > { %v866_v22 = vmul.f32 %v3855_v18, %v4457_v37  ;;  %v710_v50 = vpop.xlane.xlu2 %709  ;;  %v860_v29 = vmul.f32 %v3853_v56, %v859_v19  ;;  %vm872_vm14 = vweird.f32 %v3855_v18 }
 0x14c   : > { %v751_v25 = vmul.f32 %v4478_v21, %v4478_v21  ;;  %v735_v26 = vmul.f32 %v710_v50, %v4394_v20  ;;  %3856 = vrsqrt.f32 %v814_v33  ;;  %v1041_v1 = vmax.f32 %v4489_v47, 0.0  ;;  %vm873_vm0 = vmor %vm871_vm15, %vm872_vm14 }
 0x14d   : > { %v867_v27 = vmul.f32 %v3855_v18, %v866_v22  ;;  %v864_v35 = vsel %vm863_vm13, %v3853_v56, %v860_v29  ;;  %vm881_vm2 = vweird.f32 %v814_v33 }
 0x14e   : > { %v767_v34 = vsub.f32 %v735_v26, %v751_v25  ;;  %v988_v40 = vmul.f32 %v864_v35, %v796_v32  ;;  %v798_v26 = vsub.f32 %v4317_v42, %v4460_v55 }
 0x14f   : > { %v868_v38 = vmul.f32 0.5, %v867_v27 }
 0x150   : > { %v783_v43 = vmax.f32 %v767_v34, 0.0  ;;  %v1007_v45 = vmul.f32 %v4437_v24, %v988_v40 }
 0x151   : > { %v869_v31 = vsub.f32 1.5, %v868_v38  ;;  %v641_v44 = vpop.xlane.xlu1 %640 }
 0x152   : > { %v815_v48 = vadd.f32 1e-05, %v783_v43  ;;  %v4492_v36 = vmul.f32 %v4394_v20, %v641_v44  ;;  %v3857_v6 = vpop.eup %3856  ;;  %v4495_v52 = vadd.f32 %v4451_v41, %v1007_v45 }
 0x153   : > { %v712_v51 = vpop.xlane.xlu0 %711  ;;  %v870_v54 = vmul.f32 %v3855_v18, %v869_v31  ;;  %v876_v56 = vmul.f32 %v3857_v6, %v814_v33  ;;  %vm882_vm1 = vweird.f32 %v3857_v6 }
 0x154   : > { %3858 = vrsqrt.f32 %v815_v48  ;;  %v752_v59 = vmul.f32 %v4492_v36, %v4492_v36  ;;  %v736_v63 = vmul.f32 %v712_v51, %v4394_v20  ;;  %v1042_v2 = vmax.f32 %v4495_v52, 0.0  ;;  %vm883_vm3 = vmor %vm881_vm2, %vm882_vm1 }
 0x155   : > { %v877_v3 = vmul.f32 %v3857_v6, %v876_v56  ;;  %v874_v37 = vsel %vm873_vm0, %v3855_v18, %v870_v54  ;;  %vm891_vm5 = vweird.f32 %v815_v48 }
 0x156   : > { %v768_v9 = vsub.f32 %v736_v63, %v752_v59  ;;  %v1056_v10 = vpack.c.bf16 %v1042_v2, %v1041_v1  ;;  %v989_v19 = vmul.f32 %v874_v37, %v797_v12  ;;  %v799_v59 = vsub.f32 %v4323_v46, %v4478_v21 }
 0x157   : > { %v878_v13 = vmul.f32 0.5, %v877_v3 }
 0x158   : > { %v784_v4 = vmax.f32 %v768_v9, 0.0  ;;  %1144 = vmatmul.bf16.gmra.mxu1 %v1056_v10  ;;  %v1008_v23 = vmul.f32 %v4437_v24, %v989_v19 }
 0x159   : > { %v643_v14 = vpop.xlane.xlu1 %642  ;;  %v879_v16 = vsub.f32 1.5, %v878_v13 }
 0x15a   : > { %v3859_v15 = vpop.eup %3858  ;;  %v4510_v17 = vmul.f32 %v4394_v20, %v643_v14  ;;  %v816_v50 = vadd.f32 1e-05, %v784_v4  ;;  %v4525_v42 = vadd.f32 %v4451_v41, %v1008_v23 }
 0x15b   : > { %v886_v22 = vmul.f32 %v3859_v15, %v815_v48  ;;  %v714_v25 = vpop.xlane.xlu0 %713  ;;  %v880_v28 = vmul.f32 %v3857_v6, %v879_v16  ;;  %vm892_vm4 = vweird.f32 %v3859_v15 }
 0x15c   : > { %v753_v18 = vmul.f32 %v4510_v17, %v4510_v17  ;;  %v737_v39 = vmul.f32 %v714_v25, %v4394_v20  ;;  %3860 = vrsqrt.f32 %v816_v50  ;;  %vm893_vm6 = vmor %vm891_vm5, %vm892_vm4  ;;  %v6097_v10 = vmax.f32 %v4525_v42, 0.0 }
 0x15d   : > { %v887_v29 = vmul.f32 %v3859_v15, %v886_v22  ;;  %v884_v27 = vsel %vm883_vm3, %v3857_v6, %v880_v28  ;;  %vm901_vm8 = vweird.f32 %v816_v50 }
 0x15e   : > { %v769_v32 = vsub.f32 %v737_v39, %v753_v18  ;;  %v990_v35 = vmul.f32 %v884_v27, %v798_v26 }
 0x15f   : > { %v888_v34 = vmul.f32 0.5, %v887_v29 }
 0x160   : > { %v785_v38 = vmax.f32 %v769_v32, 0.0  ;;  %v1009_v43 = vmul.f32 %v4437_v24, %v990_v35  ;;  %v800_v32 = vsub.f32 %v4329_v49, %v4492_v36 }
 0x161   : > { %v889_v33 = vsub.f32 1.5, %v888_v34  ;;  %v645_v40 = vpop.xlane.xlu2 %644 }
 0x162   : > { %v4519_v31 = vadd.f32 1e-05, %v785_v38  ;;  %v4522_v44 = vmul.f32 %v4394_v20, %v645_v40  ;;  %v3861_v55 = vpop.eup %3860  ;;  %v4528_v54 = vadd.f32 %v4451_v41, %v1009_v43 }
 0x163   : > { %v890_v45 = vmul.f32 %v3859_v15, %v889_v33  ;;  %v649_v6 = vpop.xlane.xlu0 %648  ;;  %v716_v51 = vpop.xlane.xlu1 %715  ;;  %v896_v56 = vmul.f32 %v3861_v55, %v816_v50  ;;  %vm902_vm7 = vweird.f32 %v3861_v55 }
 0x164   : > { %3862 = vrsqrt.f32 %v4519_v31  ;;  %v754_v63 = vmul.f32 %v4522_v44, %v4522_v44  ;;  %v738_v3 = vmul.f32 %v716_v51, %v4394_v20  ;;  %v6096_v37 = vmax.f32 %v4528_v54, 0.0  ;;  %vm903_vm9 = vmor %vm901_vm8, %vm902_vm7 }
 0x165   : > { %v897_v9 = vmul.f32 %v3861_v55, %v896_v56  ;;  %v894_v12 = vsel %vm893_vm6, %v3859_v15, %v890_v45  ;;  %v4560_v50 = vmul.f32 %v4394_v20, %v649_v6  ;;  %vm911_vm11 = vweird.f32 %v4519_v31 }
 0x166   : > { %v770_v13 = vsub.f32 %v738_v3, %v754_v63  ;;  %v1057_v4 = vpack.c.bf16 %v6096_v37, %v6097_v10  ;;  %v991_v46 = vmul.f32 %v894_v12, %v799_v59 }
 0x167   : > { %v898_v48 = vmul.f32 0.5, %v897_v9  ;;  %v756_v51 = vmul.f32 %v4560_v50, %v4560_v50 }
 0x168   : > { %v786_v21 = vmax.f32 %v770_v13, 0.0  ;;  %1149 = vmatmul.bf16.vlgmr.msra.gmra.mxu2 %v1057_v4  ;;  %v1010_v29 = vmul.f32 %v4437_v24, %v991_v46 }
 0x169   : > { %v647_v14 = vpop.xlane.xlu2 %646  ;;  %v899_v19 = vsub.f32 1.5, %v898_v48 }
 0x16a   : > { %v4542_v16 = vpop.eup %3862  ;;  %v4545_v22 = vmul.f32 %v4394_v20, %v647_v14  ;;  %v4549_v25 = vadd.f32 1e-05, %v786_v21  ;;  %v4563_v40 = vadd.f32 %v4451_v41, %v1010_v29 }
 0x16b   : > { %v906_v15 = vmul.f32 %v4542_v16, %v4519_v31  ;;  %v651_v18 = vpop.xlane.xlu0 %650  ;;  %v718_v39 = vpop.xlane.xlu1 %717  ;;  %v900_v28 = vmul.f32 %v3861_v55, %v899_v19  ;;  %vm912_vm10 = vweird.f32 %v4542_v16  ;;  %v801_v31 = vsub.f32 %v4335_v53, %v4510_v17 }
 0x16c   : > { %v755_v26 = vmul.f32 %v4545_v22, %v4545_v22  ;;  %3864 = vrsqrt.f32 %v4549_v25  ;;  %v739_v23 = vmul.f32 %v718_v39, %v4394_v20  ;;  %v6095_v48 = vmax.f32 %v4563_v40, 0.0  ;;  %vm4596_vm12 = vmor %vm911_vm11, %vm912_vm10 }
 0x16d   : > { %v907_v27 = vmul.f32 %v4542_v16, %v906_v15  ;;  %v904_v34 = vsel %vm903_vm9, %v3861_v55, %v900_v28  ;;  %v4588_v39 = vmul.f32 %v4394_v20, %v651_v18  ;;  %vm921_vm14 = vweird.f32 %v4549_v25 }
 0x16e   : > { %v771_v38 = vsub.f32 %v739_v23, %v755_v26  ;;  %v992_v33 = vmul.f32 %v904_v34, %v800_v32 }
 0x16f   : > { %v908_v35 = vmul.f32 0.5, %v907_v27  ;;  %v757_v18 = vmul.f32 %v4588_v39, %v4588_v39 }
 0x170   : > { %v787_v45 = vmax.f32 %v771_v38, 0.0  ;;  %v1011_v36 = vmul.f32 %v4437_v24, %v992_v33 }
 0x171   : > { %v909_v43 = vsub.f32 1.5, %v908_v35  ;;  %v720_v49 = vpop.xlane.xlu2 %719 }
 0x172   : > { %v740_v56 = vmul.f32 %v720_v49, %v4394_v20  ;;  %v3865_v55 = vpop.eup %3864  ;;  %v4570_v59 = vadd.f32 1e-05, %v787_v45  ;;  %v4573_v3 = vadd.f32 %v4451_v41, %v1011_v36 }
 0x173   : > { %v653_v6 = vpop.xlane.xlu1 %652  ;;  %v724_v63 = vpop.xlane.xlu0 %723  ;;  %v916_v9 = vmul.f32 %v3865_v55, %v4549_v25  ;;  %v910_v4 = vmul.f32 %v4542_v16, %v909_v43  ;;  %vm922_vm13 = vweird.f32 %v3865_v55 }
 0x174   : > { %v772_v12 = vsub.f32 %v740_v56, %v756_v51  ;;  %v4577_v13 = vmul.f32 %v4394_v20, %v653_v6  ;;  %3866 = vrsqrt.f32 %v4570_v59  ;;  %v742_v46 = vmul.f32 %v724_v63, %v4394_v20  ;;  %vm923_vm15 = vmor %vm921_vm14, %vm922_vm13 }
 0x175   : > { %v6094_v21 = vmax.f32 %v4573_v3, 0.0  ;;  %v917_v14 = vmul.f32 %v3865_v55, %v916_v9  ;;  %v914_v34 = vsel %vm4596_vm12, %v4542_v16, %v910_v4  ;;  %v802_v51 = vsub.f32 %v4341_v57, %v4522_v44 }
 0x176   : > { %v788_v19 = vmax.f32 %v772_v12, 0.0  ;;  %v758_v15 = vmul.f32 %v4577_v13, %v4577_v13  ;;  %v993_v16 = vmul.f32 %v914_v34, %v801_v31  ;;  %vm931_vm1 = vweird.f32 %v4570_v59 }
 0x177   : > { %v1058_v28 = vpack.c.bf16 %v6094_v21, %v6095_v48  ;;  %v918_v29 = vmul.f32 0.5, %v917_v14 }
 0x178   : > { %v4600_v32 = vadd.f32 1e-05, %v788_v19  ;;  %v774_v27 = vsub.f32 %v742_v46, %v758_v15  ;;  %v1012_v57 = vmul.f32 %v4437_v24, %v993_v16 }
 0x179   : > { %v722_v23 = vpop.xlane.xlu2 %721  ;;  %v919_v35 = vsub.f32 1.5, %v918_v29  ;;  %1154 = vmatmul.bf16.gmra.mxu2 %v1058_v28 }
 0x17a   : > { %3868 = vrsqrt.f32 %v4600_v32  ;;  %v790_v38 = vmax.f32 %v774_v27, 0.0  ;;  %v4610_v33 = vpop.eup %3866  ;;  %v741_v53 = vmul.f32 %v722_v23, %v4394_v20  ;;  %vm941_vm4 = vweird.f32 %v4600_v32 }
 0x17b   : > { %v655_v17 = vpop.xlane.xlu1 %654  ;;  %v726_v43 = vpop.xlane.xlu0 %725  ;;  %v920_v45 = vmul.f32 %v3865_v55, %v919_v35  ;;  %v926_v49 = vmul.f32 %v4610_v33, %v4570_v59  ;;  %vm932_vm0 = vweird.f32 %v4610_v33 }
 0x17c   : > { %v4616_v36 = vadd.f32 1e-05, %v790_v38  ;;  %v773_v56 = vsub.f32 %v741_v53, %v757_v18  ;;  %v4621_v6 = vmul.f32 %v4394_v20, %v655_v17  ;;  %v743_v25 = vmul.f32 %v726_v43, %v4394_v20  ;;  %vm4657_vm3 = vmor %vm931_vm1, %vm932_vm0 }
 0x17d   : > { %v927_v63 = vmul.f32 %v4610_v33, %v926_v49  ;;  %v924_v9 = vsel %vm923_vm15, %v3865_v55, %v920_v45  ;;  %v4642_v53 = vadd.f32 %v4451_v41, %v1012_v57 }
 0x17e   : > { %3870 = vrsqrt.f32 %v4616_v36  ;;  %v789_v12 = vmax.f32 %v773_v56, 0.0  ;;  %v759_v4 = vmul.f32 %v4621_v6, %v4621_v6  ;;  %v994_v46 = vmul.f32 %v924_v9, %v802_v51 }
 0x17f   : > { %v928_v19 = vmul.f32 0.5, %v927_v63  ;;  %v804_v63 = vsub.f32 %v4344_v58, %v4560_v50  ;;  %v6093_v59 = vmax.f32 %v4642_v53, 0.0  ;;  %v803_v50 = vsub.f32 %v4350_v60, %v4545_v22 }
 0x180   : > { %v3869_v14 = vpop.eup %3868  ;;  %v4630_v15 = vadd.f32 1e-05, %v789_v12  ;;  %v775_v28 = vsub.f32 %v743_v25, %v759_v4  ;;  %v1013_v55 = vmul.f32 %v4437_v24, %v994_v46  ;;  %vm961_vm6 = vweird.f32 %v4616_v36 }
 0x181   : > { %v936_v44 = vmul.f32 %v3869_v14, %v4600_v32  ;;  %v657_v26 = vpop.xlane.xlu2 %656  ;;  %v929_v29 = vsub.f32 1.5, %v928_v19  ;;  %vm942_vm2 = vweird.f32 %v3869_v14 }
 0x182   : > { %v4633_v27 = vmul.f32 %v4394_v20, %v657_v26  ;;  %3872 = vrsqrt.f32 %v4630_v15  ;;  %v791_v18 = vmax.f32 %v775_v28, 0.0  ;;  %v4650_v51 = vadd.f32 %v4451_v41, %v1013_v55  ;;  %vm943_vm5 = vmor %vm941_vm4, %vm942_vm2 }
 0x183   : > { %v937_v31 = vmul.f32 %v3869_v14, %v936_v44  ;;  %v728_v23 = vpop.xlane.xlu1 %727  ;;  %v930_v17 = vmul.f32 %v4610_v33, %v929_v29  ;;  %vm951_vm10 = vweird.f32 %v4630_v15 }
 0x184   : > { %v3871_v34 = vpop.eup %3870  ;;  %v760_v35 = vmul.f32 %v4633_v27, %v4633_v27  ;;  %v744_v38 = vmul.f32 %v728_v23, %v4394_v20  ;;  %v4646_v49 = vadd.f32 1e-05, %v791_v18  ;;  %v6092_v4 = vmax.f32 %v4650_v51, 0.0 }
 0x185   : > { %v938_v43 = vmul.f32 0.5, %v937_v31  ;;  %v956_v45 = vmul.f32 %v3871_v34, %v4616_v36  ;;  %v934_v58 = vsel %vm4657_vm3, %v4610_v33, %v930_v17  ;;  %vm962_vm7 = vweird.f32 %v3871_v34 }
 0x186   : > { %v776_v16 = vsub.f32 %v744_v38, %v760_v35  ;;  %3874 = vrsqrt.f32 %v4646_v49  ;;  %v1059_v26 = vpack.c.bf16 %v6092_v4, %v6093_v59  ;;  %v995_v33 = vmul.f32 %v934_v58, %v803_v50  ;;  %vm963_vm8 = vmor %vm961_vm6, %vm962_vm7 }
 0x187   : > { %v939_v56 = vsub.f32 1.5, %v938_v43  ;;  %v957_v25 = vmul.f32 %v3871_v34, %v956_v45  ;;  %v806_v18 = vsub.f32 %v4361_v0, %v4577_v13  ;;  %v805_v13 = vsub.f32 %v4354_v62, %v4588_v39 }
 0x188   : > { %v792_v12 = vmax.f32 %v776_v16, 0.0  ;;  %v3873_v46 = vpop.eup %3872  ;;  %v1014_v43 = vmul.f32 %v4437_v24, %v995_v33  ;;  %vm971_vm12 = vweird.f32 %v4646_v49 }
 0x189   : > { %v940_v19 = vmul.f32 %v3869_v14, %v939_v56  ;;  %v958_v57 = vmul.f32 0.5, %v957_v25  ;;  %v946_v44 = vmul.f32 %v3873_v46, %v4630_v15  ;;  %1159 = vmatmul.bf16.gmra.mxu2 %v1059_v26  ;;  %vm952_vm9 = vweird.f32 %v3873_v46 }
 0x18a   : > { %v824_v28 = vadd.f32 1e-05, %v792_v12  ;;  %vm953_vm11 = vmor %vm951_vm10, %vm952_vm9 }
 0x18b   : > { %v959_v29 = vsub.f32 1.5, %v958_v57  ;;  %v944_v32 = vsel %vm943_vm5, %v3869_v14, %v940_v19  ;;  %v947_v55 = vmul.f32 %v3873_v46, %v946_v44  ;;  %v4688_v19 = vadd.f32 %v4451_v41, %v1014_v43 }
 0x18c   : > { %3876 = vrsqrt.f32 %v824_v28  ;;  %v996_v31 = vmul.f32 %v944_v32, %v804_v63  ;;  %v3875_v60 = vpop.eup %3874  ;;  %vm981_vm15 = vweird.f32 %v824_v28 }
 0x18d   : > { %v960_v22 = vmul.f32 %v3871_v34, %v959_v29  ;;  %v948_v23 = vmul.f32 0.5, %v947_v55  ;;  %v966_v35 = vmul.f32 %v3875_v60, %v4646_v49  ;;  %vm972_vm13 = vweird.f32 %v3875_v60 }
 0x18e   : > { %v1015_v38 = vmul.f32 %v4437_v24, %v996_v31  ;;  %vm4697_vm14 = vmor %vm971_vm12, %vm972_vm13 }
 0x18f   : > { %v964_v17 = vsel %vm963_vm8, %v3871_v34, %v960_v22  ;;  %v949_v36 = vsub.f32 1.5, %v948_v23  ;;  %v967_v14 = vmul.f32 %v3875_v60, %v966_v35  ;;  %v808_v22 = vsub.f32 %v4377_v11, %v4633_v27 }
 0x190   : > { %v998_v45 = vmul.f32 %v964_v17, %v806_v18  ;;  %v4682_v0 = vadd.f32 %v4451_v41, %v1015_v38  ;;  %v807_v18 = vsub.f32 %v4369_v5, %v4621_v6 }
 0x191   : > { %v950_v56 = vmul.f32 %v3873_v46, %v949_v36  ;;  %v968_v25 = vmul.f32 0.5, %v967_v14 }
 0x192   : > { %v3877_v16 = vpop.eup %3876  ;;  %v1017_v34 = vmul.f32 %v4437_v24, %v998_v45  ;;  %v6090_v15 = vmax.f32 %v4682_v0, 0.0 }
 0x193   : > { %v976_v63 = vmul.f32 %v3877_v16, %v824_v28  ;;  %v954_v9 = vsel %vm953_vm11, %v3873_v46, %v950_v56  ;;  %v969_v12 = vsub.f32 1.5, %v968_v25  ;;  %v6091_v46 = vmax.f32 %v4688_v19, 0.0 }
 0x194   : > { %v997_v58 = vmul.f32 %v954_v9, %v805_v13  ;;  %v4694_v62 = vadd.f32 %v4451_v41, %v1017_v34  ;;  %vm982_vm0 = vweird.f32 %v3877_v16 }
 0x195   : > { %v977_v57 = vmul.f32 %v3877_v16, %v976_v63  ;;  %v970_v39 = vmul.f32 %v3875_v60, %v969_v12  ;;  %v1060_v32 = vpack.c.bf16 %v6090_v15, %v6091_v46  ;;  %vm983_vm1 = vmor %vm981_vm15, %vm982_vm0 }
 0x196   : > { %v1016_v44 = vmul.f32 %v4437_v24, %v997_v58  ;;  %v6088_v31 = vmax.f32 %v4694_v62, 0.0 }
 0x197   : > { %v978_v50 = vmul.f32 0.5, %v977_v57  ;;  %v974_v28 = vsel %vm4697_vm14, %v3875_v60, %v970_v39 }
 0x198   : > { %v4702_v49 = vadd.f32 %v4451_v41, %v1016_v44  ;;  %v999_v17 = vmul.f32 %v974_v28, %v807_v18 }
 0x199   : > { %v979_v29 = vsub.f32 1.5, %v978_v50  ;;  %1164 = vmatmul.bf16.gmra.mxu2 %v1060_v32 }
 0x19a   : > { %v6089_v33 = vmax.f32 %v4702_v49, 0.0  ;;  %v1018_v11 = vmul.f32 %v4437_v24, %v999_v17 }
 0x19b   : > { %v980_v55 = vmul.f32 %v3877_v16, %v979_v29 }
 0x19c   : > { %v1061_v23 = vpack.c.bf16 %v6088_v31, %v6089_v33  ;;  %v4726_v60 = vadd.f32 %v4451_v41, %v1018_v11 }
 0x19d   : > { %v984_v35 = vsel %vm983_vm1, %v3877_v16, %v980_v55 }
 0x19e   : > { %v1000_v38 = vmul.f32 %v984_v35, %v808_v22  ;;  %1169 = vmatmul.bf16.vlgmr.msrb.gmra.mxu3 %v1061_v23  ;;  %v6087_v6 = vmax.f32 %v4726_v60, 0.0 }
 0x1a0   : > { %v1019_v36 = vmul.f32 %v4437_v24, %v1000_v38  ;;  %v4737_v24 = vld [vmem:[%s6072_s6] ss:$0 sm:$0xff] }
 0x1a2   : > { %v4723_v27 = vadd.f32 %v4451_v41, %v1019_v36  ;;  %v3730_v36 = vld [vmem:[%s6075_s9 + $0x38] sm:$0xff] }
 0x1a3   : > { %1680 = vmatpush.bf16.msrb.mxu2 %v3730_v36 }
 0x1a4   : > { %v6086_v5 = vmax.f32 %v4723_v27, 0.0 }
 0x1a6   : > { %v1062_v14 = vpack.c.bf16 %v6086_v5, %v6087_v6 }
 0x1ae   : > { %1174 = vmatmul.bf16.gmra.mxu3 %v1062_v14 }
 0x1c5   : > { %v1140_v43 = vpop.f32.mrf.mxu1 }
 0x1c6   : > { %v4740_v45 = vadd.f32 %v4737_v24, %v1140_v43 }
 0x1c8   : > { %1182 = vadd.xlane.f32.xlu2 %v4740_v45  ;;  %v1230_v41 = vmul.f32 %v4740_v45, %v4740_v45 }
 0x1ca   : > { %1246 = vadd.xlane.f32.xlu1 %v1230_v41  ;;  %v3729_v41 = vld [vmem:[%s6075_s9 + $0x30] sm:$0xff] }
 0x1cb   : > { %1681 = vmatpush.bf16.msrb.mxu2 %v3729_v41 }
 0x1cd   : > { %v1142_v16 = vpop.f32.mrf.mxu1 }
 0x1ce   : > { %v4746_v56 = vadd.f32 %v4737_v24, %v1142_v16 }
 0x1d0   : > { %1184 = vadd.xlane.f32.xlu0 %v4746_v56  ;;  %v1231_v25 = vmul.f32 %v4746_v56, %v4746_v56 }
 0x1d2   : > { %1248 = vadd.xlane.f32.xlu2 %v1231_v25 }
 0x1d5   : > { %v1145_v13 = vpop.f32.mrf.mxu1 }
 0x1d6   : > { %v4752_v63 = vadd.f32 %v4737_v24, %v1145_v13 }
 0x1d8   : > { %1186 = vadd.xlane.f32.xlu0 %v4752_v63  ;;  %v1232_v34 = vmul.f32 %v4752_v63, %v4752_v63 }
 0x1da   : > { %1250 = vadd.xlane.f32.xlu2 %v1232_v34 }
 0x1dd   : > { %v1147_v9 = vpop.f32.mrf.mxu1 }
 0x1de   : > { %v4758_v12 = vadd.f32 %v4737_v24, %v1147_v9 }
 0x1e0   : > { %1188 = vadd.xlane.f32.xlu1 %v4758_v12  ;;  %v1233_v57 = vmul.f32 %v4758_v12, %v4758_v12 }
 0x1e2   : > { %1252 = vadd.xlane.f32.xlu0 %v1233_v57 }
 0x1eb   : > { %v1150_v58 = vpop.f32.mrf.mxu2 }
 0x1ec   : > { %v4764_v50 = vadd.f32 %v4737_v24, %v1150_v58 }
 0x1ee   : > { %1190 = vadd.xlane.f32.xlu1 %v4764_v50  ;;  %v1234_v44 = vmul.f32 %v4764_v50, %v4764_v50 }
 0x1f0   : > { %1254 = vadd.xlane.f32.xlu0 %v1234_v44 }
 0x1f3   : > { %v1152_v39 = vpop.f32.mrf.mxu2 }
 0x1f4   : > { %v4770_v26 = vadd.f32 %v4737_v24, %v1152_v39 }
 0x1f6   : > { %1192 = vadd.xlane.f32.xlu2 %v4770_v26  ;;  %v1235_v29 = vmul.f32 %v4770_v26, %v4770_v26 }
 0x1f8   : > { %1256 = vadd.xlane.f32.xlu1 %v1235_v29 }
 0x1fc   : > { %v1155_v32 = vpop.f32.mrf.mxu2 }
 0x1fd   : > { %v4776_v55 = vadd.f32 %v4737_v24, %v1155_v32 }
 0x1ff   : > { %1194 = vadd.xlane.f32.xlu2 %v4776_v55  ;;  %v1236_v22 = vmul.f32 %v4776_v55, %v4776_v55 }
 0x201   : > { %1258 = vadd.xlane.f32.xlu1 %v1236_v22 }
 0x204   : > { %v1157_v28 = vpop.f32.mrf.mxu2 }
 0x205   : > { %v4782_v18 = vadd.f32 %v4737_v24, %v1157_v28 }
 0x207   : > { %1196 = vadd.xlane.f32.xlu0 %v4782_v18  ;;  %v1237_v23 = vmul.f32 %v4782_v18, %v4782_v18 }
 0x209   : > { %1260 = vadd.xlane.f32.xlu2 %v1237_v23  ;;  %v3728_v23 = vld [vmem:[%s6075_s9 + $0x28] sm:$0xff] }
 0x20a   : > { %1682 = vmatpush.bf16.msrb.mxu2 %v3728_v23 }
 0x20c   : > { %v1160_v35 = vpop.f32.mrf.mxu2 }
 0x20d   : > { %v4788_v38 = vadd.f32 %v4737_v24, %v1160_v35 }
 0x20f   : > { %1198 = vadd.xlane.f32.xlu0 %v4788_v38  ;;  %v1238_v17 = vmul.f32 %v4788_v38, %v4788_v38 }
 0x211   : > { %1262 = vadd.xlane.f32.xlu2 %v1238_v17  ;;  %v3727_v17 = vld [vmem:[%s6075_s9 + $0x20] sm:$0xff] }
 0x212   : > { %1683 = vmatpush.bf16.msrb.mxu2 %v3727_v17 }
 0x214   : > { %v1162_v11 = vpop.f32.mrf.mxu2 }
 0x215   : > { %v4797_v14 = vadd.f32 %v4737_v24, %v1162_v11 }
 0x217   : > { %1200 = vadd.xlane.f32.xlu1 %v4797_v14  ;;  %v1239_v43 = vmul.f32 %v4797_v14, %v4797_v14 }
 0x219   : > { %1264 = vadd.xlane.f32.xlu0 %v1239_v43 }
 0x21c   : > { %v1165_v16 = vpop.f32.mrf.mxu2 }
 0x21d   : > { %v4806_v25 = vadd.f32 %v4737_v24, %v1165_v16 }
 0x21f   : > { %1202 = vadd.xlane.f32.xlu1 %v4806_v25  ;;  %v1240_v13 = vmul.f32 %v4806_v25, %v4806_v25 }
 0x221   : > { %v1170_v34 = vpop.f32.mrf.mxu3  ;;  %1266 = vadd.xlane.f32.xlu0 %v1240_v13  ;;  %v3726_v13 = vld [vmem:[%s6075_s9 + $0x18] sm:$0xff] }
 0x222   : > { %v4822_v29 = vadd.f32 %v4737_v24, %v1170_v34  ;;  %1684 = vmatpush.bf16.msrb.mxu2 %v3726_v13 }
 0x224   : > { %v1167_v9 = vpop.f32.mrf.mxu2  ;;  %v1242_v32 = vmul.f32 %v4822_v29, %v4822_v29 }
 0x225   : > { %v4812_v57 = vadd.f32 %v4737_v24, %v1167_v9 }
 0x227   : > { %1204 = vadd.xlane.f32.xlu2 %v4812_v57  ;;  %v1241_v58 = vmul.f32 %v4812_v57, %v4812_v57 }
 0x229   : > { %v1172_v44 = vpop.f32.mrf.mxu3  ;;  %1268 = vadd.xlane.f32.xlu1 %v1241_v58 }
 0x22a   : > { %v4818_v39 = vadd.f32 %v4737_v24, %v1172_v44 }
 0x22c   : > { %1208 = vadd.xlane.f32.xlu0 %v4818_v39  ;;  %v1243_v35 = vmul.f32 %v4818_v39, %v4818_v39 }
 0x22f   : > { %1206 = vadd.xlane.f32.xlu2 %v4822_v29 }
 0x231   : > { %v1175_v22 = vpop.f32.mrf.mxu3  ;;  %1270 = vadd.xlane.f32.xlu1 %v1242_v32  ;;  %v3725_v32 = vld [vmem:[%s6075_s9 + $0x10] sm:$0xff] }
 0x232   : > { %v4828_v28 = vadd.f32 %v4737_v24, %v1175_v22  ;;  %1685 = vmatpush.bf16.msrb.mxu2 %v3725_v32 }
 0x234   : > { %1210 = vadd.xlane.f32.xlu0 %v4828_v28  ;;  %v1244_v58 = vmul.f32 %v4828_v28, %v4828_v28 }
 0x237   : > { %1272 = vadd.xlane.f32.xlu2 %v1243_v35 }
 0x239   : > { %v1177_v36 = vpop.f32.mrf.mxu3 }
 0x23a   : > { %v4840_v11 = vadd.f32 %v4737_v24, %v1177_v36  ;;  %v3724_v36 = vld [vmem:[%s6075_s9 + $0x8] sm:$0xff] }
 0x23b   : > { %v1183_v43 = vpop.xlane.xlu2 %1182  ;;  %1686 = vmatpush.bf16.msrb.mxu2 %v3724_v36 }
 0x23c   : > { %v4843_v41 = vmul.f32 %v1183_v43, %v4394_v20  ;;  %1212 = vadd.xlane.f32.xlu1 %v4840_v11  ;;  %v1245_v16 = vmul.f32 %v4840_v11, %v4840_v11 }
 0x23d   : > { %v1247_v34 = vpop.xlane.xlu1 %1246 }
 0x23e   : > { %v1294_v9 = vmul.f32 %v4843_v41, %v4843_v41  ;;  %v1278_v24 = vmul.f32 %v1247_v34, %v4394_v20  ;;  %1276 = vadd.xlane.f32.xlu0 %v1245_v16  ;;  %v3723_v34 = vld [vmem:[%s6075_s9] sm:$0xff] }
 0x23f   : > { %1274 = vadd.xlane.f32.xlu2 %v1244_v58  ;;  %1687 = vmatpush.bf16.msrb.mxu2 %v3723_v34 }
 0x240   : > { %v1310_v44 = vsub.f32 %v1278_v24, %v1294_v9 }
 0x242   : > { %v1326_v22 = vmax.f32 %v1310_v44, 0.0 }
 0x243   : > { %v1185_v23 = vpop.xlane.xlu0 %1184 }
 0x244   : > { %v1358_v35 = vadd.f32 1e-05, %v1326_v22  ;;  %v1215_v17 = vmul.f32 %v1185_v23, %v4394_v20 }
 0x245   : > { %v1249_v43 = vpop.xlane.xlu2 %1248 }
 0x246   : > { %3878 = vrsqrt.f32 %v1358_v35  ;;  %v1295_v16 = vmul.f32 %v1215_v17, %v1215_v17  ;;  %v1279_v13 = vmul.f32 %v1249_v43, %v4394_v20  ;;  %vm1380_vm3 = vweird.f32 %v1358_v35 }
 0x248   : > { %v1311_v9 = vsub.f32 %v1279_v13, %v1295_v16 }
 0x24a   : > { %v1327_v24 = vmax.f32 %v1311_v9, 0.0 }
 0x24b   : > { %v1187_v58 = vpop.xlane.xlu0 %1186 }
 0x24c   : > { %v3879_v44 = vpop.eup %3878  ;;  %v4868_v32 = vmul.f32 %v1187_v58, %v4394_v20  ;;  %v1359_v23 = vadd.f32 1e-05, %v1327_v24 }
 0x24d   : > { %v1375_v22 = vmul.f32 %v3879_v44, %v1358_v35  ;;  %v1251_v5 = vpop.xlane.xlu2 %1250  ;;  %vm1381_vm2 = vweird.f32 %v3879_v44  ;;  %v4884_v35 = vld [vmem:[%s6073_s7] ss:$0 sm:$0xff] }
 0x24e   : > { %v1296_v36 = vmul.f32 %v4868_v32, %v4868_v32  ;;  %v1280_v43 = vmul.f32 %v1251_v5, %v4394_v20  ;;  %3880 = vrsqrt.f32 %v1359_v23  ;;  %vm1382_vm4 = vmor %vm1380_vm3, %vm1381_vm2  ;;  %vm1390_vm6 = vweird.f32 %v1359_v23 }
 0x24f   : > { %v1376_v6 = vmul.f32 %v3879_v44, %v1375_v22 }
 0x250   : > { %v1312_v31 = vsub.f32 %v1280_v43, %v1296_v36  ;;  %v1342_v36 = vsub.f32 %v4740_v45, %v4843_v41 }
 0x251   : > { %v1377_v33 = vmul.f32 0.5, %v1376_v6 }
 0x252   : > { %v1328_v16 = vmax.f32 %v1312_v31, 0.0 }
 0x253   : > { %v1378_v13 = vsub.f32 1.5, %v1377_v33  ;;  %v1189_v34 = vpop.xlane.xlu1 %1188 }
 0x254   : > { %v1360_v9 = vadd.f32 1e-05, %v1328_v16  ;;  %v4874_v15 = vmul.f32 %v1189_v34, %v4394_v20  ;;  %v3881_v58 = vpop.eup %3880 }
 0x255   : > { %v1379_v46 = vmul.f32 %v3879_v44, %v1378_v13  ;;  %v1253_v24 = vpop.xlane.xlu0 %1252  ;;  %v1385_v4 = vmul.f32 %v3881_v58, %v1359_v23  ;;  %vm1391_vm5 = vweird.f32 %v3881_v58 }
 0x256   : > { %3882 = vrsqrt.f32 %v1360_v9  ;;  %v1297_v5 = vmul.f32 %v4874_v15, %v4874_v15  ;;  %v1281_v22 = vmul.f32 %v1253_v24, %v4394_v20  ;;  %vm1392_vm7 = vmor %vm1390_vm6, %vm1391_vm5  ;;  %vm1400_vm9 = vweird.f32 %v1360_v9 }
 0x257   : > { %v1386_v31 = vmul.f32 %v3881_v58, %v1385_v4  ;;  %v1383_v33 = vsel %vm1382_vm4, %v3879_v44, %v1379_v46  ;;  %v1343_v4 = vsub.f32 %v4746_v56, %v1215_v17  ;;  %v4891_v44 = vld [vmem:[%s6074_s8] ss:$0 sm:$0xff] }
 0x258   : > { %v1313_v6 = vsub.f32 %v1281_v22, %v1297_v5  ;;  %v1534_v59 = vmul.f32 %v1383_v33, %v1342_v36 }
 0x259   : > { %v1387_v43 = vmul.f32 0.5, %v1386_v31 }
 0x25a   : > { %v1329_v16 = vmax.f32 %v1313_v6, 0.0  ;;  %v1553_v41 = vmul.f32 %v4884_v35, %v1534_v59 }
 0x25b   : > { %v1388_v34 = vsub.f32 1.5, %v1387_v43 }
 0x25c   : > { %v3883_v13 = vpop.eup %3882  ;;  %v1361_v24 = vadd.f32 1e-05, %v1329_v16 }
 0x25d   : > { %v1395_v21 = vmul.f32 %v3883_v13, %v1360_v9  ;;  %v1389_v48 = vmul.f32 %v3881_v58, %v1388_v34  ;;  %vm1401_vm8 = vweird.f32 %v3883_v13 }
 0x25e   : > { %3884 = vrsqrt.f32 %v1361_v24  ;;  %vm1402_vm10 = vmor %vm1400_vm9, %vm1401_vm8  ;;  %vm1410_vm12 = vweird.f32 %v1361_v24 }
 0x25f   : > { %v1396_v46 = vmul.f32 %v3883_v13, %v1395_v21  ;;  %v1393_v45 = vsel %vm1392_vm7, %v3881_v58, %v1389_v48  ;;  %v1572_v48 = vadd.f32 %v4891_v44, %v1553_v41  ;;  %v1344_v41 = vsub.f32 %v4752_v63, %v4868_v32 }
 0x260   : > { %v1535_v22 = vmul.f32 %v1393_v45, %v1343_v4  ;;  %v1345_v32 = vsub.f32 %v4758_v12, %v4874_v15 }
 0x261   : > { %v1397_v5 = vmul.f32 0.5, %v1396_v46  ;;  %v1191_v31 = vpop.xlane.xlu1 %1190  ;;  %v1588_v4 = vmax.f32 %v1572_v48, 0.0 }
 0x262   : > { %v4894_v6 = vmul.f32 %v1191_v31, %v4394_v20  ;;  %v1554_v56 = vmul.f32 %v4884_v35, %v1535_v22 }
 0x263   : > { %v1398_v33 = vsub.f32 1.5, %v1397_v5  ;;  %v1255_v21 = vpop.xlane.xlu0 %1254 }
 0x264   : > { %v3885_v17 = vpop.eup %3884  ;;  %v1298_v23 = vmul.f32 %v4894_v6, %v4894_v6  ;;  %v1282_v58 = vmul.f32 %v1255_v21, %v4394_v20  ;;  %v1573_v43 = vadd.f32 %v4891_v44, %v1554_v56 }
 0x265   : > { %v1399_v59 = vmul.f32 %v3883_v13, %v1398_v33  ;;  %v1405_v36 = vmul.f32 %v3885_v17, %v1361_v24  ;;  %vm1411_vm11 = vweird.f32 %v3885_v17 }
 0x266   : > { %v1314_v16 = vsub.f32 %v1282_v58, %v1298_v23  ;;  %v1589_v46 = vmax.f32 %v1573_v43, 0.0  ;;  %vm1412_vm13 = vmor %vm1410_vm12, %vm1411_vm11 }
 0x267   : > { %v1406_v34 = vmul.f32 %v3885_v17, %v1405_v36  ;;  %v1403_v45 = vsel %vm1402_vm10, %v3883_v13, %v1399_v59 }
 0x268   : > { %v1330_v5 = vmax.f32 %v1314_v16, 0.0  ;;  %v1604_v33 = vpack.c.bf16 %v1589_v46, %v1588_v4  ;;  %v1536_v9 = vmul.f32 %v1403_v45, %v1344_v41 }
 0x269   : > { %v1407_v22 = vmul.f32 0.5, %v1406_v34  ;;  %v1193_v31 = vpop.xlane.xlu2 %1192 }
 0x26a   : > { %v1362_v37 = vadd.f32 1e-05, %v1330_v5  ;;  %v4905_v21 = vmul.f32 %v1193_v31, %v4394_v20  ;;  %1688 = vmatmul.bf16.vlgmr.msrb.gmra.mxu2 %v1604_v33  ;;  %v1555_v59 = vmul.f32 %v4884_v35, %v1536_v9 }
 0x26b   : > { %v1408_v10 = vsub.f32 1.5, %v1407_v22  ;;  %v1257_v56 = vpop.xlane.xlu1 %1256 }
 0x26c   : > { %3886 = vrsqrt.f32 %v1362_v37  ;;  %v1299_v13 = vmul.f32 %v4905_v21, %v4905_v21  ;;  %v1283_v63 = vmul.f32 %v1257_v56, %v4394_v20  ;;  %v1574_v24 = vadd.f32 %v4891_v44, %v1555_v59 }
 0x26d   : > { %v1409_v48 = vmul.f32 %v3885_v17, %v1408_v10  ;;  %vm1420_vm15 = vweird.f32 %v1362_v37 }
 0x26e   : > { %v1315_v23 = vsub.f32 %v1283_v63, %v1299_v13  ;;  %v1590_v31 = vmax.f32 %v1574_v24, 0.0 }
 0x26f   : > { %v1413_v58 = vsel %vm1412_vm13, %v3885_v17, %v1409_v48 }
 0x270   : > { %v1537_v36 = vmul.f32 %v1413_v58, %v1345_v32  ;;  %v1331_v43 = vmax.f32 %v1315_v23, 0.0 }
 0x272   : > { %v1195_v16 = vpop.xlane.xlu2 %1194  ;;  %v3887_v34 = vpop.eup %3886  ;;  %v1556_v10 = vmul.f32 %v4884_v35, %v1537_v36  ;;  %v1363_v45 = vadd.f32 1e-05, %v1331_v43 }
 0x273   : > { %v4914_v4 = vmul.f32 %v1195_v16, %v4394_v20  ;;  %v1415_v46 = vmul.f32 %v3887_v34, %v1362_v37  ;;  %vm1421_vm14 = vweird.f32 %v3887_v34 }
 0x274   : > { %v1259_v41 = vpop.xlane.xlu1 %1258  ;;  %v1575_v17 = vadd.f32 %v4891_v44, %v1556_v10  ;;  %3888 = vrsqrt.f32 %v1363_v45  ;;  %vm1422_vm0 = vmor %vm1420_vm15, %vm1421_vm14  ;;  %vm1430_vm2 = vweird.f32 %v1363_v45 }
 0x275   : > { %v1300_v15 = vmul.f32 %v4914_v4, %v4914_v4  ;;  %v1284_v12 = vmul.f32 %v1259_v41, %v4394_v20  ;;  %v1416_v5 = vmul.f32 %v3887_v34, %v1415_v46  ;;  %v1346_v41 = vsub.f32 %v4764_v50, %v4894_v6 }
 0x276   : > { %v1591_v33 = vmax.f32 %v1575_v17, 0.0 }
 0x277   : > { %v1316_v22 = vsub.f32 %v1284_v12, %v1300_v15  ;;  %v1417_v9 = vmul.f32 0.5, %v1416_v5 }
 0x278   : > { %v1605_v13 = vpack.c.bf16 %v1591_v33, %v1590_v31 }
 0x279   : > { %v1332_v56 = vmax.f32 %v1316_v22, 0.0  ;;  %v1418_v48 = vsub.f32 1.5, %v1417_v9 }
 0x27a   : > { %v1197_v63 = vpop.xlane.xlu0 %1196  ;;  %v3889_v23 = vpop.eup %3888  ;;  %1693 = vmatmul.bf16.gmra.mxu2 %v1605_v13 }
 0x27b   : > { %v1364_v32 = vadd.f32 1e-05, %v1332_v56  ;;  %v4923_v59 = vmul.f32 %v1197_v63, %v4394_v20  ;;  %v1419_v58 = vmul.f32 %v3887_v34, %v1418_v48  ;;  %v1425_v43 = vmul.f32 %v3889_v23, %v1363_v45 }
 0x27c   : > { %v1261_v36 = vpop.xlane.xlu2 %1260  ;;  %vm1431_vm1 = vweird.f32 %v3889_v23 }
 0x27d   : > { %3890 = vrsqrt.f32 %v1364_v32  ;;  %v1301_v16 = vmul.f32 %v4923_v59, %v4923_v59  ;;  %v1285_v10 = vmul.f32 %v1261_v36, %v4394_v20  ;;  %v1426_v24 = vmul.f32 %v3889_v23, %v1425_v43  ;;  %vm1432_vm3 = vmor %vm1430_vm2, %vm1431_vm1 }
 0x27e   : > { %v1423_v46 = vsel %vm1422_vm0, %v3887_v34, %v1419_v58  ;;  %v1347_v34 = vsub.f32 %v4770_v26, %v4905_v21  ;;  %vm1440_vm5 = vweird.f32 %v1364_v32 }
 0x27f   : > { %v1317_v15 = vsub.f32 %v1285_v10, %v1301_v16  ;;  %v1427_v12 = vmul.f32 0.5, %v1426_v24  ;;  %v1538_v5 = vmul.f32 %v1423_v46, %v1346_v41 }
 0x281   : > { %v1333_v17 = vmax.f32 %v1317_v15, 0.0  ;;  %v1428_v31 = vsub.f32 1.5, %v1427_v12  ;;  %v1557_v48 = vmul.f32 %v4884_v35, %v1538_v5 }
 0x282   : > { %v1199_v9 = vpop.xlane.xlu0 %1198 }
 0x283   : > { %v3891_v22 = vpop.eup %3890  ;;  %v1365_v33 = vadd.f32 1e-05, %v1333_v17  ;;  %v1429_v56 = vmul.f32 %v3889_v23, %v1428_v31  ;;  %v4931_v13 = vmul.f32 %v1199_v9, %v4394_v20  ;;  %v1576_v26 = vadd.f32 %v4891_v44, %v1557_v48 }
 0x284   : > { %v1435_v37 = vmul.f32 %v3891_v22, %v1364_v32  ;;  %v1263_v6 = vpop.xlane.xlu2 %1262  ;;  %vm1441_vm4 = vweird.f32 %v3891_v22 }
 0x285   : > { %3892 = vrsqrt.f32 %v1365_v33  ;;  %v1302_v63 = vmul.f32 %v4931_v13, %v4931_v13  ;;  %v1286_v58 = vmul.f32 %v1263_v6, %v4394_v20  ;;  %v1433_v36 = vsel %vm1432_vm3, %v3889_v23, %v1429_v56  ;;  %vm1442_vm6 = vmor %vm1440_vm5, %vm1441_vm4 }
 0x286   : > { %v1436_v50 = vmul.f32 %v3891_v22, %v1435_v37  ;;  %v1539_v45 = vmul.f32 %v1433_v36, %v1347_v34  ;;  %v1592_v37 = vmax.f32 %v1576_v26, 0.0  ;;  %vm1450_vm8 = vweird.f32 %v1365_v33 }
 0x287   : > { %v1318_v16 = vsub.f32 %v1286_v58, %v1302_v63  ;;  %v1348_v63 = vsub.f32 %v4776_v55, %v4914_v4 }
 0x288   : > { %v1437_v43 = vmul.f32 0.5, %v1436_v50  ;;  %v1558_v24 = vmul.f32 %v4884_v35, %v1539_v45 }
 0x289   : > { %v1334_v21 = vmax.f32 %v1318_v16, 0.0 }
 0x28a   : > { %v1438_v10 = vsub.f32 1.5, %v1437_v43  ;;  %v1201_v15 = vpop.xlane.xlu1 %1200  ;;  %v1577_v12 = vadd.f32 %v4891_v44, %v1558_v24 }
 0x28b   : > { %v3893_v46 = vpop.eup %3892  ;;  %v1366_v5 = vadd.f32 1e-05, %v1334_v21  ;;  %v4943_v31 = vmul.f32 %v1201_v15, %v4394_v20 }
 0x28c   : > { %v1439_v41 = vmul.f32 %v3891_v22, %v1438_v10  ;;  %v1445_v17 = vmul.f32 %v3893_v46, %v1365_v33  ;;  %v1265_v23 = vpop.xlane.xlu0 %1264  ;;  %v1593_v9 = vmax.f32 %v1577_v12, 0.0  ;;  %vm1451_vm7 = vweird.f32 %v3893_v46 }
 0x28d   : > { %3894 = vrsqrt.f32 %v1366_v5  ;;  %v1303_v34 = vmul.f32 %v4943_v31, %v4943_v31  ;;  %v1287_v50 = vmul.f32 %v1265_v23, %v4394_v20  ;;  %vm1452_vm9 = vmor %vm1450_vm8, %vm1451_vm7  ;;  %vm1460_vm11 = vweird.f32 %v1366_v5 }
 0x28e   : > { %v1446_v56 = vmul.f32 %v3893_v46, %v1445_v17  ;;  %v1606_v6 = vpack.c.bf16 %v1593_v9, %v1592_v37  ;;  %v1443_v48 = vsel %vm1442_vm6, %v3891_v22, %v1439_v41  ;;  %v1349_v22 = vsub.f32 %v4782_v18, %v4923_v59 }
 0x28f   : > { %v1319_v36 = vsub.f32 %v1287_v50, %v1303_v34  ;;  %v1540_v43 = vmul.f32 %v1443_v48, %v1348_v63 }
 0x290   : > { %v1447_v58 = vmul.f32 0.5, %v1446_v56  ;;  %1698 = vmatmul.bf16.gmra.mxu2 %v1606_v6 }
 0x291   : > { %v1335_v45 = vmax.f32 %v1319_v36, 0.0  ;;  %v1559_v17 = vmul.f32 %v4884_v35, %v1540_v43 }
 0x292   : > { %v1448_v32 = vsub.f32 1.5, %v1447_v58  ;;  %v1203_v16 = vpop.xlane.xlu1 %1202 }
 0x293   : > { %v3895_v10 = vpop.eup %3894  ;;  %v4951_v26 = vmul.f32 %v1203_v16, %v4394_v20  ;;  %v1367_v55 = vadd.f32 1e-05, %v1335_v45  ;;  %v1578_v59 = vadd.f32 %v4891_v44, %v1559_v17 }
 0x294   : > { %v1449_v24 = vmul.f32 %v3893_v46, %v1448_v32  ;;  %v1455_v21 = vmul.f32 %v3895_v10, %v1366_v5  ;;  %v1267_v4 = vpop.xlane.xlu0 %1266  ;;  %vm1461_vm10 = vweird.f32 %v3895_v10 }
 0x295   : > { %v1304_v41 = vmul.f32 %v4951_v26, %v4951_v26  ;;  %v1288_v15 = vmul.f32 %v1267_v4, %v4394_v20  ;;  %3896 = vrsqrt.f32 %v1367_v55  ;;  %v1594_v16 = vmax.f32 %v1578_v59, 0.0  ;;  %vm1462_vm12 = vmor %vm1460_vm11, %vm1461_vm10 }
 0x296   : > { %v1453_v12 = vsel %vm1452_vm9, %v3893_v46, %v1449_v24  ;;  %v1456_v23 = vmul.f32 %v3895_v10, %v1455_v21  ;;  %vm1470_vm14 = vweird.f32 %v1367_v55 }
 0x297   : > { %v1541_v33 = vmul.f32 %v1453_v12, %v1349_v22  ;;  %v1320_v37 = vsub.f32 %v1288_v15, %v1304_v41  ;;  %v1350_v15 = vsub.f32 %v4788_v38, %v4931_v13 }
 0x298   : > { %v1457_v9 = vmul.f32 0.5, %v1456_v23 }
 0x299   : > { %v1560_v56 = vmul.f32 %v4884_v35, %v1541_v33  ;;  %v1336_v18 = vmax.f32 %v1320_v37, 0.0 }
 0x29a   : > { %v1458_v34 = vsub.f32 1.5, %v1457_v9  ;;  %v1205_v50 = vpop.xlane.xlu2 %1204 }
 0x29b   : > { %v1579_v6 = vadd.f32 %v4891_v44, %v1560_v56  ;;  %v4962_v48 = vadd.f32 1e-05, %v1336_v18  ;;  %v4965_v46 = vmul.f32 %v1205_v50, %v4394_v20  ;;  %v3897_v63 = vpop.eup %3896  ;;  %v1351_v50 = vsub.f32 %v4797_v14, %v4943_v31 }
 0x29c   : > { %v1459_v58 = vmul.f32 %v3895_v10, %v1458_v34  ;;  %v1269_v36 = vpop.xlane.xlu1 %1268  ;;  %v1465_v43 = vmul.f32 %v3897_v63, %v1367_v55  ;;  %vm1471_vm13 = vweird.f32 %v3897_v63 }
 0x29d   : > { %v1595_v32 = vmax.f32 %v1579_v6, 0.0  ;;  %3898 = vrsqrt.f32 %v4962_v48  ;;  %v1305_v24 = vmul.f32 %v4965_v46, %v4965_v46  ;;  %v1289_v22 = vmul.f32 %v1269_v36, %v4394_v20  ;;  %vm1472_vm15 = vmor %vm1470_vm14, %vm1471_vm13 }
 0x29e   : > { %v1466_v21 = vmul.f32 %v3897_v63, %v1465_v43  ;;  %v1463_v41 = vsel %vm1462_vm12, %v3895_v10, %v1459_v58  ;;  %vm1480_vm1 = vweird.f32 %v4962_v48 }
 0x29f   : > { %v1209_v45 = vpop.xlane.xlu0 %1208  ;;  %v1607_v4 = vpack.c.bf16 %v1595_v32, %v1594_v16  ;;  %v1321_v12 = vsub.f32 %v1289_v22, %v1305_v24  ;;  %v1542_v33 = vmul.f32 %v1463_v41, %v1350_v15 }
 0x2a0   : > { %v1467_v17 = vmul.f32 0.5, %v1466_v21  ;;  %v4987_v55 = vmul.f32 %v1209_v45, %v4394_v20 }
 0x2a1   : > { %1703 = vmatmul.bf16.gmra.mxu2 %v1607_v4  ;;  %v1337_v5 = vmax.f32 %v1321_v12, 0.0  ;;  %v1561_v58 = vmul.f32 %v4884_v35, %v1542_v33 }
 0x2a2   : > { %v1207_v23 = vpop.xlane.xlu2 %1206  ;;  %v1468_v9 = vsub.f32 1.5, %v1467_v17 }
 0x2a3   : > { %v3899_v37 = vpop.eup %3898  ;;  %v4974_v56 = vmul.f32 %v1207_v23, %v4394_v20  ;;  %v4977_v59 = vadd.f32 1e-05, %v1337_v5  ;;  %v1580_v14 = vadd.f32 %v4891_v44, %v1561_v58 }
 0x2a4   : > { %v1475_v18 = vmul.f32 %v3899_v37, %v4962_v48  ;;  %v1271_v10 = vpop.xlane.xlu1 %1270  ;;  %v1469_v34 = vmul.f32 %v3897_v63, %v1468_v9  ;;  %vm1481_vm0 = vweird.f32 %v3899_v37 }
 0x2a5   : > { %v1306_v38 = vmul.f32 %v4974_v56, %v4974_v56  ;;  %v1290_v13 = vmul.f32 %v1271_v10, %v4394_v20  ;;  %3900 = vrsqrt.f32 %v4977_v59  ;;  %vm5003_vm2 = vmor %vm1480_vm1, %vm1481_vm0  ;;  %vm1490_vm4 = vweird.f32 %v4977_v59 }
 0x2a6   : > { %v1476_v6 = vmul.f32 %v3899_v37, %v1475_v18  ;;  %v1473_v43 = vsel %vm1472_vm15, %v3897_v63, %v1469_v34  ;;  %v1307_v63 = vmul.f32 %v4987_v55, %v4987_v55  ;;  %v1596_v34 = vmax.f32 %v1580_v14, 0.0 }
 0x2a7   : > { %v1322_v36 = vsub.f32 %v1290_v13, %v1306_v38  ;;  %v1211_v32 = vpop.xlane.xlu0 %1210  ;;  %v1543_v24 = vmul.f32 %v1473_v43, %v1351_v50 }
 0x2a8   : > { %v1477_v16 = vmul.f32 0.5, %v1476_v6  ;;  %v5001_v23 = vmul.f32 %v1211_v32, %v4394_v20  ;;  %v1352_v6 = vsub.f32 %v4806_v25, %v4951_v26 }
 0x2a9   : > { %v1338_v22 = vmax.f32 %v1322_v36, 0.0  ;;  %v1562_v41 = vmul.f32 %v4884_v35, %v1543_v24 }
 0x2aa   : > { %v1478_v21 = vsub.f32 1.5, %v1477_v16  ;;  %v1273_v4 = vpop.xlane.xlu2 %1272  ;;  %v1308_v24 = vmul.f32 %v5001_v23, %v5001_v23 }
 0x2ab   : > { %v4991_v31 = vadd.f32 1e-05, %v1338_v22  ;;  %v1291_v15 = vmul.f32 %v1273_v4, %v4394_v20  ;;  %v3901_v12 = vpop.eup %3900  ;;  %v1581_v45 = vadd.f32 %v4891_v44, %v1562_v41 }
 0x2ac   : > { %v1479_v17 = vmul.f32 %v3899_v37, %v1478_v21  ;;  %v1485_v5 = vmul.f32 %v3901_v12, %v4977_v59  ;;  %vm1491_vm3 = vweird.f32 %v3901_v12 }
 0x2ad   : > { %3902 = vrsqrt.f32 %v4991_v31  ;;  %v1323_v18 = vsub.f32 %v1291_v15, %v1307_v63  ;;  %v1597_v38 = vmax.f32 %v1581_v45, 0.0  ;;  %v1353_v45 = vsub.f32 %v4812_v57, %v4965_v46  ;;  %vm1492_vm5 = vmor %vm1490_vm4, %vm1491_vm3 }
 0x2ae   : > { %v1486_v13 = vmul.f32 %v3901_v12, %v1485_v5  ;;  %v1483_v50 = vsel %vm5003_vm2, %v3899_v37, %v1479_v17  ;;  %vm1500_vm7 = vweird.f32 %v4991_v31 }
 0x2af   : > { %v1213_v33 = vpop.xlane.xlu1 %1212  ;;  %v1339_v58 = vmax.f32 %v1323_v18, 0.0  ;;  %v1608_v32 = vpack.c.bf16 %v1597_v38, %v1596_v34  ;;  %v1544_v4 = vmul.f32 %v1483_v50, %v1352_v6 }
 0x2b0   : > { %v5008_v10 = vmul.f32 %v1213_v33, %v4394_v20  ;;  %v1487_v43 = vmul.f32 0.5, %v1486_v13 }
 0x2b1   : > { %v1277_v48 = vpop.xlane.xlu0 %1276  ;;  %v1371_v22 = vadd.f32 1e-05, %v1339_v58  ;;  %1708 = vmatmul.bf16.gmra.mxu2 %v1608_v32  ;;  %v1563_v33 = vmul.f32 %v4884_v35, %v1544_v4  ;;  %v1354_v4 = vsub.f32 %v4822_v29, %v4974_v56 }
 0x2b2   : > { %v1309_v36 = vmul.f32 %v5008_v10, %v5008_v10  ;;  %v1293_v16 = vmul.f32 %v1277_v48, %v4394_v20  ;;  %v1275_v21 = vpop.xlane.xlu2 %1274  ;;  %v1488_v37 = vsub.f32 1.5, %v1487_v43 }
 0x2b3   : > { %v3903_v41 = vpop.eup %3902  ;;  %v1292_v25 = vmul.f32 %v1275_v21, %v4394_v20  ;;  %3904 = vrsqrt.f32 %v1371_v22  ;;  %v1582_v58 = vadd.f32 %v4891_v44, %v1563_v33  ;;  %vm1510_vm10 = vweird.f32 %v1371_v22 }
 0x2b4   : > { %v1325_v14 = vsub.f32 %v1293_v16, %v1309_v36  ;;  %v1495_v26 = vmul.f32 %v3903_v41, %v4991_v31  ;;  %v1489_v15 = vmul.f32 %v3901_v12, %v1488_v37  ;;  %vm1501_vm6 = vweird.f32 %v3903_v41 }
 0x2b5   : > { %v1324_v63 = vsub.f32 %v1292_v25, %v1308_v24  ;;  %vm1502_vm8 = vmor %vm1500_vm7, %vm1501_vm6 }
 0x2b6   : > { %v1341_v17 = vmax.f32 %v1325_v14, 0.0  ;;  %v1496_v5 = vmul.f32 %v3903_v41, %v1495_v26  ;;  %v1493_v34 = vsel %vm1492_vm5, %v3901_v12, %v1489_v15  ;;  %v1598_v12 = vmax.f32 %v1582_v58, 0.0 }
 0x2b7   : > { %v1340_v18 = vmax.f32 %v1324_v63, 0.0  ;;  %v1545_v13 = vmul.f32 %v1493_v34, %v1353_v45  ;;  %v1355_v45 = vsub.f32 %v4818_v39, %v4987_v55 }
 0x2b8   : > { %v1373_v9 = vadd.f32 1e-05, %v1341_v17  ;;  %v1497_v38 = vmul.f32 0.5, %v1496_v5 }
 0x2b9   : > { %v1372_v48 = vadd.f32 1e-05, %v1340_v18  ;;  %v3905_v50 = vpop.eup %3904  ;;  %v1564_v59 = vmul.f32 %v4884_v35, %v1545_v13 }
 0x2ba   : > { %3906 = vrsqrt.f32 %v1373_v9  ;;  %v1498_v6 = vsub.f32 1.5, %v1497_v38  ;;  %v1505_v36 = vmul.f32 %v3905_v50, %v1371_v22  ;;  %vm1511_vm9 = vweird.f32 %v3905_v50 }
 0x2bb   : > { %3908 = vrsqrt.f32 %v1372_v48  ;;  %v1583_v46 = vadd.f32 %v4891_v44, %v1564_v59  ;;  %vm1512_vm11 = vmor %vm1510_vm10, %vm1511_vm9  ;;  %vm1530_vm14 = vweird.f32 %v1373_v9  ;;  %vm1520_vm0 = vweird.f32 %v1372_v48 }
 0x2bc   : > { %v1499_v57 = vmul.f32 %v3903_v41, %v1498_v6  ;;  %v1506_v32 = vmul.f32 %v3905_v50, %v1505_v36  ;;  %v1356_v36 = vsub.f32 %v4828_v28, %v5001_v23  ;;  %v5048_v28 = vld [vmem:[%s6076_s10] ss:$0 sm:$0xff] }
 0x2bd   : > { %v1599_v43 = vmax.f32 %v1583_v46, 0.0 }
 0x2be   : > { %v1507_v24 = vmul.f32 0.5, %v1506_v32  ;;  %v1503_v21 = vsel %vm1502_vm8, %v3903_v41, %v1499_v57  ;;  %v1357_v57 = vsub.f32 %v4840_v11, %v5008_v10 }
 0x2bf   : > { %v1609_v14 = vpack.c.bf16 %v1599_v43, %v1598_v12  ;;  %v1546_v63 = vmul.f32 %v1503_v21, %v1354_v4 }
 0x2c0   : > { %v3907_v16 = vpop.eup %3906  ;;  %v1508_v26 = vsub.f32 1.5, %v1507_v24 }
 0x2c1   : > { %v1525_v37 = vmul.f32 %v3907_v16, %v1373_v9  ;;  %v3909_v25 = vpop.eup %3908  ;;  %1713 = vmatmul.bf16.gmra.mxu2 %v1609_v14  ;;  %v1565_v34 = vmul.f32 %v4884_v35, %v1546_v63  ;;  %vm1531_vm12 = vweird.f32 %v3907_v16 }
 0x2c2   : > { %v1515_v17 = vmul.f32 %v3909_v25, %v1372_v48  ;;  %v1509_v31 = vmul.f32 %v3905_v50, %v1508_v26  ;;  %vm1521_vm13 = vweird.f32 %v3909_v25  ;;  %vm1532_vm15 = vmor %vm1530_vm14, %vm1531_vm12 }
 0x2c3   : > { %v1526_v15 = vmul.f32 %v3907_v16, %v1525_v37  ;;  %v1584_v59 = vadd.f32 %v4891_v44, %v1565_v34  ;;  %vm1522_vm1 = vmor %vm1520_vm0, %vm1521_vm13 }
 0x2c4   : > { %v1516_v41 = vmul.f32 %v3909_v25, %v1515_v17  ;;  %v1513_v33 = vsel %vm1512_vm11, %v3905_v50, %v1509_v31 }
 0x2c5   : > { %v1527_v5 = vmul.f32 0.5, %v1526_v15  ;;  %v1547_v56 = vmul.f32 %v1513_v33, %v1355_v45  ;;  %v1600_v46 = vmax.f32 %v1584_v59, 0.0 }
 0x2c6   : > { %v1517_v29 = vmul.f32 0.5, %v1516_v41 }
 0x2c7   : > { %v1528_v18 = vsub.f32 1.5, %v1527_v5  ;;  %v1566_v13 = vmul.f32 %v4884_v35, %v1547_v56 }
 0x2c8   : > { %v1518_v38 = vsub.f32 1.5, %v1517_v29 }
 0x2c9   : > { %v1529_v6 = vmul.f32 %v3907_v16, %v1528_v18  ;;  %v1585_v39 = vadd.f32 %v4891_v44, %v1566_v13 }
 0x2ca   : > { %v1519_v22 = vmul.f32 %v3909_v25, %v1518_v38 }
 0x2cb   : > { %v1601_v55 = vmax.f32 %v1585_v39, 0.0  ;;  %v1533_v58 = vsel %vm1532_vm15, %v3907_v16, %v1529_v6 }
 0x2cc   : > { %v1523_v50 = vsel %vm1522_vm1, %v3909_v25, %v1519_v22  ;;  %v1549_v12 = vmul.f32 %v1533_v58, %v1357_v57 }
 0x2cd   : > { %v1610_v32 = vpack.c.bf16 %v1601_v55, %v1600_v46  ;;  %v1548_v9 = vmul.f32 %v1523_v50, %v1356_v36 }
 0x2ce   : > { %v1568_v24 = vmul.f32 %v4884_v35, %v1549_v12 }
 0x2cf   : > { %v1567_v43 = vmul.f32 %v4884_v35, %v1548_v9 }
 0x2d0   : > { %v1587_v21 = vadd.f32 %v4891_v44, %v1568_v24  ;;  %v3738_v24 = vld [vmem:[%s6071_s5 + $0x78] sm:$0xff] }
 0x2d1   : > { %1718 = vmatmul.bf16.gmra.mxu2 %v1610_v32  ;;  %v1586_v48 = vadd.f32 %v4891_v44, %v1567_v43  ;;  %2231 = vmatpush.bf16.msra.mxu3 %v3738_v24 }
 0x2d2   : > { %v1603_v4 = vmax.f32 %v1587_v21, 0.0 }
 0x2d3   : > { %v1602_v16 = vmax.f32 %v1586_v48, 0.0 }
 0x2d5   : > { %v1611_v37 = vpack.c.bf16 %v1603_v4, %v1602_v16  ;;  %v3737_v4 = vld [vmem:[%s6071_s5 + $0x70] sm:$0xff] }
 0x2d6   : > { %2232 = vmatpush.bf16.msra.mxu3 %v3737_v4 }
 0x2e1   : > { %1723 = vmatmul.bf16.gmra.mxu2 %v1611_v37  ;;  %v3736_v37 = vld [vmem:[%s6071_s5 + $0x68] sm:$0xff] }
 0x2e2   : > { %2233 = vmatpush.bf16.msra.mxu3 %v3736_v37 }
 0x2ed   : > { %v1689_v11 = vpop.f32.mrf.mxu2 }
 0x2ee   : > { %v5051_v23 = vadd.f32 %v5048_v28, %v1689_v11 }
 0x2f0   : > { %1731 = vadd.xlane.f32.xlu1 %v5051_v23  ;;  %v1779_v35 = vmul.f32 %v5051_v23, %v5051_v23 }
 0x2f2   : > { %1795 = vadd.xlane.f32.xlu0 %v1779_v35 }
 0x2f5   : > { %v1691_v44 = vpop.f32.mrf.mxu2 }
 0x2f6   : > { %v5057_v10 = vadd.f32 %v5048_v28, %v1691_v44 }
 0x2f8   : > { %1733 = vadd.xlane.f32.xlu2 %v5057_v10  ;;  %v1780_v14 = vmul.f32 %v5057_v10, %v5057_v10 }
 0x2fa   : > { %1797 = vadd.xlane.f32.xlu1 %v1780_v14  ;;  %v3735_v14 = vld [vmem:[%s6071_s5 + $0x60] sm:$0xff] }
 0x2fb   : > { %2234 = vmatpush.bf16.msra.mxu3 %v3735_v14 }
 0x2fd   : > { %v1694_v25 = vpop.f32.mrf.mxu2 }
 0x2fe   : > { %v5063_v26 = vadd.f32 %v5048_v28, %v1694_v25 }
 0x300   : > { %1735 = vadd.xlane.f32.xlu2 %v5063_v26  ;;  %v1781_v15 = vmul.f32 %v5063_v26, %v5063_v26 }
 0x302   : > { %1799 = vadd.xlane.f32.xlu1 %v1781_v15 }
 0x305   : > { %v1696_v17 = vpop.f32.mrf.mxu2 }
 0x306   : > { %v5069_v63 = vadd.f32 %v5048_v28, %v1696_v17  ;;  %v3734_v17 = vld [vmem:[%s6071_s5 + $0x58] sm:$0xff] }
 0x307   : > { %2235 = vmatpush.bf16.msra.mxu3 %v3734_v17 }
 0x308   : > { %1737 = vadd.xlane.f32.xlu0 %v5069_v63  ;;  %v1782_v31 = vmul.f32 %v5069_v63, %v5069_v63 }
 0x30a   : > { %1801 = vadd.xlane.f32.xlu2 %v1782_v31 }
 0x313   : > { %v1699_v45 = vpop.f32.mrf.mxu2 }
 0x314   : > { %v5075_v5 = vadd.f32 %v5048_v28, %v1699_v45 }
 0x316   : > { %1739 = vadd.xlane.f32.xlu0 %v5075_v5  ;;  %v1783_v41 = vmul.f32 %v5075_v5, %v5075_v5 }
 0x318   : > { %1803 = vadd.xlane.f32.xlu2 %v1783_v41 }
 0x31b   : > { %v1701_v33 = vpop.f32.mrf.mxu2 }
 0x31c   : > { %v5081_v18 = vadd.f32 %v5048_v28, %v1701_v33 }
 0x31e   : > { %1741 = vadd.xlane.f32.xlu1 %v5081_v18  ;;  %v1784_v29 = vmul.f32 %v5081_v18, %v5081_v18 }
 0x320   : > { %1805 = vadd.xlane.f32.xlu0 %v1784_v29 }
 0x324   : > { %v1704_v56 = vpop.f32.mrf.mxu2 }
 0x325   : > { %v5087_v34 = vadd.f32 %v5048_v28, %v1704_v56 }
 0x327   : > { %1743 = vadd.xlane.f32.xlu1 %v5087_v34  ;;  %v1785_v38 = vmul.f32 %v5087_v34, %v5087_v34 }
 0x329   : > { %1807 = vadd.xlane.f32.xlu0 %v1785_v38 }
 0x32c   : > { %v1706_v13 = vpop.f32.mrf.mxu2 }
 0x32d   : > { %v5093_v6 = vadd.f32 %v5048_v28, %v1706_v13  ;;  %v3733_v13 = vld [vmem:[%s6071_s5 + $0x50] sm:$0xff] }
 0x32e   : > { %2236 = vmatpush.bf16.msra.mxu3 %v3733_v13 }
 0x32f   : > { %1745 = vadd.xlane.f32.xlu2 %v5093_v6  ;;  %v1786_v22 = vmul.f32 %v5093_v6, %v5093_v6 }
 0x331   : > { %1809 = vadd.xlane.f32.xlu1 %v1786_v22 }
 0x334   : > { %v1709_v59 = vpop.f32.mrf.mxu2 }
 0x335   : > { %v5099_v39 = vadd.f32 %v5048_v28, %v1709_v59 }
 0x337   : > { %1747 = vadd.xlane.f32.xlu2 %v5099_v39  ;;  %v1787_v55 = vmul.f32 %v5099_v39, %v5099_v39 }
 0x339   : > { %1811 = vadd.xlane.f32.xlu1 %v1787_v55 }
 0x33c   : > { %v1711_v50 = vpop.f32.mrf.mxu2 }
 0x33d   : > { %v5105_v58 = vadd.f32 %v5048_v28, %v1711_v50 }
 0x33f   : > { %1749 = vadd.xlane.f32.xlu0 %v5105_v58  ;;  %v1788_v36 = vmul.f32 %v5105_v58, %v5105_v58 }
 0x341   : > { %1813 = vadd.xlane.f32.xlu2 %v1788_v36  ;;  %v3732_v36 = vld [vmem:[%s6071_s5 + $0x48] sm:$0xff] }
 0x342   : > { %2237 = vmatpush.bf16.msra.mxu3 %v3732_v36 }
 0x344   : > { %v1714_v57 = vpop.f32.mrf.mxu2 }
 0x345   : > { %v5111_v46 = vadd.f32 %v5048_v28, %v1714_v57 }
 0x347   : > { %1751 = vadd.xlane.f32.xlu0 %v5111_v46  ;;  %v1789_v32 = vmul.f32 %v5111_v46, %v5111_v46 }
 0x349   : > { %1815 = vadd.xlane.f32.xlu2 %v1789_v32 }
 0x34c   : > { %v1716_v9 = vpop.f32.mrf.mxu2 }
 0x34d   : > { %v5117_v12 = vadd.f32 %v5048_v28, %v1716_v9 }
 0x34f   : > { %1753 = vadd.xlane.f32.xlu1 %v5117_v12  ;;  %v1790_v43 = vmul.f32 %v5117_v12, %v5117_v12 }
 0x351   : > { %1817 = vadd.xlane.f32.xlu0 %v1790_v43 }
 0x354   : > { %v1719_v48 = vpop.f32.mrf.mxu2 }
 0x355   : > { %v5126_v21 = vadd.f32 %v5048_v28, %v1719_v48  ;;  %v3731_v48 = vld [vmem:[%s6071_s5 + $0x40] sm:$0xff] }
 0x356   : > { %2238 = vmatpush.bf16.msra.mxu3 %v3731_v48 }
 0x357   : > { %1755 = vadd.xlane.f32.xlu1 %v5126_v21  ;;  %v1791_v16 = vmul.f32 %v5126_v21, %v5126_v21 }
 0x359   : > { %1819 = vadd.xlane.f32.xlu0 %v1791_v16 }
 0x35c   : > { %v1721_v11 = vpop.f32.mrf.mxu2 }
 0x35d   : > { %v5138_v35 = vadd.f32 %v5048_v28, %v1721_v11 }
 0x35f   : > { %1757 = vadd.xlane.f32.xlu2 %v5138_v35  ;;  %v1792_v44 = vmul.f32 %v5138_v35, %v5138_v35 }
 0x361   : > { %1821 = vadd.xlane.f32.xlu1 %v1792_v44 }
 0x363   : > { %v1732_v25 = vpop.xlane.xlu1 %1731 }
 0x364   : > { %v5147_v15 = vmul.f32 %v1732_v25, %v4394_v20  ;;  %v1724_v31 = vpop.f32.mrf.mxu2 }
 0x365   : > { %v1796_v45 = vpop.xlane.xlu0 %1795  ;;  %v5153_v41 = vadd.f32 %v5048_v28, %v1724_v31 }
 0x366   : > { %v1843_v33 = vmul.f32 %v5147_v15, %v5147_v15  ;;  %v1827_v29 = vmul.f32 %v1796_v45, %v4394_v20 }
 0x367   : > { %1759 = vadd.xlane.f32.xlu2 %v5153_v41  ;;  %v1793_v38 = vmul.f32 %v5153_v41, %v5153_v41 }
 0x368   : > { %v1859_v56 = vsub.f32 %v1827_v29, %v1843_v33 }
 0x369   : > { %1823 = vadd.xlane.f32.xlu1 %v1793_v38 }
 0x36a   : > { %v1875_v22 = vmax.f32 %v1859_v56, 0.0 }
 0x36b   : > { %v1734_v59 = vpop.xlane.xlu2 %1733 }
 0x36c   : > { %v1907_v55 = vadd.f32 1e-05, %v1875_v22  ;;  %v5165_v50 = vmul.f32 %v1734_v59, %v4394_v20  ;;  %v1726_v57 = vpop.f32.mrf.mxu2 }
 0x36d   : > { %v1798_v32 = vpop.xlane.xlu1 %1797  ;;  %v5173_v43 = vadd.f32 %v5048_v28, %v1726_v57 }
 0x36e   : > { %3910 = vrsqrt.f32 %v1907_v55  ;;  %v1844_v9 = vmul.f32 %v5165_v50, %v5165_v50  ;;  %v1828_v24 = vmul.f32 %v1798_v32, %v4394_v20  ;;  %vm1929_vm3 = vweird.f32 %v1907_v55 }
 0x36f   : > { %1761 = vadd.xlane.f32.xlu0 %v5173_v43  ;;  %v1794_v4 = vmul.f32 %v5173_v43, %v5173_v43 }
 0x370   : > { %v1860_v16 = vsub.f32 %v1828_v24, %v1844_v9 }
 0x371   : > { %1825 = vadd.xlane.f32.xlu2 %v1794_v4 }
 0x372   : > { %v1876_v37 = vmax.f32 %v1860_v16, 0.0 }
 0x373   : > { %v1736_v11 = vpop.xlane.xlu2 %1735 }
 0x374   : > { %v3911_v44 = vpop.eup %3910  ;;  %v5183_v28 = vmul.f32 %v1736_v11, %v4394_v20  ;;  %v1908_v25 = vadd.f32 1e-05, %v1876_v37  ;;  %v1891_v11 = vsub.f32 %v5051_v23, %v5147_v15 }
 0x375   : > { %v1924_v14 = vmul.f32 %v3911_v44, %v1907_v55  ;;  %v1800_v17 = vpop.xlane.xlu1 %1799  ;;  %vm1930_vm2 = vweird.f32 %v3911_v44  ;;  %v5199_v55 = vld [vmem:[%s6077_s11] ss:$0 sm:$0xff] }
 0x376   : > { %v1845_v31 = vmul.f32 %v5183_v28, %v5183_v28  ;;  %v1829_v45 = vmul.f32 %v1800_v17, %v4394_v20  ;;  %3912 = vrsqrt.f32 %v1908_v25  ;;  %vm1931_vm4 = vmor %vm1929_vm3, %vm1930_vm2  ;;  %vm1939_vm6 = vweird.f32 %v1908_v25 }
 0x377   : > { %v1925_v33 = vmul.f32 %v3911_v44, %v1924_v14  ;;  %v1893_v30 = vsub.f32 %v5063_v26, %v5183_v28 }
 0x378   : > { %v1861_v29 = vsub.f32 %v1829_v45, %v1845_v31 }
 0x379   : > { %v1926_v56 = vmul.f32 0.5, %v1925_v33 }
 0x37a   : > { %v1877_v38 = vmax.f32 %v1861_v29, 0.0 }
 0x37b   : > { %v1927_v13 = vsub.f32 1.5, %v1926_v56  ;;  %v1738_v22 = vpop.xlane.xlu0 %1737 }
 0x37c   : > { %v1909_v59 = vadd.f32 1e-05, %v1877_v38  ;;  %v5189_v36 = vmul.f32 %v1738_v22, %v4394_v20  ;;  %v3913_v57 = vpop.eup %3912  ;;  %v5207_v22 = vld [vmem:[%s6078_s12] ss:$0 sm:$0xff] }
 0x37d   : > { %v1928_v32 = vmul.f32 %v3911_v44, %v1927_v13  ;;  %v1802_v9 = vpop.xlane.xlu2 %1801  ;;  %v1934_v24 = vmul.f32 %v3913_v57, %v1908_v25  ;;  %vm1940_vm5 = vweird.f32 %v3913_v57 }
 0x37e   : > { %3914 = vrsqrt.f32 %v1909_v59  ;;  %v1846_v48 = vmul.f32 %v5189_v36, %v5189_v36  ;;  %v1830_v16 = vmul.f32 %v1802_v9, %v4394_v20  ;;  %vm1941_vm7 = vmor %vm1939_vm6, %vm1940_vm5  ;;  %vm1949_vm9 = vweird.f32 %v1909_v59 }
 0x37f   : > { %v1932_v4 = vsel %vm1931_vm4, %v3911_v44, %v1928_v32  ;;  %v1935_v37 = vmul.f32 %v3913_v57, %v1934_v24  ;;  %v1892_v44 = vsub.f32 %v5057_v10, %v5165_v50  ;;  %v1894_v26 = vsub.f32 %v5069_v63, %v5189_v36 }
 0x380   : > { %v1862_v14 = vsub.f32 %v1830_v16, %v1846_v48  ;;  %v2083_v31 = vmul.f32 %v1932_v4, %v1891_v11 }
 0x381   : > { %v1936_v17 = vmul.f32 0.5, %v1935_v37 }
 0x382   : > { %v1878_v45 = vmax.f32 %v1862_v14, 0.0  ;;  %v2102_v15 = vmul.f32 %v5199_v55, %v2083_v31 }
 0x383   : > { %v1937_v29 = vsub.f32 1.5, %v1936_v17 }
 0x384   : > { %v3915_v33 = vpop.eup %3914  ;;  %v1910_v38 = vadd.f32 1e-05, %v1878_v45  ;;  %v2121_v50 = vadd.f32 %v5207_v22, %v2102_v15 }
 0x385   : > { %v1944_v56 = vmul.f32 %v3915_v33, %v1909_v59  ;;  %v1938_v13 = vmul.f32 %v3913_v57, %v1937_v29  ;;  %vm1950_vm8 = vweird.f32 %v3915_v33 }
 0x386   : > { %3916 = vrsqrt.f32 %v1910_v38  ;;  %v5220_v29 = vadd.f32 %v2121_v50, %v1039_v7  ;;  %vm5226_vm10 = vmor %vm1949_vm9, %vm1950_vm8  ;;  %vm1959_vm12 = vweird.f32 %v1910_v38 }
 0x387   : > { %v1945_v23 = vmul.f32 %v3915_v33, %v1944_v56  ;;  %v1942_v32 = vsel %vm1941_vm7, %v3913_v57, %v1938_v13 }
 0x388   : > { %v2084_v9 = vmul.f32 %v1942_v32, %v1892_v44 }
 0x389   : > { %v1946_v24 = vmul.f32 0.5, %v1945_v23  ;;  %v1740_v48 = vpop.xlane.xlu0 %1739 }
 0x38a   : > { %v5210_v16 = vmul.f32 %v1740_v48, %v4394_v20  ;;  %v2103_v10 = vmul.f32 %v5199_v55, %v2084_v9 }
 0x38b   : > { %v1947_v25 = vsub.f32 1.5, %v1946_v24  ;;  %v1804_v4 = vpop.xlane.xlu2 %1803 }
 0x38c   : > { %v1847_v37 = vmul.f32 %v5210_v16, %v5210_v16  ;;  %v1831_v11 = vmul.f32 %v1804_v4, %v4394_v20  ;;  %v3917_v14 = vpop.eup %3916  ;;  %v2122_v57 = vadd.f32 %v5207_v22, %v2103_v10 }
 0x38d   : > { %v1948_v17 = vmul.f32 %v3915_v33, %v1947_v25  ;;  %v1954_v31 = vmul.f32 %v3917_v14, %v1910_v38  ;;  %vm1960_vm11 = vweird.f32 %v3917_v14 }
 0x38e   : > { %v1863_v45 = vsub.f32 %v1831_v11, %v1847_v37  ;;  %v5224_v56 = vadd.f32 %v2122_v57, %v1040_v8  ;;  %vm1961_vm13 = vmor %vm1959_vm12, %vm1960_vm11 }
 0x38f   : > { %v1955_v44 = vmul.f32 %v3917_v14, %v1954_v31  ;;  %v1952_v59 = vsel %vm5226_vm10, %v3915_v33, %v1948_v17 }
 0x390   : > { %v1879_v23 = vmax.f32 %v1863_v45, 0.0  ;;  %v2153_v32 = vpack.c.bf16 %v5224_v56, %v5220_v29  ;;  %v2085_v25 = vmul.f32 %v1952_v59, %v1893_v30 }
 0x391   : > { %v1742_v15 = vpop.xlane.xlu1 %1741  ;;  %v1956_v7 = vmul.f32 0.5, %v1955_v44 }
 0x392   : > { %v1911_v61 = vadd.f32 1e-05, %v1879_v23  ;;  %v5237_v8 = vmul.f32 %v1742_v15, %v4394_v20  ;;  %2239 = vmatmul.bf16.vlgmr.msra.gmra.mxu3 %v2153_v32  ;;  %v2104_v50 = vmul.f32 %v5199_v55, %v2085_v25 }
 0x393   : > { %v1806_v9 = vpop.xlane.xlu0 %1805  ;;  %v1957_v24 = vsub.f32 1.5, %v1956_v7 }
 0x394   : > { %3918 = vrsqrt.f32 %v1911_v61  ;;  %v1848_v48 = vmul.f32 %v5237_v8, %v5237_v8  ;;  %v1832_v4 = vmul.f32 %v1806_v9, %v4394_v20  ;;  %v2123_v23 = vadd.f32 %v5207_v22, %v2104_v50 }
 0x395   : > { %v1958_v33 = vmul.f32 %v3917_v14, %v1957_v24  ;;  %vm1969_vm15 = vweird.f32 %v1911_v61 }
 0x396   : > { %v1864_v28 = vsub.f32 %v1832_v4, %v1848_v48  ;;  %v5256_v30 = vadd.f32 %v2123_v23, %v1041_v1 }
 0x397   : > { %v1962_v10 = vsel %vm1961_vm13, %v3917_v14, %v1958_v33 }
 0x398   : > { %v1880_v37 = vmax.f32 %v1864_v28, 0.0  ;;  %v2086_v11 = vmul.f32 %v1962_v10, %v1894_v26 }
 0x39a   : > { %v3919_v17 = vpop.eup %3918  ;;  %v1744_v57 = vpop.xlane.xlu1 %1743  ;;  %v1912_v45 = vadd.f32 1e-05, %v1880_v37  ;;  %v2105_v38 = vmul.f32 %v5199_v55, %v2086_v11  ;;  %v1895_v37 = vsub.f32 %v5075_v5, %v5210_v16 }
 0x39b   : > { %v1964_v31 = vmul.f32 %v3919_v17, %v1911_v61  ;;  %v5246_v13 = vmul.f32 %v1744_v57, %v4394_v20  ;;  %vm1970_vm14 = vweird.f32 %v3919_v17 }
 0x39c   : > { %v1808_v44 = vpop.xlane.xlu0 %1807  ;;  %3920 = vrsqrt.f32 %v1912_v45  ;;  %v2124_v15 = vadd.f32 %v5207_v22, %v2105_v38  ;;  %vm1971_vm0 = vmor %vm1969_vm15, %vm1970_vm14  ;;  %vm1979_vm2 = vweird.f32 %v1912_v45 }
 0x39d   : > { %v1965_v63 = vmul.f32 %v3919_v17, %v1964_v31  ;;  %v1849_v36 = vmul.f32 %v5246_v13, %v5246_v13  ;;  %v1833_v14 = vmul.f32 %v1808_v44, %v4394_v20 }
 0x39e   : > { %v5260_v7 = vadd.f32 %v2124_v15, %v1042_v2 }
 0x39f   : > { %v1966_v32 = vmul.f32 0.5, %v1965_v63  ;;  %v1865_v59 = vsub.f32 %v1833_v14, %v1849_v36 }
 0x3a0   : > { %v2154_v25 = vpack.c.bf16 %v5260_v7, %v5256_v30 }
 0x3a1   : > { %v1967_v9 = vsub.f32 1.5, %v1966_v32  ;;  %v1881_v24 = vmax.f32 %v1865_v59, 0.0 }
 0x3a2   : > { %v1746_v48 = vpop.xlane.xlu2 %1745  ;;  %v3921_v4 = vpop.eup %3920  ;;  %2244 = vmatmul.bf16.gmra.mxu3 %v2154_v25 }
 0x3a3   : > { %v1968_v33 = vmul.f32 %v3919_v17, %v1967_v9  ;;  %v5265_v26 = vmul.f32 %v1746_v48, %v4394_v20  ;;  %v1974_v47 = vmul.f32 %v3921_v4, %v1912_v45  ;;  %v1913_v1 = vadd.f32 1e-05, %v1881_v24 }
 0x3a4   : > { %v1810_v28 = vpop.xlane.xlu1 %1809  ;;  %vm1980_vm1 = vweird.f32 %v3921_v4 }
 0x3a5   : > { %v1850_v52 = vmul.f32 %v5265_v26, %v5265_v26  ;;  %v1834_v2 = vmul.f32 %v1810_v28, %v4394_v20  ;;  %v1975_v10 = vmul.f32 %v3921_v4, %v1974_v47  ;;  %3922 = vrsqrt.f32 %v1913_v1  ;;  %vm1981_vm3 = vmor %vm1979_vm2, %vm1980_vm1 }
 0x3a6   : > { %v1972_v50 = vsel %vm1971_vm0, %v3919_v17, %v1968_v33  ;;  %v1896_v17 = vsub.f32 %v5081_v18, %v5237_v8  ;;  %vm1989_vm5 = vweird.f32 %v1913_v1 }
 0x3a7   : > { %v1866_v11 = vsub.f32 %v1834_v2, %v1850_v52  ;;  %v1976_v57 = vmul.f32 0.5, %v1975_v10  ;;  %v2087_v61 = vmul.f32 %v1972_v50, %v1895_v37 }
 0x3a9   : > { %v1882_v31 = vmax.f32 %v1866_v11, 0.0  ;;  %v1977_v44 = vsub.f32 1.5, %v1976_v57  ;;  %v2106_v16 = vmul.f32 %v5199_v55, %v2087_v61  ;;  %v6118_v57 = vmax.f32 %v4525_v42, 0.0 }
 0x3aa   : > { %v1748_v23 = vpop.xlane.xlu2 %1747  ;;  %v6119_v61 = vmax.f32 %v4528_v54, 0.0 }
 0x3ab   : > { %v1914_v38 = vadd.f32 1e-05, %v1882_v31  ;;  %v3923_v63 = vpop.eup %3922  ;;  %v1978_v36 = vmul.f32 %v3921_v4, %v1977_v44  ;;  %v5273_v14 = vmul.f32 %v1748_v23, %v4394_v20  ;;  %v2125_v18 = vadd.f32 %v5207_v22, %v2106_v16 }
 0x3ac   : > { %v1984_v15 = vmul.f32 %v3923_v63, %v1913_v1  ;;  %v1812_v5 = vpop.xlane.xlu1 %1811  ;;  %vm1990_vm4 = vweird.f32 %v3923_v63 }
 0x3ad   : > { %3924 = vrsqrt.f32 %v1914_v38  ;;  %v1851_v32 = vmul.f32 %v5273_v14, %v5273_v14  ;;  %v1835_v59 = vmul.f32 %v1812_v5, %v4394_v20  ;;  %v1982_v9 = vsel %vm1981_vm3, %v3921_v4, %v1978_v36  ;;  %vm1991_vm6 = vmor %vm1989_vm5, %vm1990_vm4 }
 0x3ae   : > { %v1985_v24 = vmul.f32 %v3923_v63, %v1984_v15  ;;  %v2088_v45 = vmul.f32 %v1982_v9, %v1896_v17  ;;  %v5289_v31 = vadd.f32 %v2125_v18, %v6118_v57  ;;  %v1897_v17 = vsub.f32 %v5087_v34, %v5246_v13 }
 0x3af   : > { %v1867_v48 = vsub.f32 %v1835_v59, %v1851_v32  ;;  %vm1999_vm8 = vweird.f32 %v1914_v38  ;;  %v1898_v34 = vsub.f32 %v5093_v6, %v5265_v26 }
 0x3b0   : > { %v1986_v25 = vmul.f32 0.5, %v1985_v24  ;;  %v2107_v33 = vmul.f32 %v5199_v55, %v2088_v45 }
 0x3b1   : > { %v1883_v8 = vmax.f32 %v1867_v48, 0.0 }
 0x3b2   : > { %v1987_v28 = vsub.f32 1.5, %v1986_v25  ;;  %v1750_v52 = vpop.xlane.xlu0 %1749  ;;  %v2126_v2 = vadd.f32 %v5207_v22, %v2107_v33 }
 0x3b3   : > { %v3925_v47 = vpop.eup %3924  ;;  %v1915_v50 = vadd.f32 1e-05, %v1883_v8  ;;  %v5285_v37 = vmul.f32 %v1750_v52, %v4394_v20 }
 0x3b4   : > { %v1994_v10 = vmul.f32 %v3925_v47, %v1914_v38  ;;  %v1988_v4 = vmul.f32 %v3923_v63, %v1987_v28  ;;  %v1814_v11 = vpop.xlane.xlu2 %1813  ;;  %v5293_v44 = vadd.f32 %v2126_v2, %v6119_v61  ;;  %vm2000_vm7 = vweird.f32 %v3925_v47 }
 0x3b5   : > { %3926 = vrsqrt.f32 %v1915_v50  ;;  %v1852_v36 = vmul.f32 %v5285_v37, %v5285_v37  ;;  %v1836_v1 = vmul.f32 %v1814_v11, %v4394_v20  ;;  %vm2001_vm9 = vmor %vm1999_vm8, %vm2000_vm7  ;;  %vm2009_vm11 = vweird.f32 %v1915_v50 }
 0x3b6   : > { %v1995_v23 = vmul.f32 %v3925_v47, %v1994_v10  ;;  %v2155_v42 = vpack.c.bf16 %v5293_v44, %v5289_v31  ;;  %v1992_v15 = vsel %vm1991_vm6, %v3923_v63, %v1988_v4 }
 0x3b7   : > { %v1868_v16 = vsub.f32 %v1836_v1, %v1852_v36  ;;  %v2089_v54 = vmul.f32 %v1992_v15, %v1897_v17 }
 0x3b8   : > { %v1996_v5 = vmul.f32 0.5, %v1995_v23  ;;  %2249 = vmatmul.bf16.gmra.mxu3 %v2155_v42  ;;  %v6120_v42 = vmax.f32 %v4563_v40, 0.0 }
 0x3b9   : > { %v1884_v59 = vmax.f32 %v1868_v16, 0.0  ;;  %v2108_v33 = vmul.f32 %v5199_v55, %v2089_v54 }
 0x3ba   : > { %v1997_v32 = vsub.f32 1.5, %v1996_v5  ;;  %v1752_v9 = vpop.xlane.xlu0 %1751  ;;  %v6121_v5 = vmax.f32 %v4573_v3, 0.0 }
 0x3bb   : > { %v3927_v24 = vpop.eup %3926  ;;  %v5303_v48 = vmul.f32 %v1752_v9, %v4394_v20  ;;  %v1916_v63 = vadd.f32 1e-05, %v1884_v59  ;;  %v2127_v6 = vadd.f32 %v5207_v22, %v2108_v33 }
 0x3bc   : > { %v1998_v45 = vmul.f32 %v3925_v47, %v1997_v32  ;;  %v2004_v13 = vmul.f32 %v3927_v24, %v1915_v50  ;;  %v1816_v25 = vpop.xlane.xlu2 %1815  ;;  %vm2010_vm10 = vweird.f32 %v3927_v24 }
 0x3bd   : > { %v1853_v18 = vmul.f32 %v5303_v48, %v5303_v48  ;;  %v1837_v8 = vmul.f32 %v1816_v25, %v4394_v20  ;;  %3928 = vrsqrt.f32 %v1916_v63  ;;  %v5319_v15 = vadd.f32 %v2127_v6, %v6120_v42  ;;  %vm2011_vm12 = vmor %vm2009_vm11, %vm2010_vm10 }
 0x3be   : > { %v2002_v28 = vsel %vm2001_vm9, %v3925_v47, %v1998_v45  ;;  %v2005_v52 = vmul.f32 %v3927_v24, %v2004_v13  ;;  %vm2019_vm14 = vweird.f32 %v1916_v63 }
 0x3bf   : > { %v2090_v38 = vmul.f32 %v2002_v28, %v1898_v34  ;;  %v1869_v2 = vsub.f32 %v1837_v8, %v1853_v18  ;;  %v1899_v34 = vsub.f32 %v5099_v39, %v5273_v14 }
 0x3c0   : > { %v2006_v10 = vmul.f32 0.5, %v2005_v52 }
 0x3c1   : > { %v2109_v4 = vmul.f32 %v5199_v55, %v2090_v38  ;;  %v1885_v26 = vmax.f32 %v1869_v2, 0.0 }
 0x3c2   : > { %v2007_v11 = vsub.f32 1.5, %v2006_v10  ;;  %v1754_v57 = vpop.xlane.xlu1 %1753 }
 0x3c3   : > { %v2128_v61 = vadd.f32 %v5207_v22, %v2109_v4  ;;  %v1917_v23 = vadd.f32 1e-05, %v1885_v26  ;;  %v5315_v36 = vmul.f32 %v1754_v57, %v4394_v20  ;;  %v3929_v47 = vpop.eup %3928 }
 0x3c4   : > { %v2008_v17 = vmul.f32 %v3927_v24, %v2007_v11  ;;  %v1818_v1 = vpop.xlane.xlu0 %1817  ;;  %v2014_v54 = vmul.f32 %v3929_v47, %v1916_v63  ;;  %vm2020_vm13 = vweird.f32 %v3929_v47 }
 0x3c5   : > { %v5323_v16 = vadd.f32 %v2128_v61, %v6121_v5  ;;  %3930 = vrsqrt.f32 %v1917_v23  ;;  %v1854_v32 = vmul.f32 %v5315_v36, %v5315_v36  ;;  %v1838_v59 = vmul.f32 %v1818_v1, %v4394_v20  ;;  %vm2021_vm15 = vmor %vm2019_vm14, %vm2020_vm13 }
 0x3c6   : > { %v2015_v45 = vmul.f32 %v3929_v47, %v2014_v54  ;;  %v2012_v40 = vsel %vm2011_vm12, %v3927_v24, %v2008_v17  ;;  %v1900_v24 = vsub.f32 %v5105_v58, %v5285_v37  ;;  %vm2029_vm1 = vweird.f32 %v1917_v23 }
 0x3c7   : > { %v2156_v9 = vpack.c.bf16 %v5323_v16, %v5319_v15  ;;  %v1870_v3 = vsub.f32 %v1838_v59, %v1854_v32  ;;  %v2091_v33 = vmul.f32 %v2012_v40, %v1899_v34  ;;  %v6122_v34 = vmax.f32 %v4642_v53, 0.0 }
 0x3c8   : > { %v2016_v13 = vmul.f32 0.5, %v2015_v45 }
 0x3c9   : > { %2254 = vmatmul.bf16.gmra.mxu3 %v2156_v9  ;;  %v1886_v50 = vmax.f32 %v1870_v3, 0.0  ;;  %v2110_v6 = vmul.f32 %v5199_v55, %v2091_v33 }
 0x3ca   : > { %v1756_v25 = vpop.xlane.xlu1 %1755  ;;  %v2017_v8 = vsub.f32 1.5, %v2016_v13  ;;  %v6123_v13 = vmax.f32 %v4650_v51, 0.0 }
 0x3cb   : > { %v3931_v18 = vpop.eup %3930  ;;  %v5333_v28 = vmul.f32 %v1756_v25, %v4394_v20  ;;  %v1918_v38 = vadd.f32 1e-05, %v1886_v50  ;;  %v2129_v5 = vadd.f32 %v5207_v22, %v2110_v6 }
 0x3cc   : > { %v2024_v52 = vmul.f32 %v3931_v18, %v1917_v23  ;;  %v1820_v2 = vpop.xlane.xlu0 %1819  ;;  %v2018_v10 = vmul.f32 %v3929_v47, %v2017_v8  ;;  %vm2030_vm0 = vweird.f32 %v3931_v18  ;;  %v1901_v23 = vsub.f32 %v5111_v46, %v5303_v48 }
 0x3cd   : > { %v1855_v39 = vmul.f32 %v5333_v28, %v5333_v28  ;;  %v1839_v14 = vmul.f32 %v1820_v2, %v4394_v20  ;;  %3932 = vrsqrt.f32 %v1918_v38  ;;  %vm2031_vm2 = vmor %vm2029_vm1, %vm2030_vm0  ;;  %v5352_v3 = vadd.f32 %v2129_v5, %v6122_v34 }
 0x3ce   : > { %v2025_v4 = vmul.f32 %v3931_v18, %v2024_v52  ;;  %v2022_v11 = vsel %vm2021_vm15, %v3929_v47, %v2018_v10  ;;  %vm2039_vm4 = vweird.f32 %v1918_v38 }
 0x3cf   : > { %v1871_v26 = vsub.f32 %v1839_v14, %v1855_v39  ;;  %v2092_v61 = vmul.f32 %v2022_v11, %v1900_v24  ;;  %v1902_v11 = vsub.f32 %v5117_v12, %v5315_v36 }
 0x3d0   : > { %v2026_v57 = vmul.f32 0.5, %v2025_v4 }
 0x3d1   : > { %v1887_v17 = vmax.f32 %v1871_v26, 0.0  ;;  %v2111_v42 = vmul.f32 %v5199_v55, %v2092_v61 }
 0x3d2   : > { %v2027_v1 = vsub.f32 1.5, %v2026_v57  ;;  %v1758_v63 = vpop.xlane.xlu2 %1757 }
 0x3d3   : > { %v1919_v54 = vadd.f32 1e-05, %v1887_v17  ;;  %v5344_v58 = vmul.f32 %v1758_v63, %v4394_v20  ;;  %v3933_v37 = vpop.eup %3932  ;;  %v2130_v9 = vadd.f32 %v5207_v22, %v2111_v42 }
 0x3d4   : > { %v2028_v32 = vmul.f32 %v3931_v18, %v2027_v1  ;;  %v1822_v59 = vpop.xlane.xlu1 %1821  ;;  %v2034_v47 = vmul.f32 %v3933_v37, %v1918_v38  ;;  %vm2040_vm3 = vweird.f32 %v3933_v37 }
 0x3d5   : > { %3934 = vrsqrt.f32 %v1919_v54  ;;  %v1856_v45 = vmul.f32 %v5344_v58, %v5344_v58  ;;  %v1840_v40 = vmul.f32 %v1822_v59, %v4394_v20  ;;  %v5356_v50 = vadd.f32 %v2130_v9, %v6123_v13  ;;  %vm2041_vm5 = vmor %vm2039_vm4, %vm2040_vm3 }
 0x3d6   : > { %v2035_v25 = vmul.f32 %v3933_v37, %v2034_v47  ;;  %v2032_v33 = vsel %vm2031_vm2, %v3931_v18, %v2028_v32  ;;  %vm2049_vm7 = vweird.f32 %v1919_v54 }
 0x3d7   : > { %v1872_v8 = vsub.f32 %v1840_v40, %v1856_v45  ;;  %v2157_v52 = vpack.c.bf16 %v5356_v50, %v5352_v3  ;;  %v2093_v53 = vmul.f32 %v2032_v33, %v1901_v23  ;;  %v6124_v33 = vmax.f32 %v4688_v19, 0.0 }
 0x3d8   : > { %v2036_v2 = vmul.f32 0.5, %v2035_v25 }
 0x3d9   : > { %v1888_v10 = vmax.f32 %v1872_v8, 0.0  ;;  %2259 = vmatmul.bf16.gmra.mxu3 %v2157_v52  ;;  %v2112_v61 = vmul.f32 %v5199_v55, %v2093_v53  ;;  %v6125_v8 = vmax.f32 %v4682_v0, 0.0 }
 0x3da   : > { %v1760_v39 = vpop.xlane.xlu2 %1759  ;;  %v2037_v24 = vsub.f32 1.5, %v2036_v2 }
 0x3db   : > { %v3935_v14 = vpop.eup %3934  ;;  %v5363_v51 = vmul.f32 %v1760_v39, %v4394_v20  ;;  %v1920_v18 = vadd.f32 1e-05, %v1888_v10  ;;  %v2131_v59 = vadd.f32 %v5207_v22, %v2112_v61 }
 0x3dc   : > { %v2044_v4 = vmul.f32 %v3935_v14, %v1919_v54  ;;  %v1824_v6 = vpop.xlane.xlu1 %1823  ;;  %v2038_v26 = vmul.f32 %v3933_v37, %v2037_v24  ;;  %vm2050_vm6 = vweird.f32 %v3935_v14  ;;  %v1903_v54 = vsub.f32 %v5126_v21, %v5333_v28 }
 0x3dd   : > { %v1857_v46 = vmul.f32 %v5363_v51, %v5363_v51  ;;  %v1841_v48 = vmul.f32 %v1824_v6, %v4394_v20  ;;  %3936 = vrsqrt.f32 %v1920_v18  ;;  %vm2051_vm8 = vmor %vm2049_vm7, %vm2050_vm6  ;;  %v5382_v23 = vadd.f32 %v2131_v59, %v6124_v33 }
 0x3de   : > { %v2045_v57 = vmul.f32 %v3935_v14, %v2044_v4  ;;  %v2042_v1 = vsel %vm2041_vm5, %v3933_v37, %v2038_v26  ;;  %vm2059_vm10 = vweird.f32 %v1920_v18 }
 0x3df   : > { %v1873_v17 = vsub.f32 %v1841_v48, %v1857_v46  ;;  %v2094_v42 = vmul.f32 %v2042_v1, %v1902_v11 }
 0x3e0   : > { %v2046_v63 = vmul.f32 0.5, %v2045_v57 }
 0x3e1   : > { %v1889_v5 = vmax.f32 %v1873_v17, 0.0  ;;  %v2113_v38 = vmul.f32 %v5199_v55, %v2094_v42 }
 0x3e2   : > { %v2047_v32 = vsub.f32 1.5, %v2046_v63  ;;  %v1762_v47 = vpop.xlane.xlu0 %1761 }
 0x3e3   : > { %v1921_v9 = vadd.f32 1e-05, %v1889_v5  ;;  %v3937_v45 = vpop.eup %3936  ;;  %v5374_v36 = vmul.f32 %v1762_v47, %v4394_v20  ;;  %v2132_v40 = vadd.f32 %v5207_v22, %v2113_v38  ;;  %v6127_v38 = vmax.f32 %v4694_v62, 0.0 }
 0x3e4   : > { %v2048_v12 = vmul.f32 %v3935_v14, %v2047_v32  ;;  %v2054_v37 = vmul.f32 %v3937_v45, %v1920_v18  ;;  %v1826_v34 = vpop.xlane.xlu2 %1825  ;;  %vm2060_vm9 = vweird.f32 %v3937_v45 }
 0x3e5   : > { %3938 = vrsqrt.f32 %v1921_v9  ;;  %v1858_v13 = vmul.f32 %v5374_v36, %v5374_v36  ;;  %v1842_v25 = vmul.f32 %v1826_v34, %v4394_v20  ;;  %v5386_v52 = vadd.f32 %v2132_v40, %v6125_v8  ;;  %vm2061_vm11 = vmor %vm2059_vm10, %vm2060_vm9 }
 0x3e6   : > { %v2055_v2 = vmul.f32 %v3937_v45, %v2054_v37  ;;  %v2052_v10 = vsel %vm2051_vm8, %v3935_v14, %v2048_v12  ;;  %v1904_v14 = vsub.f32 %v5138_v35, %v5344_v58  ;;  %vm2069_vm13 = vweird.f32 %v1921_v9 }
 0x3e7   : > { %v1874_v39 = vsub.f32 %v1842_v25, %v1858_v13  ;;  %v2158_v53 = vpack.c.bf16 %v5386_v52, %v5382_v23  ;;  %v2095_v6 = vmul.f32 %v2052_v10, %v1903_v54  ;;  %v6126_v58 = vmax.f32 %v4702_v49, 0.0 }
 0x3e8   : > { %v2056_v24 = vmul.f32 0.5, %v2055_v2  ;;  %v1905_v12 = vsub.f32 %v5153_v41, %v5363_v51  ;;  %v1906_v62 = vsub.f32 %v5173_v43, %v5374_v36  ;;  %v6128_v2 = vmax.f32 %v4726_v60, 0.0 }
 0x3e9   : > { %v1890_v4 = vmax.f32 %v1874_v39, 0.0  ;;  %2264 = vmatmul.bf16.gmra.mxu3 %v2158_v53  ;;  %v2114_v28 = vmul.f32 %v5199_v55, %v2095_v6  ;;  %v6129_v54 = vmax.f32 %v4723_v27, 0.0 }
 0x3ea   : > { %v2057_v26 = vsub.f32 1.5, %v2056_v24 }
 0x3eb   : > { %v3939_v19 = vpop.eup %3938  ;;  %v1922_v0 = vadd.f32 1e-05, %v1890_v4  ;;  %v2133_v63 = vadd.f32 %v5207_v22, %v2114_v28 }
 0x3ec   : > { %v2064_v46 = vmul.f32 %v3939_v19, %v1921_v9  ;;  %v2058_v48 = vmul.f32 %v3937_v45, %v2057_v26  ;;  %vm2070_vm12 = vweird.f32 %v3939_v19 }
 0x3ed   : > { %3940 = vrsqrt.f32 %v1922_v0  ;;  %vm2071_vm14 = vmor %vm2069_vm13, %vm2070_vm12  ;;  %v5400_v32 = vadd.f32 %v2133_v63, %v6126_v58  ;;  %vm2079_vm0 = vweird.f32 %v1922_v0  ;;  %v3746_v63 = vld [vmem:[%s6075_s9 + $0x78] sm:$0xff] }
 0x3ee   : > { %v2065_v21 = vmul.f32 %v3939_v19, %v2064_v46  ;;  %v2062_v11 = vsel %vm2061_vm11, %v3937_v45, %v2058_v48  ;;  %2784 = vmatpush.bf16.msrb.mxu0 %v3746_v63 }
 0x3ef   : > { %v2096_v61 = vmul.f32 %v2062_v11, %v1904_v14 }
 0x3f0   : > { %v2066_v57 = vmul.f32 0.5, %v2065_v21 }
 0x3f1   : > { %v2115_v1 = vmul.f32 %v5199_v55, %v2096_v61 }
 0x3f2   : > { %v2067_v17 = vsub.f32 1.5, %v2066_v57 }
 0x3f3   : > { %v3941_v42 = vpop.eup %3940  ;;  %v2134_v18 = vadd.f32 %v5207_v22, %v2115_v1 }
 0x3f4   : > { %v2068_v5 = vmul.f32 %v3939_v19, %v2067_v17  ;;  %v2074_v35 = vmul.f32 %v3941_v42, %v1922_v0  ;;  %vm2080_vm15 = vweird.f32 %v3941_v42 }
 0x3f5   : > { %v5404_v59 = vadd.f32 %v2134_v18, %v6127_v38  ;;  %vm2081_vm1 = vmor %vm2079_vm0, %vm2080_vm15 }
 0x3f6   : > { %v2072_v47 = vsel %vm2071_vm14, %v3939_v19, %v2068_v5  ;;  %v2075_v45 = vmul.f32 %v3941_v42, %v2074_v35  ;;  %v3745_v35 = vld [vmem:[%s6075_s9 + $0x70] sm:$0xff] }
 0x3f7   : > { %v2159_v40 = vpack.c.bf16 %v5404_v59, %v5400_v32  ;;  %v2097_v9 = vmul.f32 %v2072_v47, %v1905_v12  ;;  %2785 = vmatpush.bf16.msrb.mxu0 %v3745_v35 }
 0x3f8   : > { %v2076_v37 = vmul.f32 0.5, %v2075_v45 }
 0x3f9   : > { %2269 = vmatmul.bf16.gmra.mxu3 %v2159_v40  ;;  %v2116_v13 = vmul.f32 %v5199_v55, %v2097_v9  ;;  %v3744_v40 = vld [vmem:[%s6075_s9 + $0x68] sm:$0xff] }
 0x3fa   : > { %v2077_v34 = vsub.f32 1.5, %v2076_v37 }
 0x3fb   : > { %v2135_v51 = vadd.f32 %v5207_v22, %v2116_v13  ;;  %2786 = vmatpush.bf16.msrb.mxu0 %v3744_v40 }
 0x3fc   : > { %v2078_v49 = vmul.f32 %v3941_v42, %v2077_v34 }
 0x3fd   : > { %v5418_v10 = vadd.f32 %v2135_v51, %v6128_v2 }
 0x3fe   : > { %v2082_v25 = vsel %vm2081_vm1, %v3941_v42, %v2078_v49 }
 0x3ff   : > { %v2098_v33 = vmul.f32 %v2082_v25, %v1906_v62 }
 0x401   : > { %v2117_v41 = vmul.f32 %v5199_v55, %v2098_v33  ;;  %v5429_v55 = vld [vmem:[%s6072_s6 + $0x1] ss:$0 sm:$0xff] }
 0x403   : > { %v2136_v8 = vadd.f32 %v5207_v22, %v2117_v41 }
 0x405   : > { %v5422_v39 = vadd.f32 %v2136_v8, %v6129_v54  ;;  %v3743_v54 = vld [vmem:[%s6075_s9 + $0x60] sm:$0xff] }
 0x406   : > { %2787 = vmatpush.bf16.msrb.mxu0 %v3743_v54 }
 0x407   : > { %v2160_v43 = vpack.c.bf16 %v5422_v39, %v5418_v10 }
 0x409   : > { %2274 = vmatmul.bf16.gmra.mxu3 %v2160_v43 }
 0x415   : > { %v2240_v36 = vpop.f32.mrf.mxu3 }
 0x416   : > { %v5432_v22 = vadd.f32 %v5429_v55, %v2240_v36 }
 0x418   : > { %2284 = vadd.xlane.f32.xlu0 %v5432_v22  ;;  %v2332_v27 = vmul.f32 %v5432_v22, %v5432_v22 }
 0x41a   : > { %2348 = vadd.xlane.f32.xlu2 %v2332_v27 }
 0x41d   : > { %v2242_v60 = vpop.f32.mrf.mxu3 }
 0x41e   : > { %v5438_v53 = vadd.f32 %v5429_v55, %v2242_v60  ;;  %v3742_v60 = vld [vmem:[%s6075_s9 + $0x58] sm:$0xff] }
 0x41f   : > { %2788 = vmatpush.bf16.msrb.mxu0 %v3742_v60 }
 0x420   : > { %2286 = vadd.xlane.f32.xlu1 %v5438_v53  ;;  %v2333_v24 = vmul.f32 %v5438_v53, %v5438_v53 }
 0x422   : > { %2350 = vadd.xlane.f32.xlu0 %v2333_v24 }
 0x425   : > { %v2245_v4 = vpop.f32.mrf.mxu3 }
 0x426   : > { %v5444_v6 = vadd.f32 %v5429_v55, %v2245_v4 }
 0x428   : > { %2288 = vadd.xlane.f32.xlu1 %v5444_v6  ;;  %v2334_v19 = vmul.f32 %v5444_v6, %v5444_v6 }
 0x42a   : > { %2352 = vadd.xlane.f32.xlu0 %v2334_v19 }
 0x42d   : > { %v2247_v26 = vpop.f32.mrf.mxu3 }
 0x42e   : > { %v5450_v46 = vadd.f32 %v5429_v55, %v2247_v26 }
 0x430   : > { %2290 = vadd.xlane.f32.xlu2 %v5450_v46  ;;  %v2335_v0 = vmul.f32 %v5450_v46, %v5450_v46 }
 0x432   : > { %2354 = vadd.xlane.f32.xlu1 %v2335_v0 }
 0x43b   : > { %v2250_v48 = vpop.f32.mrf.mxu3 }
 0x43c   : > { %v5456_v14 = vadd.f32 %v5429_v55, %v2250_v48 }
 0x43e   : > { %2292 = vadd.xlane.f32.xlu2 %v5456_v14  ;;  %v2336_v21 = vmul.f32 %v5456_v14, %v5456_v14 }
 0x440   : > { %2356 = vadd.xlane.f32.xlu1 %v2336_v21 }
 0x443   : > { %v2252_v28 = vpop.f32.mrf.mxu3 }
 0x444   : > { %v5462_v11 = vadd.f32 %v5429_v55, %v2252_v28  ;;  %v3741_v28 = vld [vmem:[%s6075_s9 + $0x50] sm:$0xff] }
 0x445   : > { %2789 = vmatpush.bf16.msrb.mxu0 %v3741_v28 }
 0x446   : > { %2294 = vadd.xlane.f32.xlu0 %v5462_v11  ;;  %v2337_v57 = vmul.f32 %v5462_v11, %v5462_v11 }
 0x448   : > { %2358 = vadd.xlane.f32.xlu2 %v2337_v57 }
 0x44c   : > { %v2255_v61 = vpop.f32.mrf.mxu3 }
 0x44d   : > { %v5468_v17 = vadd.f32 %v5429_v55, %v2255_v61 }
 0x44f   : > { %2296 = vadd.xlane.f32.xlu0 %v5468_v17  ;;  %v2338_v1 = vmul.f32 %v5468_v17, %v5468_v17 }
 0x451   : > { %2360 = vadd.xlane.f32.xlu2 %v2338_v1 }
 0x454   : > { %v2257_v42 = vpop.f32.mrf.mxu3 }
 0x455   : > { %v5477_v5 = vadd.f32 %v5429_v55, %v2257_v42  ;;  %v3740_v42 = vld [vmem:[%s6075_s9 + $0x48] sm:$0xff] }
 0x456   : > { %2790 = vmatpush.bf16.msrb.mxu0 %v3740_v42 }
 0x457   : > { %2298 = vadd.xlane.f32.xlu1 %v5477_v5  ;;  %v2339_v18 = vmul.f32 %v5477_v5, %v5477_v5 }
 0x459   : > { %2362 = vadd.xlane.f32.xlu0 %v2339_v18 }
 0x45c   : > { %v2260_v58 = vpop.f32.mrf.mxu3 }
 0x45d   : > { %v5486_v38 = vadd.f32 %v5429_v55, %v2260_v58 }
 0x45f   : > { %2300 = vadd.xlane.f32.xlu1 %v5486_v38  ;;  %v2340_v47 = vmul.f32 %v5486_v38, %v5486_v38 }
 0x461   : > { %2364 = vadd.xlane.f32.xlu0 %v2340_v47 }
 0x464   : > { %v2262_v45 = vpop.f32.mrf.mxu3 }
 0x465   : > { %v5492_v12 = vadd.f32 %v5429_v55, %v2262_v45 }
 0x467   : > { %2302 = vadd.xlane.f32.xlu2 %v5492_v12  ;;  %v2341_v37 = vmul.f32 %v5492_v12, %v5492_v12 }
 0x469   : > { %2366 = vadd.xlane.f32.xlu1 %v2341_v37  ;;  %v3739_v37 = vld [vmem:[%s6075_s9 + $0x40] sm:$0xff] }
 0x46a   : > { %2791 = vmatpush.bf16.msrb.mxu0 %v3739_v37 }
 0x46c   : > { %v2265_v9 = vpop.f32.mrf.mxu3 }
 0x46d   : > { %v5501_v34 = vadd.f32 %v5429_v55, %v2265_v9 }
 0x46f   : > { %2304 = vadd.xlane.f32.xlu2 %v5501_v34  ;;  %v2342_v49 = vmul.f32 %v5501_v34, %v5501_v34 }
 0x471   : > { %2368 = vadd.xlane.f32.xlu1 %v2342_v49 }
 0x474   : > { %v2267_v62 = vpop.f32.mrf.mxu3 }
 0x475   : > { %v5507_v13 = vadd.f32 %v5429_v55, %v2267_v62 }
 0x477   : > { %2306 = vadd.xlane.f32.xlu0 %v5507_v13  ;;  %v2343_v25 = vmul.f32 %v5507_v13, %v5507_v13 }
 0x479   : > { %2370 = vadd.xlane.f32.xlu2 %v2343_v25 }
 0x47c   : > { %v2270_v33 = vpop.f32.mrf.mxu3 }
 0x47d   : > { %v5513_v41 = vadd.f32 %v5429_v55, %v2270_v33 }
 0x47f   : > { %2308 = vadd.xlane.f32.xlu0 %v5513_v41  ;;  %v2344_v51 = vmul.f32 %v5513_v41, %v5513_v41 }
 0x481   : > { %2372 = vadd.xlane.f32.xlu2 %v2344_v51 }
 0x484   : > { %v2272_v8 = vpop.f32.mrf.mxu3 }
 0x485   : > { %v5519_v2 = vadd.f32 %v5429_v55, %v2272_v8 }
 0x487   : > { %2310 = vadd.xlane.f32.xlu1 %v5519_v2  ;;  %v2345_v43 = vmul.f32 %v5519_v2, %v5519_v2 }
 0x489   : > { %2374 = vadd.xlane.f32.xlu0 %v2345_v43 }
 0x48b   : > { %v2285_v36 = vpop.xlane.xlu0 %2284 }
 0x48c   : > { %v5528_v27 = vmul.f32 %v2285_v36, %v4394_v20  ;;  %v2275_v24 = vpop.f32.mrf.mxu3 }
 0x48d   : > { %v2349_v4 = vpop.xlane.xlu2 %2348  ;;  %v5536_v26 = vadd.f32 %v5429_v55, %v2275_v24 }
 0x48e   : > { %v2396_v19 = vmul.f32 %v5528_v27, %v5528_v27  ;;  %v2380_v0 = vmul.f32 %v2349_v4, %v4394_v20 }
 0x48f   : > { %2312 = vadd.xlane.f32.xlu1 %v5536_v26  ;;  %v2346_v21 = vmul.f32 %v5536_v26, %v5536_v26 }
 0x490   : > { %v2412_v48 = vsub.f32 %v2380_v0, %v2396_v19 }
 0x491   : > { %2376 = vadd.xlane.f32.xlu0 %v2346_v21 }
 0x492   : > { %v2428_v57 = vmax.f32 %v2412_v48, 0.0 }
 0x493   : > { %v2287_v61 = vpop.xlane.xlu1 %2286 }
 0x494   : > { %v2460_v1 = vadd.f32 1e-05, %v2428_v57  ;;  %v5546_v63 = vmul.f32 %v2287_v61, %v4394_v20  ;;  %v2277_v18 = vpop.f32.mrf.mxu3 }
 0x495   : > { %v2351_v35 = vpop.xlane.xlu0 %2350  ;;  %v5552_v58 = vadd.f32 %v5429_v55, %v2277_v18 }
 0x496   : > { %3942 = vrsqrt.f32 %v2460_v1  ;;  %v2397_v47 = vmul.f32 %v5546_v63, %v5546_v63  ;;  %v2381_v45 = vmul.f32 %v2351_v35, %v4394_v20  ;;  %vm2482_vm3 = vweird.f32 %v2460_v1 }
 0x497   : > { %2314 = vadd.xlane.f32.xlu2 %v5552_v58  ;;  %v2347_v40 = vmul.f32 %v5552_v58, %v5552_v58 }
 0x498   : > { %v2413_v9 = vsub.f32 %v2381_v45, %v2397_v47 }
 0x499   : > { %2378 = vadd.xlane.f32.xlu1 %v2347_v40  ;;  %v2444_v40 = vsub.f32 %v5432_v22, %v5528_v27 }
 0x49a   : > { %v2429_v55 = vmax.f32 %v2413_v9, 0.0 }
 0x49b   : > { %v2289_v62 = vpop.xlane.xlu1 %2288 }
 0x49c   : > { %v3943_v49 = vpop.eup %3942  ;;  %v2461_v33 = vadd.f32 1e-05, %v2429_v55  ;;  %v5564_v51 = vmul.f32 %v2289_v62, %v4394_v20 }
 0x49d   : > { %v2477_v25 = vmul.f32 %v3943_v49, %v2460_v1  ;;  %v2353_v8 = vpop.xlane.xlu0 %2352  ;;  %vm2483_vm2 = vweird.f32 %v3943_v49  ;;  %v5580_v1 = vld [vmem:[%s6073_s7 + $0x1] ss:$0 sm:$0xff] }
 0x49e   : > { %3944 = vrsqrt.f32 %v2461_v33  ;;  %v2398_v43 = vmul.f32 %v5564_v51, %v5564_v51  ;;  %v2382_v36 = vmul.f32 %v2353_v8, %v4394_v20  ;;  %vm2484_vm4 = vmor %vm2482_vm3, %vm2483_vm2  ;;  %vm2492_vm6 = vweird.f32 %v2461_v33 }
 0x49f   : > { %v2478_v54 = vmul.f32 %v3943_v49, %v2477_v25 }
 0x4a0   : > { %v2414_v24 = vsub.f32 %v2382_v36, %v2398_v43  ;;  %v5588_v36 = vld [vmem:[%s6074_s8 + $0x1] ss:$0 sm:$0xff] }
 0x4a1   : > { %v2479_v60 = vmul.f32 0.5, %v2478_v54 }
 0x4a2   : > { %v2430_v19 = vmax.f32 %v2414_v24, 0.0 }
 0x4a3   : > { %v2480_v4 = vsub.f32 1.5, %v2479_v60  ;;  %v2291_v0 = vpop.xlane.xlu2 %2290 }
 0x4a4   : > { %v3945_v48 = vpop.eup %3944  ;;  %v5570_v28 = vmul.f32 %v2291_v0, %v4394_v20  ;;  %v2462_v61 = vadd.f32 1e-05, %v2430_v19 }
 0x4a5   : > { %v2481_v21 = vmul.f32 %v3943_v49, %v2480_v4  ;;  %v2487_v57 = vmul.f32 %v3945_v48, %v2461_v33  ;;  %v2355_v42 = vpop.xlane.xlu1 %2354  ;;  %vm2493_vm5 = vweird.f32 %v3945_v48 }
 0x4a6   : > { %v2399_v18 = vmul.f32 %v5570_v28, %v5570_v28  ;;  %v2383_v35 = vmul.f32 %v2355_v42, %v4394_v20  ;;  %3946 = vrsqrt.f32 %v2462_v61  ;;  %vm2494_vm7 = vmor %vm2492_vm6, %vm2493_vm5  ;;  %vm2502_vm9 = vweird.f32 %v2462_v61 }
 0x4a7   : > { %v2485_v47 = vsel %vm2484_vm4, %v3943_v49, %v2481_v21  ;;  %v2488_v45 = vmul.f32 %v3945_v48, %v2487_v57  ;;  %v2445_v49 = vsub.f32 %v5438_v53, %v5546_v63 }
 0x4a8   : > { %v2415_v37 = vsub.f32 %v2383_v35, %v2399_v18  ;;  %v2636_v62 = vmul.f32 %v2485_v47, %v2444_v40 }
 0x4a9   : > { %v2489_v9 = vmul.f32 0.5, %v2488_v45 }
 0x4aa   : > { %v2431_v55 = vmax.f32 %v2415_v37, 0.0  ;;  %v2655_v27 = vmul.f32 %v5580_v1, %v2636_v62 }
 0x4ab   : > { %v2490_v25 = vsub.f32 1.5, %v2489_v9 }
 0x4ac   : > { %v2463_v8 = vadd.f32 1e-05, %v2431_v55  ;;  %v3947_v54 = vpop.eup %3946  ;;  %v2674_v63 = vadd.f32 %v5588_v36, %v2655_v27 }
 0x4ad   : > { %v2491_v43 = vmul.f32 %v3945_v48, %v2490_v25  ;;  %v2497_v22 = vmul.f32 %v3947_v54, %v2462_v61  ;;  %vm2503_vm8 = vweird.f32 %v3947_v54  ;;  %v2446_v25 = vsub.f32 %v5444_v6, %v5564_v51 }
 0x4ae   : > { %3948 = vrsqrt.f32 %v2463_v8  ;;  %v2690_v37 = vmax.f32 %v2674_v63, 0.0  ;;  %vm2504_vm10 = vmor %vm2502_vm9, %vm2503_vm8  ;;  %vm2512_vm12 = vweird.f32 %v2463_v8  ;;  %v2447_v51 = vsub.f32 %v5450_v46, %v5570_v28 }
 0x4af   : > { %v2495_v60 = vsel %vm2494_vm7, %v3945_v48, %v2491_v43  ;;  %v2498_v24 = vmul.f32 %v3947_v54, %v2497_v22 }
 0x4b0   : > { %v2637_v19 = vmul.f32 %v2495_v60, %v2445_v49 }
 0x4b1   : > { %v2293_v4 = vpop.xlane.xlu2 %2292  ;;  %v2499_v33 = vmul.f32 0.5, %v2498_v24 }
 0x4b2   : > { %v5591_v0 = vmul.f32 %v2293_v4, %v4394_v20  ;;  %v2656_v53 = vmul.f32 %v5580_v1, %v2637_v19 }
 0x4b3   : > { %v2357_v21 = vpop.xlane.xlu1 %2356  ;;  %v2500_v35 = vsub.f32 1.5, %v2499_v33 }
 0x4b4   : > { %v2400_v57 = vmul.f32 %v5591_v0, %v5591_v0  ;;  %v2384_v42 = vmul.f32 %v2357_v21, %v4394_v20  ;;  %v3949_v18 = vpop.eup %3948  ;;  %v2675_v48 = vadd.f32 %v5588_v36, %v2656_v53 }
 0x4b5   : > { %v2507_v47 = vmul.f32 %v3949_v18, %v2463_v8  ;;  %v2501_v40 = vmul.f32 %v3947_v54, %v2500_v35  ;;  %vm2513_vm11 = vweird.f32 %v3949_v18 }
 0x4b6   : > { %v2416_v45 = vsub.f32 %v2384_v42, %v2400_v57  ;;  %v2691_v9 = vmax.f32 %v2675_v48, 0.0  ;;  %vm2514_vm13 = vmor %vm2512_vm12, %vm2513_vm11 }
 0x4b7   : > { %v2508_v55 = vmul.f32 %v3949_v18, %v2507_v47  ;;  %v2505_v22 = vsel %vm2504_vm10, %v3947_v54, %v2501_v40 }
 0x4b8   : > { %v2432_v62 = vmax.f32 %v2416_v45, 0.0  ;;  %v2706_v49 = vpack.c.bf16 %v2691_v9, %v2690_v37  ;;  %v2638_v19 = vmul.f32 %v2505_v22, %v2446_v25 }
 0x4b9   : > { %v2295_v43 = vpop.xlane.xlu0 %2294  ;;  %v2509_v27 = vmul.f32 0.5, %v2508_v55 }
 0x4ba   : > { %v2464_v60 = vadd.f32 1e-05, %v2432_v62  ;;  %v5602_v24 = vmul.f32 %v2295_v43, %v4394_v20  ;;  %2792 = vmatmul.bf16.vlgmr.msrb.gmra.mxu0 %v2706_v49  ;;  %v2657_v53 = vmul.f32 %v5580_v1, %v2638_v19 }
 0x4bb   : > { %v2359_v4 = vpop.xlane.xlu2 %2358  ;;  %v2510_v61 = vsub.f32 1.5, %v2509_v27 }
 0x4bc   : > { %3950 = vrsqrt.f32 %v2464_v60  ;;  %v2401_v33 = vmul.f32 %v5602_v24, %v5602_v24  ;;  %v2385_v21 = vmul.f32 %v2359_v4, %v4394_v20  ;;  %v2676_v9 = vadd.f32 %v5588_v36, %v2657_v53 }
 0x4bd   : > { %v2511_v6 = vmul.f32 %v3949_v18, %v2510_v61  ;;  %vm2522_vm15 = vweird.f32 %v2464_v60 }
 0x4be   : > { %v2417_v54 = vsub.f32 %v2385_v21, %v2401_v33  ;;  %v2692_v43 = vmax.f32 %v2676_v9, 0.0 }
 0x4bf   : > { %v2515_v63 = vsel %vm2514_vm13, %v3949_v18, %v2511_v6 }
 0x4c0   : > { %v2433_v57 = vmax.f32 %v2417_v54, 0.0  ;;  %v2639_v35 = vmul.f32 %v2515_v63, %v2447_v51 }
 0x4c2   : > { %v2297_v42 = vpop.xlane.xlu0 %2296  ;;  %v3951_v48 = vpop.eup %3950  ;;  %v2465_v40 = vadd.f32 1e-05, %v2433_v57  ;;  %v2658_v8 = vmul.f32 %v5580_v1, %v2639_v35  ;;  %v2448_v35 = vsub.f32 %v5456_v14, %v5591_v0 }
 0x4c3   : > { %v5611_v47 = vmul.f32 %v2297_v42, %v4394_v20  ;;  %v2517_v45 = vmul.f32 %v3951_v48, %v2464_v60  ;;  %vm2523_vm14 = vweird.f32 %v3951_v48 }
 0x4c4   : > { %v2361_v37 = vpop.xlane.xlu2 %2360  ;;  %3952 = vrsqrt.f32 %v2465_v40  ;;  %v2677_v55 = vadd.f32 %v5588_v36, %v2658_v8  ;;  %vm2524_vm0 = vmor %vm2522_vm15, %vm2523_vm14  ;;  %vm2532_vm2 = vweird.f32 %v2465_v40 }
 0x4c5   : > { %v2402_v46 = vmul.f32 %v5611_v47, %v5611_v47  ;;  %v2386_v28 = vmul.f32 %v2361_v37, %v4394_v20  ;;  %v2518_v18 = vmul.f32 %v3951_v48, %v2517_v45 }
 0x4c6   : > { %v2693_v49 = vmax.f32 %v2677_v55, 0.0 }
 0x4c7   : > { %v2418_v62 = vsub.f32 %v2386_v28, %v2402_v46  ;;  %v2519_v25 = vmul.f32 0.5, %v2518_v18 }
 0x4c8   : > { %v2707_v19 = vpack.c.bf16 %v2693_v49, %v2692_v43 }
 0x4c9   : > { %v2434_v22 = vmax.f32 %v2418_v62, 0.0  ;;  %v2520_v27 = vsub.f32 1.5, %v2519_v25 }
 0x4ca   : > { %v2299_v4 = vpop.xlane.xlu1 %2298  ;;  %v3953_v21 = vpop.eup %3952  ;;  %2797 = vmatmul.bf16.gmra.mxu0 %v2707_v19 }
 0x4cb   : > { %v2466_v61 = vadd.f32 1e-05, %v2434_v22  ;;  %v5620_v33 = vmul.f32 %v2299_v4, %v4394_v20  ;;  %v2521_v6 = vmul.f32 %v3951_v48, %v2520_v27  ;;  %v2527_v54 = vmul.f32 %v3953_v21, %v2465_v40 }
 0x4cc   : > { %v2363_v51 = vpop.xlane.xlu0 %2362  ;;  %vm2533_vm1 = vweird.f32 %v3953_v21 }
 0x4cd   : > { %3954 = vrsqrt.f32 %v2466_v61  ;;  %v2403_v53 = vmul.f32 %v5620_v33, %v5620_v33  ;;  %v2387_v63 = vmul.f32 %v2363_v51, %v4394_v20  ;;  %v2528_v57 = vmul.f32 %v3953_v21, %v2527_v54  ;;  %vm2534_vm3 = vmor %vm2532_vm2, %vm2533_vm1 }
 0x4ce   : > { %v2525_v42 = vsel %vm2524_vm0, %v3951_v48, %v2521_v6  ;;  %v2449_v48 = vsub.f32 %v5462_v11, %v5602_v24  ;;  %vm2542_vm5 = vweird.f32 %v2466_v61 }
 0x4cf   : > { %v2419_v45 = vsub.f32 %v2387_v63, %v2403_v53  ;;  %v2529_v37 = vmul.f32 0.5, %v2528_v57  ;;  %v2640_v9 = vmul.f32 %v2525_v42, %v2448_v35 }
 0x4d1   : > { %v2435_v8 = vmax.f32 %v2419_v45, 0.0  ;;  %v2530_v28 = vsub.f32 1.5, %v2529_v37  ;;  %v2659_v43 = vmul.f32 %v5580_v1, %v2640_v9 }
 0x4d2   : > { %v2301_v55 = vpop.xlane.xlu1 %2300 }
 0x4d3   : > { %v3955_v46 = vpop.eup %3954  ;;  %v2467_v18 = vadd.f32 1e-05, %v2435_v8  ;;  %v2531_v62 = vmul.f32 %v3953_v21, %v2530_v28  ;;  %v5628_v25 = vmul.f32 %v2301_v55, %v4394_v20  ;;  %v2678_v11 = vadd.f32 %v5588_v36, %v2659_v43 }
 0x4d4   : > { %v2537_v60 = vmul.f32 %v3955_v46, %v2466_v61  ;;  %v2365_v0 = vpop.xlane.xlu0 %2364  ;;  %vm2543_vm4 = vweird.f32 %v3955_v46  ;;  %v2450_v55 = vsub.f32 %v5468_v17, %v5611_v47  ;;  %v2451_v17 = vsub.f32 %v5477_v5, %v5620_v33 }
 0x4d5   : > { %3956 = vrsqrt.f32 %v2467_v18  ;;  %v2404_v49 = vmul.f32 %v5628_v25, %v5628_v25  ;;  %v2388_v22 = vmul.f32 %v2365_v0, %v4394_v20  ;;  %v2535_v27 = vsel %vm2534_vm3, %v3953_v21, %v2531_v62  ;;  %vm2544_vm6 = vmor %vm2542_vm5, %vm2543_vm4 }
 0x4d6   : > { %v2538_v14 = vmul.f32 %v3955_v46, %v2537_v60  ;;  %v2641_v40 = vmul.f32 %v2535_v27, %v2449_v48  ;;  %v2694_v37 = vmax.f32 %v2678_v11, 0.0  ;;  %vm2552_vm8 = vweird.f32 %v2467_v18 }
 0x4d7   : > { %v2420_v19 = vsub.f32 %v2388_v22, %v2404_v49 }
 0x4d8   : > { %v2539_v4 = vmul.f32 0.5, %v2538_v14  ;;  %v2660_v51 = vmul.f32 %v5580_v1, %v2641_v40 }
 0x4d9   : > { %v2436_v24 = vmax.f32 %v2420_v19, 0.0 }
 0x4da   : > { %v2540_v6 = vsub.f32 1.5, %v2539_v4  ;;  %v2303_v63 = vpop.xlane.xlu2 %2302  ;;  %v2679_v57 = vadd.f32 %v5588_v36, %v2660_v51 }
 0x4db   : > { %v3957_v54 = vpop.eup %3956  ;;  %v2468_v35 = vadd.f32 1e-05, %v2436_v24  ;;  %v5640_v21 = vmul.f32 %v2303_v63, %v4394_v20 }
 0x4dc   : > { %v2541_v53 = vmul.f32 %v3955_v46, %v2540_v6  ;;  %v2547_v42 = vmul.f32 %v3957_v54, %v2467_v18  ;;  %v2367_v45 = vpop.xlane.xlu1 %2366  ;;  %v2695_v8 = vmax.f32 %v2679_v57, 0.0  ;;  %vm2553_vm7 = vweird.f32 %v3957_v54 }
 0x4dd   : > { %3958 = vrsqrt.f32 %v2468_v35  ;;  %v2405_v28 = vmul.f32 %v5640_v21, %v5640_v21  ;;  %v2389_v61 = vmul.f32 %v2367_v45, %v4394_v20  ;;  %vm2554_vm9 = vmor %vm2552_vm8, %vm2553_vm7  ;;  %vm2562_vm11 = vweird.f32 %v2468_v35 }
 0x4de   : > { %v2548_v9 = vmul.f32 %v3957_v54, %v2547_v42  ;;  %v2545_v60 = vsel %vm2544_vm6, %v3955_v46, %v2541_v53  ;;  %v2708_v62 = vpack.c.bf16 %v2695_v8, %v2694_v37 }
 0x4df   : > { %v2421_v14 = vsub.f32 %v2389_v61, %v2405_v28  ;;  %v2642_v0 = vmul.f32 %v2545_v60, %v2450_v55 }
 0x4e0   : > { %v2549_v48 = vmul.f32 0.5, %v2548_v9  ;;  %2802 = vmatmul.bf16.gmra.mxu0 %v2708_v62 }
 0x4e1   : > { %v2437_v49 = vmax.f32 %v2421_v14, 0.0  ;;  %v2661_v6 = vmul.f32 %v5580_v1, %v2642_v0 }
 0x4e2   : > { %v2550_v43 = vsub.f32 1.5, %v2549_v48  ;;  %v2305_v22 = vpop.xlane.xlu2 %2304 }
 0x4e3   : > { %v3959_v27 = vpop.eup %3958  ;;  %v5648_v40 = vmul.f32 %v2305_v22, %v4394_v20  ;;  %v2469_v46 = vadd.f32 1e-05, %v2437_v49  ;;  %v2680_v5 = vadd.f32 %v5588_v36, %v2661_v6 }
 0x4e4   : > { %v2551_v4 = vmul.f32 %v3957_v54, %v2550_v43  ;;  %v2557_v47 = vmul.f32 %v3959_v27, %v2468_v35  ;;  %v2369_v19 = vpop.xlane.xlu1 %2368  ;;  %vm2563_vm10 = vweird.f32 %v3959_v27 }
 0x4e5   : > { %v2406_v51 = vmul.f32 %v5648_v40, %v5648_v40  ;;  %v2390_v11 = vmul.f32 %v2369_v19, %v4394_v20  ;;  %3960 = vrsqrt.f32 %v2469_v46  ;;  %v2696_v61 = vmax.f32 %v2680_v5, 0.0  ;;  %vm2564_vm12 = vmor %vm2562_vm11, %vm2563_vm10 }
 0x4e6   : > { %v2555_v24 = vsel %vm2554_vm9, %v3957_v54, %v2551_v4  ;;  %v2558_v53 = vmul.f32 %v3959_v27, %v2557_v47  ;;  %v2452_v4 = vsub.f32 %v5486_v38, %v5628_v25  ;;  %vm2572_vm14 = vweird.f32 %v2469_v46 }
 0x4e7   : > { %v2643_v18 = vmul.f32 %v2555_v24, %v2451_v17  ;;  %v2422_v63 = vsub.f32 %v2390_v11, %v2406_v51 }
 0x4e8   : > { %v2559_v57 = vmul.f32 0.5, %v2558_v53 }
 0x4e9   : > { %v2662_v42 = vmul.f32 %v5580_v1, %v2643_v18  ;;  %v2438_v33 = vmax.f32 %v2422_v63, 0.0 }
 0x4ea   : > { %v2560_v45 = vsub.f32 1.5, %v2559_v57  ;;  %v2307_v37 = vpop.xlane.xlu0 %2306 }
 0x4eb   : > { %v2681_v8 = vadd.f32 %v5588_v36, %v2662_v42  ;;  %v2470_v9 = vadd.f32 1e-05, %v2438_v33  ;;  %v5660_v28 = vmul.f32 %v2307_v37, %v4394_v20  ;;  %v3961_v54 = vpop.eup %3960 }
 0x4ec   : > { %v2561_v60 = vmul.f32 %v3959_v27, %v2560_v45  ;;  %v2371_v55 = vpop.xlane.xlu2 %2370  ;;  %v2567_v48 = vmul.f32 %v3961_v54, %v2469_v46  ;;  %vm2573_vm13 = vweird.f32 %v3961_v54 }
 0x4ed   : > { %v2697_v62 = vmax.f32 %v2681_v8, 0.0  ;;  %3962 = vrsqrt.f32 %v2470_v9  ;;  %v2407_v14 = vmul.f32 %v5660_v28, %v5660_v28  ;;  %v2391_v0 = vmul.f32 %v2371_v55, %v4394_v20  ;;  %vm2574_vm15 = vmor %vm2572_vm14, %vm2573_vm13 }
 0x4ee   : > { %v2568_v49 = vmul.f32 %v3961_v54, %v2567_v48  ;;  %v2565_v22 = vsel %vm2564_vm12, %v3959_v27, %v2561_v60  ;;  %v2453_v27 = vsub.f32 %v5492_v12, %v5640_v21  ;;  %vm2582_vm1 = vweird.f32 %v2470_v9 }
 0x4ef   : > { %v2709_v43 = vpack.c.bf16 %v2697_v62, %v2696_v61  ;;  %v2423_v17 = vsub.f32 %v2391_v0, %v2407_v14  ;;  %v2644_v35 = vmul.f32 %v2565_v22, %v2452_v4 }
 0x4f0   : > { %v2569_v47 = vmul.f32 0.5, %v2568_v49 }
 0x4f1   : > { %2807 = vmatmul.bf16.gmra.mxu0 %v2709_v43  ;;  %v2439_v19 = vmax.f32 %v2423_v17, 0.0  ;;  %v2663_v5 = vmul.f32 %v5580_v1, %v2644_v35 }
 0x4f2   : > { %v2309_v6 = vpop.xlane.xlu0 %2308  ;;  %v2570_v11 = vsub.f32 1.5, %v2569_v47 }
 0x4f3   : > { %v3963_v51 = vpop.eup %3962  ;;  %v5668_v24 = vmul.f32 %v2309_v6, %v4394_v20  ;;  %v2471_v18 = vadd.f32 1e-05, %v2439_v19  ;;  %v2682_v62 = vadd.f32 %v5588_v36, %v2663_v5  ;;  %v2454_v6 = vsub.f32 %v5501_v34, %v5648_v40 }
 0x4f4   : > { %v2577_v53 = vmul.f32 %v3963_v51, %v2470_v9  ;;  %v2373_v63 = vpop.xlane.xlu2 %2372  ;;  %v2571_v57 = vmul.f32 %v3961_v54, %v2570_v11  ;;  %vm2583_vm0 = vweird.f32 %v3963_v51 }
 0x4f5   : > { %v2408_v38 = vmul.f32 %v5668_v24, %v5668_v24  ;;  %v2392_v25 = vmul.f32 %v2373_v63, %v4394_v20  ;;  %3964 = vrsqrt.f32 %v2471_v18  ;;  %vm2584_vm2 = vmor %vm2582_vm1, %vm2583_vm0  ;;  %v2698_v4 = vmax.f32 %v2682_v62, 0.0 }
 0x4f6   : > { %v2578_v42 = vmul.f32 %v3963_v51, %v2577_v53  ;;  %v2575_v45 = vsel %vm2574_vm15, %v3961_v54, %v2571_v57  ;;  %vm2592_vm4 = vweird.f32 %v2471_v18 }
 0x4f7   : > { %v2424_v33 = vsub.f32 %v2392_v25, %v2408_v38  ;;  %v2645_v8 = vmul.f32 %v2575_v45, %v2453_v27  ;;  %v2455_v45 = vsub.f32 %v5507_v13, %v5660_v28 }
 0x4f8   : > { %v2579_v37 = vmul.f32 0.5, %v2578_v42 }
 0x4f9   : > { %v2440_v60 = vmax.f32 %v2424_v33, 0.0  ;;  %v2664_v61 = vmul.f32 %v5580_v1, %v2645_v8 }
 0x4fa   : > { %v2580_v55 = vsub.f32 1.5, %v2579_v37  ;;  %v2311_v46 = vpop.xlane.xlu1 %2310 }
 0x4fb   : > { %v2472_v48 = vadd.f32 1e-05, %v2440_v60  ;;  %v5679_v12 = vmul.f32 %v2311_v46, %v4394_v20  ;;  %v3965_v21 = vpop.eup %3964  ;;  %v2683_v43 = vadd.f32 %v5588_v36, %v2664_v61 }
 0x4fc   : > { %v2581_v14 = vmul.f32 %v3963_v51, %v2580_v55  ;;  %v2375_v0 = vpop.xlane.xlu0 %2374  ;;  %v2587_v54 = vmul.f32 %v3965_v21, %v2471_v18  ;;  %vm2593_vm3 = vweird.f32 %v3965_v21 }
 0x4fd   : > { %3966 = vrsqrt.f32 %v2472_v48  ;;  %v2409_v49 = vmul.f32 %v5679_v12, %v5679_v12  ;;  %v2393_v22 = vmul.f32 %v2375_v0, %v4394_v20  ;;  %v2699_v17 = vmax.f32 %v2683_v43, 0.0  ;;  %vm2594_vm5 = vmor %vm2592_vm4, %vm2593_vm3 }
 0x4fe   : > { %v2588_v47 = vmul.f32 %v3965_v21, %v2587_v54  ;;  %v2585_v19 = vsel %vm2584_vm2, %v3963_v51, %v2581_v14  ;;  %vm2602_vm7 = vweird.f32 %v2472_v48 }
 0x4ff   : > { %v2425_v35 = vsub.f32 %v2393_v22, %v2409_v49  ;;  %v2710_v11 = vpack.c.bf16 %v2699_v17, %v2698_v4  ;;  %v2646_v57 = vmul.f32 %v2585_v19, %v2454_v6 }
 0x500   : > { %v2589_v53 = vmul.f32 0.5, %v2588_v47 }
 0x501   : > { %v2441_v63 = vmax.f32 %v2425_v35, 0.0  ;;  %2812 = vmatmul.bf16.gmra.mxu0 %v2710_v11  ;;  %v2665_v8 = vmul.f32 %v5580_v1, %v2646_v57 }
 0x502   : > { %v2313_v9 = vpop.xlane.xlu1 %2312  ;;  %v2590_v25 = vsub.f32 1.5, %v2589_v53  ;;  %v2456_v53 = vsub.f32 %v5513_v41, %v5668_v24 }
 0x503   : > { %v3967_v38 = vpop.eup %3966  ;;  %v5688_v27 = vmul.f32 %v2313_v9, %v4394_v20  ;;  %v2473_v5 = vadd.f32 1e-05, %v2441_v63  ;;  %v2684_v43 = vadd.f32 %v5588_v36, %v2665_v8 }
 0x504   : > { %v2597_v42 = vmul.f32 %v3967_v38, %v2472_v48  ;;  %v2377_v33 = vpop.xlane.xlu0 %2376  ;;  %v2591_v51 = vmul.f32 %v3965_v21, %v2590_v25  ;;  %vm2603_vm6 = vweird.f32 %v3967_v38 }
 0x505   : > { %v2410_v34 = vmul.f32 %v5688_v27, %v5688_v27  ;;  %v2394_v40 = vmul.f32 %v2377_v33, %v4394_v20  ;;  %3968 = vrsqrt.f32 %v2473_v5  ;;  %vm2604_vm8 = vmor %vm2602_vm7, %vm2603_vm6  ;;  %v2700_v19 = vmax.f32 %v2684_v43, 0.0 }
 0x506   : > { %v2598_v37 = vmul.f32 %v3967_v38, %v2597_v42  ;;  %v2595_v55 = vsel %vm2594_vm5, %v3965_v21, %v2591_v51  ;;  %vm2612_vm10 = vweird.f32 %v2473_v5  ;;  %v2458_v43 = vsub.f32 %v5536_v26, %v5688_v27 }
 0x507   : > { %v2426_v60 = vsub.f32 %v2394_v40, %v2410_v34  ;;  %v2647_v61 = vmul.f32 %v2595_v55, %v2455_v45  ;;  %v2457_v45 = vsub.f32 %v5519_v2, %v5679_v12 }
 0x508   : > { %v2599_v46 = vmul.f32 0.5, %v2598_v37 }
 0x509   : > { %v2442_v62 = vmax.f32 %v2426_v60, 0.0  ;;  %v2666_v0 = vmul.f32 %v5580_v1, %v2647_v61 }
 0x50a   : > { %v2600_v14 = vsub.f32 1.5, %v2599_v46  ;;  %v2315_v18 = vpop.xlane.xlu2 %2314 }
 0x50b   : > { %v2474_v54 = vadd.f32 1e-05, %v2442_v62  ;;  %v5699_v13 = vmul.f32 %v2315_v18, %v4394_v20  ;;  %v3969_v28 = vpop.eup %3968  ;;  %v2685_v4 = vadd.f32 %v5588_v36, %v2666_v0 }
 0x50c   : > { %v2601_v49 = vmul.f32 %v3967_v38, %v2600_v14  ;;  %v2379_v22 = vpop.xlane.xlu1 %2378  ;;  %v2607_v21 = vmul.f32 %v3969_v28, %v2473_v5  ;;  %vm2613_vm9 = vweird.f32 %v3969_v28 }
 0x50d   : > { %3970 = vrsqrt.f32 %v2474_v54  ;;  %v2411_v17 = vmul.f32 %v5699_v13, %v5699_v13  ;;  %v2395_v47 = vmul.f32 %v2379_v22, %v4394_v20  ;;  %v2701_v6 = vmax.f32 %v2685_v4, 0.0  ;;  %vm2614_vm11 = vmor %vm2612_vm10, %vm2613_vm9 }
 0x50e   : > { %v2608_v35 = vmul.f32 %v3969_v28, %v2607_v21  ;;  %v2605_v11 = vsel %vm2604_vm8, %v3967_v38, %v2601_v49  ;;  %vm2622_vm13 = vweird.f32 %v2474_v54 }
 0x50f   : > { %v2427_v63 = vsub.f32 %v2395_v47, %v2411_v17  ;;  %v2711_v9 = vpack.c.bf16 %v2701_v6, %v2700_v19  ;;  %v2648_v48 = vmul.f32 %v2605_v11, %v2456_v53 }
 0x510   : > { %v2609_v57 = vmul.f32 0.5, %v2608_v35 }
 0x511   : > { %v2443_v25 = vmax.f32 %v2427_v63, 0.0  ;;  %2817 = vmatmul.bf16.gmra.mxu0 %v2711_v9  ;;  %v2667_v41 = vmul.f32 %v5580_v1, %v2648_v48  ;;  %v5724_v63 = vld [vmem:[%s6076_s10 + $0x1] ss:$0 sm:$0xff] }
 0x512   : > { %v2610_v33 = vsub.f32 1.5, %v2609_v57 }
 0x513   : > { %v3971_v42 = vpop.eup %3970  ;;  %v2475_v34 = vadd.f32 1e-05, %v2443_v25  ;;  %v2686_v46 = vadd.f32 %v5588_v36, %v2667_v41 }
 0x514   : > { %v2617_v51 = vmul.f32 %v3971_v42, %v2474_v54  ;;  %v2611_v40 = vmul.f32 %v3969_v28, %v2610_v33  ;;  %vm2623_vm12 = vweird.f32 %v3971_v42  ;;  %v2459_v54 = vsub.f32 %v5552_v58, %v5699_v13 }
 0x515   : > { %3972 = vrsqrt.f32 %v2475_v34  ;;  %vm2624_vm14 = vmor %vm2622_vm13, %vm2623_vm12  ;;  %v2702_v12 = vmax.f32 %v2686_v46, 0.0  ;;  %vm2632_vm0 = vweird.f32 %v2475_v34 }
 0x516   : > { %v2618_v38 = vmul.f32 %v3971_v42, %v2617_v51  ;;  %v2615_v24 = vsel %vm2614_vm11, %v3969_v28, %v2611_v40 }
 0x517   : > { %v2649_v8 = vmul.f32 %v2615_v24, %v2457_v45 }
 0x518   : > { %v2619_v37 = vmul.f32 0.5, %v2618_v38 }
 0x519   : > { %v2668_v55 = vmul.f32 %v5580_v1, %v2649_v8 }
 0x51a   : > { %v2620_v60 = vsub.f32 1.5, %v2619_v37 }
 0x51b   : > { %v3973_v61 = vpop.eup %3972  ;;  %v2687_v5 = vadd.f32 %v5588_v36, %v2668_v55 }
 0x51c   : > { %v2621_v62 = vmul.f32 %v3971_v42, %v2620_v60  ;;  %v2627_v2 = vmul.f32 %v3973_v61, %v2475_v34  ;;  %vm2633_vm15 = vweird.f32 %v3973_v61 }
 0x51d   : > { %v2703_v14 = vmax.f32 %v2687_v5, 0.0  ;;  %vm2634_vm1 = vmor %vm2632_vm0, %vm2633_vm15 }
 0x51e   : > { %v2625_v18 = vsel %vm2624_vm14, %v3971_v42, %v2621_v62  ;;  %v2628_v0 = vmul.f32 %v3973_v61, %v2627_v2 }
 0x51f   : > { %v2712_v28 = vpack.c.bf16 %v2703_v14, %v2702_v12  ;;  %v2650_v22 = vmul.f32 %v2625_v18, %v2458_v43 }
 0x520   : > { %v2629_v49 = vmul.f32 0.5, %v2628_v0 }
 0x521   : > { %2822 = vmatmul.bf16.gmra.mxu0 %v2712_v28  ;;  %v2669_v17 = vmul.f32 %v5580_v1, %v2650_v22 }
 0x522   : > { %v2630_v4 = vsub.f32 1.5, %v2629_v49 }
 0x523   : > { %v2688_v26 = vadd.f32 %v5588_v36, %v2669_v17 }
 0x524   : > { %v2631_v21 = vmul.f32 %v3973_v61, %v2630_v4 }
 0x525   : > { %v2704_v35 = vmax.f32 %v2688_v26, 0.0  ;;  %v3752_v26 = vld [vmem:[#allocation2 + $0x28] sm:$0xff] }
 0x526   : > { %v2635_v47 = vsel %vm2634_vm1, %v3973_v61, %v2631_v21 }
 0x527   : > { %v2651_v19 = vmul.f32 %v2635_v47, %v2459_v54  ;;  %v3754_v54 = vld [vmem:[#allocation2 + $0x38] sm:$0xff] }
 0x528   : > { %3335 = vmatpush.bf16.msrb.mxu1 %v3754_v54 }
 0x529   : > { %v2670_v6 = vmul.f32 %v5580_v1, %v2651_v19 }
 0x52b   : > { %v2689_v27 = vadd.f32 %v5588_v36, %v2670_v6  ;;  %v3753_v6 = vld [vmem:[#allocation2 + $0x30] sm:$0xff] }
 0x52c   : > { %3336 = vmatpush.bf16.msrb.mxu1 %v3753_v6 }
 0x52d   : > { %v2705_v11 = vmax.f32 %v2689_v27, 0.0 }
 0x52f   : > { %v2713_v53 = vpack.c.bf16 %v2705_v11, %v2704_v35 }
 0x530   : > { %3337 = vmatpush.bf16.msrb.mxu1 %v3752_v26 }
 0x531   : > { %2827 = vmatmul.bf16.gmra.mxu0 %v2713_v53  ;;  %v3751_v53 = vld [vmem:[#allocation2 + $0x20] sm:$0xff] }
 0x534   : > { %3338 = vmatpush.bf16.msrb.mxu1 %v3751_v53 }
 0x537   : > { %v2793_v58 = vpop.f32.mrf.mxu0 }
 0x538   : > { %v5727_v13 = vadd.f32 %v5724_v63, %v2793_v58 }
 0x53a   : > { %2837 = vadd.xlane.f32.xlu2 %v5727_v13  ;;  %v2885_v1 = vmul.f32 %v5727_v13, %v5727_v13 }
 0x53c   : > { %2901 = vadd.xlane.f32.xlu1 %v2885_v1 }
 0x53f   : > { %v2795_v36 = vpop.f32.mrf.mxu0 }
 0x540   : > { %v5733_v9 = vadd.f32 %v5724_v63, %v2795_v36  ;;  %v3750_v36 = vld [vmem:[#allocation2 + $0x18] sm:$0xff] }
 0x541   : > { %3339 = vmatpush.bf16.msrb.mxu1 %v3750_v36 }
 0x542   : > { %2839 = vadd.xlane.f32.xlu0 %v5733_v9  ;;  %v2886_v57 = vmul.f32 %v5733_v9, %v5733_v9 }
 0x544   : > { %2903 = vadd.xlane.f32.xlu2 %v2886_v57 }
 0x547   : > { %v2798_v25 = vpop.f32.mrf.mxu0 }
 0x548   : > { %v5739_v48 = vadd.f32 %v5724_v63, %v2798_v25 }
 0x54a   : > { %2841 = vadd.xlane.f32.xlu0 %v5739_v48  ;;  %v2887_v42 = vmul.f32 %v5739_v48, %v5739_v48 }
 0x54c   : > { %2905 = vadd.xlane.f32.xlu2 %v2887_v42 }
 0x54f   : > { %v2800_v33 = vpop.f32.mrf.mxu0 }
 0x550   : > { %v5745_v51 = vadd.f32 %v5724_v63, %v2800_v33 }
 0x552   : > { %2843 = vadd.xlane.f32.xlu1 %v5745_v51  ;;  %v2888_v34 = vmul.f32 %v5745_v51, %v5745_v51 }
 0x554   : > { %2907 = vadd.xlane.f32.xlu0 %v2888_v34 }
 0x55d   : > { %v2803_v40 = vpop.f32.mrf.mxu0 }
 0x55e   : > { %v5751_v45 = vadd.f32 %v5724_v63, %v2803_v40 }
 0x560   : > { %2845 = vadd.xlane.f32.xlu1 %v5751_v45  ;;  %v2889_v38 = vmul.f32 %v5751_v45, %v5751_v45 }
 0x562   : > { %2909 = vadd.xlane.f32.xlu0 %v2889_v38 }
 0x565   : > { %v2805_v41 = vpop.f32.mrf.mxu0 }
 0x566   : > { %v5757_v24 = vadd.f32 %v5724_v63, %v2805_v41  ;;  %v3749_v41 = vld [vmem:[#allocation2 + $0x10] sm:$0xff] }
 0x567   : > { %3340 = vmatpush.bf16.msrb.mxu1 %v3749_v41 }
 0x568   : > { %2847 = vadd.xlane.f32.xlu2 %v5757_v24  ;;  %v2890_v37 = vmul.f32 %v5757_v24, %v5757_v24 }
 0x56a   : > { %2911 = vadd.xlane.f32.xlu1 %v2890_v37 }
 0x56e   : > { %v2808_v8 = vpop.f32.mrf.mxu0 }
 0x56f   : > { %v5763_v60 = vadd.f32 %v5724_v63, %v2808_v8 }
 0x571   : > { %2849 = vadd.xlane.f32.xlu2 %v5763_v60  ;;  %v2891_v55 = vmul.f32 %v5763_v60, %v5763_v60 }
 0x573   : > { %2913 = vadd.xlane.f32.xlu1 %v2891_v55 }
 0x576   : > { %v2810_v46 = vpop.f32.mrf.mxu0 }
 0x577   : > { %v5769_v61 = vadd.f32 %v5724_v63, %v2810_v46 }
 0x579   : > { %2851 = vadd.xlane.f32.xlu0 %v5769_v61  ;;  %v2892_v62 = vmul.f32 %v5769_v61, %v5769_v61 }
 0x57b   : > { %2915 = vadd.xlane.f32.xlu2 %v2892_v62  ;;  %v3748_v62 = vld [vmem:[#allocation2 + $0x8] sm:$0xff] }
 0x57c   : > { %3341 = vmatpush.bf16.msrb.mxu1 %v3748_v62 }
 0x57e   : > { %v2813_v5 = vpop.f32.mrf.mxu0 }
 0x57f   : > { %v5775_v2 = vadd.f32 %v5724_v63, %v2813_v5 }
 0x581   : > { %2853 = vadd.xlane.f32.xlu0 %v5775_v2  ;;  %v2893_v12 = vmul.f32 %v5775_v2, %v5775_v2 }
 0x583   : > { %2917 = vadd.xlane.f32.xlu2 %v2893_v12 }
 0x586   : > { %v2815_v14 = vpop.f32.mrf.mxu0 }
 0x587   : > { %v5781_v18 = vadd.f32 %v5724_v63, %v2815_v14 }
 0x589   : > { %2855 = vadd.xlane.f32.xlu1 %v5781_v18  ;;  %v2894_v0 = vmul.f32 %v5781_v18, %v5781_v18 }
 0x58b   : > { %2919 = vadd.xlane.f32.xlu0 %v2894_v0 }
 0x58e   : > { %v2818_v43 = vpop.f32.mrf.mxu0 }
 0x58f   : > { %v5787_v28 = vadd.f32 %v5724_v63, %v2818_v43 }
 0x591   : > { %2857 = vadd.xlane.f32.xlu1 %v5787_v28  ;;  %v2895_v49 = vmul.f32 %v5787_v28, %v5787_v28 }
 0x593   : > { %2921 = vadd.xlane.f32.xlu0 %v2895_v49  ;;  %v3747_v49 = vld [vmem:[#allocation2] sm:$0xff] }
 0x594   : > { %3342 = vmatpush.bf16.msrb.mxu1 %v3747_v49 }
 0x596   : > { %v2820_v22 = vpop.f32.mrf.mxu0 }
 0x597   : > { %v5793_v4 = vadd.f32 %v5724_v63, %v2820_v22 }
 0x599   : > { %2859 = vadd.xlane.f32.xlu2 %v5793_v4  ;;  %v2896_v21 = vmul.f32 %v5793_v4, %v5793_v4 }
 0x59b   : > { %2923 = vadd.xlane.f32.xlu1 %v2896_v21 }
 0x59e   : > { %v2823_v17 = vpop.f32.mrf.mxu0 }
 0x59f   : > { %v5799_v47 = vadd.f32 %v5724_v63, %v2823_v17 }
 0x5a1   : > { %2861 = vadd.xlane.f32.xlu2 %v5799_v47  ;;  %v2897_v19 = vmul.f32 %v5799_v47, %v5799_v47 }
 0x5a3   : > { %2925 = vadd.xlane.f32.xlu1 %v2897_v19 }
 0x5a6   : > { %v2825_v27 = vpop.f32.mrf.mxu0 }
 0x5a7   : > { %v5805_v35 = vadd.f32 %v5724_v63, %v2825_v27 }
 0x5a9   : > { %2863 = vadd.xlane.f32.xlu0 %v5805_v35  ;;  %v2898_v11 = vmul.f32 %v5805_v35, %v5805_v35 }
 0x5ab   : > { %2927 = vadd.xlane.f32.xlu2 %v2898_v11 }
 0x5ad   : > { %v2838_v58 = vpop.xlane.xlu2 %2837 }
 0x5ae   : > { %v5811_v1 = vmul.f32 %v2838_v58, %v4394_v20  ;;  %v2828_v57 = vpop.f32.mrf.mxu0 }
 0x5af   : > { %v2902_v25 = vpop.xlane.xlu1 %2901  ;;  %v5816_v33 = vadd.f32 %v5724_v63, %v2828_v57 }
 0x5b0   : > { %v2949_v42 = vmul.f32 %v5811_v1, %v5811_v1  ;;  %v2933_v34 = vmul.f32 %v2902_v25, %v4394_v20  ;;  %v2997_v49 = vsub.f32 %v5727_v13, %v5811_v1 }
 0x5b1   : > { %2865 = vadd.xlane.f32.xlu0 %v5816_v33  ;;  %v2899_v38 = vmul.f32 %v5816_v33, %v5816_v33 }
 0x5b2   : > { %v2965_v40 = vsub.f32 %v2933_v34, %v2949_v42 }
 0x5b3   : > { %2929 = vadd.xlane.f32.xlu2 %v2899_v38 }
 0x5b4   : > { %v2981_v37 = vmax.f32 %v2965_v40, 0.0 }
 0x5b5   : > { %v2840_v8 = vpop.xlane.xlu0 %2839 }
 0x5b6   : > { %v3013_v55 = vadd.f32 1e-05, %v2981_v37  ;;  %v5823_v46 = vmul.f32 %v2840_v8, %v4394_v20  ;;  %v2830_v5 = vpop.f32.mrf.mxu0 }
 0x5b7   : > { %v2904_v12 = vpop.xlane.xlu2 %2903  ;;  %v5828_v0 = vadd.f32 %v5724_v63, %v2830_v5 }
 0x5b8   : > { %3974 = vrsqrt.f32 %v3013_v55  ;;  %v2950_v14 = vmul.f32 %v5823_v46, %v5823_v46  ;;  %v2934_v43 = vmul.f32 %v2904_v12, %v4394_v20  ;;  %vm3035_vm3 = vweird.f32 %v3013_v55 }
 0x5b9   : > { %2867 = vadd.xlane.f32.xlu1 %v5828_v0  ;;  %v2900_v21 = vmul.f32 %v5828_v0, %v5828_v0 }
 0x5ba   : > { %v2966_v22 = vsub.f32 %v2934_v43, %v2950_v14 }
 0x5bb   : > { %2931 = vadd.xlane.f32.xlu0 %v2900_v21 }
 0x5bc   : > { %v2982_v54 = vmax.f32 %v2966_v22, 0.0 }
 0x5bd   : > { %v2842_v17 = vpop.xlane.xlu0 %2841 }
 0x5be   : > { %v3975_v19 = vpop.eup %3974  ;;  %v5835_v6 = vmul.f32 %v2842_v17, %v4394_v20  ;;  %v3014_v63 = vadd.f32 1e-05, %v2982_v54 }
 0x5bf   : > { %v3030_v26 = vmul.f32 %v3975_v19, %v3013_v55  ;;  %v2906_v27 = vpop.xlane.xlu2 %2905  ;;  %vm3036_vm2 = vweird.f32 %v3975_v19  ;;  %v5851_v55 = vld [vmem:[%s6077_s11 + $0x1] ss:$0 sm:$0xff] }
 0x5c0   : > { %v2951_v11 = vmul.f32 %v5835_v6, %v5835_v6  ;;  %v2935_v53 = vmul.f32 %v2906_v27, %v4394_v20  ;;  %3976 = vrsqrt.f32 %v3014_v63  ;;  %vm3037_vm4 = vmor %vm3035_vm3, %vm3036_vm2  ;;  %vm3045_vm6 = vweird.f32 %v3014_v63 }
 0x5c1   : > { %v3031_v58 = vmul.f32 %v3975_v19, %v3030_v26 }
 0x5c2   : > { %v2967_v36 = vsub.f32 %v2935_v53, %v2951_v11 }
 0x5c3   : > { %v3032_v57 = vmul.f32 0.5, %v3031_v58 }
 0x5c4   : > { %v2983_v25 = vmax.f32 %v2967_v36, 0.0  ;;  %v5859_v36 = vld [vmem:[%s6078_s12 + $0x1] ss:$0 sm:$0xff] }
 0x5c5   : > { %v3033_v42 = vsub.f32 1.5, %v3032_v57  ;;  %v2844_v34 = vpop.xlane.xlu1 %2843 }
 0x5c6   : > { %v3015_v40 = vadd.f32 1e-05, %v2983_v25  ;;  %v5841_v38 = vmul.f32 %v2844_v34, %v4394_v20  ;;  %v3977_v41 = vpop.eup %3976 }
 0x5c7   : > { %v3034_v37 = vmul.f32 %v3975_v19, %v3033_v42  ;;  %v2908_v8 = vpop.xlane.xlu0 %2907  ;;  %v3040_v62 = vmul.f32 %v3977_v41, %v3014_v63  ;;  %vm3046_vm5 = vweird.f32 %v3977_v41 }
 0x5c8   : > { %3978 = vrsqrt.f32 %v3015_v40  ;;  %v2952_v5 = vmul.f32 %v5841_v38, %v5841_v38  ;;  %v2936_v12 = vmul.f32 %v2908_v8, %v4394_v20  ;;  %vm3047_vm7 = vmor %vm3045_vm6, %vm3046_vm5  ;;  %vm3055_vm9 = vweird.f32 %v3015_v40 }
 0x5c9   : > { %v3038_v14 = vsel %vm3037_vm4, %v3975_v19, %v3034_v37  ;;  %v3041_v43 = vmul.f32 %v3977_v41, %v3040_v62  ;;  %v2998_v19 = vsub.f32 %v5733_v9, %v5823_v46 }
 0x5ca   : > { %v2968_v22 = vsub.f32 %v2936_v12, %v2952_v5  ;;  %v3189_v17 = vmul.f32 %v3038_v14, %v2997_v49 }
 0x5cb   : > { %v3042_v21 = vmul.f32 0.5, %v3041_v43 }
 0x5cc   : > { %v2984_v54 = vmax.f32 %v2968_v22, 0.0  ;;  %v3208_v1 = vmul.f32 %v5851_v55, %v3189_v17 }
 0x5cd   : > { %v3043_v27 = vsub.f32 1.5, %v3042_v21 }
 0x5ce   : > { %v3979_v26 = vpop.eup %3978  ;;  %v3016_v53 = vadd.f32 1e-05, %v2984_v54  ;;  %v3227_v46 = vadd.f32 %v5859_v36, %v3208_v1 }
 0x5cf   : > { %v3050_v11 = vmul.f32 %v3979_v26, %v3015_v40  ;;  %v3044_v58 = vmul.f32 %v3977_v41, %v3043_v27  ;;  %vm3056_vm8 = vweird.f32 %v3979_v26 }
 0x5d0   : > { %3980 = vrsqrt.f32 %v3016_v53  ;;  %vm3057_vm10 = vmor %vm3055_vm9, %vm3056_vm8  ;;  %v3243_v22 = vadd.f32 %v3227_v46, %v5220_v29  ;;  %vm3065_vm12 = vweird.f32 %v3016_v53 }
 0x5d1   : > { %v3051_v13 = vmul.f32 %v3979_v26, %v3050_v11  ;;  %v3048_v57 = vsel %vm3047_vm7, %v3977_v41, %v3044_v58  ;;  %v2999_v11 = vsub.f32 %v5739_v48, %v5835_v6  ;;  %v3000_v48 = vsub.f32 %v5745_v51, %v5841_v38 }
 0x5d2   : > { %v3190_v34 = vmul.f32 %v3048_v57, %v2998_v19 }
 0x5d3   : > { %v3052_v25 = vmul.f32 0.5, %v3051_v13  ;;  %v2846_v42 = vpop.xlane.xlu1 %2845 }
 0x5d4   : > { %v5862_v37 = vmul.f32 %v2846_v42, %v4394_v20  ;;  %v3209_v9 = vmul.f32 %v5851_v55, %v3190_v34 }
 0x5d5   : > { %v3053_v63 = vsub.f32 1.5, %v3052_v25  ;;  %v2910_v8 = vpop.xlane.xlu0 %2909 }
 0x5d6   : > { %v2953_v62 = vmul.f32 %v5862_v37, %v5862_v37  ;;  %v2937_v5 = vmul.f32 %v2910_v8, %v4394_v20  ;;  %v3981_v12 = vpop.eup %3980  ;;  %v3228_v14 = vadd.f32 %v5859_v36, %v3209_v9 }
 0x5d7   : > { %v3054_v41 = vmul.f32 %v3979_v26, %v3053_v63  ;;  %v3060_v43 = vmul.f32 %v3981_v12, %v3016_v53  ;;  %vm3066_vm11 = vweird.f32 %v3981_v12 }
 0x5d8   : > { %v2969_v49 = vsub.f32 %v2937_v5, %v2953_v62  ;;  %v3244_v21 = vadd.f32 %v3228_v14, %v5224_v56  ;;  %vm3067_vm13 = vmor %vm3065_vm12, %vm3066_vm11 }
 0x5d9   : > { %v3061_v54 = vmul.f32 %v3981_v12, %v3060_v43  ;;  %v3058_v27 = vsel %vm3057_vm10, %v3979_v26, %v3054_v41 }
 0x5da   : > { %v2985_v17 = vmax.f32 %v2969_v49, 0.0  ;;  %v3259_v19 = vpack.c.bf16 %v3244_v21, %v3243_v22  ;;  %v3191_v25 = vmul.f32 %v3058_v27, %v2999_v11 }
 0x5db   : > { %v2848_v58 = vpop.xlane.xlu2 %2847  ;;  %v3062_v13 = vmul.f32 0.5, %v3061_v54 }
 0x5dc   : > { %v3017_v1 = vadd.f32 1e-05, %v2985_v17  ;;  %v5875_v57 = vmul.f32 %v2848_v58, %v4394_v20  ;;  %3343 = vmatmul.bf16.vlgmr.msrb.gmra.mxu1 %v3259_v19  ;;  %v3210_v34 = vmul.f32 %v5851_v55, %v3191_v25 }
 0x5dd   : > { %v2912_v40 = vpop.xlane.xlu1 %2911  ;;  %v3063_v42 = vsub.f32 1.5, %v3062_v13 }
 0x5de   : > { %3982 = vrsqrt.f32 %v3017_v1  ;;  %v2954_v29 = vmul.f32 %v5875_v57, %v5875_v57  ;;  %v2938_v56 = vmul.f32 %v2912_v40, %v4394_v20  ;;  %v3229_v49 = vadd.f32 %v5859_v36, %v3210_v34 }
 0x5df   : > { %v3064_v26 = vmul.f32 %v3981_v12, %v3063_v42  ;;  %vm3075_vm15 = vweird.f32 %v3017_v1  ;;  %v3001_v34 = vsub.f32 %v5751_v45, %v5862_v37 }
 0x5e0   : > { %v2970_v6 = vsub.f32 %v2938_v56, %v2954_v29  ;;  %v3245_v17 = vadd.f32 %v3229_v49, %v5256_v30 }
 0x5e1   : > { %v3068_v63 = vsel %vm3067_vm13, %v3981_v12, %v3064_v26 }
 0x5e2   : > { %v2986_v8 = vmax.f32 %v2970_v6, 0.0  ;;  %v3192_v46 = vmul.f32 %v3068_v63, %v3000_v48 }
 0x5e4   : > { %v2850_v9 = vpop.xlane.xlu2 %2849  ;;  %v3983_v62 = vpop.eup %3982  ;;  %v3018_v14 = vadd.f32 1e-05, %v2986_v8  ;;  %v3211_v53 = vmul.f32 %v5851_v55, %v3192_v46 }
 0x5e5   : > { %v5884_v5 = vmul.f32 %v2850_v9, %v4394_v20  ;;  %v3070_v41 = vmul.f32 %v3983_v62, %v3017_v1  ;;  %vm3076_vm14 = vweird.f32 %v3983_v62 }
 0x5e6   : > { %v2914_v43 = vpop.xlane.xlu1 %2913  ;;  %3984 = vrsqrt.f32 %v3018_v14  ;;  %v3230_v22 = vadd.f32 %v5859_v36, %v3211_v53  ;;  %vm3077_vm0 = vmor %vm3075_vm15, %vm3076_vm14  ;;  %vm3085_vm2 = vweird.f32 %v3018_v14 }
 0x5e7   : > { %v2955_v51 = vmul.f32 %v5884_v5, %v5884_v5  ;;  %v2939_v38 = vmul.f32 %v2914_v43, %v4394_v20  ;;  %v3071_v12 = vmul.f32 %v3983_v62, %v3070_v41 }
 0x5e8   : > { %v3246_v27 = vadd.f32 %v3230_v22, %v5260_v7 }
 0x5e9   : > { %v2971_v21 = vsub.f32 %v2939_v38, %v2955_v51  ;;  %v3072_v54 = vmul.f32 0.5, %v3071_v12 }
 0x5ea   : > { %v3260_v13 = vpack.c.bf16 %v3246_v27, %v3245_v17 }
 0x5eb   : > { %v2987_v11 = vmax.f32 %v2971_v21, 0.0  ;;  %v3073_v58 = vsub.f32 1.5, %v3072_v54 }
 0x5ec   : > { %v2852_v19 = vpop.xlane.xlu0 %2851  ;;  %v3985_v42 = vpop.eup %3984  ;;  %3348 = vmatmul.bf16.gmra.mxu1 %v3260_v13 }
 0x5ed   : > { %v3019_v40 = vadd.f32 1e-05, %v2987_v11  ;;  %v5895_v25 = vmul.f32 %v2852_v19, %v4394_v20  ;;  %v3074_v29 = vmul.f32 %v3983_v62, %v3073_v58  ;;  %v3080_v26 = vmul.f32 %v3985_v42, %v3018_v14 }
 0x5ee   : > { %v2916_v56 = vpop.xlane.xlu2 %2915  ;;  %vm3086_vm1 = vweird.f32 %v3985_v42 }
 0x5ef   : > { %3986 = vrsqrt.f32 %v3019_v40  ;;  %v2956_v30 = vmul.f32 %v5895_v25, %v5895_v25  ;;  %v2940_v7 = vmul.f32 %v2916_v56, %v4394_v20  ;;  %v3081_v48 = vmul.f32 %v3985_v42, %v3080_v26  ;;  %vm3087_vm3 = vmor %vm3085_vm2, %vm3086_vm1 }
 0x5f0   : > { %v3078_v6 = vsel %vm3077_vm0, %v3983_v62, %v3074_v29  ;;  %v3002_v62 = vsub.f32 %v5757_v24, %v5875_v57  ;;  %vm3095_vm5 = vweird.f32 %v3019_v40 }
 0x5f1   : > { %v2972_v63 = vsub.f32 %v2940_v7, %v2956_v30  ;;  %v3082_v8 = vmul.f32 0.5, %v3081_v48  ;;  %v3193_v46 = vmul.f32 %v3078_v6, %v3001_v34 }
 0x5f3   : > { %v2988_v9 = vmax.f32 %v2972_v63, 0.0  ;;  %v3083_v43 = vsub.f32 1.5, %v3082_v8  ;;  %v3212_v12 = vmul.f32 %v5851_v55, %v3193_v46 }
 0x5f4   : > { %v2854_v49 = vpop.xlane.xlu0 %2853 }
 0x5f5   : > { %v3987_v41 = vpop.eup %3986  ;;  %v3020_v53 = vadd.f32 1e-05, %v2988_v9  ;;  %v3084_v51 = vmul.f32 %v3985_v42, %v3083_v43  ;;  %v5903_v38 = vmul.f32 %v2854_v49, %v4394_v20  ;;  %v3231_v24 = vadd.f32 %v5859_v36, %v3212_v12 }
 0x5f6   : > { %v3090_v1 = vmul.f32 %v3987_v41, %v3019_v40  ;;  %v2918_v37 = vpop.xlane.xlu2 %2917  ;;  %vm3096_vm4 = vweird.f32 %v3987_v41  ;;  %v3003_v40 = vsub.f32 %v5763_v60, %v5884_v5  ;;  %v3004_v60 = vsub.f32 %v5769_v61, %v5895_v25 }
 0x5f7   : > { %3988 = vrsqrt.f32 %v3020_v53  ;;  %v2957_v22 = vmul.f32 %v5903_v38, %v5903_v38  ;;  %v2941_v21 = vmul.f32 %v2918_v37, %v4394_v20  ;;  %v3088_v54 = vsel %vm3087_vm3, %v3985_v42, %v3084_v51  ;;  %vm3097_vm6 = vmor %vm3095_vm5, %vm3096_vm4 }
 0x5f8   : > { %v3091_v45 = vmul.f32 %v3987_v41, %v3090_v1  ;;  %v3194_v14 = vmul.f32 %v3088_v54, %v3002_v62  ;;  %v3247_v48 = vadd.f32 %v3231_v24, %v5289_v31  ;;  %vm3105_vm8 = vweird.f32 %v3020_v53 }
 0x5f9   : > { %v2973_v27 = vsub.f32 %v2941_v21, %v2957_v22 }
 0x5fa   : > { %v3092_v17 = vmul.f32 0.5, %v3091_v45  ;;  %v3213_v58 = vmul.f32 %v5851_v55, %v3194_v14 }
 0x5fb   : > { %v2989_v57 = vmax.f32 %v2973_v27, 0.0 }
 0x5fc   : > { %v3093_v11 = vsub.f32 1.5, %v3092_v17  ;;  %v2856_v29 = vpop.xlane.xlu1 %2855  ;;  %v3232_v56 = vadd.f32 %v5859_v36, %v3213_v58 }
 0x5fd   : > { %v3989_v19 = vpop.eup %3988  ;;  %v3021_v30 = vadd.f32 1e-05, %v2989_v57  ;;  %v5915_v42 = vmul.f32 %v2856_v29, %v4394_v20 }
 0x5fe   : > { %v3094_v13 = vmul.f32 %v3987_v41, %v3093_v11  ;;  %v3100_v26 = vmul.f32 %v3989_v19, %v3020_v53  ;;  %v2920_v7 = vpop.xlane.xlu0 %2919  ;;  %v3248_v6 = vadd.f32 %v3232_v56, %v5293_v44  ;;  %vm3106_vm7 = vweird.f32 %v3989_v19 }
 0x5ff   : > { %3990 = vrsqrt.f32 %v3021_v30  ;;  %v2958_v63 = vmul.f32 %v5915_v42, %v5915_v42  ;;  %v2942_v9 = vmul.f32 %v2920_v7, %v4394_v20  ;;  %vm3107_vm9 = vmor %vm3105_vm8, %vm3106_vm7  ;;  %vm3115_vm11 = vweird.f32 %v3021_v30 }
 0x600   : > { %v3101_v34 = vmul.f32 %v3989_v19, %v3100_v26  ;;  %v3098_v8 = vsel %vm3097_vm6, %v3987_v41, %v3094_v13  ;;  %v3261_v46 = vpack.c.bf16 %v3248_v6, %v3247_v48 }
 0x601   : > { %v2974_v1 = vsub.f32 %v2942_v9, %v2958_v63  ;;  %v3195_v49 = vmul.f32 %v3098_v8, %v3003_v40 }
 0x602   : > { %v3102_v43 = vmul.f32 0.5, %v3101_v34  ;;  %3353 = vmatmul.bf16.gmra.mxu1 %v3261_v46 }
 0x603   : > { %v2990_v31 = vmax.f32 %v2974_v1, 0.0  ;;  %v3214_v22 = vmul.f32 %v5851_v55, %v3195_v49 }
 0x604   : > { %v3103_v51 = vsub.f32 1.5, %v3102_v43  ;;  %v2858_v44 = vpop.xlane.xlu1 %2857  ;;  %v3005_v43 = vsub.f32 %v5775_v2, %v5903_v38 }
 0x605   : > { %v3991_v62 = vpop.eup %3990  ;;  %v5925_v37 = vmul.f32 %v2858_v44, %v4394_v20  ;;  %v3022_v41 = vadd.f32 1e-05, %v2990_v31  ;;  %v3233_v61 = vadd.f32 %v5859_v36, %v3214_v22 }
 0x606   : > { %v3104_v45 = vmul.f32 %v3989_v19, %v3103_v51  ;;  %v3110_v5 = vmul.f32 %v3991_v62, %v3021_v30  ;;  %v2922_v12 = vpop.xlane.xlu0 %2921  ;;  %vm3116_vm10 = vweird.f32 %v3991_v62 }
 0x607   : > { %v2959_v21 = vmul.f32 %v5925_v37, %v5925_v37  ;;  %v2943_v54 = vmul.f32 %v2922_v12, %v4394_v20  ;;  %3992 = vrsqrt.f32 %v3022_v41  ;;  %v3249_v48 = vadd.f32 %v3233_v61, %v5319_v15  ;;  %vm3117_vm12 = vmor %vm3115_vm11, %vm3116_vm10 }
 0x608   : > { %v3108_v17 = vsel %vm3107_vm9, %v3989_v19, %v3104_v45  ;;  %v3111_v14 = vmul.f32 %v3991_v62, %v3110_v5  ;;  %vm3125_vm14 = vweird.f32 %v3022_v41 }
 0x609   : > { %v3196_v53 = vmul.f32 %v3108_v17, %v3004_v60  ;;  %v2975_v27 = vsub.f32 %v2943_v54, %v2959_v21 }
 0x60a   : > { %v3112_v11 = vmul.f32 0.5, %v3111_v14 }
 0x60b   : > { %v3215_v58 = vmul.f32 %v5851_v55, %v3196_v53  ;;  %v2991_v25 = vmax.f32 %v2975_v27, 0.0 }
 0x60c   : > { %v3113_v24 = vsub.f32 1.5, %v3112_v11  ;;  %v2860_v57 = vpop.xlane.xlu2 %2859 }
 0x60d   : > { %v3234_v13 = vadd.f32 %v5859_v36, %v3215_v58  ;;  %v3023_v29 = vadd.f32 1e-05, %v2991_v25  ;;  %v5937_v56 = vmul.f32 %v2860_v57, %v4394_v20  ;;  %v3993_v19 = vpop.eup %3992 }
 0x60e   : > { %v3114_v26 = vmul.f32 %v3991_v62, %v3113_v24  ;;  %v2924_v7 = vpop.xlane.xlu1 %2923  ;;  %v3120_v34 = vmul.f32 %v3993_v19, %v3022_v41  ;;  %vm3126_vm13 = vweird.f32 %v3993_v19 }
 0x60f   : > { %v3250_v6 = vadd.f32 %v3234_v13, %v5323_v16  ;;  %3994 = vrsqrt.f32 %v3023_v29  ;;  %v2960_v63 = vmul.f32 %v5937_v56, %v5937_v56  ;;  %v2944_v8 = vmul.f32 %v2924_v7, %v4394_v20  ;;  %vm3127_vm15 = vmor %vm3125_vm14, %vm3126_vm13 }
 0x610   : > { %v3121_v9 = vmul.f32 %v3993_v19, %v3120_v34  ;;  %v3118_v46 = vsel %vm3117_vm12, %v3991_v62, %v3114_v26  ;;  %v3006_v62 = vsub.f32 %v5781_v18, %v5915_v42  ;;  %vm3135_vm1 = vweird.f32 %v3023_v29 }
 0x611   : > { %v3262_v40 = vpack.c.bf16 %v3250_v6, %v3249_v48  ;;  %v2976_v1 = vsub.f32 %v2944_v8, %v2960_v63  ;;  %v3197_v30 = vmul.f32 %v3118_v46, %v3005_v43  ;;  %v3007_v8 = vsub.f32 %v5787_v28, %v5925_v37 }
 0x612   : > { %v3122_v15 = vmul.f32 0.5, %v3121_v9 }
 0x613   : > { %3358 = vmatmul.bf16.gmra.mxu1 %v3262_v40  ;;  %v2992_v49 = vmax.f32 %v2976_v1, 0.0  ;;  %v3216_v21 = vmul.f32 %v5851_v55, %v3197_v30 }
 0x614   : > { %v2862_v16 = vpop.xlane.xlu2 %2861  ;;  %v3123_v31 = vsub.f32 1.5, %v3122_v15 }
 0x615   : > { %v3995_v51 = vpop.eup %3994  ;;  %v5947_v44 = vmul.f32 %v2862_v16, %v4394_v20  ;;  %v3024_v60 = vadd.f32 1e-05, %v2992_v49  ;;  %v3235_v61 = vadd.f32 %v5859_v36, %v3216_v21 }
 0x616   : > { %v3130_v45 = vmul.f32 %v3995_v51, %v3023_v29  ;;  %v2926_v5 = vpop.xlane.xlu1 %2925  ;;  %v3124_v12 = vmul.f32 %v3993_v19, %v3123_v31  ;;  %vm3136_vm0 = vweird.f32 %v3995_v51  ;;  %v3008_v31 = vsub.f32 %v5793_v4, %v5937_v56 }
 0x617   : > { %v2961_v2 = vmul.f32 %v5947_v44, %v5947_v44  ;;  %v2945_v38 = vmul.f32 %v2926_v5, %v4394_v20  ;;  %3996 = vrsqrt.f32 %v3024_v60  ;;  %vm3137_vm2 = vmor %vm3135_vm1, %vm3136_vm0  ;;  %v3251_v48 = vadd.f32 %v3235_v61, %v5352_v3 }
 0x618   : > { %v3131_v22 = vmul.f32 %v3995_v51, %v3130_v45  ;;  %v3128_v17 = vsel %vm3127_vm15, %v3993_v19, %v3124_v12  ;;  %vm3145_vm4 = vweird.f32 %v3024_v60 }
 0x619   : > { %v2977_v54 = vsub.f32 %v2945_v38, %v2961_v2  ;;  %v3198_v53 = vmul.f32 %v3128_v17, %v3006_v62 }
 0x61a   : > { %v3132_v14 = vmul.f32 0.5, %v3131_v22 }
 0x61b   : > { %v2993_v27 = vmax.f32 %v2977_v54, 0.0  ;;  %v3217_v58 = vmul.f32 %v5851_v55, %v3198_v53 }
 0x61c   : > { %v3133_v11 = vsub.f32 1.5, %v3132_v14  ;;  %v2864_v41 = vpop.xlane.xlu0 %2863 }
 0x61d   : > { %v3025_v25 = vadd.f32 1e-05, %v2993_v27  ;;  %v5958_v18 = vmul.f32 %v2864_v41, %v4394_v20  ;;  %v3997_v42 = vpop.eup %3996  ;;  %v3236_v13 = vadd.f32 %v5859_v36, %v3217_v58 }
 0x61e   : > { %v3134_v24 = vmul.f32 %v3995_v51, %v3133_v11  ;;  %v2928_v57 = vpop.xlane.xlu2 %2927  ;;  %v3140_v19 = vmul.f32 %v3997_v42, %v3024_v60  ;;  %vm3146_vm3 = vweird.f32 %v3997_v42 }
 0x61f   : > { %3998 = vrsqrt.f32 %v3025_v25  ;;  %v2962_v26 = vmul.f32 %v5958_v18, %v5958_v18  ;;  %v2946_v7 = vmul.f32 %v2928_v57, %v4394_v20  ;;  %v3252_v6 = vadd.f32 %v3236_v13, %v5356_v50  ;;  %vm3147_vm5 = vmor %vm3145_vm4, %vm3146_vm3 }
 0x620   : > { %v3141_v34 = vmul.f32 %v3997_v42, %v3140_v19  ;;  %v3138_v63 = vsel %vm3137_vm2, %v3995_v51, %v3134_v24  ;;  %vm3155_vm7 = vweird.f32 %v3025_v25  ;;  %v3009_v19 = vsub.f32 %v5799_v47, %v5947_v44 }
 0x621   : > { %v2978_v40 = vsub.f32 %v2946_v7, %v2962_v26  ;;  %v3263_v9 = vpack.c.bf16 %v3252_v6, %v3251_v48  ;;  %v3199_v1 = vmul.f32 %v3138_v63, %v3007_v8 }
 0x622   : > { %v3142_v29 = vmul.f32 0.5, %v3141_v34 }
 0x623   : > { %v2994_v46 = vmax.f32 %v2978_v40, 0.0  ;;  %3363 = vmatmul.bf16.gmra.mxu1 %v3263_v9  ;;  %v3218_v5 = vmul.f32 %v5851_v55, %v3199_v1 }
 0x624   : > { %v2866_v43 = vpop.xlane.xlu0 %2865  ;;  %v3143_v49 = vsub.f32 1.5, %v3142_v29 }
 0x625   : > { %v3999_v15 = vpop.eup %3998  ;;  %v5969_v16 = vmul.f32 %v2866_v43, %v4394_v20  ;;  %v3026_v50 = vadd.f32 1e-05, %v2994_v46  ;;  %v3237_v54 = vadd.f32 %v5859_v36, %v3218_v5 }
 0x626   : > { %v3150_v3 = vmul.f32 %v3999_v15, %v3025_v25  ;;  %v2930_v30 = vpop.xlane.xlu2 %2929  ;;  %v3144_v51 = vmul.f32 %v3997_v42, %v3143_v49  ;;  %vm3156_vm6 = vweird.f32 %v3999_v15 }
 0x627   : > { %v2963_v28 = vmul.f32 %v5969_v16, %v5969_v16  ;;  %v2947_v37 = vmul.f32 %v2930_v30, %v4394_v20  ;;  %4000 = vrsqrt.f32 %v3026_v50  ;;  %vm3157_vm8 = vmor %vm3155_vm7, %vm3156_vm6  ;;  %vm3165_vm10 = vweird.f32 %v3026_v50 }
 0x628   : > { %v3151_v45 = vmul.f32 %v3999_v15, %v3150_v3  ;;  %v3148_v2 = vsel %vm3147_vm5, %v3997_v42, %v3144_v51  ;;  %v3253_v42 = vadd.f32 %v3237_v54, %v5382_v23  ;;  %v3010_v23 = vsub.f32 %v5805_v35, %v5958_v18 }
 0x629   : > { %v2979_v12 = vsub.f32 %v2947_v37, %v2963_v28  ;;  %v3200_v62 = vmul.f32 %v3148_v2, %v3008_v31  ;;  %v3011_v28 = vsub.f32 %v5816_v33, %v5969_v16 }
 0x62a   : > { %v3152_v38 = vmul.f32 0.5, %v3151_v45 }
 0x62b   : > { %v2995_v22 = vmax.f32 %v2979_v12, 0.0  ;;  %v3219_v60 = vmul.f32 %v5851_v55, %v3200_v62 }
 0x62c   : > { %v3153_v21 = vsub.f32 1.5, %v3152_v38  ;;  %v2868_v14 = vpop.xlane.xlu1 %2867 }
 0x62d   : > { %v3027_v17 = vadd.f32 1e-05, %v2995_v22  ;;  %v4001_v53 = vpop.eup %4000  ;;  %v5980_v56 = vmul.f32 %v2868_v14, %v4394_v20  ;;  %v3238_v27 = vadd.f32 %v5859_v36, %v3219_v60 }
 0x62e   : > { %v3154_v4 = vmul.f32 %v3999_v15, %v3153_v21  ;;  %v3160_v11 = vmul.f32 %v4001_v53, %v3026_v50  ;;  %v2932_v41 = vpop.xlane.xlu0 %2931  ;;  %vm3166_vm9 = vweird.f32 %v4001_v53 }
 0x62f   : > { %4002 = vrsqrt.f32 %v3027_v17  ;;  %v2964_v58 = vmul.f32 %v5980_v56, %v5980_v56  ;;  %v2948_v61 = vmul.f32 %v2932_v41, %v4394_v20  ;;  %v3254_v24 = vadd.f32 %v3238_v27, %v5386_v52  ;;  %vm3167_vm11 = vmor %vm3165_vm10, %vm3166_vm9 }
 0x630   : > { %v3161_v57 = vmul.f32 %v4001_v53, %v3160_v11  ;;  %v3158_v13 = vsel %vm3157_vm8, %v3999_v15, %v3154_v4  ;;  %vm3175_vm13 = vweird.f32 %v3027_v17 }
 0x631   : > { %v2980_v26 = vsub.f32 %v2948_v61, %v2964_v58  ;;  %v3264_v25 = vpack.c.bf16 %v3254_v24, %v3253_v42  ;;  %v3201_v6 = vmul.f32 %v3158_v13, %v3009_v19 }
 0x632   : > { %v3162_v7 = vmul.f32 0.5, %v3161_v57 }
 0x633   : > { %v2996_v48 = vmax.f32 %v2980_v26, 0.0  ;;  %3368 = vmatmul.bf16.gmra.mxu1 %v3264_v25  ;;  %v3220_v47 = vmul.f32 %v5851_v55, %v3201_v6 }
 0x634   : > { %v3163_v63 = vsub.f32 1.5, %v3162_v7 }
 0x635   : > { %v4003_v34 = vpop.eup %4002  ;;  %v3028_v20 = vadd.f32 1e-05, %v2996_v48  ;;  %v3239_v1 = vadd.f32 %v5859_v36, %v3220_v47 }
 0x636   : > { %v3170_v8 = vmul.f32 %v4003_v34, %v3027_v17  ;;  %v3164_v40 = vmul.f32 %v4001_v53, %v3163_v63  ;;  %vm3176_vm12 = vweird.f32 %v4003_v34 }
 0x637   : > { %4004 = vrsqrt.f32 %v3028_v20  ;;  %vm3177_vm14 = vmor %vm3175_vm13, %vm3176_vm12  ;;  %v3255_v18 = vadd.f32 %v3239_v1, %v5400_v32  ;;  %vm3185_vm0 = vweird.f32 %v3028_v20  ;;  %v3012_v32 = vsub.f32 %v5828_v0, %v5980_v56  ;;  %v3843_v0 = vld [vmem:[%s6080_s14] ss:$0 sm:$0xff] }
 0x638   : > { %v3171_v52 = vmul.f32 %v4003_v34, %v3170_v8  ;;  %v3168_v44 = vsel %vm3167_vm11, %v4001_v53, %v3164_v40 }
 0x639   : > { %v3202_v29 = vmul.f32 %v3168_v44, %v3010_v23 }
 0x63a   : > { %v3172_v9 = vmul.f32 0.5, %v3171_v52 }
 0x63b   : > { %v3221_v43 = vmul.f32 %v5851_v55, %v3202_v29 }
 0x63c   : > { %v3173_v46 = vsub.f32 1.5, %v3172_v9 }
 0x63d   : > { %v4005_v15 = vpop.eup %4004  ;;  %v3240_v3 = vadd.f32 %v5859_v36, %v3221_v43 }
 0x63e   : > { %v3174_v49 = vmul.f32 %v4003_v34, %v3173_v46  ;;  %v3180_v35 = vmul.f32 %v4005_v15, %v3028_v20  ;;  %vm3186_vm15 = vweird.f32 %v4005_v15 }
 0x63f   : > { %v3256_v50 = vadd.f32 %v3240_v3, %v5404_v59  ;;  %vm3187_vm1 = vmor %vm3185_vm0, %vm3186_vm15 }
 0x640   : > { %v3181_v30 = vmul.f32 %v4005_v15, %v3180_v35  ;;  %v3178_v51 = vsel %vm3177_vm14, %v4003_v34, %v3174_v49 }
 0x641   : > { %v3265_v37 = vpack.c.bf16 %v3256_v50, %v3255_v18  ;;  %v3203_v45 = vmul.f32 %v3178_v51, %v3011_v28 }
 0x642   : > { %v3182_v31 = vmul.f32 0.5, %v3181_v30 }
 0x643   : > { %3373 = vmatmul.bf16.gmra.mxu1 %v3265_v37  ;;  %v3222_v59 = vmul.f32 %v5851_v55, %v3203_v45 }
 0x644   : > { %v3183_v5 = vsub.f32 1.5, %v3182_v31 }
 0x645   : > { %v3241_v16 = vadd.f32 %v5859_v36, %v3222_v59 }
 0x646   : > { %v3184_v12 = vmul.f32 %v4005_v15, %v3183_v5 }
 0x647   : > { %v3257_v22 = vadd.f32 %v3241_v16, %v5418_v10 }
 0x648   : > { %v3188_v2 = vsel %vm3187_vm1, %v4005_v15, %v3184_v12 }
 0x649   : > { %v3204_v38 = vmul.f32 %v3188_v2, %v3012_v32 }
 0x64b   : > { %v3223_v33 = vmul.f32 %v5851_v55, %v3204_v38 }
 0x64d   : > { %v3242_v62 = vadd.f32 %v5859_v36, %v3223_v33 }
 0x64f   : > { %v3258_v21 = vadd.f32 %v3242_v62, %v5422_v39 }
 0x651   : > { %v3266_v60 = vpack.c.bf16 %v3258_v21, %v3257_v22 }
 0x653   : > { %3378 = vmatmul.bf16.gmra.mxu1 %v3266_v60 }
 0x659   : > { %v3344_v54 = vpop.f32.mrf.mxu1 }
 0x65a   : > { %v3345_v17 = vadd.f32 %v3843_v0, %v3344_v54 }
 0x65c   : > { %3384 = vst [vmem:[%s6014_s23] sm:$0xff] %v3345_v17 }
 0x661   : > { %v3346_v10 = vpop.f32.mrf.mxu1 }
 0x662   : > { %v3347_v39 = vadd.f32 %v3843_v0, %v3346_v10 }
 0x664   : > { %3385 = vst [vmem:[%s6014_s23 + $0x8] sm:$0xff] %v3347_v39 }
 0x669   : > { %v3349_v55 = vpop.f32.mrf.mxu1 }
 0x66a   : > { %v3350_v36 = vadd.f32 %v3843_v0, %v3349_v55 }
 0x66c   : > { %3386 = vst [vmem:[%s6014_s23 + $0x10] sm:$0xff] %v3350_v36 }
 0x671   : > { %v3351_v14 = vpop.f32.mrf.mxu1 }
 0x672   : > { %v3352_v53 = vadd.f32 %v3843_v0, %v3351_v14 }
 0x674   : > { %3387 = vst [vmem:[%s6014_s23 + $0x18] sm:$0xff] %v3352_v53 }
 0x67f   : > { %v3354_v4 = vpop.f32.mrf.mxu1 }
 0x680   : > { %v3355_v56 = vadd.f32 %v3843_v0, %v3354_v4 }
 0x682   : > { %3388 = vst [vmem:[%s6014_s23 + $0x20] sm:$0xff] %v3355_v56 }
 0x687   : > { %v3356_v27 = vpop.f32.mrf.mxu1 }
 0x688   : > { %v3357_v11 = vadd.f32 %v3843_v0, %v3356_v27 }
 0x68a   : > { %3389 = vst [vmem:[%s6014_s23 + $0x28] sm:$0xff] %v3357_v11 }
 0x690   : > { %v3359_v41 = vpop.f32.mrf.mxu1 }
 0x691   : > { %v3360_v58 = vadd.f32 %v3843_v0, %v3359_v41 }
 0x693   : > { %3390 = vst [vmem:[%s6014_s23 + $0x30] sm:$0xff] %v3360_v58 }
 0x698   : > { %v3361_v61 = vpop.f32.mrf.mxu1 }
 0x699   : > { %v3362_v42 = vadd.f32 %v3843_v0, %v3361_v61 }
 0x69b   : > { %3391 = vst [vmem:[%s6014_s23 + $0x38] sm:$0xff] %v3362_v42 }
 0x6a0   : > { %v3364_v24 = vpop.f32.mrf.mxu1 }
 0x6a1   : > { %v3365_v57 = vadd.f32 %v3843_v0, %v3364_v24 }
 0x6a3   : > { %3392 = vst [vmem:[%s6014_s23 + $0x40] sm:$0xff] %v3365_v57 }
 0x6a8   : > { %v3366_v13 = vpop.f32.mrf.mxu1 }
 0x6a9   : > { %v3367_v19 = vadd.f32 %v3843_v0, %v3366_v13 }
 0x6ab   : > { %3393 = vst [vmem:[%s6014_s23 + $0x48] sm:$0xff] %v3367_v19 }
 0x6b0   : > { %v3369_v26 = vpop.f32.mrf.mxu1 }
 0x6b1   : > { %v3370_v25 = vadd.f32 %v3843_v0, %v3369_v26 }
 0x6b3   : > { %3394 = vst [vmem:[%s6014_s23 + $0x50] sm:$0xff] %v3370_v25 }
 0x6b8   : > { %v3371_v7 = vpop.f32.mrf.mxu1 }
 0x6b9   : > { %v3372_v48 = vadd.f32 %v3843_v0, %v3371_v7 }
 0x6bb   : > { %3395 = vst [vmem:[%s6014_s23 + $0x58] sm:$0xff] %v3372_v48 }
 0x6c0   : > { %v3374_v6 = vpop.f32.mrf.mxu1 }
 0x6c1   : > { %v3375_v34 = vadd.f32 %v3843_v0, %v3374_v6 }
 0x6c3   : > { %3396 = vst [vmem:[%s6014_s23 + $0x60] sm:$0xff] %v3375_v34 }
 0x6c8   : > { %v3376_v63 = vpop.f32.mrf.mxu1 }
 0x6c9   : > { %v3377_v8 = vadd.f32 %v3843_v0, %v3376_v63 }
 0x6cb   : > { %3397 = vst [vmem:[%s6014_s23 + $0x68] sm:$0xff] %v3377_v8 }
 0x6d0   : > { %v3379_v20 = vpop.f32.mrf.mxu1 }
 0x6d1   : > { %v3380_v40 = vadd.f32 %v3843_v0, %v3379_v20 }
 0x6d3   : > { %3398 = vst [vmem:[%s6014_s23 + $0x70] sm:$0xff] %v3380_v40 }
 0x6d8   : > { %v3381_v23 = vpop.f32.mrf.mxu1 }
 0x6d9   : > { %v3382_v52 = vadd.f32 %v3843_v0, %v3381_v23 }
 0x6db   : > { %3399 = vst [vmem:[%s6014_s23 + $0x78] sm:$0xff] %v3382_v52 }
 0x6dc   : > { %4063 = shalt.err (!%p4060_p8)
}
 0x6dd   : > { %s4108_s25 = smov 128   ;;  %s4109_s23 = smov 8  }
 0x6de   : > { %3777 = dma.vmem_to_hbm [thread:$0]  (%p4228_p5), %s3414_s29, 2048, %s3416_s17, %s3401_s26, %s4108_s25, %s4108_s25, %s4109_s23  }
 0x6df PF: > { %p3789_p9 = scmp.ge.s32.totalorder %s4102_s21, 2  ;;  %s3430_s16 = sand.u32 1, %s4090_s18  }
 0x6e0   : > { %s3431_s24 = scalar_lea.sflag [#allocation4], %s3430_s16 }
 0x6e1   : > { %p3784_p10 = pnand %p3789_p9, %p4232_p6 }
 0x6e3   : > { %p3785_p11 = pneg %p3784_p10 }
 0x6e5   : > { %4085 = dma.done.wait (%p3785_p11), %s3431_s24, 2048  }
 0x6e6   : > { %4087 = vsyncadd (%p3785_p11), %s3431_s24, 4294965248  ;;  %s6131_s21 = sld [smem:[#allocation9_spill]]  ;;  %s6134_s18 = smov %s4094_s19 }
 0x6e7   : > { %s6132_s30 = sld [smem:[#allocation8_spill]] }
 0x6e8   : > { %s6133_s20 = sld [smem:[#allocation10_spill]] }
 0x6ec   : > { %p26_p12 = scmp.ge.s32.totalorder %s6131_s21, 4  }
 0x6ed   : > { %s6135_s19 = smov %s6132_s30 }
 0x6ee   :  { %28 = sbr.rel (!%p26_p12) target bundleno = 7 (0x7), region = 128 }
 0x6f3   :  { %3437 = vsyncpa [#allocation3], 1 }
 0x6f4   :  { %3439 = vsyncpa [#allocation3 + $0x1], 1 }
 0x6f5   :  { %3440 = vsyncpa [#allocation4], 1 }
 0x6f6   :  { %3442 = vsyncpa [#allocation4 + $0x1], 1 }

</bundles_post_ra>
